<compile_context>
chip_gen: v5e
topology: v5e:2x2
jax: 0.10.0
libtpu: 0.0.40
codegen_flags: <defaults>
</compile_context>

<pallas_src>
import math

import numpy as np
import jax
import jax.numpy as jnp
from jax.experimental import pallas as pl
from jax.experimental.pallas import tpu as pltpu


_MSSSIM_WEIGHTS = np.array([0.0448, 0.2856, 0.3001, 0.2363, 0.1333], np.float32)
_LEVELS = 5
_N_MOM = 5          # {x, y, x*x, y*y, x*y}


# ---------------------------------------------------------------------------
# Static (host-side) window / matrix construction
# ---------------------------------------------------------------------------
def _gaussian_1d(window_size: int, sigma: float = 1.5) -> np.ndarray:
    g = np.array(
        [math.exp(-((x - window_size // 2) ** 2) / (2.0 * sigma ** 2))
         for x in range(window_size)],
        dtype=np.float64,
    )
    return (g / g.sum()).astype(np.float32)


def _round_up(x: int, m: int) -> int:
    return ((x + m - 1) // m) * m


def _row_band(oh: int, oh_pad: int, h: int, taps: np.ndarray) -> np.ndarray:
    """(oh_pad, h) left matmul = valid vertical cross-correlation (rows >= oh zero)."""
    ws = len(taps)
    m = np.zeros((oh_pad, h), np.float32)
    for r in range(oh):
        m[r, r:r + ws] = taps
    return m


def _col_band(w: int, ow: int, taps: np.ndarray) -> np.ndarray:
    """(w, ow) right matmul = valid horizontal cross-correlation (dense, shared)."""
    ws = len(taps)
    m = np.zeros((w, ow), np.float32)
    for k in range(ow):
        m[k:k + ws, k] = taps
    return m


def _pool_rows(h: int) -> np.ndarray:
    m = np.zeros((h // 2, h), np.float32)
    for k in range(h // 2):
        m[k, 2 * k] = 0.5
        m[k, 2 * k + 1] = 0.5
    return m


def _pool_cols(w: int) -> np.ndarray:
    m = np.zeros((w, w // 2), np.float32)
    for k in range(w // 2):
        m[2 * k, k] = 0.5
        m[2 * k + 1, k] = 0.5
    return m


# ---------------------------------------------------------------------------
# Fused multi-scale SSIM kernel (whole pyramid, single program)
# ---------------------------------------------------------------------------
def _make_msssim_kernel(levels, S, H0, dims):
    n_in = 1 + 2 * levels + 2 * (levels - 1)

    def kernel(*refs):
        ab_ref = refs[0]
        vband_refs = refs[1:1 + levels]
        hband_refs = refs[1 + levels:1 + 2 * levels]
        dh_refs = refs[1 + 2 * levels:1 + 2 * levels + (levels - 1)]
        dw_refs = refs[1 + 2 * levels + (levels - 1):n_in]
        ssim_ref, cs_ref = refs[n_in], refs[n_in + 1]

        # (2*H0, S*W0): img1 on rows [0, H0), img2 on rows [H0, 2*H0).
        ab = ab_ref[...]

        # Dynamic-range detection (val_range=None), hoisted: computed once
        # from level-0 img1 and reused at every scale.  Identical to the
        # reference unless 2x2 pooling moves max(img1) across 128 or
        # min(img1) across -0.5 at a deeper level.
        a0 = ab[0:H0, :]
        max_val = jnp.where(jnp.max(a0) > 128.0, 255.0, 1.0)
        min_val = jnp.where(jnp.min(a0) < -0.5, -1.0, 0.0)
        rng = max_val - min_val
        t1 = 0.01 * rng
        t2 = 0.03 * rng
        c1 = t1 * t1
        c2 = t2 * t2

        for lvl in range(levels):
            hl, wl, ws, oh, ow, pad = dims[lvl]
            a = ab[0:hl, :]
            b = ab[hl:2 * hl, :]

            # Sublane-stack the five moment planes -> ONE vertical-band matmul
            # (M = 5*pad rows) on the MXU; no unaligned sublane shift+FMA.
            stacked = jnp.concatenate([ab, a * a, b * b, a * b], axis=0)
            vert = jnp.dot(vband_refs[lvl][...], stacked,
                           preferred_element_type=jnp.float32)   # (5*pad, S*wl)

            hband = hband_refs[lvl][...]                          # (wl, ow) dense

            ssim_sum = jnp.zeros((), jnp.float32)
            cs_sum = jnp.zeros((), jnp.float32)
            for s in range(S):
                # Dense horizontal band shared across segments (no kron(eye_S)).
                seg = vert[:, s * wl:(s + 1) * wl]                # (5*pad, wl)
                mom = jnp.dot(seg, hband,
                              preferred_element_type=jnp.float32)  # (5*pad, ow)

                mu1 = mom[0 * pad:0 * pad + oh, :]
                mu2 = mom[1 * pad:1 * pad + oh, :]
                s11 = mom[2 * pad:2 * pad + oh, :]
                s22 = mom[3 * pad:3 * pad + oh, :]
                s12 = mom[4 * pad:4 * pad + oh, :]

                mu1_sq = mu1 * mu1
                mu2_sq = mu2 * mu2
                mu1_mu2 = mu1 * mu2
                sigma1_sq = s11 - mu1_sq
                sigma2_sq = s22 - mu2_sq
                sigma12 = s12 - mu1_mu2

                v1 = 2.0 * sigma12 + c2
                v2 = sigma1_sq + sigma2_sq + c2
                inv_v2 = pl.reciprocal(v2)                        # shared
                inv_den = pl.reciprocal(mu1_sq + mu2_sq + c1)
                cs_map = v1 * inv_v2
                ssim_map = (2.0 * mu1_mu2 + c1) * cs_map * inv_den

                cs_sum = cs_sum + jnp.sum(cs_map)
                ssim_sum = ssim_sum + jnp.sum(ssim_map)

            inv_cnt = 1.0 / float(S * oh * ow)
            ssim_ref[lvl] = (ssim_sum * inv_cnt).astype(jnp.float32)
            cs_ref[lvl] = (cs_sum * inv_cnt).astype(jnp.float32)

            if lvl < levels - 1:
                # 2x2 / stride-2 avg-pool of BOTH images at once: two matmuls.
                ab = jnp.dot(
                    jnp.dot(dh_refs[lvl][...], ab,
                            preferred_element_type=jnp.float32),
                    dw_refs[lvl][...], preferred_element_type=jnp.float32)

    return kernel


# ---------------------------------------------------------------------------
# MS-SSIM wrapper (all per-scale compute happens inside the fused kernel)
# ---------------------------------------------------------------------------
def msssim(img1, img2, window_size=11, size_average=True):
    if not size_average:
        # TODO(synk): per-image (size_average=False) reduction path not needed
        # by MSSSIM.forward (module default is True).
        raise NotImplementedError("size_average=False not implemented")

    B, C, H, W = img1.shape
    S = B * C
    levels = _LEVELS
    weights = jnp.asarray(_MSSSIM_WEIGHTS)

    # Pack NCHW -> (H, B*C*W): H on sublanes, (b, c) image columns side by
    # side on lanes; stack img1 over img2 -> one (2H, S*W) slab.
    def _pack(x):
        return jnp.transpose(x, (2, 0, 1, 3)).reshape(H, S * W).astype(jnp.float32)

    ab0 = jnp.concatenate([_pack(img1), _pack(img2)], axis=0)

    # Static per-level band / pooling matrices (tiny, S-independent bands).
    dims = []
    vbands, hbands, dhs, dws = [], [], [], []
    eye5 = np.eye(_N_MOM, dtype=np.float32)
    eye2 = np.eye(2, dtype=np.float32)
    eye_s = np.eye(S, dtype=np.float32)
    hl, wl = H, W
    for lvl in range(levels):
        ws_l = min(window_size, hl, wl)            # per-scale window shrink
        taps = _gaussian_1d(ws_l, 1.5)
        oh, ow = hl - ws_l + 1, wl - ws_l + 1
        pad = _round_up(oh, 8)                     # sublane-aligned moment blocks
        dims.append((hl, wl, ws_l, oh, ow, pad))
        vbands.append(jnp.asarray(np.kron(eye5, _row_band(oh, pad, hl, taps))))
        hbands.append(jnp.asarray(_col_band(wl, ow, taps)))
        if lvl < levels - 1:
            dhs.append(jnp.asarray(np.kron(eye2, _pool_rows(hl))))
            dws.append(jnp.asarray(np.kron(eye_s, _pool_cols(wl))))
            hl, wl = hl // 2, wl // 2

    kernel = _make_msssim_kernel(levels, S, H, dims)
    n_in = 1 + 2 * levels + 2 * (levels - 1)
    vmem = pltpu.MemorySpace.VMEM
    smem = pltpu.MemorySpace.SMEM
    mssim_v, mcs_v = pl.pallas_call(
        kernel,
        out_shape=(jax.ShapeDtypeStruct((levels,), jnp.float32),
                   jax.ShapeDtypeStruct((levels,), jnp.float32)),
        in_specs=[pl.BlockSpec(memory_space=vmem)] * n_in,
        out_specs=(pl.BlockSpec(memory_space=smem),
                   pl.BlockSpec(memory_space=smem)),
        compiler_params=pltpu.CompilerParams(vmem_limit_bytes=32 * 1024 * 1024),
    )(ab0, *vbands, *hbands, *dhs, *dws)

    # Reference's (quirky, broadcasted) final combination, on 10 scalars.
    pow1 = mcs_v ** weights
    pow2 = mssim_v ** weights
    return jnp.prod(pow1[:-1] * pow2[-1])


class MSSSIM:
    """JAX/Pallas equivalent of the PyTorch MSSSIM module (forward only)."""

    def __init__(self, window_size=11, size_average=True, channel=3):
        self.window_size = window_size
        self.size_average = size_average
        self.channel = channel

    def __call__(self, img1, img2):
        return msssim(img1, img2, window_size=self.window_size,
                      size_average=self.size_average)


if __name__ == "__main__":
    key = jax.random.PRNGKey(0)
    k1, k2 = jax.random.split(key)

    # NCHW; 32x32 spatial so all 5 MS-SSIM scales are valid, as in the
    # PyTorch reference.
    B, C, H, W = 2, 3, 32, 32
    img1 = jax.random.uniform(k1, (B, C, H, W), dtype=jnp.float32)
    img2 = jnp.clip(
        img1 + 0.05 * jax.random.normal(k2, (B, C, H, W), dtype=jnp.float32),
        0.0, 1.0)

    model = MSSSIM(window_size=11, size_average=True, channel=C)
    forward = jax.jit(lambda a, b: model(a, b))

    out = forward(img1, img2)
    jax.block_until_ready(out)
    print("KERNEL_OK")
</pallas_src>

<mosaic_0001>
module attributes {stable_mosaic.version = 11 : i64} {
  func.func @kernel(%arg0: memref<64x192xf32, #tpu.memory_space<vmem>>, %arg1: memref<120x160xf32, #tpu.memory_space<vmem>>, %arg2: memref<40x80xf32, #tpu.memory_space<vmem>>, %arg3: memref<40x40xf32, #tpu.memory_space<vmem>>, %arg4: memref<40x20xf32, #tpu.memory_space<vmem>>, %arg5: memref<40x10xf32, #tpu.memory_space<vmem>>, %arg6: memref<32x22xf32, #tpu.memory_space<vmem>>, %arg7: memref<16x6xf32, #tpu.memory_space<vmem>>, %arg8: memref<8x1xf32, #tpu.memory_space<vmem>>, %arg9: memref<4x1xf32, #tpu.memory_space<vmem>>, %arg10: memref<2x1xf32, #tpu.memory_space<vmem>>, %arg11: memref<32x64xf32, #tpu.memory_space<vmem>>, %arg12: memref<16x32xf32, #tpu.memory_space<vmem>>, %arg13: memref<8x16xf32, #tpu.memory_space<vmem>>, %arg14: memref<4x8xf32, #tpu.memory_space<vmem>>, %arg15: memref<192x96xf32, #tpu.memory_space<vmem>>, %arg16: memref<96x48xf32, #tpu.memory_space<vmem>>, %arg17: memref<48x24xf32, #tpu.memory_space<vmem>>, %arg18: memref<24x12xf32, #tpu.memory_space<vmem>>, %arg19: memref<5xf32, #tpu.memory_space<smem>>, %arg20: memref<5xf32, #tpu.memory_space<smem>>) attributes {dimension_semantics = [], scalar_prefetch = 0 : i64, scratch_operands = 0 : i64, tpu.core_type = #tpu.core_type<tc>} {
    %c0 = arith.constant 0 : index
    %c0_0 = arith.constant 0 : index
    %0 = vector.load %arg0[%c0, %c0_0] : memref<64x192xf32, #tpu.memory_space<vmem>>, vector<64x192xf32>
    %1 = vector.extract_strided_slice %0 {offsets = [0, 0], sizes = [32, 192], strides = [1, 1]} : vector<64x192xf32> to vector<32x192xf32>
    %2 = vector.shape_cast %1 : vector<32x192xf32> to vector<1x32x192xf32>
    %cst = arith.constant dense<0xFF800000> : vector<1xf32>
    %3 = vector.multi_reduction <maximumf>, %2, %cst [1, 2] : vector<1x32x192xf32> to vector<1xf32>
    %4 = vector.shape_cast %3 : vector<1xf32> to vector<1x1x1xf32>
    %5 = vector.extract %4[0, 0, 0] : f32 from vector<1x1x1xf32>
    %cst_1 = arith.constant 1.280000e+02 : f32
    %6 = arith.cmpf ogt, %5, %cst_1 : f32
    %cst_2 = arith.constant 2.550000e+02 : f32
    %cst_3 = arith.constant 1.000000e+00 : f32
    %7 = arith.select %6, %cst_2, %cst_3 : f32
    %8 = vector.shape_cast %1 : vector<32x192xf32> to vector<1x32x192xf32>
    %cst_4 = arith.constant dense<0x7F800000> : vector<1xf32>
    %9 = vector.multi_reduction <minimumf>, %8, %cst_4 [1, 2] : vector<1x32x192xf32> to vector<1xf32>
    %10 = vector.shape_cast %9 : vector<1xf32> to vector<1x1x1xf32>
    %11 = vector.extract %10[0, 0, 0] : f32 from vector<1x1x1xf32>
    %cst_5 = arith.constant -5.000000e-01 : f32
    %12 = arith.cmpf olt, %11, %cst_5 : f32
    %cst_6 = arith.constant -1.000000e+00 : f32
    %cst_7 = arith.constant 0.000000e+00 : f32
    %13 = arith.select %12, %cst_6, %cst_7 : f32
    %14 = arith.subf %7, %13 : f32
    %cst_8 = arith.constant 0.00999999977 : f32
    %15 = arith.mulf %cst_8, %14 : f32
    %cst_9 = arith.constant 3.000000e-02 : f32
    %16 = arith.mulf %cst_9, %14 : f32
    %17 = arith.mulf %15, %15 : f32
    %18 = arith.mulf %16, %16 : f32
    %19 = vector.extract_strided_slice %0 {offsets = [0, 0], sizes = [32, 192], strides = [1, 1]} : vector<64x192xf32> to vector<32x192xf32>
    %20 = vector.extract_strided_slice %0 {offsets = [32, 0], sizes = [32, 192], strides = [1, 1]} : vector<64x192xf32> to vector<32x192xf32>
    %21 = arith.mulf %19, %19 : vector<32x192xf32>
    %22 = arith.mulf %20, %20 : vector<32x192xf32>
    %23 = arith.mulf %19, %20 : vector<32x192xf32>
    %24 = tpu.concatenate %0, %21, %22, %23 in 0 : vector<64x192xf32>, vector<32x192xf32>, vector<32x192xf32>, vector<32x192xf32> -> vector<160x192xf32>
    %c0_10 = arith.constant 0 : index
    %c0_11 = arith.constant 0 : index
    %25 = vector.load %arg1[%c0_10, %c0_11] : memref<120x160xf32, #tpu.memory_space<vmem>>, vector<120x160xf32>
    %cst_12 = arith.constant dense<0.000000e+00> : vector<120x192xf32>
    %26 = tpu.matmul %25, %24, %cst_12 {dimension_numbers = #tpu.dot_dimension_numbers<[1], [0], [0], [1], [0, 0, 1, 1], [], []>} : vector<120x160xf32>, vector<160x192xf32>, vector<120x192xf32> -> vector<120x192xf32>
    %c0_13 = arith.constant 0 : index
    %c0_14 = arith.constant 0 : index
    %27 = vector.load %arg6[%c0_13, %c0_14] : memref<32x22xf32, #tpu.memory_space<vmem>>, vector<32x22xf32>
    %28 = vector.extract_strided_slice %26 {offsets = [0, 0], sizes = [120, 32], strides = [1, 1]} : vector<120x192xf32> to vector<120x32xf32>
    %cst_15 = arith.constant dense<0.000000e+00> : vector<120x22xf32>
    %29 = tpu.matmul %28, %27, %cst_15 {dimension_numbers = #tpu.dot_dimension_numbers<[1], [0], [0], [1], [0, 0, 1, 1], [], []>} : vector<120x32xf32>, vector<32x22xf32>, vector<120x22xf32> -> vector<120x22xf32>
    %30 = vector.extract_strided_slice %29 {offsets = [0, 0], sizes = [22, 22], strides = [1, 1]} : vector<120x22xf32> to vector<22x22xf32>
    %31 = vector.extract_strided_slice %29 {offsets = [24, 0], sizes = [22, 22], strides = [1, 1]} : vector<120x22xf32> to vector<22x22xf32>
    %32 = vector.extract_strided_slice %29 {offsets = [48, 0], sizes = [22, 22], strides = [1, 1]} : vector<120x22xf32> to vector<22x22xf32>
    %33 = vector.extract_strided_slice %29 {offsets = [72, 0], sizes = [22, 22], strides = [1, 1]} : vector<120x22xf32> to vector<22x22xf32>
    %34 = vector.extract_strided_slice %29 {offsets = [96, 0], sizes = [22, 22], strides = [1, 1]} : vector<120x22xf32> to vector<22x22xf32>
    %35 = arith.mulf %30, %30 : vector<22x22xf32>
    %36 = arith.mulf %31, %31 : vector<22x22xf32>
    %37 = arith.mulf %30, %31 : vector<22x22xf32>
    %38 = arith.subf %32, %35 : vector<22x22xf32>
    %39 = arith.subf %33, %36 : vector<22x22xf32>
    %40 = arith.subf %34, %37 : vector<22x22xf32>
    %cst_16 = arith.constant 2.000000e+00 : f32
    %41 = vector.broadcast %cst_16 : f32 to vector<22x22xf32>
    %42 = arith.mulf %41, %40 : vector<22x22xf32>
    %43 = vector.broadcast %18 : f32 to vector<22x22xf32>
    %44 = arith.addf %42, %43 : vector<22x22xf32>
    %45 = arith.addf %38, %39 : vector<22x22xf32>
    %46 = vector.broadcast %18 : f32 to vector<22x22xf32>
    %47 = arith.addf %45, %46 : vector<22x22xf32>
    %48 = tpu.reciprocal %47 : vector<22x22xf32> -> vector<22x22xf32>
    %49 = arith.addf %35, %36 : vector<22x22xf32>
    %50 = vector.broadcast %17 : f32 to vector<22x22xf32>
    %51 = arith.addf %49, %50 : vector<22x22xf32>
    %52 = tpu.reciprocal %51 : vector<22x22xf32> -> vector<22x22xf32>
    %53 = arith.mulf %44, %48 : vector<22x22xf32>
    %cst_17 = arith.constant 2.000000e+00 : f32
    %54 = vector.broadcast %cst_17 : f32 to vector<22x22xf32>
    %55 = arith.mulf %54, %37 : vector<22x22xf32>
    %56 = vector.broadcast %17 : f32 to vector<22x22xf32>
    %57 = arith.addf %55, %56 : vector<22x22xf32>
    %58 = arith.mulf %57, %53 : vector<22x22xf32>
    %59 = arith.mulf %58, %52 : vector<22x22xf32>
    %60 = vector.shape_cast %53 : vector<22x22xf32> to vector<1x22x22xf32>
    %cst_18 = arith.constant dense<0.000000e+00> : vector<1xf32>
    %61 = vector.multi_reduction <add>, %60, %cst_18 [1, 2] : vector<1x22x22xf32> to vector<1xf32>
    %62 = vector.shape_cast %61 : vector<1xf32> to vector<1x1x1xf32>
    %63 = vector.extract %62[0, 0, 0] : f32 from vector<1x1x1xf32>
    %cst_19 = arith.constant 0.000000e+00 : f32
    %64 = arith.addf %cst_19, %63 : f32
    %65 = vector.shape_cast %59 : vector<22x22xf32> to vector<1x22x22xf32>
    %cst_20 = arith.constant dense<0.000000e+00> : vector<1xf32>
    %66 = vector.multi_reduction <add>, %65, %cst_20 [1, 2] : vector<1x22x22xf32> to vector<1xf32>
    %67 = vector.shape_cast %66 : vector<1xf32> to vector<1x1x1xf32>
    %68 = vector.extract %67[0, 0, 0] : f32 from vector<1x1x1xf32>
    %cst_21 = arith.constant 0.000000e+00 : f32
    %69 = arith.addf %cst_21, %68 : f32
    %70 = vector.extract_strided_slice %26 {offsets = [0, 32], sizes = [120, 32], strides = [1, 1]} : vector<120x192xf32> to vector<120x32xf32>
    %cst_22 = arith.constant dense<0.000000e+00> : vector<120x22xf32>
    %71 = tpu.matmul %70, %27, %cst_22 {dimension_numbers = #tpu.dot_dimension_numbers<[1], [0], [0], [1], [0, 0, 1, 1], [], []>} : vector<120x32xf32>, vector<32x22xf32>, vector<120x22xf32> -> vector<120x22xf32>
    %72 = vector.extract_strided_slice %71 {offsets = [0, 0], sizes = [22, 22], strides = [1, 1]} : vector<120x22xf32> to vector<22x22xf32>
    %73 = vector.extract_strided_slice %71 {offsets = [24, 0], sizes = [22, 22], strides = [1, 1]} : vector<120x22xf32> to vector<22x22xf32>
    %74 = vector.extract_strided_slice %71 {offsets = [48, 0], sizes = [22, 22], strides = [1, 1]} : vector<120x22xf32> to vector<22x22xf32>
    %75 = vector.extract_strided_slice %71 {offsets = [72, 0], sizes = [22, 22], strides = [1, 1]} : vector<120x22xf32> to vector<22x22xf32>
    %76 = vector.extract_strided_slice %71 {offsets = [96, 0], sizes = [22, 22], strides = [1, 1]} : vector<120x22xf32> to vector<22x22xf32>
    %77 = arith.mulf %72, %72 : vector<22x22xf32>
    %78 = arith.mulf %73, %73 : vector<22x22xf32>
    %79 = arith.mulf %72, %73 : vector<22x22xf32>
    %80 = arith.subf %74, %77 : vector<22x22xf32>
    %81 = arith.subf %75, %78 : vector<22x22xf32>
    %82 = arith.subf %76, %79 : vector<22x22xf32>
    %cst_23 = arith.constant 2.000000e+00 : f32
    %83 = vector.broadcast %cst_23 : f32 to vector<22x22xf32>
    %84 = arith.mulf %83, %82 : vector<22x22xf32>
    %85 = vector.broadcast %18 : f32 to vector<22x22xf32>
    %86 = arith.addf %84, %85 : vector<22x22xf32>
    %87 = arith.addf %80, %81 : vector<22x22xf32>
    %88 = vector.broadcast %18 : f32 to vector<22x22xf32>
    %89 = arith.addf %87, %88 : vector<22x22xf32>
    %90 = tpu.reciprocal %89 : vector<22x22xf32> -> vector<22x22xf32>
    %91 = arith.addf %77, %78 : vector<22x22xf32>
    %92 = vector.broadcast %17 : f32 to vector<22x22xf32>
    %93 = arith.addf %91, %92 : vector<22x22xf32>
    %94 = tpu.reciprocal %93 : vector<22x22xf32> -> vector<22x22xf32>
    %95 = arith.mulf %86, %90 : vector<22x22xf32>
    %cst_24 = arith.constant 2.000000e+00 : f32
    %96 = vector.broadcast %cst_24 : f32 to vector<22x22xf32>
    %97 = arith.mulf %96, %79 : vector<22x22xf32>
    %98 = vector.broadcast %17 : f32 to vector<22x22xf32>
    %99 = arith.addf %97, %98 : vector<22x22xf32>
    %100 = arith.mulf %99, %95 : vector<22x22xf32>
    %101 = arith.mulf %100, %94 : vector<22x22xf32>
    %102 = vector.shape_cast %95 : vector<22x22xf32> to vector<1x22x22xf32>
    %cst_25 = arith.constant dense<0.000000e+00> : vector<1xf32>
    %103 = vector.multi_reduction <add>, %102, %cst_25 [1, 2] : vector<1x22x22xf32> to vector<1xf32>
    %104 = vector.shape_cast %103 : vector<1xf32> to vector<1x1x1xf32>
    %105 = vector.extract %104[0, 0, 0] : f32 from vector<1x1x1xf32>
    %106 = arith.addf %64, %105 : f32
    %107 = vector.shape_cast %101 : vector<22x22xf32> to vector<1x22x22xf32>
    %cst_26 = arith.constant dense<0.000000e+00> : vector<1xf32>
    %108 = vector.multi_reduction <add>, %107, %cst_26 [1, 2] : vector<1x22x22xf32> to vector<1xf32>
    %109 = vector.shape_cast %108 : vector<1xf32> to vector<1x1x1xf32>
    %110 = vector.extract %109[0, 0, 0] : f32 from vector<1x1x1xf32>
    %111 = arith.addf %69, %110 : f32
    %112 = vector.extract_strided_slice %26 {offsets = [0, 64], sizes = [120, 32], strides = [1, 1]} : vector<120x192xf32> to vector<120x32xf32>
    %cst_27 = arith.constant dense<0.000000e+00> : vector<120x22xf32>
    %113 = tpu.matmul %112, %27, %cst_27 {dimension_numbers = #tpu.dot_dimension_numbers<[1], [0], [0], [1], [0, 0, 1, 1], [], []>} : vector<120x32xf32>, vector<32x22xf32>, vector<120x22xf32> -> vector<120x22xf32>
    %114 = vector.extract_strided_slice %113 {offsets = [0, 0], sizes = [22, 22], strides = [1, 1]} : vector<120x22xf32> to vector<22x22xf32>
    %115 = vector.extract_strided_slice %113 {offsets = [24, 0], sizes = [22, 22], strides = [1, 1]} : vector<120x22xf32> to vector<22x22xf32>
    %116 = vector.extract_strided_slice %113 {offsets = [48, 0], sizes = [22, 22], strides = [1, 1]} : vector<120x22xf32> to vector<22x22xf32>
    %117 = vector.extract_strided_slice %113 {offsets = [72, 0], sizes = [22, 22], strides = [1, 1]} : vector<120x22xf32> to vector<22x22xf32>
    %118 = vector.extract_strided_slice %113 {offsets = [96, 0], sizes = [22, 22], strides = [1, 1]} : vector<120x22xf32> to vector<22x22xf32>
    %119 = arith.mulf %114, %114 : vector<22x22xf32>
    %120 = arith.mulf %115, %115 : vector<22x22xf32>
    %121 = arith.mulf %114, %115 : vector<22x22xf32>
    %122 = arith.subf %116, %119 : vector<22x22xf32>
    %123 = arith.subf %117, %120 : vector<22x22xf32>
    %124 = arith.subf %118, %121 : vector<22x22xf32>
    %cst_28 = arith.constant 2.000000e+00 : f32
    %125 = vector.broadcast %cst_28 : f32 to vector<22x22xf32>
    %126 = arith.mulf %125, %124 : vector<22x22xf32>
    %127 = vector.broadcast %18 : f32 to vector<22x22xf32>
    %128 = arith.addf %126, %127 : vector<22x22xf32>
    %129 = arith.addf %122, %123 : vector<22x22xf32>
    %130 = vector.broadcast %18 : f32 to vector<22x22xf32>
    %131 = arith.addf %129, %130 : vector<22x22xf32>
    %132 = tpu.reciprocal %131 : vector<22x22xf32> -> vector<22x22xf32>
    %133 = arith.addf %119, %120 : vector<22x22xf32>
    %134 = vector.broadcast %17 : f32 to vector<22x22xf32>
    %135 = arith.addf %133, %134 : vector<22x22xf32>
    %136 = tpu.reciprocal %135 : vector<22x22xf32> -> vector<22x22xf32>
    %137 = arith.mulf %128, %132 : vector<22x22xf32>
    %cst_29 = arith.constant 2.000000e+00 : f32
    %138 = vector.broadcast %cst_29 : f32 to vector<22x22xf32>
    %139 = arith.mulf %138, %121 : vector<22x22xf32>
    %140 = vector.broadcast %17 : f32 to vector<22x22xf32>
    %141 = arith.addf %139, %140 : vector<22x22xf32>
    %142 = arith.mulf %141, %137 : vector<22x22xf32>
    %143 = arith.mulf %142, %136 : vector<22x22xf32>
    %144 = vector.shape_cast %137 : vector<22x22xf32> to vector<1x22x22xf32>
    %cst_30 = arith.constant dense<0.000000e+00> : vector<1xf32>
    %145 = vector.multi_reduction <add>, %144, %cst_30 [1, 2] : vector<1x22x22xf32> to vector<1xf32>
    %146 = vector.shape_cast %145 : vector<1xf32> to vector<1x1x1xf32>
    %147 = vector.extract %146[0, 0, 0] : f32 from vector<1x1x1xf32>
    %148 = arith.addf %106, %147 : f32
    %149 = vector.shape_cast %143 : vector<22x22xf32> to vector<1x22x22xf32>
    %cst_31 = arith.constant dense<0.000000e+00> : vector<1xf32>
    %150 = vector.multi_reduction <add>, %149, %cst_31 [1, 2] : vector<1x22x22xf32> to vector<1xf32>
    %151 = vector.shape_cast %150 : vector<1xf32> to vector<1x1x1xf32>
    %152 = vector.extract %151[0, 0, 0] : f32 from vector<1x1x1xf32>
    %153 = arith.addf %111, %152 : f32
    %154 = vector.extract_strided_slice %26 {offsets = [0, 96], sizes = [120, 32], strides = [1, 1]} : vector<120x192xf32> to vector<120x32xf32>
    %cst_32 = arith.constant dense<0.000000e+00> : vector<120x22xf32>
    %155 = tpu.matmul %154, %27, %cst_32 {dimension_numbers = #tpu.dot_dimension_numbers<[1], [0], [0], [1], [0, 0, 1, 1], [], []>} : vector<120x32xf32>, vector<32x22xf32>, vector<120x22xf32> -> vector<120x22xf32>
    %156 = vector.extract_strided_slice %155 {offsets = [0, 0], sizes = [22, 22], strides = [1, 1]} : vector<120x22xf32> to vector<22x22xf32>
    %157 = vector.extract_strided_slice %155 {offsets = [24, 0], sizes = [22, 22], strides = [1, 1]} : vector<120x22xf32> to vector<22x22xf32>
    %158 = vector.extract_strided_slice %155 {offsets = [48, 0], sizes = [22, 22], strides = [1, 1]} : vector<120x22xf32> to vector<22x22xf32>
    %159 = vector.extract_strided_slice %155 {offsets = [72, 0], sizes = [22, 22], strides = [1, 1]} : vector<120x22xf32> to vector<22x22xf32>
    %160 = vector.extract_strided_slice %155 {offsets = [96, 0], sizes = [22, 22], strides = [1, 1]} : vector<120x22xf32> to vector<22x22xf32>
    %161 = arith.mulf %156, %156 : vector<22x22xf32>
    %162 = arith.mulf %157, %157 : vector<22x22xf32>
    %163 = arith.mulf %156, %157 : vector<22x22xf32>
    %164 = arith.subf %158, %161 : vector<22x22xf32>
    %165 = arith.subf %159, %162 : vector<22x22xf32>
    %166 = arith.subf %160, %163 : vector<22x22xf32>
    %cst_33 = arith.constant 2.000000e+00 : f32
    %167 = vector.broadcast %cst_33 : f32 to vector<22x22xf32>
    %168 = arith.mulf %167, %166 : vector<22x22xf32>
    %169 = vector.broadcast %18 : f32 to vector<22x22xf32>
    %170 = arith.addf %168, %169 : vector<22x22xf32>
    %171 = arith.addf %164, %165 : vector<22x22xf32>
    %172 = vector.broadcast %18 : f32 to vector<22x22xf32>
    %173 = arith.addf %171, %172 : vector<22x22xf32>
    %174 = tpu.reciprocal %173 : vector<22x22xf32> -> vector<22x22xf32>
    %175 = arith.addf %161, %162 : vector<22x22xf32>
    %176 = vector.broadcast %17 : f32 to vector<22x22xf32>
    %177 = arith.addf %175, %176 : vector<22x22xf32>
    %178 = tpu.reciprocal %177 : vector<22x22xf32> -> vector<22x22xf32>
    %179 = arith.mulf %170, %174 : vector<22x22xf32>
    %cst_34 = arith.constant 2.000000e+00 : f32
    %180 = vector.broadcast %cst_34 : f32 to vector<22x22xf32>
    %181 = arith.mulf %180, %163 : vector<22x22xf32>
    %182 = vector.broadcast %17 : f32 to vector<22x22xf32>
    %183 = arith.addf %181, %182 : vector<22x22xf32>
    %184 = arith.mulf %183, %179 : vector<22x22xf32>
    %185 = arith.mulf %184, %178 : vector<22x22xf32>
    %186 = vector.shape_cast %179 : vector<22x22xf32> to vector<1x22x22xf32>
    %cst_35 = arith.constant dense<0.000000e+00> : vector<1xf32>
    %187 = vector.multi_reduction <add>, %186, %cst_35 [1, 2] : vector<1x22x22xf32> to vector<1xf32>
    %188 = vector.shape_cast %187 : vector<1xf32> to vector<1x1x1xf32>
    %189 = vector.extract %188[0, 0, 0] : f32 from vector<1x1x1xf32>
    %190 = arith.addf %148, %189 : f32
    %191 = vector.shape_cast %185 : vector<22x22xf32> to vector<1x22x22xf32>
    %cst_36 = arith.constant dense<0.000000e+00> : vector<1xf32>
    %192 = vector.multi_reduction <add>, %191, %cst_36 [1, 2] : vector<1x22x22xf32> to vector<1xf32>
    %193 = vector.shape_cast %192 : vector<1xf32> to vector<1x1x1xf32>
    %194 = vector.extract %193[0, 0, 0] : f32 from vector<1x1x1xf32>
    %195 = arith.addf %153, %194 : f32
    %196 = vector.extract_strided_slice %26 {offsets = [0, 128], sizes = [120, 32], strides = [1, 1]} : vector<120x192xf32> to vector<120x32xf32>
    %cst_37 = arith.constant dense<0.000000e+00> : vector<120x22xf32>
    %197 = tpu.matmul %196, %27, %cst_37 {dimension_numbers = #tpu.dot_dimension_numbers<[1], [0], [0], [1], [0, 0, 1, 1], [], []>} : vector<120x32xf32>, vector<32x22xf32>, vector<120x22xf32> -> vector<120x22xf32>
    %198 = vector.extract_strided_slice %197 {offsets = [0, 0], sizes = [22, 22], strides = [1, 1]} : vector<120x22xf32> to vector<22x22xf32>
    %199 = vector.extract_strided_slice %197 {offsets = [24, 0], sizes = [22, 22], strides = [1, 1]} : vector<120x22xf32> to vector<22x22xf32>
    %200 = vector.extract_strided_slice %197 {offsets = [48, 0], sizes = [22, 22], strides = [1, 1]} : vector<120x22xf32> to vector<22x22xf32>
    %201 = vector.extract_strided_slice %197 {offsets = [72, 0], sizes = [22, 22], strides = [1, 1]} : vector<120x22xf32> to vector<22x22xf32>
    %202 = vector.extract_strided_slice %197 {offsets = [96, 0], sizes = [22, 22], strides = [1, 1]} : vector<120x22xf32> to vector<22x22xf32>
    %203 = arith.mulf %198, %198 : vector<22x22xf32>
    %204 = arith.mulf %199, %199 : vector<22x22xf32>
    %205 = arith.mulf %198, %199 : vector<22x22xf32>
    %206 = arith.subf %200, %203 : vector<22x22xf32>
    %207 = arith.subf %201, %204 : vector<22x22xf32>
    %208 = arith.subf %202, %205 : vector<22x22xf32>
    %cst_38 = arith.constant 2.000000e+00 : f32
    %209 = vector.broadcast %cst_38 : f32 to vector<22x22xf32>
    %210 = arith.mulf %209, %208 : vector<22x22xf32>
    %211 = vector.broadcast %18 : f32 to vector<22x22xf32>
    %212 = arith.addf %210, %211 : vector<22x22xf32>
    %213 = arith.addf %206, %207 : vector<22x22xf32>
    %214 = vector.broadcast %18 : f32 to vector<22x22xf32>
    %215 = arith.addf %213, %214 : vector<22x22xf32>
    %216 = tpu.reciprocal %215 : vector<22x22xf32> -> vector<22x22xf32>
    %217 = arith.addf %203, %204 : vector<22x22xf32>
    %218 = vector.broadcast %17 : f32 to vector<22x22xf32>
    %219 = arith.addf %217, %218 : vector<22x22xf32>
    %220 = tpu.reciprocal %219 : vector<22x22xf32> -> vector<22x22xf32>
    %221 = arith.mulf %212, %216 : vector<22x22xf32>
    %cst_39 = arith.constant 2.000000e+00 : f32
    %222 = vector.broadcast %cst_39 : f32 to vector<22x22xf32>
    %223 = arith.mulf %222, %205 : vector<22x22xf32>
    %224 = vector.broadcast %17 : f32 to vector<22x22xf32>
    %225 = arith.addf %223, %224 : vector<22x22xf32>
    %226 = arith.mulf %225, %221 : vector<22x22xf32>
    %227 = arith.mulf %226, %220 : vector<22x22xf32>
    %228 = vector.shape_cast %221 : vector<22x22xf32> to vector<1x22x22xf32>
    %cst_40 = arith.constant dense<0.000000e+00> : vector<1xf32>
    %229 = vector.multi_reduction <add>, %228, %cst_40 [1, 2] : vector<1x22x22xf32> to vector<1xf32>
    %230 = vector.shape_cast %229 : vector<1xf32> to vector<1x1x1xf32>
    %231 = vector.extract %230[0, 0, 0] : f32 from vector<1x1x1xf32>
    %232 = arith.addf %190, %231 : f32
    %233 = vector.shape_cast %227 : vector<22x22xf32> to vector<1x22x22xf32>
    %cst_41 = arith.constant dense<0.000000e+00> : vector<1xf32>
    %234 = vector.multi_reduction <add>, %233, %cst_41 [1, 2] : vector<1x22x22xf32> to vector<1xf32>
    %235 = vector.shape_cast %234 : vector<1xf32> to vector<1x1x1xf32>
    %236 = vector.extract %235[0, 0, 0] : f32 from vector<1x1x1xf32>
    %237 = arith.addf %195, %236 : f32
    %238 = vector.extract_strided_slice %26 {offsets = [0, 160], sizes = [120, 32], strides = [1, 1]} : vector<120x192xf32> to vector<120x32xf32>
    %cst_42 = arith.constant dense<0.000000e+00> : vector<120x22xf32>
    %239 = tpu.matmul %238, %27, %cst_42 {dimension_numbers = #tpu.dot_dimension_numbers<[1], [0], [0], [1], [0, 0, 1, 1], [], []>} : vector<120x32xf32>, vector<32x22xf32>, vector<120x22xf32> -> vector<120x22xf32>
    %240 = vector.extract_strided_slice %239 {offsets = [0, 0], sizes = [22, 22], strides = [1, 1]} : vector<120x22xf32> to vector<22x22xf32>
    %241 = vector.extract_strided_slice %239 {offsets = [24, 0], sizes = [22, 22], strides = [1, 1]} : vector<120x22xf32> to vector<22x22xf32>
    %242 = vector.extract_strided_slice %239 {offsets = [48, 0], sizes = [22, 22], strides = [1, 1]} : vector<120x22xf32> to vector<22x22xf32>
    %243 = vector.extract_strided_slice %239 {offsets = [72, 0], sizes = [22, 22], strides = [1, 1]} : vector<120x22xf32> to vector<22x22xf32>
    %244 = vector.extract_strided_slice %239 {offsets = [96, 0], sizes = [22, 22], strides = [1, 1]} : vector<120x22xf32> to vector<22x22xf32>
    %245 = arith.mulf %240, %240 : vector<22x22xf32>
    %246 = arith.mulf %241, %241 : vector<22x22xf32>
    %247 = arith.mulf %240, %241 : vector<22x22xf32>
    %248 = arith.subf %242, %245 : vector<22x22xf32>
    %249 = arith.subf %243, %246 : vector<22x22xf32>
    %250 = arith.subf %244, %247 : vector<22x22xf32>
    %cst_43 = arith.constant 2.000000e+00 : f32
    %251 = vector.broadcast %cst_43 : f32 to vector<22x22xf32>
    %252 = arith.mulf %251, %250 : vector<22x22xf32>
    %253 = vector.broadcast %18 : f32 to vector<22x22xf32>
    %254 = arith.addf %252, %253 : vector<22x22xf32>
    %255 = arith.addf %248, %249 : vector<22x22xf32>
    %256 = vector.broadcast %18 : f32 to vector<22x22xf32>
    %257 = arith.addf %255, %256 : vector<22x22xf32>
    %258 = tpu.reciprocal %257 : vector<22x22xf32> -> vector<22x22xf32>
    %259 = arith.addf %245, %246 : vector<22x22xf32>
    %260 = vector.broadcast %17 : f32 to vector<22x22xf32>
    %261 = arith.addf %259, %260 : vector<22x22xf32>
    %262 = tpu.reciprocal %261 : vector<22x22xf32> -> vector<22x22xf32>
    %263 = arith.mulf %254, %258 : vector<22x22xf32>
    %cst_44 = arith.constant 2.000000e+00 : f32
    %264 = vector.broadcast %cst_44 : f32 to vector<22x22xf32>
    %265 = arith.mulf %264, %247 : vector<22x22xf32>
    %266 = vector.broadcast %17 : f32 to vector<22x22xf32>
    %267 = arith.addf %265, %266 : vector<22x22xf32>
    %268 = arith.mulf %267, %263 : vector<22x22xf32>
    %269 = arith.mulf %268, %262 : vector<22x22xf32>
    %270 = vector.shape_cast %263 : vector<22x22xf32> to vector<1x22x22xf32>
    %cst_45 = arith.constant dense<0.000000e+00> : vector<1xf32>
    %271 = vector.multi_reduction <add>, %270, %cst_45 [1, 2] : vector<1x22x22xf32> to vector<1xf32>
    %272 = vector.shape_cast %271 : vector<1xf32> to vector<1x1x1xf32>
    %273 = vector.extract %272[0, 0, 0] : f32 from vector<1x1x1xf32>
    %274 = arith.addf %232, %273 : f32
    %275 = vector.shape_cast %269 : vector<22x22xf32> to vector<1x22x22xf32>
    %cst_46 = arith.constant dense<0.000000e+00> : vector<1xf32>
    %276 = vector.multi_reduction <add>, %275, %cst_46 [1, 2] : vector<1x22x22xf32> to vector<1xf32>
    %277 = vector.shape_cast %276 : vector<1xf32> to vector<1x1x1xf32>
    %278 = vector.extract %277[0, 0, 0] : f32 from vector<1x1x1xf32>
    %279 = arith.addf %237, %278 : f32
    %cst_47 = arith.constant 3.44352622E-4 : f32
    %280 = arith.mulf %279, %cst_47 : f32
    %c0_48 = arith.constant 0 : index
    %281 = memref.load %arg19[%c0_48] : memref<5xf32, #tpu.memory_space<smem>>
    memref.store %280, %arg19[%c0_48] : memref<5xf32, #tpu.memory_space<smem>>
    %cst_49 = arith.constant 3.44352622E-4 : f32
    %282 = arith.mulf %274, %cst_49 : f32
    %c0_50 = arith.constant 0 : index
    %283 = memref.load %arg20[%c0_50] : memref<5xf32, #tpu.memory_space<smem>>
    memref.store %282, %arg20[%c0_50] : memref<5xf32, #tpu.memory_space<smem>>
    %c0_51 = arith.constant 0 : index
    %c0_52 = arith.constant 0 : index
    %284 = vector.load %arg11[%c0_51, %c0_52] : memref<32x64xf32, #tpu.memory_space<vmem>>, vector<32x64xf32>
    %cst_53 = arith.constant dense<0.000000e+00> : vector<32x192xf32>
    %285 = tpu.matmul %284, %0, %cst_53 {dimension_numbers = #tpu.dot_dimension_numbers<[1], [0], [0], [1], [0, 0, 1, 1], [], []>} : vector<32x64xf32>, vector<64x192xf32>, vector<32x192xf32> -> vector<32x192xf32>
    %c0_54 = arith.constant 0 : index
    %c0_55 = arith.constant 0 : index
    %286 = vector.load %arg15[%c0_54, %c0_55] : memref<192x96xf32, #tpu.memory_space<vmem>>, vector<192x96xf32>
    %cst_56 = arith.constant dense<0.000000e+00> : vector<32x96xf32>
    %287 = tpu.matmul %285, %286, %cst_56 {dimension_numbers = #tpu.dot_dimension_numbers<[1], [0], [0], [1], [0, 0, 1, 1], [], []>} : vector<32x192xf32>, vector<192x96xf32>, vector<32x96xf32> -> vector<32x96xf32>
    %288 = vector.extract_strided_slice %287 {offsets = [0, 0], sizes = [16, 96], strides = [1, 1]} : vector<32x96xf32> to vector<16x96xf32>
    %289 = vector.extract_strided_slice %287 {offsets = [16, 0], sizes = [16, 96], strides = [1, 1]} : vector<32x96xf32> to vector<16x96xf32>
    %290 = arith.mulf %288, %288 : vector<16x96xf32>
    %291 = arith.mulf %289, %289 : vector<16x96xf32>
    %292 = arith.mulf %288, %289 : vector<16x96xf32>
    %293 = tpu.concatenate %287, %290, %291, %292 in 0 : vector<32x96xf32>, vector<16x96xf32>, vector<16x96xf32>, vector<16x96xf32> -> vector<80x96xf32>
    %c0_57 = arith.constant 0 : index
    %c0_58 = arith.constant 0 : index
    %294 = vector.load %arg2[%c0_57, %c0_58] : memref<40x80xf32, #tpu.memory_space<vmem>>, vector<40x80xf32>
    %cst_59 = arith.constant dense<0.000000e+00> : vector<40x96xf32>
    %295 = tpu.matmul %294, %293, %cst_59 {dimension_numbers = #tpu.dot_dimension_numbers<[1], [0], [0], [1], [0, 0, 1, 1], [], []>} : vector<40x80xf32>, vector<80x96xf32>, vector<40x96xf32> -> vector<40x96xf32>
    %c0_60 = arith.constant 0 : index
    %c0_61 = arith.constant 0 : index
    %296 = vector.load %arg7[%c0_60, %c0_61] : memref<16x6xf32, #tpu.memory_space<vmem>>, vector<16x6xf32>
    %297 = vector.extract_strided_slice %295 {offsets = [0, 0], sizes = [40, 16], strides = [1, 1]} : vector<40x96xf32> to vector<40x16xf32>
    %cst_62 = arith.constant dense<0.000000e+00> : vector<40x6xf32>
    %298 = tpu.matmul %297, %296, %cst_62 {dimension_numbers = #tpu.dot_dimension_numbers<[1], [0], [0], [1], [0, 0, 1, 1], [], []>} : vector<40x16xf32>, vector<16x6xf32>, vector<40x6xf32> -> vector<40x6xf32>
    %299 = vector.extract_strided_slice %298 {offsets = [0, 0], sizes = [6, 6], strides = [1, 1]} : vector<40x6xf32> to vector<6x6xf32>
    %300 = vector.extract_strided_slice %298 {offsets = [8, 0], sizes = [6, 6], strides = [1, 1]} : vector<40x6xf32> to vector<6x6xf32>
    %301 = vector.extract_strided_slice %298 {offsets = [16, 0], sizes = [6, 6], strides = [1, 1]} : vector<40x6xf32> to vector<6x6xf32>
    %302 = vector.extract_strided_slice %298 {offsets = [24, 0], sizes = [6, 6], strides = [1, 1]} : vector<40x6xf32> to vector<6x6xf32>
    %303 = vector.extract_strided_slice %298 {offsets = [32, 0], sizes = [6, 6], strides = [1, 1]} : vector<40x6xf32> to vector<6x6xf32>
    %304 = arith.mulf %299, %299 : vector<6x6xf32>
    %305 = arith.mulf %300, %300 : vector<6x6xf32>
    %306 = arith.mulf %299, %300 : vector<6x6xf32>
    %307 = arith.subf %301, %304 : vector<6x6xf32>
    %308 = arith.subf %302, %305 : vector<6x6xf32>
    %309 = arith.subf %303, %306 : vector<6x6xf32>
    %cst_63 = arith.constant 2.000000e+00 : f32
    %310 = vector.broadcast %cst_63 : f32 to vector<6x6xf32>
    %311 = arith.mulf %310, %309 : vector<6x6xf32>
    %312 = vector.broadcast %18 : f32 to vector<6x6xf32>
    %313 = arith.addf %311, %312 : vector<6x6xf32>
    %314 = arith.addf %307, %308 : vector<6x6xf32>
    %315 = vector.broadcast %18 : f32 to vector<6x6xf32>
    %316 = arith.addf %314, %315 : vector<6x6xf32>
    %317 = tpu.reciprocal %316 : vector<6x6xf32> -> vector<6x6xf32>
    %318 = arith.addf %304, %305 : vector<6x6xf32>
    %319 = vector.broadcast %17 : f32 to vector<6x6xf32>
    %320 = arith.addf %318, %319 : vector<6x6xf32>
    %321 = tpu.reciprocal %320 : vector<6x6xf32> -> vector<6x6xf32>
    %322 = arith.mulf %313, %317 : vector<6x6xf32>
    %cst_64 = arith.constant 2.000000e+00 : f32
    %323 = vector.broadcast %cst_64 : f32 to vector<6x6xf32>
    %324 = arith.mulf %323, %306 : vector<6x6xf32>
    %325 = vector.broadcast %17 : f32 to vector<6x6xf32>
    %326 = arith.addf %324, %325 : vector<6x6xf32>
    %327 = arith.mulf %326, %322 : vector<6x6xf32>
    %328 = arith.mulf %327, %321 : vector<6x6xf32>
    %329 = vector.shape_cast %322 : vector<6x6xf32> to vector<1x6x6xf32>
    %cst_65 = arith.constant dense<0.000000e+00> : vector<1xf32>
    %330 = vector.multi_reduction <add>, %329, %cst_65 [1, 2] : vector<1x6x6xf32> to vector<1xf32>
    %331 = vector.shape_cast %330 : vector<1xf32> to vector<1x1x1xf32>
    %332 = vector.extract %331[0, 0, 0] : f32 from vector<1x1x1xf32>
    %cst_66 = arith.constant 0.000000e+00 : f32
    %333 = arith.addf %cst_66, %332 : f32
    %334 = vector.shape_cast %328 : vector<6x6xf32> to vector<1x6x6xf32>
    %cst_67 = arith.constant dense<0.000000e+00> : vector<1xf32>
    %335 = vector.multi_reduction <add>, %334, %cst_67 [1, 2] : vector<1x6x6xf32> to vector<1xf32>
    %336 = vector.shape_cast %335 : vector<1xf32> to vector<1x1x1xf32>
    %337 = vector.extract %336[0, 0, 0] : f32 from vector<1x1x1xf32>
    %cst_68 = arith.constant 0.000000e+00 : f32
    %338 = arith.addf %cst_68, %337 : f32
    %339 = vector.extract_strided_slice %295 {offsets = [0, 16], sizes = [40, 16], strides = [1, 1]} : vector<40x96xf32> to vector<40x16xf32>
    %cst_69 = arith.constant dense<0.000000e+00> : vector<40x6xf32>
    %340 = tpu.matmul %339, %296, %cst_69 {dimension_numbers = #tpu.dot_dimension_numbers<[1], [0], [0], [1], [0, 0, 1, 1], [], []>} : vector<40x16xf32>, vector<16x6xf32>, vector<40x6xf32> -> vector<40x6xf32>
    %341 = vector.extract_strided_slice %340 {offsets = [0, 0], sizes = [6, 6], strides = [1, 1]} : vector<40x6xf32> to vector<6x6xf32>
    %342 = vector.extract_strided_slice %340 {offsets = [8, 0], sizes = [6, 6], strides = [1, 1]} : vector<40x6xf32> to vector<6x6xf32>
    %343 = vector.extract_strided_slice %340 {offsets = [16, 0], sizes = [6, 6], strides = [1, 1]} : vector<40x6xf32> to vector<6x6xf32>
    %344 = vector.extract_strided_slice %340 {offsets = [24, 0], sizes = [6, 6], strides = [1, 1]} : vector<40x6xf32> to vector<6x6xf32>
    %345 = vector.extract_strided_slice %340 {offsets = [32, 0], sizes = [6, 6], strides = [1, 1]} : vector<40x6xf32> to vector<6x6xf32>
    %346 = arith.mulf %341, %341 : vector<6x6xf32>
    %347 = arith.mulf %342, %342 : vector<6x6xf32>
    %348 = arith.mulf %341, %342 : vector<6x6xf32>
    %349 = arith.subf %343, %346 : vector<6x6xf32>
    %350 = arith.subf %344, %347 : vector<6x6xf32>
    %351 = arith.subf %345, %348 : vector<6x6xf32>
    %cst_70 = arith.constant 2.000000e+00 : f32
    %352 = vector.broadcast %cst_70 : f32 to vector<6x6xf32>
    %353 = arith.mulf %352, %351 : vector<6x6xf32>
    %354 = vector.broadcast %18 : f32 to vector<6x6xf32>
    %355 = arith.addf %353, %354 : vector<6x6xf32>
    %356 = arith.addf %349, %350 : vector<6x6xf32>
    %357 = vector.broadcast %18 : f32 to vector<6x6xf32>
    %358 = arith.addf %356, %357 : vector<6x6xf32>
    %359 = tpu.reciprocal %358 : vector<6x6xf32> -> vector<6x6xf32>
    %360 = arith.addf %346, %347 : vector<6x6xf32>
    %361 = vector.broadcast %17 : f32 to vector<6x6xf32>
    %362 = arith.addf %360, %361 : vector<6x6xf32>
    %363 = tpu.reciprocal %362 : vector<6x6xf32> -> vector<6x6xf32>
    %364 = arith.mulf %355, %359 : vector<6x6xf32>
    %cst_71 = arith.constant 2.000000e+00 : f32
    %365 = vector.broadcast %cst_71 : f32 to vector<6x6xf32>
    %366 = arith.mulf %365, %348 : vector<6x6xf32>
    %367 = vector.broadcast %17 : f32 to vector<6x6xf32>
    %368 = arith.addf %366, %367 : vector<6x6xf32>
    %369 = arith.mulf %368, %364 : vector<6x6xf32>
    %370 = arith.mulf %369, %363 : vector<6x6xf32>
    %371 = vector.shape_cast %364 : vector<6x6xf32> to vector<1x6x6xf32>
    %cst_72 = arith.constant dense<0.000000e+00> : vector<1xf32>
    %372 = vector.multi_reduction <add>, %371, %cst_72 [1, 2] : vector<1x6x6xf32> to vector<1xf32>
    %373 = vector.shape_cast %372 : vector<1xf32> to vector<1x1x1xf32>
    %374 = vector.extract %373[0, 0, 0] : f32 from vector<1x1x1xf32>
    %375 = arith.addf %333, %374 : f32
    %376 = vector.shape_cast %370 : vector<6x6xf32> to vector<1x6x6xf32>
    %cst_73 = arith.constant dense<0.000000e+00> : vector<1xf32>
    %377 = vector.multi_reduction <add>, %376, %cst_73 [1, 2] : vector<1x6x6xf32> to vector<1xf32>
    %378 = vector.shape_cast %377 : vector<1xf32> to vector<1x1x1xf32>
    %379 = vector.extract %378[0, 0, 0] : f32 from vector<1x1x1xf32>
    %380 = arith.addf %338, %379 : f32
    %381 = vector.extract_strided_slice %295 {offsets = [0, 32], sizes = [40, 16], strides = [1, 1]} : vector<40x96xf32> to vector<40x16xf32>
    %cst_74 = arith.constant dense<0.000000e+00> : vector<40x6xf32>
    %382 = tpu.matmul %381, %296, %cst_74 {dimension_numbers = #tpu.dot_dimension_numbers<[1], [0], [0], [1], [0, 0, 1, 1], [], []>} : vector<40x16xf32>, vector<16x6xf32>, vector<40x6xf32> -> vector<40x6xf32>
    %383 = vector.extract_strided_slice %382 {offsets = [0, 0], sizes = [6, 6], strides = [1, 1]} : vector<40x6xf32> to vector<6x6xf32>
    %384 = vector.extract_strided_slice %382 {offsets = [8, 0], sizes = [6, 6], strides = [1, 1]} : vector<40x6xf32> to vector<6x6xf32>
    %385 = vector.extract_strided_slice %382 {offsets = [16, 0], sizes = [6, 6], strides = [1, 1]} : vector<40x6xf32> to vector<6x6xf32>
    %386 = vector.extract_strided_slice %382 {offsets = [24, 0], sizes = [6, 6], strides = [1, 1]} : vector<40x6xf32> to vector<6x6xf32>
    %387 = vector.extract_strided_slice %382 {offsets = [32, 0], sizes = [6, 6], strides = [1, 1]} : vector<40x6xf32> to vector<6x6xf32>
    %388 = arith.mulf %383, %383 : vector<6x6xf32>
    %389 = arith.mulf %384, %384 : vector<6x6xf32>
    %390 = arith.mulf %383, %384 : vector<6x6xf32>
    %391 = arith.subf %385, %388 : vector<6x6xf32>
    %392 = arith.subf %386, %389 : vector<6x6xf32>
    %393 = arith.subf %387, %390 : vector<6x6xf32>
    %cst_75 = arith.constant 2.000000e+00 : f32
    %394 = vector.broadcast %cst_75 : f32 to vector<6x6xf32>
    %395 = arith.mulf %394, %393 : vector<6x6xf32>
    %396 = vector.broadcast %18 : f32 to vector<6x6xf32>
    %397 = arith.addf %395, %396 : vector<6x6xf32>
    %398 = arith.addf %391, %392 : vector<6x6xf32>
    %399 = vector.broadcast %18 : f32 to vector<6x6xf32>
    %400 = arith.addf %398, %399 : vector<6x6xf32>
    %401 = tpu.reciprocal %400 : vector<6x6xf32> -> vector<6x6xf32>
    %402 = arith.addf %388, %389 : vector<6x6xf32>
    %403 = vector.broadcast %17 : f32 to vector<6x6xf32>
    %404 = arith.addf %402, %403 : vector<6x6xf32>
    %405 = tpu.reciprocal %404 : vector<6x6xf32> -> vector<6x6xf32>
    %406 = arith.mulf %397, %401 : vector<6x6xf32>
    %cst_76 = arith.constant 2.000000e+00 : f32
    %407 = vector.broadcast %cst_76 : f32 to vector<6x6xf32>
    %408 = arith.mulf %407, %390 : vector<6x6xf32>
    %409 = vector.broadcast %17 : f32 to vector<6x6xf32>
    %410 = arith.addf %408, %409 : vector<6x6xf32>
    %411 = arith.mulf %410, %406 : vector<6x6xf32>
    %412 = arith.mulf %411, %405 : vector<6x6xf32>
    %413 = vector.shape_cast %406 : vector<6x6xf32> to vector<1x6x6xf32>
    %cst_77 = arith.constant dense<0.000000e+00> : vector<1xf32>
    %414 = vector.multi_reduction <add>, %413, %cst_77 [1, 2] : vector<1x6x6xf32> to vector<1xf32>
    %415 = vector.shape_cast %414 : vector<1xf32> to vector<1x1x1xf32>
    %416 = vector.extract %415[0, 0, 0] : f32 from vector<1x1x1xf32>
    %417 = arith.addf %375, %416 : f32
    %418 = vector.shape_cast %412 : vector<6x6xf32> to vector<1x6x6xf32>
    %cst_78 = arith.constant dense<0.000000e+00> : vector<1xf32>
    %419 = vector.multi_reduction <add>, %418, %cst_78 [1, 2] : vector<1x6x6xf32> to vector<1xf32>
    %420 = vector.shape_cast %419 : vector<1xf32> to vector<1x1x1xf32>
    %421 = vector.extract %420[0, 0, 0] : f32 from vector<1x1x1xf32>
    %422 = arith.addf %380, %421 : f32
    %423 = vector.extract_strided_slice %295 {offsets = [0, 48], sizes = [40, 16], strides = [1, 1]} : vector<40x96xf32> to vector<40x16xf32>
    %cst_79 = arith.constant dense<0.000000e+00> : vector<40x6xf32>
    %424 = tpu.matmul %423, %296, %cst_79 {dimension_numbers = #tpu.dot_dimension_numbers<[1], [0], [0], [1], [0, 0, 1, 1], [], []>} : vector<40x16xf32>, vector<16x6xf32>, vector<40x6xf32> -> vector<40x6xf32>
    %425 = vector.extract_strided_slice %424 {offsets = [0, 0], sizes = [6, 6], strides = [1, 1]} : vector<40x6xf32> to vector<6x6xf32>
    %426 = vector.extract_strided_slice %424 {offsets = [8, 0], sizes = [6, 6], strides = [1, 1]} : vector<40x6xf32> to vector<6x6xf32>
    %427 = vector.extract_strided_slice %424 {offsets = [16, 0], sizes = [6, 6], strides = [1, 1]} : vector<40x6xf32> to vector<6x6xf32>
    %428 = vector.extract_strided_slice %424 {offsets = [24, 0], sizes = [6, 6], strides = [1, 1]} : vector<40x6xf32> to vector<6x6xf32>
    %429 = vector.extract_strided_slice %424 {offsets = [32, 0], sizes = [6, 6], strides = [1, 1]} : vector<40x6xf32> to vector<6x6xf32>
    %430 = arith.mulf %425, %425 : vector<6x6xf32>
    %431 = arith.mulf %426, %426 : vector<6x6xf32>
    %432 = arith.mulf %425, %426 : vector<6x6xf32>
    %433 = arith.subf %427, %430 : vector<6x6xf32>
    %434 = arith.subf %428, %431 : vector<6x6xf32>
    %435 = arith.subf %429, %432 : vector<6x6xf32>
    %cst_80 = arith.constant 2.000000e+00 : f32
    %436 = vector.broadcast %cst_80 : f32 to vector<6x6xf32>
    %437 = arith.mulf %436, %435 : vector<6x6xf32>
    %438 = vector.broadcast %18 : f32 to vector<6x6xf32>
    %439 = arith.addf %437, %438 : vector<6x6xf32>
    %440 = arith.addf %433, %434 : vector<6x6xf32>
    %441 = vector.broadcast %18 : f32 to vector<6x6xf32>
    %442 = arith.addf %440, %441 : vector<6x6xf32>
    %443 = tpu.reciprocal %442 : vector<6x6xf32> -> vector<6x6xf32>
    %444 = arith.addf %430, %431 : vector<6x6xf32>
    %445 = vector.broadcast %17 : f32 to vector<6x6xf32>
    %446 = arith.addf %444, %445 : vector<6x6xf32>
    %447 = tpu.reciprocal %446 : vector<6x6xf32> -> vector<6x6xf32>
    %448 = arith.mulf %439, %443 : vector<6x6xf32>
    %cst_81 = arith.constant 2.000000e+00 : f32
    %449 = vector.broadcast %cst_81 : f32 to vector<6x6xf32>
    %450 = arith.mulf %449, %432 : vector<6x6xf32>
    %451 = vector.broadcast %17 : f32 to vector<6x6xf32>
    %452 = arith.addf %450, %451 : vector<6x6xf32>
    %453 = arith.mulf %452, %448 : vector<6x6xf32>
    %454 = arith.mulf %453, %447 : vector<6x6xf32>
    %455 = vector.shape_cast %448 : vector<6x6xf32> to vector<1x6x6xf32>
    %cst_82 = arith.constant dense<0.000000e+00> : vector<1xf32>
    %456 = vector.multi_reduction <add>, %455, %cst_82 [1, 2] : vector<1x6x6xf32> to vector<1xf32>
    %457 = vector.shape_cast %456 : vector<1xf32> to vector<1x1x1xf32>
    %458 = vector.extract %457[0, 0, 0] : f32 from vector<1x1x1xf32>
    %459 = arith.addf %417, %458 : f32
    %460 = vector.shape_cast %454 : vector<6x6xf32> to vector<1x6x6xf32>
    %cst_83 = arith.constant dense<0.000000e+00> : vector<1xf32>
    %461 = vector.multi_reduction <add>, %460, %cst_83 [1, 2] : vector<1x6x6xf32> to vector<1xf32>
    %462 = vector.shape_cast %461 : vector<1xf32> to vector<1x1x1xf32>
    %463 = vector.extract %462[0, 0, 0] : f32 from vector<1x1x1xf32>
    %464 = arith.addf %422, %463 : f32
    %465 = vector.extract_strided_slice %295 {offsets = [0, 64], sizes = [40, 16], strides = [1, 1]} : vector<40x96xf32> to vector<40x16xf32>
    %cst_84 = arith.constant dense<0.000000e+00> : vector<40x6xf32>
    %466 = tpu.matmul %465, %296, %cst_84 {dimension_numbers = #tpu.dot_dimension_numbers<[1], [0], [0], [1], [0, 0, 1, 1], [], []>} : vector<40x16xf32>, vector<16x6xf32>, vector<40x6xf32> -> vector<40x6xf32>
    %467 = vector.extract_strided_slice %466 {offsets = [0, 0], sizes = [6, 6], strides = [1, 1]} : vector<40x6xf32> to vector<6x6xf32>
    %468 = vector.extract_strided_slice %466 {offsets = [8, 0], sizes = [6, 6], strides = [1, 1]} : vector<40x6xf32> to vector<6x6xf32>
    %469 = vector.extract_strided_slice %466 {offsets = [16, 0], sizes = [6, 6], strides = [1, 1]} : vector<40x6xf32> to vector<6x6xf32>
    %470 = vector.extract_strided_slice %466 {offsets = [24, 0], sizes = [6, 6], strides = [1, 1]} : vector<40x6xf32> to vector<6x6xf32>
    %471 = vector.extract_strided_slice %466 {offsets = [32, 0], sizes = [6, 6], strides = [1, 1]} : vector<40x6xf32> to vector<6x6xf32>
    %472 = arith.mulf %467, %467 : vector<6x6xf32>
    %473 = arith.mulf %468, %468 : vector<6x6xf32>
    %474 = arith.mulf %467, %468 : vector<6x6xf32>
    %475 = arith.subf %469, %472 : vector<6x6xf32>
    %476 = arith.subf %470, %473 : vector<6x6xf32>
    %477 = arith.subf %471, %474 : vector<6x6xf32>
    %cst_85 = arith.constant 2.000000e+00 : f32
    %478 = vector.broadcast %cst_85 : f32 to vector<6x6xf32>
    %479 = arith.mulf %478, %477 : vector<6x6xf32>
    %480 = vector.broadcast %18 : f32 to vector<6x6xf32>
    %481 = arith.addf %479, %480 : vector<6x6xf32>
    %482 = arith.addf %475, %476 : vector<6x6xf32>
    %483 = vector.broadcast %18 : f32 to vector<6x6xf32>
    %484 = arith.addf %482, %483 : vector<6x6xf32>
    %485 = tpu.reciprocal %484 : vector<6x6xf32> -> vector<6x6xf32>
    %486 = arith.addf %472, %473 : vector<6x6xf32>
    %487 = vector.broadcast %17 : f32 to vector<6x6xf32>
    %488 = arith.addf %486, %487 : vector<6x6xf32>
    %489 = tpu.reciprocal %488 : vector<6x6xf32> -> vector<6x6xf32>
    %490 = arith.mulf %481, %485 : vector<6x6xf32>
    %cst_86 = arith.constant 2.000000e+00 : f32
    %491 = vector.broadcast %cst_86 : f32 to vector<6x6xf32>
    %492 = arith.mulf %491, %474 : vector<6x6xf32>
    %493 = vector.broadcast %17 : f32 to vector<6x6xf32>
    %494 = arith.addf %492, %493 : vector<6x6xf32>
    %495 = arith.mulf %494, %490 : vector<6x6xf32>
    %496 = arith.mulf %495, %489 : vector<6x6xf32>
    %497 = vector.shape_cast %490 : vector<6x6xf32> to vector<1x6x6xf32>
    %cst_87 = arith.constant dense<0.000000e+00> : vector<1xf32>
    %498 = vector.multi_reduction <add>, %497, %cst_87 [1, 2] : vector<1x6x6xf32> to vector<1xf32>
    %499 = vector.shape_cast %498 : vector<1xf32> to vector<1x1x1xf32>
    %500 = vector.extract %499[0, 0, 0] : f32 from vector<1x1x1xf32>
    %501 = arith.addf %459, %500 : f32
    %502 = vector.shape_cast %496 : vector<6x6xf32> to vector<1x6x6xf32>
    %cst_88 = arith.constant dense<0.000000e+00> : vector<1xf32>
    %503 = vector.multi_reduction <add>, %502, %cst_88 [1, 2] : vector<1x6x6xf32> to vector<1xf32>
    %504 = vector.shape_cast %503 : vector<1xf32> to vector<1x1x1xf32>
    %505 = vector.extract %504[0, 0, 0] : f32 from vector<1x1x1xf32>
    %506 = arith.addf %464, %505 : f32
    %507 = vector.extract_strided_slice %295 {offsets = [0, 80], sizes = [40, 16], strides = [1, 1]} : vector<40x96xf32> to vector<40x16xf32>
    %cst_89 = arith.constant dense<0.000000e+00> : vector<40x6xf32>
    %508 = tpu.matmul %507, %296, %cst_89 {dimension_numbers = #tpu.dot_dimension_numbers<[1], [0], [0], [1], [0, 0, 1, 1], [], []>} : vector<40x16xf32>, vector<16x6xf32>, vector<40x6xf32> -> vector<40x6xf32>
    %509 = vector.extract_strided_slice %508 {offsets = [0, 0], sizes = [6, 6], strides = [1, 1]} : vector<40x6xf32> to vector<6x6xf32>
    %510 = vector.extract_strided_slice %508 {offsets = [8, 0], sizes = [6, 6], strides = [1, 1]} : vector<40x6xf32> to vector<6x6xf32>
    %511 = vector.extract_strided_slice %508 {offsets = [16, 0], sizes = [6, 6], strides = [1, 1]} : vector<40x6xf32> to vector<6x6xf32>
    %512 = vector.extract_strided_slice %508 {offsets = [24, 0], sizes = [6, 6], strides = [1, 1]} : vector<40x6xf32> to vector<6x6xf32>
    %513 = vector.extract_strided_slice %508 {offsets = [32, 0], sizes = [6, 6], strides = [1, 1]} : vector<40x6xf32> to vector<6x6xf32>
    %514 = arith.mulf %509, %509 : vector<6x6xf32>
    %515 = arith.mulf %510, %510 : vector<6x6xf32>
    %516 = arith.mulf %509, %510 : vector<6x6xf32>
    %517 = arith.subf %511, %514 : vector<6x6xf32>
    %518 = arith.subf %512, %515 : vector<6x6xf32>
    %519 = arith.subf %513, %516 : vector<6x6xf32>
    %cst_90 = arith.constant 2.000000e+00 : f32
    %520 = vector.broadcast %cst_90 : f32 to vector<6x6xf32>
    %521 = arith.mulf %520, %519 : vector<6x6xf32>
    %522 = vector.broadcast %18 : f32 to vector<6x6xf32>
    %523 = arith.addf %521, %522 : vector<6x6xf32>
    %524 = arith.addf %517, %518 : vector<6x6xf32>
    %525 = vector.broadcast %18 : f32 to vector<6x6xf32>
    %526 = arith.addf %524, %525 : vector<6x6xf32>
    %527 = tpu.reciprocal %526 : vector<6x6xf32> -> vector<6x6xf32>
    %528 = arith.addf %514, %515 : vector<6x6xf32>
    %529 = vector.broadcast %17 : f32 to vector<6x6xf32>
    %530 = arith.addf %528, %529 : vector<6x6xf32>
    %531 = tpu.reciprocal %530 : vector<6x6xf32> -> vector<6x6xf32>
    %532 = arith.mulf %523, %527 : vector<6x6xf32>
    %cst_91 = arith.constant 2.000000e+00 : f32
    %533 = vector.broadcast %cst_91 : f32 to vector<6x6xf32>
    %534 = arith.mulf %533, %516 : vector<6x6xf32>
    %535 = vector.broadcast %17 : f32 to vector<6x6xf32>
    %536 = arith.addf %534, %535 : vector<6x6xf32>
    %537 = arith.mulf %536, %532 : vector<6x6xf32>
    %538 = arith.mulf %537, %531 : vector<6x6xf32>
    %539 = vector.shape_cast %532 : vector<6x6xf32> to vector<1x6x6xf32>
    %cst_92 = arith.constant dense<0.000000e+00> : vector<1xf32>
    %540 = vector.multi_reduction <add>, %539, %cst_92 [1, 2] : vector<1x6x6xf32> to vector<1xf32>
    %541 = vector.shape_cast %540 : vector<1xf32> to vector<1x1x1xf32>
    %542 = vector.extract %541[0, 0, 0] : f32 from vector<1x1x1xf32>
    %543 = arith.addf %501, %542 : f32
    %544 = vector.shape_cast %538 : vector<6x6xf32> to vector<1x6x6xf32>
    %cst_93 = arith.constant dense<0.000000e+00> : vector<1xf32>
    %545 = vector.multi_reduction <add>, %544, %cst_93 [1, 2] : vector<1x6x6xf32> to vector<1xf32>
    %546 = vector.shape_cast %545 : vector<1xf32> to vector<1x1x1xf32>
    %547 = vector.extract %546[0, 0, 0] : f32 from vector<1x1x1xf32>
    %548 = arith.addf %506, %547 : f32
    %cst_94 = arith.constant 0.00462962966 : f32
    %549 = arith.mulf %548, %cst_94 : f32
    %c1 = arith.constant 1 : index
    %550 = memref.load %arg19[%c1] : memref<5xf32, #tpu.memory_space<smem>>
    memref.store %549, %arg19[%c1] : memref<5xf32, #tpu.memory_space<smem>>
    %cst_95 = arith.constant 0.00462962966 : f32
    %551 = arith.mulf %543, %cst_95 : f32
    %c1_96 = arith.constant 1 : index
    %552 = memref.load %arg20[%c1_96] : memref<5xf32, #tpu.memory_space<smem>>
    memref.store %551, %arg20[%c1_96] : memref<5xf32, #tpu.memory_space<smem>>
    %c0_97 = arith.constant 0 : index
    %c0_98 = arith.constant 0 : index
    %553 = vector.load %arg12[%c0_97, %c0_98] : memref<16x32xf32, #tpu.memory_space<vmem>>, vector<16x32xf32>
    %cst_99 = arith.constant dense<0.000000e+00> : vector<16x96xf32>
    %554 = tpu.matmul %553, %287, %cst_99 {dimension_numbers = #tpu.dot_dimension_numbers<[1], [0], [0], [1], [0, 0, 1, 1], [], []>} : vector<16x32xf32>, vector<32x96xf32>, vector<16x96xf32> -> vector<16x96xf32>
    %c0_100 = arith.constant 0 : index
    %c0_101 = arith.constant 0 : index
    %555 = vector.load %arg16[%c0_100, %c0_101] : memref<96x48xf32, #tpu.memory_space<vmem>>, vector<96x48xf32>
    %cst_102 = arith.constant dense<0.000000e+00> : vector<16x48xf32>
    %556 = tpu.matmul %554, %555, %cst_102 {dimension_numbers = #tpu.dot_dimension_numbers<[1], [0], [0], [1], [0, 0, 1, 1], [], []>} : vector<16x96xf32>, vector<96x48xf32>, vector<16x48xf32> -> vector<16x48xf32>
    %557 = vector.extract_strided_slice %556 {offsets = [0, 0], sizes = [8, 48], strides = [1, 1]} : vector<16x48xf32> to vector<8x48xf32>
    %558 = vector.extract_strided_slice %556 {offsets = [8, 0], sizes = [8, 48], strides = [1, 1]} : vector<16x48xf32> to vector<8x48xf32>
    %559 = arith.mulf %557, %557 : vector<8x48xf32>
    %560 = arith.mulf %558, %558 : vector<8x48xf32>
    %561 = arith.mulf %557, %558 : vector<8x48xf32>
    %562 = tpu.concatenate %556, %559, %560, %561 in 0 : vector<16x48xf32>, vector<8x48xf32>, vector<8x48xf32>, vector<8x48xf32> -> vector<40x48xf32>
    %c0_103 = arith.constant 0 : index
    %c0_104 = arith.constant 0 : index
    %563 = vector.load %arg3[%c0_103, %c0_104] : memref<40x40xf32, #tpu.memory_space<vmem>>, vector<40x40xf32>
    %cst_105 = arith.constant dense<0.000000e+00> : vector<40x48xf32>
    %564 = tpu.matmul %563, %562, %cst_105 {dimension_numbers = #tpu.dot_dimension_numbers<[1], [0], [0], [1], [0, 0, 1, 1], [], []>} : vector<40x40xf32>, vector<40x48xf32>, vector<40x48xf32> -> vector<40x48xf32>
    %c0_106 = arith.constant 0 : index
    %c0_107 = arith.constant 0 : index
    %565 = vector.load %arg8[%c0_106, %c0_107] : memref<8x1xf32, #tpu.memory_space<vmem>>, vector<8x1xf32>
    %566 = vector.extract_strided_slice %564 {offsets = [0, 0], sizes = [40, 8], strides = [1, 1]} : vector<40x48xf32> to vector<40x8xf32>
    %cst_108 = arith.constant dense<0.000000e+00> : vector<40x1xf32>
    %567 = tpu.matmul %566, %565, %cst_108 {dimension_numbers = #tpu.dot_dimension_numbers<[1], [0], [0], [1], [0, 0, 1, 1], [], []>} : vector<40x8xf32>, vector<8x1xf32>, vector<40x1xf32> -> vector<40x1xf32>
    %568 = vector.extract_strided_slice %567 {offsets = [0, 0], sizes = [1, 1], strides = [1, 1]} : vector<40x1xf32> to vector<1x1xf32>
    %569 = vector.extract_strided_slice %567 {offsets = [8, 0], sizes = [1, 1], strides = [1, 1]} : vector<40x1xf32> to vector<1x1xf32>
    %570 = vector.extract_strided_slice %567 {offsets = [16, 0], sizes = [1, 1], strides = [1, 1]} : vector<40x1xf32> to vector<1x1xf32>
    %571 = vector.extract_strided_slice %567 {offsets = [24, 0], sizes = [1, 1], strides = [1, 1]} : vector<40x1xf32> to vector<1x1xf32>
    %572 = vector.extract_strided_slice %567 {offsets = [32, 0], sizes = [1, 1], strides = [1, 1]} : vector<40x1xf32> to vector<1x1xf32>
    %573 = arith.mulf %568, %568 : vector<1x1xf32>
    %574 = arith.mulf %569, %569 : vector<1x1xf32>
    %575 = arith.mulf %568, %569 : vector<1x1xf32>
    %576 = arith.subf %570, %573 : vector<1x1xf32>
    %577 = arith.subf %571, %574 : vector<1x1xf32>
    %578 = arith.subf %572, %575 : vector<1x1xf32>
    %cst_109 = arith.constant 2.000000e+00 : f32
    %579 = vector.broadcast %cst_109 : f32 to vector<1x1xf32>
    %580 = arith.mulf %579, %578 : vector<1x1xf32>
    %581 = vector.broadcast %18 : f32 to vector<1x1xf32>
    %582 = arith.addf %580, %581 : vector<1x1xf32>
    %583 = arith.addf %576, %577 : vector<1x1xf32>
    %584 = vector.broadcast %18 : f32 to vector<1x1xf32>
    %585 = arith.addf %583, %584 : vector<1x1xf32>
    %586 = tpu.reciprocal %585 : vector<1x1xf32> -> vector<1x1xf32>
    %587 = arith.addf %573, %574 : vector<1x1xf32>
    %588 = vector.broadcast %17 : f32 to vector<1x1xf32>
    %589 = arith.addf %587, %588 : vector<1x1xf32>
    %590 = tpu.reciprocal %589 : vector<1x1xf32> -> vector<1x1xf32>
    %591 = arith.mulf %582, %586 : vector<1x1xf32>
    %cst_110 = arith.constant 2.000000e+00 : f32
    %592 = vector.broadcast %cst_110 : f32 to vector<1x1xf32>
    %593 = arith.mulf %592, %575 : vector<1x1xf32>
    %594 = vector.broadcast %17 : f32 to vector<1x1xf32>
    %595 = arith.addf %593, %594 : vector<1x1xf32>
    %596 = arith.mulf %595, %591 : vector<1x1xf32>
    %597 = arith.mulf %596, %590 : vector<1x1xf32>
    %598 = vector.shape_cast %591 : vector<1x1xf32> to vector<1x1x1xf32>
    %cst_111 = arith.constant dense<0.000000e+00> : vector<1xf32>
    %599 = vector.multi_reduction <add>, %598, %cst_111 [1, 2] : vector<1x1x1xf32> to vector<1xf32>
    %600 = vector.shape_cast %599 : vector<1xf32> to vector<1x1x1xf32>
    %601 = vector.extract %600[0, 0, 0] : f32 from vector<1x1x1xf32>
    %cst_112 = arith.constant 0.000000e+00 : f32
    %602 = arith.addf %cst_112, %601 : f32
    %603 = vector.shape_cast %597 : vector<1x1xf32> to vector<1x1x1xf32>
    %cst_113 = arith.constant dense<0.000000e+00> : vector<1xf32>
    %604 = vector.multi_reduction <add>, %603, %cst_113 [1, 2] : vector<1x1x1xf32> to vector<1xf32>
    %605 = vector.shape_cast %604 : vector<1xf32> to vector<1x1x1xf32>
    %606 = vector.extract %605[0, 0, 0] : f32 from vector<1x1x1xf32>
    %cst_114 = arith.constant 0.000000e+00 : f32
    %607 = arith.addf %cst_114, %606 : f32
    %608 = vector.extract_strided_slice %564 {offsets = [0, 8], sizes = [40, 8], strides = [1, 1]} : vector<40x48xf32> to vector<40x8xf32>
    %cst_115 = arith.constant dense<0.000000e+00> : vector<40x1xf32>
    %609 = tpu.matmul %608, %565, %cst_115 {dimension_numbers = #tpu.dot_dimension_numbers<[1], [0], [0], [1], [0, 0, 1, 1], [], []>} : vector<40x8xf32>, vector<8x1xf32>, vector<40x1xf32> -> vector<40x1xf32>
    %610 = vector.extract_strided_slice %609 {offsets = [0, 0], sizes = [1, 1], strides = [1, 1]} : vector<40x1xf32> to vector<1x1xf32>
    %611 = vector.extract_strided_slice %609 {offsets = [8, 0], sizes = [1, 1], strides = [1, 1]} : vector<40x1xf32> to vector<1x1xf32>
    %612 = vector.extract_strided_slice %609 {offsets = [16, 0], sizes = [1, 1], strides = [1, 1]} : vector<40x1xf32> to vector<1x1xf32>
    %613 = vector.extract_strided_slice %609 {offsets = [24, 0], sizes = [1, 1], strides = [1, 1]} : vector<40x1xf32> to vector<1x1xf32>
    %614 = vector.extract_strided_slice %609 {offsets = [32, 0], sizes = [1, 1], strides = [1, 1]} : vector<40x1xf32> to vector<1x1xf32>
    %615 = arith.mulf %610, %610 : vector<1x1xf32>
    %616 = arith.mulf %611, %611 : vector<1x1xf32>
    %617 = arith.mulf %610, %611 : vector<1x1xf32>
    %618 = arith.subf %612, %615 : vector<1x1xf32>
    %619 = arith.subf %613, %616 : vector<1x1xf32>
    %620 = arith.subf %614, %617 : vector<1x1xf32>
    %cst_116 = arith.constant 2.000000e+00 : f32
    %621 = vector.broadcast %cst_116 : f32 to vector<1x1xf32>
    %622 = arith.mulf %621, %620 : vector<1x1xf32>
    %623 = vector.broadcast %18 : f32 to vector<1x1xf32>
    %624 = arith.addf %622, %623 : vector<1x1xf32>
    %625 = arith.addf %618, %619 : vector<1x1xf32>
    %626 = vector.broadcast %18 : f32 to vector<1x1xf32>
    %627 = arith.addf %625, %626 : vector<1x1xf32>
    %628 = tpu.reciprocal %627 : vector<1x1xf32> -> vector<1x1xf32>
    %629 = arith.addf %615, %616 : vector<1x1xf32>
    %630 = vector.broadcast %17 : f32 to vector<1x1xf32>
    %631 = arith.addf %629, %630 : vector<1x1xf32>
    %632 = tpu.reciprocal %631 : vector<1x1xf32> -> vector<1x1xf32>
    %633 = arith.mulf %624, %628 : vector<1x1xf32>
    %cst_117 = arith.constant 2.000000e+00 : f32
    %634 = vector.broadcast %cst_117 : f32 to vector<1x1xf32>
    %635 = arith.mulf %634, %617 : vector<1x1xf32>
    %636 = vector.broadcast %17 : f32 to vector<1x1xf32>
    %637 = arith.addf %635, %636 : vector<1x1xf32>
    %638 = arith.mulf %637, %633 : vector<1x1xf32>
    %639 = arith.mulf %638, %632 : vector<1x1xf32>
    %640 = vector.shape_cast %633 : vector<1x1xf32> to vector<1x1x1xf32>
    %cst_118 = arith.constant dense<0.000000e+00> : vector<1xf32>
    %641 = vector.multi_reduction <add>, %640, %cst_118 [1, 2] : vector<1x1x1xf32> to vector<1xf32>
    %642 = vector.shape_cast %641 : vector<1xf32> to vector<1x1x1xf32>
    %643 = vector.extract %642[0, 0, 0] : f32 from vector<1x1x1xf32>
    %644 = arith.addf %602, %643 : f32
    %645 = vector.shape_cast %639 : vector<1x1xf32> to vector<1x1x1xf32>
    %cst_119 = arith.constant dense<0.000000e+00> : vector<1xf32>
    %646 = vector.multi_reduction <add>, %645, %cst_119 [1, 2] : vector<1x1x1xf32> to vector<1xf32>
    %647 = vector.shape_cast %646 : vector<1xf32> to vector<1x1x1xf32>
    %648 = vector.extract %647[0, 0, 0] : f32 from vector<1x1x1xf32>
    %649 = arith.addf %607, %648 : f32
    %650 = vector.extract_strided_slice %564 {offsets = [0, 16], sizes = [40, 8], strides = [1, 1]} : vector<40x48xf32> to vector<40x8xf32>
    %cst_120 = arith.constant dense<0.000000e+00> : vector<40x1xf32>
    %651 = tpu.matmul %650, %565, %cst_120 {dimension_numbers = #tpu.dot_dimension_numbers<[1], [0], [0], [1], [0, 0, 1, 1], [], []>} : vector<40x8xf32>, vector<8x1xf32>, vector<40x1xf32> -> vector<40x1xf32>
    %652 = vector.extract_strided_slice %651 {offsets = [0, 0], sizes = [1, 1], strides = [1, 1]} : vector<40x1xf32> to vector<1x1xf32>
    %653 = vector.extract_strided_slice %651 {offsets = [8, 0], sizes = [1, 1], strides = [1, 1]} : vector<40x1xf32> to vector<1x1xf32>
    %654 = vector.extract_strided_slice %651 {offsets = [16, 0], sizes = [1, 1], strides = [1, 1]} : vector<40x1xf32> to vector<1x1xf32>
    %655 = vector.extract_strided_slice %651 {offsets = [24, 0], sizes = [1, 1], strides = [1, 1]} : vector<40x1xf32> to vector<1x1xf32>
    %656 = vector.extract_strided_slice %651 {offsets = [32, 0], sizes = [1, 1], strides = [1, 1]} : vector<40x1xf32> to vector<1x1xf32>
    %657 = arith.mulf %652, %652 : vector<1x1xf32>
    %658 = arith.mulf %653, %653 : vector<1x1xf32>
    %659 = arith.mulf %652, %653 : vector<1x1xf32>
    %660 = arith.subf %654, %657 : vector<1x1xf32>
    %661 = arith.subf %655, %658 : vector<1x1xf32>
    %662 = arith.subf %656, %659 : vector<1x1xf32>
    %cst_121 = arith.constant 2.000000e+00 : f32
    %663 = vector.broadcast %cst_121 : f32 to vector<1x1xf32>
    %664 = arith.mulf %663, %662 : vector<1x1xf32>
    %665 = vector.broadcast %18 : f32 to vector<1x1xf32>
    %666 = arith.addf %664, %665 : vector<1x1xf32>
    %667 = arith.addf %660, %661 : vector<1x1xf32>
    %668 = vector.broadcast %18 : f32 to vector<1x1xf32>
    %669 = arith.addf %667, %668 : vector<1x1xf32>
    %670 = tpu.reciprocal %669 : vector<1x1xf32> -> vector<1x1xf32>
    %671 = arith.addf %657, %658 : vector<1x1xf32>
    %672 = vector.broadcast %17 : f32 to vector<1x1xf32>
    %673 = arith.addf %671, %672 : vector<1x1xf32>
    %674 = tpu.reciprocal %673 : vector<1x1xf32> -> vector<1x1xf32>
    %675 = arith.mulf %666, %670 : vector<1x1xf32>
    %cst_122 = arith.constant 2.000000e+00 : f32
    %676 = vector.broadcast %cst_122 : f32 to vector<1x1xf32>
    %677 = arith.mulf %676, %659 : vector<1x1xf32>
    %678 = vector.broadcast %17 : f32 to vector<1x1xf32>
    %679 = arith.addf %677, %678 : vector<1x1xf32>
    %680 = arith.mulf %679, %675 : vector<1x1xf32>
    %681 = arith.mulf %680, %674 : vector<1x1xf32>
    %682 = vector.shape_cast %675 : vector<1x1xf32> to vector<1x1x1xf32>
    %cst_123 = arith.constant dense<0.000000e+00> : vector<1xf32>
    %683 = vector.multi_reduction <add>, %682, %cst_123 [1, 2] : vector<1x1x1xf32> to vector<1xf32>
    %684 = vector.shape_cast %683 : vector<1xf32> to vector<1x1x1xf32>
    %685 = vector.extract %684[0, 0, 0] : f32 from vector<1x1x1xf32>
    %686 = arith.addf %644, %685 : f32
    %687 = vector.shape_cast %681 : vector<1x1xf32> to vector<1x1x1xf32>
    %cst_124 = arith.constant dense<0.000000e+00> : vector<1xf32>
    %688 = vector.multi_reduction <add>, %687, %cst_124 [1, 2] : vector<1x1x1xf32> to vector<1xf32>
    %689 = vector.shape_cast %688 : vector<1xf32> to vector<1x1x1xf32>
    %690 = vector.extract %689[0, 0, 0] : f32 from vector<1x1x1xf32>
    %691 = arith.addf %649, %690 : f32
    %692 = vector.extract_strided_slice %564 {offsets = [0, 24], sizes = [40, 8], strides = [1, 1]} : vector<40x48xf32> to vector<40x8xf32>
    %cst_125 = arith.constant dense<0.000000e+00> : vector<40x1xf32>
    %693 = tpu.matmul %692, %565, %cst_125 {dimension_numbers = #tpu.dot_dimension_numbers<[1], [0], [0], [1], [0, 0, 1, 1], [], []>} : vector<40x8xf32>, vector<8x1xf32>, vector<40x1xf32> -> vector<40x1xf32>
    %694 = vector.extract_strided_slice %693 {offsets = [0, 0], sizes = [1, 1], strides = [1, 1]} : vector<40x1xf32> to vector<1x1xf32>
    %695 = vector.extract_strided_slice %693 {offsets = [8, 0], sizes = [1, 1], strides = [1, 1]} : vector<40x1xf32> to vector<1x1xf32>
    %696 = vector.extract_strided_slice %693 {offsets = [16, 0], sizes = [1, 1], strides = [1, 1]} : vector<40x1xf32> to vector<1x1xf32>
    %697 = vector.extract_strided_slice %693 {offsets = [24, 0], sizes = [1, 1], strides = [1, 1]} : vector<40x1xf32> to vector<1x1xf32>
    %698 = vector.extract_strided_slice %693 {offsets = [32, 0], sizes = [1, 1], strides = [1, 1]} : vector<40x1xf32> to vector<1x1xf32>
    %699 = arith.mulf %694, %694 : vector<1x1xf32>
    %700 = arith.mulf %695, %695 : vector<1x1xf32>
    %701 = arith.mulf %694, %695 : vector<1x1xf32>
    %702 = arith.subf %696, %699 : vector<1x1xf32>
    %703 = arith.subf %697, %700 : vector<1x1xf32>
    %704 = arith.subf %698, %701 : vector<1x1xf32>
    %cst_126 = arith.constant 2.000000e+00 : f32
    %705 = vector.broadcast %cst_126 : f32 to vector<1x1xf32>
    %706 = arith.mulf %705, %704 : vector<1x1xf32>
    %707 = vector.broadcast %18 : f32 to vector<1x1xf32>
    %708 = arith.addf %706, %707 : vector<1x1xf32>
    %709 = arith.addf %702, %703 : vector<1x1xf32>
    %710 = vector.broadcast %18 : f32 to vector<1x1xf32>
    %711 = arith.addf %709, %710 : vector<1x1xf32>
    %712 = tpu.reciprocal %711 : vector<1x1xf32> -> vector<1x1xf32>
    %713 = arith.addf %699, %700 : vector<1x1xf32>
    %714 = vector.broadcast %17 : f32 to vector<1x1xf32>
    %715 = arith.addf %713, %714 : vector<1x1xf32>
    %716 = tpu.reciprocal %715 : vector<1x1xf32> -> vector<1x1xf32>
    %717 = arith.mulf %708, %712 : vector<1x1xf32>
    %cst_127 = arith.constant 2.000000e+00 : f32
    %718 = vector.broadcast %cst_127 : f32 to vector<1x1xf32>
    %719 = arith.mulf %718, %701 : vector<1x1xf32>
    %720 = vector.broadcast %17 : f32 to vector<1x1xf32>
    %721 = arith.addf %719, %720 : vector<1x1xf32>
    %722 = arith.mulf %721, %717 : vector<1x1xf32>
    %723 = arith.mulf %722, %716 : vector<1x1xf32>
    %724 = vector.shape_cast %717 : vector<1x1xf32> to vector<1x1x1xf32>
    %cst_128 = arith.constant dense<0.000000e+00> : vector<1xf32>
    %725 = vector.multi_reduction <add>, %724, %cst_128 [1, 2] : vector<1x1x1xf32> to vector<1xf32>
    %726 = vector.shape_cast %725 : vector<1xf32> to vector<1x1x1xf32>
    %727 = vector.extract %726[0, 0, 0] : f32 from vector<1x1x1xf32>
    %728 = arith.addf %686, %727 : f32
    %729 = vector.shape_cast %723 : vector<1x1xf32> to vector<1x1x1xf32>
    %cst_129 = arith.constant dense<0.000000e+00> : vector<1xf32>
    %730 = vector.multi_reduction <add>, %729, %cst_129 [1, 2] : vector<1x1x1xf32> to vector<1xf32>
    %731 = vector.shape_cast %730 : vector<1xf32> to vector<1x1x1xf32>
    %732 = vector.extract %731[0, 0, 0] : f32 from vector<1x1x1xf32>
    %733 = arith.addf %691, %732 : f32
    %734 = vector.extract_strided_slice %564 {offsets = [0, 32], sizes = [40, 8], strides = [1, 1]} : vector<40x48xf32> to vector<40x8xf32>
    %cst_130 = arith.constant dense<0.000000e+00> : vector<40x1xf32>
    %735 = tpu.matmul %734, %565, %cst_130 {dimension_numbers = #tpu.dot_dimension_numbers<[1], [0], [0], [1], [0, 0, 1, 1], [], []>} : vector<40x8xf32>, vector<8x1xf32>, vector<40x1xf32> -> vector<40x1xf32>
    %736 = vector.extract_strided_slice %735 {offsets = [0, 0], sizes = [1, 1], strides = [1, 1]} : vector<40x1xf32> to vector<1x1xf32>
    %737 = vector.extract_strided_slice %735 {offsets = [8, 0], sizes = [1, 1], strides = [1, 1]} : vector<40x1xf32> to vector<1x1xf32>
    %738 = vector.extract_strided_slice %735 {offsets = [16, 0], sizes = [1, 1], strides = [1, 1]} : vector<40x1xf32> to vector<1x1xf32>
    %739 = vector.extract_strided_slice %735 {offsets = [24, 0], sizes = [1, 1], strides = [1, 1]} : vector<40x1xf32> to vector<1x1xf32>
    %740 = vector.extract_strided_slice %735 {offsets = [32, 0], sizes = [1, 1], strides = [1, 1]} : vector<40x1xf32> to vector<1x1xf32>
    %741 = arith.mulf %736, %736 : vector<1x1xf32>
    %742 = arith.mulf %737, %737 : vector<1x1xf32>
    %743 = arith.mulf %736, %737 : vector<1x1xf32>
    %744 = arith.subf %738, %741 : vector<1x1xf32>
    %745 = arith.subf %739, %742 : vector<1x1xf32>
    %746 = arith.subf %740, %743 : vector<1x1xf32>
    %cst_131 = arith.constant 2.000000e+00 : f32
    %747 = vector.broadcast %cst_131 : f32 to vector<1x1xf32>
    %748 = arith.mulf %747, %746 : vector<1x1xf32>
    %749 = vector.broadcast %18 : f32 to vector<1x1xf32>
    %750 = arith.addf %748, %749 : vector<1x1xf32>
    %751 = arith.addf %744, %745 : vector<1x1xf32>
    %752 = vector.broadcast %18 : f32 to vector<1x1xf32>
    %753 = arith.addf %751, %752 : vector<1x1xf32>
    %754 = tpu.reciprocal %753 : vector<1x1xf32> -> vector<1x1xf32>
    %755 = arith.addf %741, %742 : vector<1x1xf32>
    %756 = vector.broadcast %17 : f32 to vector<1x1xf32>
    %757 = arith.addf %755, %756 : vector<1x1xf32>
    %758 = tpu.reciprocal %757 : vector<1x1xf32> -> vector<1x1xf32>
    %759 = arith.mulf %750, %754 : vector<1x1xf32>
    %cst_132 = arith.constant 2.000000e+00 : f32
    %760 = vector.broadcast %cst_132 : f32 to vector<1x1xf32>
    %761 = arith.mulf %760, %743 : vector<1x1xf32>
    %762 = vector.broadcast %17 : f32 to vector<1x1xf32>
    %763 = arith.addf %761, %762 : vector<1x1xf32>
    %764 = arith.mulf %763, %759 : vector<1x1xf32>
    %765 = arith.mulf %764, %758 : vector<1x1xf32>
    %766 = vector.shape_cast %759 : vector<1x1xf32> to vector<1x1x1xf32>
    %cst_133 = arith.constant dense<0.000000e+00> : vector<1xf32>
    %767 = vector.multi_reduction <add>, %766, %cst_133 [1, 2] : vector<1x1x1xf32> to vector<1xf32>
    %768 = vector.shape_cast %767 : vector<1xf32> to vector<1x1x1xf32>
    %769 = vector.extract %768[0, 0, 0] : f32 from vector<1x1x1xf32>
    %770 = arith.addf %728, %769 : f32
    %771 = vector.shape_cast %765 : vector<1x1xf32> to vector<1x1x1xf32>
    %cst_134 = arith.constant dense<0.000000e+00> : vector<1xf32>
    %772 = vector.multi_reduction <add>, %771, %cst_134 [1, 2] : vector<1x1x1xf32> to vector<1xf32>
    %773 = vector.shape_cast %772 : vector<1xf32> to vector<1x1x1xf32>
    %774 = vector.extract %773[0, 0, 0] : f32 from vector<1x1x1xf32>
    %775 = arith.addf %733, %774 : f32
    %776 = vector.extract_strided_slice %564 {offsets = [0, 40], sizes = [40, 8], strides = [1, 1]} : vector<40x48xf32> to vector<40x8xf32>
    %cst_135 = arith.constant dense<0.000000e+00> : vector<40x1xf32>
    %777 = tpu.matmul %776, %565, %cst_135 {dimension_numbers = #tpu.dot_dimension_numbers<[1], [0], [0], [1], [0, 0, 1, 1], [], []>} : vector<40x8xf32>, vector<8x1xf32>, vector<40x1xf32> -> vector<40x1xf32>
    %778 = vector.extract_strided_slice %777 {offsets = [0, 0], sizes = [1, 1], strides = [1, 1]} : vector<40x1xf32> to vector<1x1xf32>
    %779 = vector.extract_strided_slice %777 {offsets = [8, 0], sizes = [1, 1], strides = [1, 1]} : vector<40x1xf32> to vector<1x1xf32>
    %780 = vector.extract_strided_slice %777 {offsets = [16, 0], sizes = [1, 1], strides = [1, 1]} : vector<40x1xf32> to vector<1x1xf32>
    %781 = vector.extract_strided_slice %777 {offsets = [24, 0], sizes = [1, 1], strides = [1, 1]} : vector<40x1xf32> to vector<1x1xf32>
    %782 = vector.extract_strided_slice %777 {offsets = [32, 0], sizes = [1, 1], strides = [1, 1]} : vector<40x1xf32> to vector<1x1xf32>
    %783 = arith.mulf %778, %778 : vector<1x1xf32>
    %784 = arith.mulf %779, %779 : vector<1x1xf32>
    %785 = arith.mulf %778, %779 : vector<1x1xf32>
    %786 = arith.subf %780, %783 : vector<1x1xf32>
    %787 = arith.subf %781, %784 : vector<1x1xf32>
    %788 = arith.subf %782, %785 : vector<1x1xf32>
    %cst_136 = arith.constant 2.000000e+00 : f32
    %789 = vector.broadcast %cst_136 : f32 to vector<1x1xf32>
    %790 = arith.mulf %789, %788 : vector<1x1xf32>
    %791 = vector.broadcast %18 : f32 to vector<1x1xf32>
    %792 = arith.addf %790, %791 : vector<1x1xf32>
    %793 = arith.addf %786, %787 : vector<1x1xf32>
    %794 = vector.broadcast %18 : f32 to vector<1x1xf32>
    %795 = arith.addf %793, %794 : vector<1x1xf32>
    %796 = tpu.reciprocal %795 : vector<1x1xf32> -> vector<1x1xf32>
    %797 = arith.addf %783, %784 : vector<1x1xf32>
    %798 = vector.broadcast %17 : f32 to vector<1x1xf32>
    %799 = arith.addf %797, %798 : vector<1x1xf32>
    %800 = tpu.reciprocal %799 : vector<1x1xf32> -> vector<1x1xf32>
    %801 = arith.mulf %792, %796 : vector<1x1xf32>
    %cst_137 = arith.constant 2.000000e+00 : f32
    %802 = vector.broadcast %cst_137 : f32 to vector<1x1xf32>
    %803 = arith.mulf %802, %785 : vector<1x1xf32>
    %804 = vector.broadcast %17 : f32 to vector<1x1xf32>
    %805 = arith.addf %803, %804 : vector<1x1xf32>
    %806 = arith.mulf %805, %801 : vector<1x1xf32>
    %807 = arith.mulf %806, %800 : vector<1x1xf32>
    %808 = vector.shape_cast %801 : vector<1x1xf32> to vector<1x1x1xf32>
    %cst_138 = arith.constant dense<0.000000e+00> : vector<1xf32>
    %809 = vector.multi_reduction <add>, %808, %cst_138 [1, 2] : vector<1x1x1xf32> to vector<1xf32>
    %810 = vector.shape_cast %809 : vector<1xf32> to vector<1x1x1xf32>
    %811 = vector.extract %810[0, 0, 0] : f32 from vector<1x1x1xf32>
    %812 = arith.addf %770, %811 : f32
    %813 = vector.shape_cast %807 : vector<1x1xf32> to vector<1x1x1xf32>
    %cst_139 = arith.constant dense<0.000000e+00> : vector<1xf32>
    %814 = vector.multi_reduction <add>, %813, %cst_139 [1, 2] : vector<1x1x1xf32> to vector<1xf32>
    %815 = vector.shape_cast %814 : vector<1xf32> to vector<1x1x1xf32>
    %816 = vector.extract %815[0, 0, 0] : f32 from vector<1x1x1xf32>
    %817 = arith.addf %775, %816 : f32
    %cst_140 = arith.constant 0.166666672 : f32
    %818 = arith.mulf %817, %cst_140 : f32
    %c2 = arith.constant 2 : index
    %819 = memref.load %arg19[%c2] : memref<5xf32, #tpu.memory_space<smem>>
    memref.store %818, %arg19[%c2] : memref<5xf32, #tpu.memory_space<smem>>
    %cst_141 = arith.constant 0.166666672 : f32
    %820 = arith.mulf %812, %cst_141 : f32
    %c2_142 = arith.constant 2 : index
    %821 = memref.load %arg20[%c2_142] : memref<5xf32, #tpu.memory_space<smem>>
    memref.store %820, %arg20[%c2_142] : memref<5xf32, #tpu.memory_space<smem>>
    %c0_143 = arith.constant 0 : index
    %c0_144 = arith.constant 0 : index
    %822 = vector.load %arg13[%c0_143, %c0_144] : memref<8x16xf32, #tpu.memory_space<vmem>>, vector<8x16xf32>
    %cst_145 = arith.constant dense<0.000000e+00> : vector<8x48xf32>
    %823 = tpu.matmul %822, %556, %cst_145 {dimension_numbers = #tpu.dot_dimension_numbers<[1], [0], [0], [1], [0, 0, 1, 1], [], []>} : vector<8x16xf32>, vector<16x48xf32>, vector<8x48xf32> -> vector<8x48xf32>
    %c0_146 = arith.constant 0 : index
    %c0_147 = arith.constant 0 : index
    %824 = vector.load %arg17[%c0_146, %c0_147] : memref<48x24xf32, #tpu.memory_space<vmem>>, vector<48x24xf32>
    %cst_148 = arith.constant dense<0.000000e+00> : vector<8x24xf32>
    %825 = tpu.matmul %823, %824, %cst_148 {dimension_numbers = #tpu.dot_dimension_numbers<[1], [0], [0], [1], [0, 0, 1, 1], [], []>} : vector<8x48xf32>, vector<48x24xf32>, vector<8x24xf32> -> vector<8x24xf32>
    %826 = vector.extract_strided_slice %825 {offsets = [0, 0], sizes = [4, 24], strides = [1, 1]} : vector<8x24xf32> to vector<4x24xf32>
    %827 = vector.extract_strided_slice %825 {offsets = [4, 0], sizes = [4, 24], strides = [1, 1]} : vector<8x24xf32> to vector<4x24xf32>
    %828 = arith.mulf %826, %826 : vector<4x24xf32>
    %829 = arith.mulf %827, %827 : vector<4x24xf32>
    %830 = arith.mulf %826, %827 : vector<4x24xf32>
    %831 = tpu.concatenate %825, %828, %829, %830 in 0 : vector<8x24xf32>, vector<4x24xf32>, vector<4x24xf32>, vector<4x24xf32> -> vector<20x24xf32>
    %c0_149 = arith.constant 0 : index
    %c0_150 = arith.constant 0 : index
    %832 = vector.load %arg4[%c0_149, %c0_150] : memref<40x20xf32, #tpu.memory_space<vmem>>, vector<40x20xf32>
    %cst_151 = arith.constant dense<0.000000e+00> : vector<40x24xf32>
    %833 = tpu.matmul %832, %831, %cst_151 {dimension_numbers = #tpu.dot_dimension_numbers<[1], [0], [0], [1], [0, 0, 1, 1], [], []>} : vector<40x20xf32>, vector<20x24xf32>, vector<40x24xf32> -> vector<40x24xf32>
    %c0_152 = arith.constant 0 : index
    %c0_153 = arith.constant 0 : index
    %834 = vector.load %arg9[%c0_152, %c0_153] : memref<4x1xf32, #tpu.memory_space<vmem>>, vector<4x1xf32>
    %835 = vector.extract_strided_slice %833 {offsets = [0, 0], sizes = [40, 4], strides = [1, 1]} : vector<40x24xf32> to vector<40x4xf32>
    %cst_154 = arith.constant dense<0.000000e+00> : vector<40x1xf32>
    %836 = tpu.matmul %835, %834, %cst_154 {dimension_numbers = #tpu.dot_dimension_numbers<[1], [0], [0], [1], [0, 0, 1, 1], [], []>} : vector<40x4xf32>, vector<4x1xf32>, vector<40x1xf32> -> vector<40x1xf32>
    %837 = vector.extract_strided_slice %836 {offsets = [0, 0], sizes = [1, 1], strides = [1, 1]} : vector<40x1xf32> to vector<1x1xf32>
    %838 = vector.extract_strided_slice %836 {offsets = [8, 0], sizes = [1, 1], strides = [1, 1]} : vector<40x1xf32> to vector<1x1xf32>
    %839 = vector.extract_strided_slice %836 {offsets = [16, 0], sizes = [1, 1], strides = [1, 1]} : vector<40x1xf32> to vector<1x1xf32>
    %840 = vector.extract_strided_slice %836 {offsets = [24, 0], sizes = [1, 1], strides = [1, 1]} : vector<40x1xf32> to vector<1x1xf32>
    %841 = vector.extract_strided_slice %836 {offsets = [32, 0], sizes = [1, 1], strides = [1, 1]} : vector<40x1xf32> to vector<1x1xf32>
    %842 = arith.mulf %837, %837 : vector<1x1xf32>
    %843 = arith.mulf %838, %838 : vector<1x1xf32>
    %844 = arith.mulf %837, %838 : vector<1x1xf32>
    %845 = arith.subf %839, %842 : vector<1x1xf32>
    %846 = arith.subf %840, %843 : vector<1x1xf32>
    %847 = arith.subf %841, %844 : vector<1x1xf32>
    %cst_155 = arith.constant 2.000000e+00 : f32
    %848 = vector.broadcast %cst_155 : f32 to vector<1x1xf32>
    %849 = arith.mulf %848, %847 : vector<1x1xf32>
    %850 = vector.broadcast %18 : f32 to vector<1x1xf32>
    %851 = arith.addf %849, %850 : vector<1x1xf32>
    %852 = arith.addf %845, %846 : vector<1x1xf32>
    %853 = vector.broadcast %18 : f32 to vector<1x1xf32>
    %854 = arith.addf %852, %853 : vector<1x1xf32>
    %855 = tpu.reciprocal %854 : vector<1x1xf32> -> vector<1x1xf32>
    %856 = arith.addf %842, %843 : vector<1x1xf32>
    %857 = vector.broadcast %17 : f32 to vector<1x1xf32>
    %858 = arith.addf %856, %857 : vector<1x1xf32>
    %859 = tpu.reciprocal %858 : vector<1x1xf32> -> vector<1x1xf32>
    %860 = arith.mulf %851, %855 : vector<1x1xf32>
    %cst_156 = arith.constant 2.000000e+00 : f32
    %861 = vector.broadcast %cst_156 : f32 to vector<1x1xf32>
    %862 = arith.mulf %861, %844 : vector<1x1xf32>
    %863 = vector.broadcast %17 : f32 to vector<1x1xf32>
    %864 = arith.addf %862, %863 : vector<1x1xf32>
    %865 = arith.mulf %864, %860 : vector<1x1xf32>
    %866 = arith.mulf %865, %859 : vector<1x1xf32>
    %867 = vector.shape_cast %860 : vector<1x1xf32> to vector<1x1x1xf32>
    %cst_157 = arith.constant dense<0.000000e+00> : vector<1xf32>
    %868 = vector.multi_reduction <add>, %867, %cst_157 [1, 2] : vector<1x1x1xf32> to vector<1xf32>
    %869 = vector.shape_cast %868 : vector<1xf32> to vector<1x1x1xf32>
    %870 = vector.extract %869[0, 0, 0] : f32 from vector<1x1x1xf32>
    %cst_158 = arith.constant 0.000000e+00 : f32
    %871 = arith.addf %cst_158, %870 : f32
    %872 = vector.shape_cast %866 : vector<1x1xf32> to vector<1x1x1xf32>
    %cst_159 = arith.constant dense<0.000000e+00> : vector<1xf32>
    %873 = vector.multi_reduction <add>, %872, %cst_159 [1, 2] : vector<1x1x1xf32> to vector<1xf32>
    %874 = vector.shape_cast %873 : vector<1xf32> to vector<1x1x1xf32>
    %875 = vector.extract %874[0, 0, 0] : f32 from vector<1x1x1xf32>
    %cst_160 = arith.constant 0.000000e+00 : f32
    %876 = arith.addf %cst_160, %875 : f32
    %877 = vector.extract_strided_slice %833 {offsets = [0, 4], sizes = [40, 4], strides = [1, 1]} : vector<40x24xf32> to vector<40x4xf32>
    %cst_161 = arith.constant dense<0.000000e+00> : vector<40x1xf32>
    %878 = tpu.matmul %877, %834, %cst_161 {dimension_numbers = #tpu.dot_dimension_numbers<[1], [0], [0], [1], [0, 0, 1, 1], [], []>} : vector<40x4xf32>, vector<4x1xf32>, vector<40x1xf32> -> vector<40x1xf32>
    %879 = vector.extract_strided_slice %878 {offsets = [0, 0], sizes = [1, 1], strides = [1, 1]} : vector<40x1xf32> to vector<1x1xf32>
    %880 = vector.extract_strided_slice %878 {offsets = [8, 0], sizes = [1, 1], strides = [1, 1]} : vector<40x1xf32> to vector<1x1xf32>
    %881 = vector.extract_strided_slice %878 {offsets = [16, 0], sizes = [1, 1], strides = [1, 1]} : vector<40x1xf32> to vector<1x1xf32>
    %882 = vector.extract_strided_slice %878 {offsets = [24, 0], sizes = [1, 1], strides = [1, 1]} : vector<40x1xf32> to vector<1x1xf32>
    %883 = vector.extract_strided_slice %878 {offsets = [32, 0], sizes = [1, 1], strides = [1, 1]} : vector<40x1xf32> to vector<1x1xf32>
    %884 = arith.mulf %879, %879 : vector<1x1xf32>
    %885 = arith.mulf %880, %880 : vector<1x1xf32>
    %886 = arith.mulf %879, %880 : vector<1x1xf32>
    %887 = arith.subf %881, %884 : vector<1x1xf32>
    %888 = arith.subf %882, %885 : vector<1x1xf32>
    %889 = arith.subf %883, %886 : vector<1x1xf32>
    %cst_162 = arith.constant 2.000000e+00 : f32
    %890 = vector.broadcast %cst_162 : f32 to vector<1x1xf32>
    %891 = arith.mulf %890, %889 : vector<1x1xf32>
    %892 = vector.broadcast %18 : f32 to vector<1x1xf32>
    %893 = arith.addf %891, %892 : vector<1x1xf32>
    %894 = arith.addf %887, %888 : vector<1x1xf32>
    %895 = vector.broadcast %18 : f32 to vector<1x1xf32>
    %896 = arith.addf %894, %895 : vector<1x1xf32>
    %897 = tpu.reciprocal %896 : vector<1x1xf32> -> vector<1x1xf32>
    %898 = arith.addf %884, %885 : vector<1x1xf32>
    %899 = vector.broadcast %17 : f32 to vector<1x1xf32>
    %900 = arith.addf %898, %899 : vector<1x1xf32>
    %901 = tpu.reciprocal %900 : vector<1x1xf32> -> vector<1x1xf32>
    %902 = arith.mulf %893, %897 : vector<1x1xf32>
    %cst_163 = arith.constant 2.000000e+00 : f32
    %903 = vector.broadcast %cst_163 : f32 to vector<1x1xf32>
    %904 = arith.mulf %903, %886 : vector<1x1xf32>
    %905 = vector.broadcast %17 : f32 to vector<1x1xf32>
    %906 = arith.addf %904, %905 : vector<1x1xf32>
    %907 = arith.mulf %906, %902 : vector<1x1xf32>
    %908 = arith.mulf %907, %901 : vector<1x1xf32>
    %909 = vector.shape_cast %902 : vector<1x1xf32> to vector<1x1x1xf32>
    %cst_164 = arith.constant dense<0.000000e+00> : vector<1xf32>
    %910 = vector.multi_reduction <add>, %909, %cst_164 [1, 2] : vector<1x1x1xf32> to vector<1xf32>
    %911 = vector.shape_cast %910 : vector<1xf32> to vector<1x1x1xf32>
    %912 = vector.extract %911[0, 0, 0] : f32 from vector<1x1x1xf32>
    %913 = arith.addf %871, %912 : f32
    %914 = vector.shape_cast %908 : vector<1x1xf32> to vector<1x1x1xf32>
    %cst_165 = arith.constant dense<0.000000e+00> : vector<1xf32>
    %915 = vector.multi_reduction <add>, %914, %cst_165 [1, 2] : vector<1x1x1xf32> to vector<1xf32>
    %916 = vector.shape_cast %915 : vector<1xf32> to vector<1x1x1xf32>
    %917 = vector.extract %916[0, 0, 0] : f32 from vector<1x1x1xf32>
    %918 = arith.addf %876, %917 : f32
    %919 = vector.extract_strided_slice %833 {offsets = [0, 8], sizes = [40, 4], strides = [1, 1]} : vector<40x24xf32> to vector<40x4xf32>
    %cst_166 = arith.constant dense<0.000000e+00> : vector<40x1xf32>
    %920 = tpu.matmul %919, %834, %cst_166 {dimension_numbers = #tpu.dot_dimension_numbers<[1], [0], [0], [1], [0, 0, 1, 1], [], []>} : vector<40x4xf32>, vector<4x1xf32>, vector<40x1xf32> -> vector<40x1xf32>
    %921 = vector.extract_strided_slice %920 {offsets = [0, 0], sizes = [1, 1], strides = [1, 1]} : vector<40x1xf32> to vector<1x1xf32>
    %922 = vector.extract_strided_slice %920 {offsets = [8, 0], sizes = [1, 1], strides = [1, 1]} : vector<40x1xf32> to vector<1x1xf32>
    %923 = vector.extract_strided_slice %920 {offsets = [16, 0], sizes = [1, 1], strides = [1, 1]} : vector<40x1xf32> to vector<1x1xf32>
    %924 = vector.extract_strided_slice %920 {offsets = [24, 0], sizes = [1, 1], strides = [1, 1]} : vector<40x1xf32> to vector<1x1xf32>
    %925 = vector.extract_strided_slice %920 {offsets = [32, 0], sizes = [1, 1], strides = [1, 1]} : vector<40x1xf32> to vector<1x1xf32>
    %926 = arith.mulf %921, %921 : vector<1x1xf32>
    %927 = arith.mulf %922, %922 : vector<1x1xf32>
    %928 = arith.mulf %921, %922 : vector<1x1xf32>
    %929 = arith.subf %923, %926 : vector<1x1xf32>
    %930 = arith.subf %924, %927 : vector<1x1xf32>
    %931 = arith.subf %925, %928 : vector<1x1xf32>
    %cst_167 = arith.constant 2.000000e+00 : f32
    %932 = vector.broadcast %cst_167 : f32 to vector<1x1xf32>
    %933 = arith.mulf %932, %931 : vector<1x1xf32>
    %934 = vector.broadcast %18 : f32 to vector<1x1xf32>
    %935 = arith.addf %933, %934 : vector<1x1xf32>
    %936 = arith.addf %929, %930 : vector<1x1xf32>
    %937 = vector.broadcast %18 : f32 to vector<1x1xf32>
    %938 = arith.addf %936, %937 : vector<1x1xf32>
    %939 = tpu.reciprocal %938 : vector<1x1xf32> -> vector<1x1xf32>
    %940 = arith.addf %926, %927 : vector<1x1xf32>
    %941 = vector.broadcast %17 : f32 to vector<1x1xf32>
    %942 = arith.addf %940, %941 : vector<1x1xf32>
    %943 = tpu.reciprocal %942 : vector<1x1xf32> -> vector<1x1xf32>
    %944 = arith.mulf %935, %939 : vector<1x1xf32>
    %cst_168 = arith.constant 2.000000e+00 : f32
    %945 = vector.broadcast %cst_168 : f32 to vector<1x1xf32>
    %946 = arith.mulf %945, %928 : vector<1x1xf32>
    %947 = vector.broadcast %17 : f32 to vector<1x1xf32>
    %948 = arith.addf %946, %947 : vector<1x1xf32>
    %949 = arith.mulf %948, %944 : vector<1x1xf32>
    %950 = arith.mulf %949, %943 : vector<1x1xf32>
    %951 = vector.shape_cast %944 : vector<1x1xf32> to vector<1x1x1xf32>
    %cst_169 = arith.constant dense<0.000000e+00> : vector<1xf32>
    %952 = vector.multi_reduction <add>, %951, %cst_169 [1, 2] : vector<1x1x1xf32> to vector<1xf32>
    %953 = vector.shape_cast %952 : vector<1xf32> to vector<1x1x1xf32>
    %954 = vector.extract %953[0, 0, 0] : f32 from vector<1x1x1xf32>
    %955 = arith.addf %913, %954 : f32
    %956 = vector.shape_cast %950 : vector<1x1xf32> to vector<1x1x1xf32>
    %cst_170 = arith.constant dense<0.000000e+00> : vector<1xf32>
    %957 = vector.multi_reduction <add>, %956, %cst_170 [1, 2] : vector<1x1x1xf32> to vector<1xf32>
    %958 = vector.shape_cast %957 : vector<1xf32> to vector<1x1x1xf32>
    %959 = vector.extract %958[0, 0, 0] : f32 from vector<1x1x1xf32>
    %960 = arith.addf %918, %959 : f32
    %961 = vector.extract_strided_slice %833 {offsets = [0, 12], sizes = [40, 4], strides = [1, 1]} : vector<40x24xf32> to vector<40x4xf32>
    %cst_171 = arith.constant dense<0.000000e+00> : vector<40x1xf32>
    %962 = tpu.matmul %961, %834, %cst_171 {dimension_numbers = #tpu.dot_dimension_numbers<[1], [0], [0], [1], [0, 0, 1, 1], [], []>} : vector<40x4xf32>, vector<4x1xf32>, vector<40x1xf32> -> vector<40x1xf32>
    %963 = vector.extract_strided_slice %962 {offsets = [0, 0], sizes = [1, 1], strides = [1, 1]} : vector<40x1xf32> to vector<1x1xf32>
    %964 = vector.extract_strided_slice %962 {offsets = [8, 0], sizes = [1, 1], strides = [1, 1]} : vector<40x1xf32> to vector<1x1xf32>
    %965 = vector.extract_strided_slice %962 {offsets = [16, 0], sizes = [1, 1], strides = [1, 1]} : vector<40x1xf32> to vector<1x1xf32>
    %966 = vector.extract_strided_slice %962 {offsets = [24, 0], sizes = [1, 1], strides = [1, 1]} : vector<40x1xf32> to vector<1x1xf32>
    %967 = vector.extract_strided_slice %962 {offsets = [32, 0], sizes = [1, 1], strides = [1, 1]} : vector<40x1xf32> to vector<1x1xf32>
    %968 = arith.mulf %963, %963 : vector<1x1xf32>
    %969 = arith.mulf %964, %964 : vector<1x1xf32>
    %970 = arith.mulf %963, %964 : vector<1x1xf32>
    %971 = arith.subf %965, %968 : vector<1x1xf32>
    %972 = arith.subf %966, %969 : vector<1x1xf32>
    %973 = arith.subf %967, %970 : vector<1x1xf32>
    %cst_172 = arith.constant 2.000000e+00 : f32
    %974 = vector.broadcast %cst_172 : f32 to vector<1x1xf32>
    %975 = arith.mulf %974, %973 : vector<1x1xf32>
    %976 = vector.broadcast %18 : f32 to vector<1x1xf32>
    %977 = arith.addf %975, %976 : vector<1x1xf32>
    %978 = arith.addf %971, %972 : vector<1x1xf32>
    %979 = vector.broadcast %18 : f32 to vector<1x1xf32>
    %980 = arith.addf %978, %979 : vector<1x1xf32>
    %981 = tpu.reciprocal %980 : vector<1x1xf32> -> vector<1x1xf32>
    %982 = arith.addf %968, %969 : vector<1x1xf32>
    %983 = vector.broadcast %17 : f32 to vector<1x1xf32>
    %984 = arith.addf %982, %983 : vector<1x1xf32>
    %985 = tpu.reciprocal %984 : vector<1x1xf32> -> vector<1x1xf32>
    %986 = arith.mulf %977, %981 : vector<1x1xf32>
    %cst_173 = arith.constant 2.000000e+00 : f32
    %987 = vector.broadcast %cst_173 : f32 to vector<1x1xf32>
    %988 = arith.mulf %987, %970 : vector<1x1xf32>
    %989 = vector.broadcast %17 : f32 to vector<1x1xf32>
    %990 = arith.addf %988, %989 : vector<1x1xf32>
    %991 = arith.mulf %990, %986 : vector<1x1xf32>
    %992 = arith.mulf %991, %985 : vector<1x1xf32>
    %993 = vector.shape_cast %986 : vector<1x1xf32> to vector<1x1x1xf32>
    %cst_174 = arith.constant dense<0.000000e+00> : vector<1xf32>
    %994 = vector.multi_reduction <add>, %993, %cst_174 [1, 2] : vector<1x1x1xf32> to vector<1xf32>
    %995 = vector.shape_cast %994 : vector<1xf32> to vector<1x1x1xf32>
    %996 = vector.extract %995[0, 0, 0] : f32 from vector<1x1x1xf32>
    %997 = arith.addf %955, %996 : f32
    %998 = vector.shape_cast %992 : vector<1x1xf32> to vector<1x1x1xf32>
    %cst_175 = arith.constant dense<0.000000e+00> : vector<1xf32>
    %999 = vector.multi_reduction <add>, %998, %cst_175 [1, 2] : vector<1x1x1xf32> to vector<1xf32>
    %1000 = vector.shape_cast %999 : vector<1xf32> to vector<1x1x1xf32>
    %1001 = vector.extract %1000[0, 0, 0] : f32 from vector<1x1x1xf32>
    %1002 = arith.addf %960, %1001 : f32
    %1003 = vector.extract_strided_slice %833 {offsets = [0, 16], sizes = [40, 4], strides = [1, 1]} : vector<40x24xf32> to vector<40x4xf32>
    %cst_176 = arith.constant dense<0.000000e+00> : vector<40x1xf32>
    %1004 = tpu.matmul %1003, %834, %cst_176 {dimension_numbers = #tpu.dot_dimension_numbers<[1], [0], [0], [1], [0, 0, 1, 1], [], []>} : vector<40x4xf32>, vector<4x1xf32>, vector<40x1xf32> -> vector<40x1xf32>
    %1005 = vector.extract_strided_slice %1004 {offsets = [0, 0], sizes = [1, 1], strides = [1, 1]} : vector<40x1xf32> to vector<1x1xf32>
    %1006 = vector.extract_strided_slice %1004 {offsets = [8, 0], sizes = [1, 1], strides = [1, 1]} : vector<40x1xf32> to vector<1x1xf32>
    %1007 = vector.extract_strided_slice %1004 {offsets = [16, 0], sizes = [1, 1], strides = [1, 1]} : vector<40x1xf32> to vector<1x1xf32>
    %1008 = vector.extract_strided_slice %1004 {offsets = [24, 0], sizes = [1, 1], strides = [1, 1]} : vector<40x1xf32> to vector<1x1xf32>
    %1009 = vector.extract_strided_slice %1004 {offsets = [32, 0], sizes = [1, 1], strides = [1, 1]} : vector<40x1xf32> to vector<1x1xf32>
    %1010 = arith.mulf %1005, %1005 : vector<1x1xf32>
    %1011 = arith.mulf %1006, %1006 : vector<1x1xf32>
    %1012 = arith.mulf %1005, %1006 : vector<1x1xf32>
    %1013 = arith.subf %1007, %1010 : vector<1x1xf32>
    %1014 = arith.subf %1008, %1011 : vector<1x1xf32>
    %1015 = arith.subf %1009, %1012 : vector<1x1xf32>
    %cst_177 = arith.constant 2.000000e+00 : f32
    %1016 = vector.broadcast %cst_177 : f32 to vector<1x1xf32>
    %1017 = arith.mulf %1016, %1015 : vector<1x1xf32>
    %1018 = vector.broadcast %18 : f32 to vector<1x1xf32>
    %1019 = arith.addf %1017, %1018 : vector<1x1xf32>
    %1020 = arith.addf %1013, %1014 : vector<1x1xf32>
    %1021 = vector.broadcast %18 : f32 to vector<1x1xf32>
    %1022 = arith.addf %1020, %1021 : vector<1x1xf32>
    %1023 = tpu.reciprocal %1022 : vector<1x1xf32> -> vector<1x1xf32>
    %1024 = arith.addf %1010, %1011 : vector<1x1xf32>
    %1025 = vector.broadcast %17 : f32 to vector<1x1xf32>
    %1026 = arith.addf %1024, %1025 : vector<1x1xf32>
    %1027 = tpu.reciprocal %1026 : vector<1x1xf32> -> vector<1x1xf32>
    %1028 = arith.mulf %1019, %1023 : vector<1x1xf32>
    %cst_178 = arith.constant 2.000000e+00 : f32
    %1029 = vector.broadcast %cst_178 : f32 to vector<1x1xf32>
    %1030 = arith.mulf %1029, %1012 : vector<1x1xf32>
    %1031 = vector.broadcast %17 : f32 to vector<1x1xf32>
    %1032 = arith.addf %1030, %1031 : vector<1x1xf32>
    %1033 = arith.mulf %1032, %1028 : vector<1x1xf32>
    %1034 = arith.mulf %1033, %1027 : vector<1x1xf32>
    %1035 = vector.shape_cast %1028 : vector<1x1xf32> to vector<1x1x1xf32>
    %cst_179 = arith.constant dense<0.000000e+00> : vector<1xf32>
    %1036 = vector.multi_reduction <add>, %1035, %cst_179 [1, 2] : vector<1x1x1xf32> to vector<1xf32>
    %1037 = vector.shape_cast %1036 : vector<1xf32> to vector<1x1x1xf32>
    %1038 = vector.extract %1037[0, 0, 0] : f32 from vector<1x1x1xf32>
    %1039 = arith.addf %997, %1038 : f32
    %1040 = vector.shape_cast %1034 : vector<1x1xf32> to vector<1x1x1xf32>
    %cst_180 = arith.constant dense<0.000000e+00> : vector<1xf32>
    %1041 = vector.multi_reduction <add>, %1040, %cst_180 [1, 2] : vector<1x1x1xf32> to vector<1xf32>
    %1042 = vector.shape_cast %1041 : vector<1xf32> to vector<1x1x1xf32>
    %1043 = vector.extract %1042[0, 0, 0] : f32 from vector<1x1x1xf32>
    %1044 = arith.addf %1002, %1043 : f32
    %1045 = vector.extract_strided_slice %833 {offsets = [0, 20], sizes = [40, 4], strides = [1, 1]} : vector<40x24xf32> to vector<40x4xf32>
    %cst_181 = arith.constant dense<0.000000e+00> : vector<40x1xf32>
    %1046 = tpu.matmul %1045, %834, %cst_181 {dimension_numbers = #tpu.dot_dimension_numbers<[1], [0], [0], [1], [0, 0, 1, 1], [], []>} : vector<40x4xf32>, vector<4x1xf32>, vector<40x1xf32> -> vector<40x1xf32>
    %1047 = vector.extract_strided_slice %1046 {offsets = [0, 0], sizes = [1, 1], strides = [1, 1]} : vector<40x1xf32> to vector<1x1xf32>
    %1048 = vector.extract_strided_slice %1046 {offsets = [8, 0], sizes = [1, 1], strides = [1, 1]} : vector<40x1xf32> to vector<1x1xf32>
    %1049 = vector.extract_strided_slice %1046 {offsets = [16, 0], sizes = [1, 1], strides = [1, 1]} : vector<40x1xf32> to vector<1x1xf32>
    %1050 = vector.extract_strided_slice %1046 {offsets = [24, 0], sizes = [1, 1], strides = [1, 1]} : vector<40x1xf32> to vector<1x1xf32>
    %1051 = vector.extract_strided_slice %1046 {offsets = [32, 0], sizes = [1, 1], strides = [1, 1]} : vector<40x1xf32> to vector<1x1xf32>
    %1052 = arith.mulf %1047, %1047 : vector<1x1xf32>
    %1053 = arith.mulf %1048, %1048 : vector<1x1xf32>
    %1054 = arith.mulf %1047, %1048 : vector<1x1xf32>
    %1055 = arith.subf %1049, %1052 : vector<1x1xf32>
    %1056 = arith.subf %1050, %1053 : vector<1x1xf32>
    %1057 = arith.subf %1051, %1054 : vector<1x1xf32>
    %cst_182 = arith.constant 2.000000e+00 : f32
    %1058 = vector.broadcast %cst_182 : f32 to vector<1x1xf32>
    %1059 = arith.mulf %1058, %1057 : vector<1x1xf32>
    %1060 = vector.broadcast %18 : f32 to vector<1x1xf32>
    %1061 = arith.addf %1059, %1060 : vector<1x1xf32>
    %1062 = arith.addf %1055, %1056 : vector<1x1xf32>
    %1063 = vector.broadcast %18 : f32 to vector<1x1xf32>
    %1064 = arith.addf %1062, %1063 : vector<1x1xf32>
    %1065 = tpu.reciprocal %1064 : vector<1x1xf32> -> vector<1x1xf32>
    %1066 = arith.addf %1052, %1053 : vector<1x1xf32>
    %1067 = vector.broadcast %17 : f32 to vector<1x1xf32>
    %1068 = arith.addf %1066, %1067 : vector<1x1xf32>
    %1069 = tpu.reciprocal %1068 : vector<1x1xf32> -> vector<1x1xf32>
    %1070 = arith.mulf %1061, %1065 : vector<1x1xf32>
    %cst_183 = arith.constant 2.000000e+00 : f32
    %1071 = vector.broadcast %cst_183 : f32 to vector<1x1xf32>
    %1072 = arith.mulf %1071, %1054 : vector<1x1xf32>
    %1073 = vector.broadcast %17 : f32 to vector<1x1xf32>
    %1074 = arith.addf %1072, %1073 : vector<1x1xf32>
    %1075 = arith.mulf %1074, %1070 : vector<1x1xf32>
    %1076 = arith.mulf %1075, %1069 : vector<1x1xf32>
    %1077 = vector.shape_cast %1070 : vector<1x1xf32> to vector<1x1x1xf32>
    %cst_184 = arith.constant dense<0.000000e+00> : vector<1xf32>
    %1078 = vector.multi_reduction <add>, %1077, %cst_184 [1, 2] : vector<1x1x1xf32> to vector<1xf32>
    %1079 = vector.shape_cast %1078 : vector<1xf32> to vector<1x1x1xf32>
    %1080 = vector.extract %1079[0, 0, 0] : f32 from vector<1x1x1xf32>
    %1081 = arith.addf %1039, %1080 : f32
    %1082 = vector.shape_cast %1076 : vector<1x1xf32> to vector<1x1x1xf32>
    %cst_185 = arith.constant dense<0.000000e+00> : vector<1xf32>
    %1083 = vector.multi_reduction <add>, %1082, %cst_185 [1, 2] : vector<1x1x1xf32> to vector<1xf32>
    %1084 = vector.shape_cast %1083 : vector<1xf32> to vector<1x1x1xf32>
    %1085 = vector.extract %1084[0, 0, 0] : f32 from vector<1x1x1xf32>
    %1086 = arith.addf %1044, %1085 : f32
    %cst_186 = arith.constant 0.166666672 : f32
    %1087 = arith.mulf %1086, %cst_186 : f32
    %c3 = arith.constant 3 : index
    %1088 = memref.load %arg19[%c3] : memref<5xf32, #tpu.memory_space<smem>>
    memref.store %1087, %arg19[%c3] : memref<5xf32, #tpu.memory_space<smem>>
    %cst_187 = arith.constant 0.166666672 : f32
    %1089 = arith.mulf %1081, %cst_187 : f32
    %c3_188 = arith.constant 3 : index
    %1090 = memref.load %arg20[%c3_188] : memref<5xf32, #tpu.memory_space<smem>>
    memref.store %1089, %arg20[%c3_188] : memref<5xf32, #tpu.memory_space<smem>>
    %c0_189 = arith.constant 0 : index
    %c0_190 = arith.constant 0 : index
    %1091 = vector.load %arg14[%c0_189, %c0_190] : memref<4x8xf32, #tpu.memory_space<vmem>>, vector<4x8xf32>
    %cst_191 = arith.constant dense<0.000000e+00> : vector<4x24xf32>
    %1092 = tpu.matmul %1091, %825, %cst_191 {dimension_numbers = #tpu.dot_dimension_numbers<[1], [0], [0], [1], [0, 0, 1, 1], [], []>} : vector<4x8xf32>, vector<8x24xf32>, vector<4x24xf32> -> vector<4x24xf32>
    %c0_192 = arith.constant 0 : index
    %c0_193 = arith.constant 0 : index
    %1093 = vector.load %arg18[%c0_192, %c0_193] : memref<24x12xf32, #tpu.memory_space<vmem>>, vector<24x12xf32>
    %cst_194 = arith.constant dense<0.000000e+00> : vector<4x12xf32>
    %1094 = tpu.matmul %1092, %1093, %cst_194 {dimension_numbers = #tpu.dot_dimension_numbers<[1], [0], [0], [1], [0, 0, 1, 1], [], []>} : vector<4x24xf32>, vector<24x12xf32>, vector<4x12xf32> -> vector<4x12xf32>
    %1095 = vector.extract_strided_slice %1094 {offsets = [0, 0], sizes = [2, 12], strides = [1, 1]} : vector<4x12xf32> to vector<2x12xf32>
    %1096 = vector.extract_strided_slice %1094 {offsets = [2, 0], sizes = [2, 12], strides = [1, 1]} : vector<4x12xf32> to vector<2x12xf32>
    %1097 = arith.mulf %1095, %1095 : vector<2x12xf32>
    %1098 = arith.mulf %1096, %1096 : vector<2x12xf32>
    %1099 = arith.mulf %1095, %1096 : vector<2x12xf32>
    %1100 = tpu.concatenate %1094, %1097, %1098, %1099 in 0 : vector<4x12xf32>, vector<2x12xf32>, vector<2x12xf32>, vector<2x12xf32> -> vector<10x12xf32>
    %c0_195 = arith.constant 0 : index
    %c0_196 = arith.constant 0 : index
    %1101 = vector.load %arg5[%c0_195, %c0_196] : memref<40x10xf32, #tpu.memory_space<vmem>>, vector<40x10xf32>
    %cst_197 = arith.constant dense<0.000000e+00> : vector<40x12xf32>
    %1102 = tpu.matmul %1101, %1100, %cst_197 {dimension_numbers = #tpu.dot_dimension_numbers<[1], [0], [0], [1], [0, 0, 1, 1], [], []>} : vector<40x10xf32>, vector<10x12xf32>, vector<40x12xf32> -> vector<40x12xf32>
    %c0_198 = arith.constant 0 : index
    %c0_199 = arith.constant 0 : index
    %1103 = vector.load %arg10[%c0_198, %c0_199] : memref<2x1xf32, #tpu.memory_space<vmem>>, vector<2x1xf32>
    %1104 = vector.extract_strided_slice %1102 {offsets = [0, 0], sizes = [40, 2], strides = [1, 1]} : vector<40x12xf32> to vector<40x2xf32>
    %cst_200 = arith.constant dense<0.000000e+00> : vector<40x1xf32>
    %1105 = tpu.matmul %1104, %1103, %cst_200 {dimension_numbers = #tpu.dot_dimension_numbers<[1], [0], [0], [1], [0, 0, 1, 1], [], []>} : vector<40x2xf32>, vector<2x1xf32>, vector<40x1xf32> -> vector<40x1xf32>
    %1106 = vector.extract_strided_slice %1105 {offsets = [0, 0], sizes = [1, 1], strides = [1, 1]} : vector<40x1xf32> to vector<1x1xf32>
    %1107 = vector.extract_strided_slice %1105 {offsets = [8, 0], sizes = [1, 1], strides = [1, 1]} : vector<40x1xf32> to vector<1x1xf32>
    %1108 = vector.extract_strided_slice %1105 {offsets = [16, 0], sizes = [1, 1], strides = [1, 1]} : vector<40x1xf32> to vector<1x1xf32>
    %1109 = vector.extract_strided_slice %1105 {offsets = [24, 0], sizes = [1, 1], strides = [1, 1]} : vector<40x1xf32> to vector<1x1xf32>
    %1110 = vector.extract_strided_slice %1105 {offsets = [32, 0], sizes = [1, 1], strides = [1, 1]} : vector<40x1xf32> to vector<1x1xf32>
    %1111 = arith.mulf %1106, %1106 : vector<1x1xf32>
    %1112 = arith.mulf %1107, %1107 : vector<1x1xf32>
    %1113 = arith.mulf %1106, %1107 : vector<1x1xf32>
    %1114 = arith.subf %1108, %1111 : vector<1x1xf32>
    %1115 = arith.subf %1109, %1112 : vector<1x1xf32>
    %1116 = arith.subf %1110, %1113 : vector<1x1xf32>
    %cst_201 = arith.constant 2.000000e+00 : f32
    %1117 = vector.broadcast %cst_201 : f32 to vector<1x1xf32>
    %1118 = arith.mulf %1117, %1116 : vector<1x1xf32>
    %1119 = vector.broadcast %18 : f32 to vector<1x1xf32>
    %1120 = arith.addf %1118, %1119 : vector<1x1xf32>
    %1121 = arith.addf %1114, %1115 : vector<1x1xf32>
    %1122 = vector.broadcast %18 : f32 to vector<1x1xf32>
    %1123 = arith.addf %1121, %1122 : vector<1x1xf32>
    %1124 = tpu.reciprocal %1123 : vector<1x1xf32> -> vector<1x1xf32>
    %1125 = arith.addf %1111, %1112 : vector<1x1xf32>
    %1126 = vector.broadcast %17 : f32 to vector<1x1xf32>
    %1127 = arith.addf %1125, %1126 : vector<1x1xf32>
    %1128 = tpu.reciprocal %1127 : vector<1x1xf32> -> vector<1x1xf32>
    %1129 = arith.mulf %1120, %1124 : vector<1x1xf32>
    %cst_202 = arith.constant 2.000000e+00 : f32
    %1130 = vector.broadcast %cst_202 : f32 to vector<1x1xf32>
    %1131 = arith.mulf %1130, %1113 : vector<1x1xf32>
    %1132 = vector.broadcast %17 : f32 to vector<1x1xf32>
    %1133 = arith.addf %1131, %1132 : vector<1x1xf32>
    %1134 = arith.mulf %1133, %1129 : vector<1x1xf32>
    %1135 = arith.mulf %1134, %1128 : vector<1x1xf32>
    %1136 = vector.shape_cast %1129 : vector<1x1xf32> to vector<1x1x1xf32>
    %cst_203 = arith.constant dense<0.000000e+00> : vector<1xf32>
    %1137 = vector.multi_reduction <add>, %1136, %cst_203 [1, 2] : vector<1x1x1xf32> to vector<1xf32>
    %1138 = vector.shape_cast %1137 : vector<1xf32> to vector<1x1x1xf32>
    %1139 = vector.extract %1138[0, 0, 0] : f32 from vector<1x1x1xf32>
    %cst_204 = arith.constant 0.000000e+00 : f32
    %1140 = arith.addf %cst_204, %1139 : f32
    %1141 = vector.shape_cast %1135 : vector<1x1xf32> to vector<1x1x1xf32>
    %cst_205 = arith.constant dense<0.000000e+00> : vector<1xf32>
    %1142 = vector.multi_reduction <add>, %1141, %cst_205 [1, 2] : vector<1x1x1xf32> to vector<1xf32>
    %1143 = vector.shape_cast %1142 : vector<1xf32> to vector<1x1x1xf32>
    %1144 = vector.extract %1143[0, 0, 0] : f32 from vector<1x1x1xf32>
    %cst_206 = arith.constant 0.000000e+00 : f32
    %1145 = arith.addf %cst_206, %1144 : f32
    %1146 = vector.extract_strided_slice %1102 {offsets = [0, 2], sizes = [40, 2], strides = [1, 1]} : vector<40x12xf32> to vector<40x2xf32>
    %cst_207 = arith.constant dense<0.000000e+00> : vector<40x1xf32>
    %1147 = tpu.matmul %1146, %1103, %cst_207 {dimension_numbers = #tpu.dot_dimension_numbers<[1], [0], [0], [1], [0, 0, 1, 1], [], []>} : vector<40x2xf32>, vector<2x1xf32>, vector<40x1xf32> -> vector<40x1xf32>
    %1148 = vector.extract_strided_slice %1147 {offsets = [0, 0], sizes = [1, 1], strides = [1, 1]} : vector<40x1xf32> to vector<1x1xf32>
    %1149 = vector.extract_strided_slice %1147 {offsets = [8, 0], sizes = [1, 1], strides = [1, 1]} : vector<40x1xf32> to vector<1x1xf32>
    %1150 = vector.extract_strided_slice %1147 {offsets = [16, 0], sizes = [1, 1], strides = [1, 1]} : vector<40x1xf32> to vector<1x1xf32>
    %1151 = vector.extract_strided_slice %1147 {offsets = [24, 0], sizes = [1, 1], strides = [1, 1]} : vector<40x1xf32> to vector<1x1xf32>
    %1152 = vector.extract_strided_slice %1147 {offsets = [32, 0], sizes = [1, 1], strides = [1, 1]} : vector<40x1xf32> to vector<1x1xf32>
    %1153 = arith.mulf %1148, %1148 : vector<1x1xf32>
    %1154 = arith.mulf %1149, %1149 : vector<1x1xf32>
    %1155 = arith.mulf %1148, %1149 : vector<1x1xf32>
    %1156 = arith.subf %1150, %1153 : vector<1x1xf32>
    %1157 = arith.subf %1151, %1154 : vector<1x1xf32>
    %1158 = arith.subf %1152, %1155 : vector<1x1xf32>
    %cst_208 = arith.constant 2.000000e+00 : f32
    %1159 = vector.broadcast %cst_208 : f32 to vector<1x1xf32>
    %1160 = arith.mulf %1159, %1158 : vector<1x1xf32>
    %1161 = vector.broadcast %18 : f32 to vector<1x1xf32>
    %1162 = arith.addf %1160, %1161 : vector<1x1xf32>
    %1163 = arith.addf %1156, %1157 : vector<1x1xf32>
    %1164 = vector.broadcast %18 : f32 to vector<1x1xf32>
    %1165 = arith.addf %1163, %1164 : vector<1x1xf32>
    %1166 = tpu.reciprocal %1165 : vector<1x1xf32> -> vector<1x1xf32>
    %1167 = arith.addf %1153, %1154 : vector<1x1xf32>
    %1168 = vector.broadcast %17 : f32 to vector<1x1xf32>
    %1169 = arith.addf %1167, %1168 : vector<1x1xf32>
    %1170 = tpu.reciprocal %1169 : vector<1x1xf32> -> vector<1x1xf32>
    %1171 = arith.mulf %1162, %1166 : vector<1x1xf32>
    %cst_209 = arith.constant 2.000000e+00 : f32
    %1172 = vector.broadcast %cst_209 : f32 to vector<1x1xf32>
    %1173 = arith.mulf %1172, %1155 : vector<1x1xf32>
    %1174 = vector.broadcast %17 : f32 to vector<1x1xf32>
    %1175 = arith.addf %1173, %1174 : vector<1x1xf32>
    %1176 = arith.mulf %1175, %1171 : vector<1x1xf32>
    %1177 = arith.mulf %1176, %1170 : vector<1x1xf32>
    %1178 = vector.shape_cast %1171 : vector<1x1xf32> to vector<1x1x1xf32>
    %cst_210 = arith.constant dense<0.000000e+00> : vector<1xf32>
    %1179 = vector.multi_reduction <add>, %1178, %cst_210 [1, 2] : vector<1x1x1xf32> to vector<1xf32>
    %1180 = vector.shape_cast %1179 : vector<1xf32> to vector<1x1x1xf32>
    %1181 = vector.extract %1180[0, 0, 0] : f32 from vector<1x1x1xf32>
    %1182 = arith.addf %1140, %1181 : f32
    %1183 = vector.shape_cast %1177 : vector<1x1xf32> to vector<1x1x1xf32>
    %cst_211 = arith.constant dense<0.000000e+00> : vector<1xf32>
    %1184 = vector.multi_reduction <add>, %1183, %cst_211 [1, 2] : vector<1x1x1xf32> to vector<1xf32>
    %1185 = vector.shape_cast %1184 : vector<1xf32> to vector<1x1x1xf32>
    %1186 = vector.extract %1185[0, 0, 0] : f32 from vector<1x1x1xf32>
    %1187 = arith.addf %1145, %1186 : f32
    %1188 = vector.extract_strided_slice %1102 {offsets = [0, 4], sizes = [40, 2], strides = [1, 1]} : vector<40x12xf32> to vector<40x2xf32>
    %cst_212 = arith.constant dense<0.000000e+00> : vector<40x1xf32>
    %1189 = tpu.matmul %1188, %1103, %cst_212 {dimension_numbers = #tpu.dot_dimension_numbers<[1], [0], [0], [1], [0, 0, 1, 1], [], []>} : vector<40x2xf32>, vector<2x1xf32>, vector<40x1xf32> -> vector<40x1xf32>
    %1190 = vector.extract_strided_slice %1189 {offsets = [0, 0], sizes = [1, 1], strides = [1, 1]} : vector<40x1xf32> to vector<1x1xf32>
    %1191 = vector.extract_strided_slice %1189 {offsets = [8, 0], sizes = [1, 1], strides = [1, 1]} : vector<40x1xf32> to vector<1x1xf32>
    %1192 = vector.extract_strided_slice %1189 {offsets = [16, 0], sizes = [1, 1], strides = [1, 1]} : vector<40x1xf32> to vector<1x1xf32>
    %1193 = vector.extract_strided_slice %1189 {offsets = [24, 0], sizes = [1, 1], strides = [1, 1]} : vector<40x1xf32> to vector<1x1xf32>
    %1194 = vector.extract_strided_slice %1189 {offsets = [32, 0], sizes = [1, 1], strides = [1, 1]} : vector<40x1xf32> to vector<1x1xf32>
    %1195 = arith.mulf %1190, %1190 : vector<1x1xf32>
    %1196 = arith.mulf %1191, %1191 : vector<1x1xf32>
    %1197 = arith.mulf %1190, %1191 : vector<1x1xf32>
    %1198 = arith.subf %1192, %1195 : vector<1x1xf32>
    %1199 = arith.subf %1193, %1196 : vector<1x1xf32>
    %1200 = arith.subf %1194, %1197 : vector<1x1xf32>
    %cst_213 = arith.constant 2.000000e+00 : f32
    %1201 = vector.broadcast %cst_213 : f32 to vector<1x1xf32>
    %1202 = arith.mulf %1201, %1200 : vector<1x1xf32>
    %1203 = vector.broadcast %18 : f32 to vector<1x1xf32>
    %1204 = arith.addf %1202, %1203 : vector<1x1xf32>
    %1205 = arith.addf %1198, %1199 : vector<1x1xf32>
    %1206 = vector.broadcast %18 : f32 to vector<1x1xf32>
    %1207 = arith.addf %1205, %1206 : vector<1x1xf32>
    %1208 = tpu.reciprocal %1207 : vector<1x1xf32> -> vector<1x1xf32>
    %1209 = arith.addf %1195, %1196 : vector<1x1xf32>
    %1210 = vector.broadcast %17 : f32 to vector<1x1xf32>
    %1211 = arith.addf %1209, %1210 : vector<1x1xf32>
    %1212 = tpu.reciprocal %1211 : vector<1x1xf32> -> vector<1x1xf32>
    %1213 = arith.mulf %1204, %1208 : vector<1x1xf32>
    %cst_214 = arith.constant 2.000000e+00 : f32
    %1214 = vector.broadcast %cst_214 : f32 to vector<1x1xf32>
    %1215 = arith.mulf %1214, %1197 : vector<1x1xf32>
    %1216 = vector.broadcast %17 : f32 to vector<1x1xf32>
    %1217 = arith.addf %1215, %1216 : vector<1x1xf32>
    %1218 = arith.mulf %1217, %1213 : vector<1x1xf32>
    %1219 = arith.mulf %1218, %1212 : vector<1x1xf32>
    %1220 = vector.shape_cast %1213 : vector<1x1xf32> to vector<1x1x1xf32>
    %cst_215 = arith.constant dense<0.000000e+00> : vector<1xf32>
    %1221 = vector.multi_reduction <add>, %1220, %cst_215 [1, 2] : vector<1x1x1xf32> to vector<1xf32>
    %1222 = vector.shape_cast %1221 : vector<1xf32> to vector<1x1x1xf32>
    %1223 = vector.extract %1222[0, 0, 0] : f32 from vector<1x1x1xf32>
    %1224 = arith.addf %1182, %1223 : f32
    %1225 = vector.shape_cast %1219 : vector<1x1xf32> to vector<1x1x1xf32>
    %cst_216 = arith.constant dense<0.000000e+00> : vector<1xf32>
    %1226 = vector.multi_reduction <add>, %1225, %cst_216 [1, 2] : vector<1x1x1xf32> to vector<1xf32>
    %1227 = vector.shape_cast %1226 : vector<1xf32> to vector<1x1x1xf32>
    %1228 = vector.extract %1227[0, 0, 0] : f32 from vector<1x1x1xf32>
    %1229 = arith.addf %1187, %1228 : f32
    %1230 = vector.extract_strided_slice %1102 {offsets = [0, 6], sizes = [40, 2], strides = [1, 1]} : vector<40x12xf32> to vector<40x2xf32>
    %cst_217 = arith.constant dense<0.000000e+00> : vector<40x1xf32>
    %1231 = tpu.matmul %1230, %1103, %cst_217 {dimension_numbers = #tpu.dot_dimension_numbers<[1], [0], [0], [1], [0, 0, 1, 1], [], []>} : vector<40x2xf32>, vector<2x1xf32>, vector<40x1xf32> -> vector<40x1xf32>
    %1232 = vector.extract_strided_slice %1231 {offsets = [0, 0], sizes = [1, 1], strides = [1, 1]} : vector<40x1xf32> to vector<1x1xf32>
    %1233 = vector.extract_strided_slice %1231 {offsets = [8, 0], sizes = [1, 1], strides = [1, 1]} : vector<40x1xf32> to vector<1x1xf32>
    %1234 = vector.extract_strided_slice %1231 {offsets = [16, 0], sizes = [1, 1], strides = [1, 1]} : vector<40x1xf32> to vector<1x1xf32>
    %1235 = vector.extract_strided_slice %1231 {offsets = [24, 0], sizes = [1, 1], strides = [1, 1]} : vector<40x1xf32> to vector<1x1xf32>
    %1236 = vector.extract_strided_slice %1231 {offsets = [32, 0], sizes = [1, 1], strides = [1, 1]} : vector<40x1xf32> to vector<1x1xf32>
    %1237 = arith.mulf %1232, %1232 : vector<1x1xf32>
    %1238 = arith.mulf %1233, %1233 : vector<1x1xf32>
    %1239 = arith.mulf %1232, %1233 : vector<1x1xf32>
    %1240 = arith.subf %1234, %1237 : vector<1x1xf32>
    %1241 = arith.subf %1235, %1238 : vector<1x1xf32>
    %1242 = arith.subf %1236, %1239 : vector<1x1xf32>
    %cst_218 = arith.constant 2.000000e+00 : f32
    %1243 = vector.broadcast %cst_218 : f32 to vector<1x1xf32>
    %1244 = arith.mulf %1243, %1242 : vector<1x1xf32>
    %1245 = vector.broadcast %18 : f32 to vector<1x1xf32>
    %1246 = arith.addf %1244, %1245 : vector<1x1xf32>
    %1247 = arith.addf %1240, %1241 : vector<1x1xf32>
    %1248 = vector.broadcast %18 : f32 to vector<1x1xf32>
    %1249 = arith.addf %1247, %1248 : vector<1x1xf32>
    %1250 = tpu.reciprocal %1249 : vector<1x1xf32> -> vector<1x1xf32>
    %1251 = arith.addf %1237, %1238 : vector<1x1xf32>
    %1252 = vector.broadcast %17 : f32 to vector<1x1xf32>
    %1253 = arith.addf %1251, %1252 : vector<1x1xf32>
    %1254 = tpu.reciprocal %1253 : vector<1x1xf32> -> vector<1x1xf32>
    %1255 = arith.mulf %1246, %1250 : vector<1x1xf32>
    %cst_219 = arith.constant 2.000000e+00 : f32
    %1256 = vector.broadcast %cst_219 : f32 to vector<1x1xf32>
    %1257 = arith.mulf %1256, %1239 : vector<1x1xf32>
    %1258 = vector.broadcast %17 : f32 to vector<1x1xf32>
    %1259 = arith.addf %1257, %1258 : vector<1x1xf32>
    %1260 = arith.mulf %1259, %1255 : vector<1x1xf32>
    %1261 = arith.mulf %1260, %1254 : vector<1x1xf32>
    %1262 = vector.shape_cast %1255 : vector<1x1xf32> to vector<1x1x1xf32>
    %cst_220 = arith.constant dense<0.000000e+00> : vector<1xf32>
    %1263 = vector.multi_reduction <add>, %1262, %cst_220 [1, 2] : vector<1x1x1xf32> to vector<1xf32>
    %1264 = vector.shape_cast %1263 : vector<1xf32> to vector<1x1x1xf32>
    %1265 = vector.extract %1264[0, 0, 0] : f32 from vector<1x1x1xf32>
    %1266 = arith.addf %1224, %1265 : f32
    %1267 = vector.shape_cast %1261 : vector<1x1xf32> to vector<1x1x1xf32>
    %cst_221 = arith.constant dense<0.000000e+00> : vector<1xf32>
    %1268 = vector.multi_reduction <add>, %1267, %cst_221 [1, 2] : vector<1x1x1xf32> to vector<1xf32>
    %1269 = vector.shape_cast %1268 : vector<1xf32> to vector<1x1x1xf32>
    %1270 = vector.extract %1269[0, 0, 0] : f32 from vector<1x1x1xf32>
    %1271 = arith.addf %1229, %1270 : f32
    %1272 = vector.extract_strided_slice %1102 {offsets = [0, 8], sizes = [40, 2], strides = [1, 1]} : vector<40x12xf32> to vector<40x2xf32>
    %cst_222 = arith.constant dense<0.000000e+00> : vector<40x1xf32>
    %1273 = tpu.matmul %1272, %1103, %cst_222 {dimension_numbers = #tpu.dot_dimension_numbers<[1], [0], [0], [1], [0, 0, 1, 1], [], []>} : vector<40x2xf32>, vector<2x1xf32>, vector<40x1xf32> -> vector<40x1xf32>
    %1274 = vector.extract_strided_slice %1273 {offsets = [0, 0], sizes = [1, 1], strides = [1, 1]} : vector<40x1xf32> to vector<1x1xf32>
    %1275 = vector.extract_strided_slice %1273 {offsets = [8, 0], sizes = [1, 1], strides = [1, 1]} : vector<40x1xf32> to vector<1x1xf32>
    %1276 = vector.extract_strided_slice %1273 {offsets = [16, 0], sizes = [1, 1], strides = [1, 1]} : vector<40x1xf32> to vector<1x1xf32>
    %1277 = vector.extract_strided_slice %1273 {offsets = [24, 0], sizes = [1, 1], strides = [1, 1]} : vector<40x1xf32> to vector<1x1xf32>
    %1278 = vector.extract_strided_slice %1273 {offsets = [32, 0], sizes = [1, 1], strides = [1, 1]} : vector<40x1xf32> to vector<1x1xf32>
    %1279 = arith.mulf %1274, %1274 : vector<1x1xf32>
    %1280 = arith.mulf %1275, %1275 : vector<1x1xf32>
    %1281 = arith.mulf %1274, %1275 : vector<1x1xf32>
    %1282 = arith.subf %1276, %1279 : vector<1x1xf32>
    %1283 = arith.subf %1277, %1280 : vector<1x1xf32>
    %1284 = arith.subf %1278, %1281 : vector<1x1xf32>
    %cst_223 = arith.constant 2.000000e+00 : f32
    %1285 = vector.broadcast %cst_223 : f32 to vector<1x1xf32>
    %1286 = arith.mulf %1285, %1284 : vector<1x1xf32>
    %1287 = vector.broadcast %18 : f32 to vector<1x1xf32>
    %1288 = arith.addf %1286, %1287 : vector<1x1xf32>
    %1289 = arith.addf %1282, %1283 : vector<1x1xf32>
    %1290 = vector.broadcast %18 : f32 to vector<1x1xf32>
    %1291 = arith.addf %1289, %1290 : vector<1x1xf32>
    %1292 = tpu.reciprocal %1291 : vector<1x1xf32> -> vector<1x1xf32>
    %1293 = arith.addf %1279, %1280 : vector<1x1xf32>
    %1294 = vector.broadcast %17 : f32 to vector<1x1xf32>
    %1295 = arith.addf %1293, %1294 : vector<1x1xf32>
    %1296 = tpu.reciprocal %1295 : vector<1x1xf32> -> vector<1x1xf32>
    %1297 = arith.mulf %1288, %1292 : vector<1x1xf32>
    %cst_224 = arith.constant 2.000000e+00 : f32
    %1298 = vector.broadcast %cst_224 : f32 to vector<1x1xf32>
    %1299 = arith.mulf %1298, %1281 : vector<1x1xf32>
    %1300 = vector.broadcast %17 : f32 to vector<1x1xf32>
    %1301 = arith.addf %1299, %1300 : vector<1x1xf32>
    %1302 = arith.mulf %1301, %1297 : vector<1x1xf32>
    %1303 = arith.mulf %1302, %1296 : vector<1x1xf32>
    %1304 = vector.shape_cast %1297 : vector<1x1xf32> to vector<1x1x1xf32>
    %cst_225 = arith.constant dense<0.000000e+00> : vector<1xf32>
    %1305 = vector.multi_reduction <add>, %1304, %cst_225 [1, 2] : vector<1x1x1xf32> to vector<1xf32>
    %1306 = vector.shape_cast %1305 : vector<1xf32> to vector<1x1x1xf32>
    %1307 = vector.extract %1306[0, 0, 0] : f32 from vector<1x1x1xf32>
    %1308 = arith.addf %1266, %1307 : f32
    %1309 = vector.shape_cast %1303 : vector<1x1xf32> to vector<1x1x1xf32>
    %cst_226 = arith.constant dense<0.000000e+00> : vector<1xf32>
    %1310 = vector.multi_reduction <add>, %1309, %cst_226 [1, 2] : vector<1x1x1xf32> to vector<1xf32>
    %1311 = vector.shape_cast %1310 : vector<1xf32> to vector<1x1x1xf32>
    %1312 = vector.extract %1311[0, 0, 0] : f32 from vector<1x1x1xf32>
    %1313 = arith.addf %1271, %1312 : f32
    %1314 = vector.extract_strided_slice %1102 {offsets = [0, 10], sizes = [40, 2], strides = [1, 1]} : vector<40x12xf32> to vector<40x2xf32>
    %cst_227 = arith.constant dense<0.000000e+00> : vector<40x1xf32>
    %1315 = tpu.matmul %1314, %1103, %cst_227 {dimension_numbers = #tpu.dot_dimension_numbers<[1], [0], [0], [1], [0, 0, 1, 1], [], []>} : vector<40x2xf32>, vector<2x1xf32>, vector<40x1xf32> -> vector<40x1xf32>
    %1316 = vector.extract_strided_slice %1315 {offsets = [0, 0], sizes = [1, 1], strides = [1, 1]} : vector<40x1xf32> to vector<1x1xf32>
    %1317 = vector.extract_strided_slice %1315 {offsets = [8, 0], sizes = [1, 1], strides = [1, 1]} : vector<40x1xf32> to vector<1x1xf32>
    %1318 = vector.extract_strided_slice %1315 {offsets = [16, 0], sizes = [1, 1], strides = [1, 1]} : vector<40x1xf32> to vector<1x1xf32>
    %1319 = vector.extract_strided_slice %1315 {offsets = [24, 0], sizes = [1, 1], strides = [1, 1]} : vector<40x1xf32> to vector<1x1xf32>
    %1320 = vector.extract_strided_slice %1315 {offsets = [32, 0], sizes = [1, 1], strides = [1, 1]} : vector<40x1xf32> to vector<1x1xf32>
    %1321 = arith.mulf %1316, %1316 : vector<1x1xf32>
    %1322 = arith.mulf %1317, %1317 : vector<1x1xf32>
    %1323 = arith.mulf %1316, %1317 : vector<1x1xf32>
    %1324 = arith.subf %1318, %1321 : vector<1x1xf32>
    %1325 = arith.subf %1319, %1322 : vector<1x1xf32>
    %1326 = arith.subf %1320, %1323 : vector<1x1xf32>
    %cst_228 = arith.constant 2.000000e+00 : f32
    %1327 = vector.broadcast %cst_228 : f32 to vector<1x1xf32>
    %1328 = arith.mulf %1327, %1326 : vector<1x1xf32>
    %1329 = vector.broadcast %18 : f32 to vector<1x1xf32>
    %1330 = arith.addf %1328, %1329 : vector<1x1xf32>
    %1331 = arith.addf %1324, %1325 : vector<1x1xf32>
    %1332 = vector.broadcast %18 : f32 to vector<1x1xf32>
    %1333 = arith.addf %1331, %1332 : vector<1x1xf32>
    %1334 = tpu.reciprocal %1333 : vector<1x1xf32> -> vector<1x1xf32>
    %1335 = arith.addf %1321, %1322 : vector<1x1xf32>
    %1336 = vector.broadcast %17 : f32 to vector<1x1xf32>
    %1337 = arith.addf %1335, %1336 : vector<1x1xf32>
    %1338 = tpu.reciprocal %1337 : vector<1x1xf32> -> vector<1x1xf32>
    %1339 = arith.mulf %1330, %1334 : vector<1x1xf32>
    %cst_229 = arith.constant 2.000000e+00 : f32
    %1340 = vector.broadcast %cst_229 : f32 to vector<1x1xf32>
    %1341 = arith.mulf %1340, %1323 : vector<1x1xf32>
    %1342 = vector.broadcast %17 : f32 to vector<1x1xf32>
    %1343 = arith.addf %1341, %1342 : vector<1x1xf32>
    %1344 = arith.mulf %1343, %1339 : vector<1x1xf32>
    %1345 = arith.mulf %1344, %1338 : vector<1x1xf32>
    %1346 = vector.shape_cast %1339 : vector<1x1xf32> to vector<1x1x1xf32>
    %cst_230 = arith.constant dense<0.000000e+00> : vector<1xf32>
    %1347 = vector.multi_reduction <add>, %1346, %cst_230 [1, 2] : vector<1x1x1xf32> to vector<1xf32>
    %1348 = vector.shape_cast %1347 : vector<1xf32> to vector<1x1x1xf32>
    %1349 = vector.extract %1348[0, 0, 0] : f32 from vector<1x1x1xf32>
    %1350 = arith.addf %1308, %1349 : f32
    %1351 = vector.shape_cast %1345 : vector<1x1xf32> to vector<1x1x1xf32>
    %cst_231 = arith.constant dense<0.000000e+00> : vector<1xf32>
    %1352 = vector.multi_reduction <add>, %1351, %cst_231 [1, 2] : vector<1x1x1xf32> to vector<1xf32>
    %1353 = vector.shape_cast %1352 : vector<1xf32> to vector<1x1x1xf32>
    %1354 = vector.extract %1353[0, 0, 0] : f32 from vector<1x1x1xf32>
    %1355 = arith.addf %1313, %1354 : f32
    %cst_232 = arith.constant 0.166666672 : f32
    %1356 = arith.mulf %1355, %cst_232 : f32
    %c4 = arith.constant 4 : index
    %1357 = memref.load %arg19[%c4] : memref<5xf32, #tpu.memory_space<smem>>
    memref.store %1356, %arg19[%c4] : memref<5xf32, #tpu.memory_space<smem>>
    %cst_233 = arith.constant 0.166666672 : f32
    %1358 = arith.mulf %1350, %cst_233 : f32
    %c4_234 = arith.constant 4 : index
    %1359 = memref.load %arg20[%c4_234] : memref<5xf32, #tpu.memory_space<smem>>
    memref.store %1358, %arg20[%c4_234] : memref<5xf32, #tpu.memory_space<smem>>
    return
  }
}

</mosaic_0001>

<bundles_post_ra>
// kernel: _lambda_.1
= control target key start
LH: loop header
LB: loop body
LE: loop exit
PB: predicated region body
PF: predicated region fallthrough
CT: control target
= control target key end

     0   :  { %s11503_s0 = inlined_call_operand.vmem [shape: f32[64,192], index: 0, kind: input, shape index: {}]   ;;  %s11504_s1 = inlined_call_operand.vmem [shape: f32[120,160], index: 1, kind: input, shape index: {}]   ;;  %s11505_s2 = inlined_call_operand.vmem [shape: f32[40,80], index: 2, kind: input, shape index: {}]   ;;  %s11506_s3 = inlined_call_operand.vmem [shape: f32[40,40], index: 3, kind: input, shape index: {}]   ;;  %s11507_s4 = inlined_call_operand.vmem [shape: f32[40,20], index: 4, kind: input, shape index: {}]   ;;  %s11508_s5 = inlined_call_operand.vmem [shape: f32[40,10], index: 5, kind: input, shape index: {}]   ;;  %s11509_s6 = inlined_call_operand.vmem [shape: f32[32,22], index: 6, kind: input, shape index: {}]   ;;  %s11510_s7 = inlined_call_operand.vmem [shape: f32[16,6], index: 7, kind: input, shape index: {}]   ;;  %s11511_s8 = inlined_call_operand.vmem [shape: f32[8,1], index: 8, kind: input, shape index: {}]   ;;  %s11512_s9 = inlined_call_operand.vmem [shape: f32[4,1], index: 9, kind: input, shape index: {}]   ;;  %s11513_s10 = inlined_call_operand.vmem [shape: f32[2,1], index: 10, kind: input, shape index: {}]   ;;  %s11514_s11 = inlined_call_operand.vmem [shape: f32[32,64], index: 11, kind: input, shape index: {}]   ;;  %s11515_s12 = inlined_call_operand.vmem [shape: f32[16,32], index: 12, kind: input, shape index: {}]   ;;  %s11516_s13 = inlined_call_operand.vmem [shape: f32[8,16], index: 13, kind: input, shape index: {}]   ;;  %s11517_s14 = inlined_call_operand.vmem [shape: f32[4,8], index: 14, kind: input, shape index: {}]   ;;  %s11518_s15 = inlined_call_operand.vmem [shape: f32[192,96], index: 15, kind: input, shape index: {}]   ;;  %s11519_s16 = inlined_call_operand.vmem [shape: f32[96,48], index: 16, kind: input, shape index: {}]   ;;  %s11520_s17 = inlined_call_operand.vmem [shape: f32[48,24], index: 17, kind: input, shape index: {}]   ;;  %s11521_s18 = inlined_call_operand.vmem [shape: f32[24,12], index: 18, kind: input, shape index: {}]   ;;  %s11522_s19 = inlined_call_operand.vmem [shape: f32[5], index: 19, kind: output, shape index: {0}]   ;;  %s11523_s20 = inlined_call_operand.vmem [shape: f32[5], index: 20, kind: output, shape index: {1}]  }
   0x1   :  { %11798 = sst [smem:[#allocation236_spill]] %s11503_s0 }
   0x2   :  { %11799 = sst [smem:[#allocation237_spill]] %s11504_s1 }
   0x3   :  { %11800 = sst [smem:[#allocation238_spill]] %s11505_s2 }
   0x4   :  { %11801 = sst [smem:[#allocation239_spill]] %s11506_s3 }
   0x5   :  { %11802 = sst [smem:[#allocation240_spill]] %s11507_s4 }
   0x6   :  { %26 = vsyncpa [#allocation3], 0  ;;  %s11803_s23 = sld [smem:[#allocation236_spill]] }
   0xc   :  { %v6166_v0 = vld [vmem:[%s11803_s23 + $0x70] sm:$0xff]  ;;  %v6171_v1 = vld [vmem:[%s11803_s23 + $0x60] sm:$0xff] }
   0xd   :  { %v6176_v2 = vld [vmem:[%s11803_s23 + $0x50] sm:$0xff]  ;;  %v146_v3 = vmul.f32 %v6166_v0, %v6166_v0  ;;  %v144_v4 = vmul.f32 %v6171_v1, %v6171_v1  ;;  %v6190_v6 = vld [vmem:[%s11803_s23 + $0x40] sm:$0xff] }
   0xe   :  { %v6185_v5 = vld [vmem:[%s11803_s23 + $0x30] sm:$0xff]  ;;  %v6195_v7 = vld [vmem:[%s11803_s23 + $0x20] sm:$0xff]  ;;  %v142_v9 = vmul.f32 %v6176_v2, %v6176_v2 }
   0xf   :  { %v154_v8 = vmul.f32 %v6166_v0, %v6185_v5  ;;  %232 = vmatpush.msra.mxu0 %v146_v3  ;;  %v6204_v10 = vld [vmem:[%s11803_s23 + $0x10] sm:$0xff]  ;;  %v152_v11 = vmul.f32 %v6171_v1, %v6195_v7 }
  0x10   :  { %27 = vsyncpa [#allocation5], 0  ;;  %v150_v12 = vmul.f32 %v6176_v2, %v6204_v10  ;;  %v140_v13 = vmul.f32 %v6190_v6, %v6190_v6  ;;  %v6215_v14 = vld [vmem:[%s11803_s23] sm:$0xff]  ;;  %v138_v16 = vmul.f32 %v6185_v5, %v6185_v5  ;;  %s11804_s25 = sld [smem:[#allocation237_spill]]  ;;  %vm186_vm0 = vcmask 261120   ;;  %v6348_v37 = vld [vmem:[%s11803_s23 + $0x78] sm:$0xff] }
  0x11   :  { %306 = vmatpush.msra.mxu1 %v154_v8  ;;  %5688 = vmatpush.msra.mxu3 %v154_v8  ;;  %v148_v15 = vmul.f32 %v6190_v6, %v6215_v14  ;;  %v136_v18 = vmul.f32 %v6195_v7, %v6195_v7  ;;  %v134_v19 = vmul.f32 %v6204_v10, %v6204_v10  ;;  %v6353_v38 = vld [vmem:[%s11803_s23 + $0x68] sm:$0xff]  ;;  %v6358_v39 = vld [vmem:[%s11803_s23 + $0x58] sm:$0xff]  ;;  %s6042_s28 = smov 32   ;;  %s6043_s4 = smov 96   ;;  %vm82_vm1 = vcmask 523264  }
  0x12   :  { %233 = vmatpush.msra.mxu0 %v144_v4  ;;  %v132_v20 = vmul.f32 %v6215_v14, %v6215_v14  ;;  %v147_v40 = vmul.f32 %v6348_v37, %v6348_v37  ;;  %v145_v41 = vmul.f32 %v6353_v38, %v6353_v38  ;;  %v143_v42 = vmul.f32 %v6358_v39, %v6358_v39  ;;  %v6381_v45 = vld [vmem:[%s11803_s23 + $0x48] sm:$0xff]  ;;  %v6389_v47 = vld [vmem:[%s11803_s23 + $0x38] sm:$0xff]  ;;  %s11855_s1 = sld [smem:[#allocation238_spill]]  ;;  %s6046_s29 = smov 48  }
  0x13   :  { %307 = vmatpush.msra.mxu1 %v152_v11  ;;  %5689 = vmatpush.msra.mxu3 %v152_v11  ;;  %v141_v46 = vmul.f32 %v6381_v45, %v6381_v45  ;;  %v6394_v48 = vld [vmem:[%s11803_s23 + $0x28] sm:$0xff]  ;;  %v6399_v49 = vld [vmem:[%s11803_s23 + $0x18] sm:$0xff]  ;;  %v139_v50 = vmul.f32 %v6389_v47, %v6389_v47  ;;  %v155_v60 = vmul.f32 %v6348_v37, %v6389_v47  ;;  %vm2365_vm2 = vcmask 654336   ;;  %s11875_s26 = sld [smem:[#allocation239_spill]]  ;;  %s6047_s21 = smov 104  }
  0x14   :  { %234 = vmatpush.msra.mxu0 %v142_v9  ;;  %356 = vmatpush.msra.mxu2 %v147_v40  ;;  %v137_v51 = vmul.f32 %v6394_v48, %v6394_v48  ;;  %v135_v52 = vmul.f32 %v6399_v49, %v6399_v49  ;;  %v6422_v55 = vld [vmem:[%s11803_s23 + $0x8] sm:$0xff]  ;;  %v153_v61 = vmul.f32 %v6353_v38, %v6394_v48  ;;  %v6478_v8 = vld [vmem:[%s11509_s6 + $0x18] sm:$0xff]  ;;  %v6487_v9 = vld [vmem:[%s11509_s6 + $0x10] sm:$0xff]  ;;  %vm2415_vm3 = vcmask 130048   ;;  %s6049_s22 = smov 88   ;;  %s6051_s3 = smov 116  }
  0x15   :  { %308 = vmatpush.msra.mxu1 %v150_v12  ;;  %5690 = vmatpush.msra.mxu3 %v150_v12  ;;  %v133_v56 = vmul.f32 %v6422_v55, %v6422_v55  ;;  %v151_v62 = vmul.f32 %v6358_v39, %v6399_v49  ;;  %v149_v4 = vmul.f32 %v6381_v45, %v6422_v55  ;;  %v6511_v12 = vld [vmem:[%s11509_s6 + $0x8] sm:$0xff]  ;;  %vm3175_vm4 = vcmask 785408  }
  0x16   :  { %v6224_v17 = vld [vmem:[%s11804_s25 + $0x8] sm:$0xff]  ;;  %235 = vmatpush.msra.mxu0 %v140_v13  ;;  %v6237_v21 = vld [vmem:[%s11804_s25 + $0x18] sm:$0xff]  ;;  %v6258_v23 = vld [vmem:[%s11804_s25] sm:$0xff]  ;;  %357 = vmatpush.msra.mxu2 %v145_v41  ;;  %vm3213_vm5 = vcmask 326656   ;;  %vm3262_vm6 = vcmask 64512   ;;  %vm3912_vm7 = vcmask 392192  }
  0x17   :  { %309 = vmatpush.msra.mxu1 %v148_v15  ;;  %5691 = vmatpush.msra.mxu3 %v148_v15  ;;  %v6247_v22 = vld [vmem:[%s11804_s25 + $0x28] sm:$0xff]  ;;  %v6263_v24 = vld [vmem:[%s11804_s25 + $0x38] sm:$0xff]  ;;  %v6272_v25 = vld [vmem:[%s11804_s25 + $0x10] sm:$0xff]  ;;  %vm3941_vm8 = vcmask 1043456   ;;  %vm3947_vm9 = vcmask 162816   ;;  %vm3999_vm10 = vcmask 31744  }
  0x18   :  { %236 = vmatpush.msra.mxu0 %v138_v16  ;;  %5394 = vmatmul.msk.f32.vlgmr.msra.gmra.mxu1 %vm186_vm0, %v6224_v17  ;;  %v6277_v26 = vld [vmem:[%s11804_s25 + $0x48] sm:$0xff]  ;;  %v6285_v27 = vld [vmem:[%s11804_s25 + $0x20] sm:$0xff]  ;;  %v6290_v28 = vld [vmem:[%s11804_s25 + $0x58] sm:$0xff]  ;;  %vm4649_vm11 = vcmask 195584   ;;  %vm4705_vm12 = vcmask 1041408   ;;  %vm4682_vm13 = vcmask 1045504  }
  0x19   :  { %v6298_v29 = vld [vmem:[%s11804_s25 + $0x30] sm:$0xff]  ;;  %v6303_v30 = vld [vmem:[%s11804_s25 + $0x68] sm:$0xff]  ;;  %v6311_v31 = vld [vmem:[%s11804_s25 + $0x40] sm:$0xff]  ;;  %358 = vmatpush.msra.mxu2 %v143_v42  ;;  %430 = vmatpush.msrb.mxu3 %v155_v60  ;;  %vm4689_vm14 = vcmask 80896   ;;  %vm4742_vm15 = vcmask 15360  }
  0x1a   :  { %237 = vmatpush.msra.mxu0 %v136_v18  ;;  %v6316_v32 = vld [vmem:[%s11804_s25 + $0x78] sm:$0xff]  ;;  %v6324_v33 = vld [vmem:[%s11804_s25 + $0x50] sm:$0xff]  ;;  %v6329_v34 = vld [vmem:[%s11804_s25 + $0x88] sm:$0xff]  ;;  %541 = vmatpush.msrb.mxu1 %v6478_v8 }
  0x1b   :  { %v6337_v35 = vld [vmem:[%s11804_s25 + $0x60] sm:$0xff]  ;;  %v6342_v36 = vld [vmem:[%s11804_s25 + $0x98] sm:$0xff]  ;;  %v6371_v43 = vld [vmem:[%s11804_s25 + $0x70] sm:$0xff]  ;;  %359 = vmatpush.msra.mxu2 %v141_v46  ;;  %431 = vmatpush.msrb.mxu3 %v153_v61 }
  0x1c   :  { %238 = vmatpush.msra.mxu0 %v134_v19  ;;  %v6376_v44 = vld [vmem:[%s11804_s25 + $0xa8] sm:$0xff]  ;;  %v6412_v53 = vld [vmem:[%s11804_s25 + $0x80] sm:$0xff]  ;;  %v6417_v54 = vld [vmem:[%s11804_s25 + $0xb8] sm:$0xff]  ;;  %542 = vmatpush.msrb.mxu1 %v6487_v9 }
  0x1d   :  { %360 = vmatpush.msra.mxu2 %v139_v50  ;;  %v6433_v57 = vld [vmem:[%s11804_s25 + $0x90] sm:$0xff]  ;;  %v6439_v58 = vld [vmem:[%s11804_s25 + $0xc8] sm:$0xff]  ;;  %v6463_v63 = vld [vmem:[%s11804_s25 + $0xa0] sm:$0xff]  ;;  %432 = vmatpush.msrb.mxu3 %v151_v62 }
  0x1e   :  { %239 = vmatpush.msra.mxu0 %v132_v20  ;;  %v6446_v59 = vld [vmem:[%s11804_s25 + $0xe8] sm:$0xff]  ;;  %v6469_v3 = vld [vmem:[%s11804_s25 + $0xd8] sm:$0xff]  ;;  %v6497_v11 = vld [vmem:[%s11804_s25 + $0xb0] sm:$0xff]  ;;  %543 = vmatpush.msrb.mxu1 %v6511_v12 }
  0x1f   :  { %361 = vmatpush.msra.mxu2 %v137_v51  ;;  %5408 = vmatmul.msk.f32.vlgmr.msra.gmra.mxu3 %vm186_vm0, %v6446_v59  ;;  %v6516_v13 = vld [vmem:[%s11804_s25 + $0xc0] sm:$0xff]  ;;  %v6543_v16 = vld [vmem:[%s11804_s25 + $0xd0] sm:$0xff] }
  0x20   :  { %240 = vmatpush.msra.mxu0 %v6166_v0  ;;  %5395 = vmatmul.msk.f32.gmra.mxu1 %vm186_vm0, %v6237_v21  ;;  %v6523_v15 = vld [vmem:[%s11509_s6] sm:$0xff]  ;;  %s6054_s6 = smov 126  }
  0x21   :  { %362 = vmatpush.msra.mxu2 %v135_v52  ;;  %433 = vmatpush.msrb.mxu3 %v149_v4 }
  0x22   :  { %241 = vmatpush.msra.mxu0 %v6171_v1  ;;  %544 = vmatpush.msrb.mxu1 %v6523_v15 }
  0x23   :  { %363 = vmatpush.msra.mxu2 %v133_v56  ;;  %832 = vmatpush.msra.mxu3 %v6478_v8 }
  0x24   :  { %242 = vmatpush.msra.mxu0 %v6176_v2  ;;  %1678 = vmatpush.msra.mxu1 %v6478_v8 }
  0x25   :  { %364 = vmatpush.msra.mxu2 %v6348_v37  ;;  %833 = vmatpush.msra.mxu3 %v6487_v9 }
  0x26   :  { %243 = vmatpush.msra.mxu0 %v6190_v6  ;;  %1679 = vmatpush.msra.mxu1 %v6487_v9 }
  0x27   :  { %365 = vmatpush.msra.mxu2 %v6353_v38  ;;  %5409 = vmatmul.msk.f32.vlgmr.msrb.gmra.mxu3 %vm186_vm0, %v6224_v17 }
  0x28   :  { %244 = vmatpush.msra.mxu0 %v6185_v5  ;;  %5396 = vmatmul.msk.f32.gmra.mxu1 %vm186_vm0, %v6247_v22 }
  0x29   :  { %366 = vmatpush.msra.mxu2 %v6358_v39  ;;  %834 = vmatpush.msra.mxu3 %v6511_v12 }
  0x2a   :  { %245 = vmatpush.msra.mxu0 %v6195_v7  ;;  %1680 = vmatpush.msra.mxu1 %v6511_v12 }
  0x2b   :  { %367 = vmatpush.msra.mxu2 %v6381_v45  ;;  %835 = vmatpush.msra.mxu3 %v6523_v15 }
  0x2c   :  { %246 = vmatpush.msra.mxu0 %v6204_v10  ;;  %1681 = vmatpush.msra.mxu1 %v6523_v15 }
  0x2d   :  { %368 = vmatpush.msra.mxu2 %v6389_v47  ;;  %5692 = vmatpush.msrb.mxu3 %v6478_v8 }
  0x2e   :  { %247 = vmatpush.msra.mxu0 %v6215_v14 }
  0x2f   :  { %248 = vmatmul.f32.vlgmr.msra.gmra.mxu0 %v6258_v23  ;;  %369 = vmatpush.msra.mxu2 %v6394_v48 }
  0x30   :  { %5397 = vmatmul.msk.f32.gmra.mxu1 %vm186_vm0, %v6263_v24  ;;  %1119 = vmatpush.msrb.mxu0 %v6478_v8 }
  0x31   :  { %370 = vmatpush.msra.mxu2 %v6399_v49  ;;  %5410 = vmatmul.msk.f32.gmra.mxu3 %vm186_vm0, %v6237_v21 }
  0x32   :  { %1120 = vmatpush.msrb.mxu0 %v6487_v9  ;;  %5693 = vmatpush.msrb.mxu3 %v6487_v9 }
  0x33   :  { %371 = vmatpush.msra.mxu2 %v6422_v55 }
  0x34   :  { %372 = vmatmul.f32.vlgmr.msra.gmra.mxu2 %v6258_v23  ;;  %1121 = vmatpush.msrb.mxu0 %v6511_v12 }
  0x35   :  { %1406 = vmatpush.msrb.mxu2 %v6478_v8  ;;  %5694 = vmatpush.msrb.mxu3 %v6511_v12 }
  0x36   :  { %1122 = vmatpush.msrb.mxu0 %v6523_v15 }
  0x37   :  { %251 = vmatmul.f32.gmra.mxu0 %v6272_v25  ;;  %1407 = vmatpush.msrb.mxu2 %v6487_v9 }
  0x38   :  { %5398 = vmatmul.msk.f32.gmra.mxu1 %vm186_vm0, %v6277_v26  ;;  %2210 = vmatpush.msra.mxu0 %v6166_v0 }
  0x39   :  { %1408 = vmatpush.msrb.mxu2 %v6511_v12  ;;  %5411 = vmatmul.msk.f32.gmra.mxu3 %vm186_vm0, %v6247_v22 }
  0x3a   :  { %2211 = vmatpush.msra.mxu0 %v6171_v1  ;;  %v6564_v1 = vld [vmem:[%s11804_s25 + $0xe0] sm:$0xff]  ;;  %5695 = vmatpush.msrb.mxu3 %v6523_v15  ;;  %s6041_s25 = smov 64  }
  0x3b   :  { %1409 = vmatpush.msrb.mxu2 %v6523_v15 }
  0x3c   :  { %375 = vmatmul.f32.gmra.mxu2 %v6272_v25  ;;  %2212 = vmatpush.msra.mxu0 %v6176_v2 }
  0x3d   :  { %2239 = vmatpush.msra.mxu2 %v6348_v37 }
  0x3e   :  { %2213 = vmatpush.msra.mxu0 %v6190_v6 }
  0x3f   :  { %254 = vmatmul.f32.gmra.mxu0 %v6285_v27  ;;  %2240 = vmatpush.msra.mxu2 %v6353_v38 }
  0x40   :  { %5399 = vmatmul.msk.f32.gmra.mxu1 %vm186_vm0, %v6290_v28  ;;  %2214 = vmatpush.msra.mxu0 %v6185_v5 }
  0x41   :  { %2241 = vmatpush.msra.mxu2 %v6358_v39  ;;  %5412 = vmatmul.msk.f32.gmra.mxu3 %vm186_vm0, %v6263_v24 }
  0x42   :  { %2215 = vmatpush.msra.mxu0 %v6195_v7 }
  0x43   :  { %2242 = vmatpush.msra.mxu2 %v6381_v45 }
  0x44   :  { %378 = vmatmul.f32.gmra.mxu2 %v6285_v27  ;;  %2216 = vmatpush.msra.mxu0 %v6204_v10 }
  0x45   :  { %2243 = vmatpush.msra.mxu2 %v6389_v47 }
  0x46   :  { %2217 = vmatpush.msra.mxu0 %v6215_v14 }
  0x47   :  { %257 = vmatmul.f32.gmra.mxu0 %v6298_v29  ;;  %2244 = vmatpush.msra.mxu2 %v6394_v48 }
  0x48   :  { %5400 = vmatmul.msk.f32.gmra.mxu1 %vm186_vm0, %v6303_v30 }
  0x49   :  { %2245 = vmatpush.msra.mxu2 %v6399_v49  ;;  %5413 = vmatmul.msk.f32.gmra.mxu3 %vm186_vm0, %v6277_v26 }
  0x4b   :  { %2246 = vmatpush.msra.mxu2 %v6422_v55 }
  0x4c   :  { %381 = vmatmul.f32.gmra.mxu2 %v6298_v29 }
  0x4f   :  { %260 = vmatmul.f32.gmra.mxu0 %v6311_v31 }
  0x50   :  { %5401 = vmatmul.msk.f32.gmra.mxu1 %vm186_vm0, %v6316_v32 }
  0x51   :  { %5414 = vmatmul.msk.f32.gmra.mxu3 %vm186_vm0, %v6290_v28 }
  0x54   :  { %384 = vmatmul.f32.gmra.mxu2 %v6311_v31 }
  0x57   :  { %263 = vmatmul.f32.gmra.mxu0 %v6324_v33 }
  0x58   :  { %5402 = vmatmul.msk.f32.gmra.mxu1 %vm186_vm0, %v6329_v34 }
  0x59   :  { %5415 = vmatmul.msk.f32.gmra.mxu3 %vm186_vm0, %v6303_v30 }
  0x5c   :  { %387 = vmatmul.f32.gmra.mxu2 %v6324_v33 }
  0x5f   :  { %266 = vmatmul.f32.gmra.mxu0 %v6337_v35 }
  0x60   :  { %5403 = vmatmul.msk.f32.gmra.mxu1 %vm186_vm0, %v6342_v36 }
  0x61   :  { %5416 = vmatmul.msk.f32.gmra.mxu3 %vm186_vm0, %v6316_v32 }
  0x64   :  { %390 = vmatmul.f32.gmra.mxu2 %v6337_v35 }
  0x67   :  { %269 = vmatmul.f32.gmra.mxu0 %v6371_v43 }
  0x68   :  { %5404 = vmatmul.msk.f32.gmra.mxu1 %vm186_vm0, %v6376_v44 }
  0x69   :  { %5417 = vmatmul.msk.f32.gmra.mxu3 %vm186_vm0, %v6329_v34 }
  0x6c   :  { %393 = vmatmul.f32.gmra.mxu2 %v6371_v43 }
  0x6f   :  { %272 = vmatmul.f32.gmra.mxu0 %v6412_v53 }
  0x70   :  { %5405 = vmatmul.msk.f32.gmra.mxu1 %vm186_vm0, %v6417_v54 }
  0x71   :  { %5418 = vmatmul.msk.f32.gmra.mxu3 %vm186_vm0, %v6342_v36 }
  0x74   :  { %396 = vmatmul.f32.gmra.mxu2 %v6412_v53 }
  0x77   :  { %275 = vmatmul.f32.gmra.mxu0 %v6433_v57 }
  0x78   :  { %5406 = vmatmul.msk.f32.gmra.mxu1 %vm186_vm0, %v6439_v58 }
  0x79   :  { %5419 = vmatmul.msk.f32.gmra.mxu3 %vm186_vm0, %v6376_v44 }
  0x7c   :  { %399 = vmatmul.f32.gmra.mxu2 %v6433_v57 }
  0x7f   :  { %278 = vmatmul.f32.gmra.mxu0 %v6463_v63 }
  0x80   :  { %5407 = vmatmul.msk.f32.gmra.mxu1 %vm186_vm0, %v6469_v3 }
  0x81   :  { %5420 = vmatmul.msk.f32.gmra.mxu3 %vm186_vm0, %v6417_v54 }
  0x84   :  { %402 = vmatmul.f32.gmra.mxu2 %v6463_v63 }
  0x87   :  { %281 = vmatmul.f32.gmra.mxu0 %v6497_v11 }
  0x89   :  { %5421 = vmatmul.msk.f32.gmra.mxu3 %vm186_vm0, %v6439_v58 }
  0x8c   :  { %405 = vmatmul.f32.gmra.mxu2 %v6497_v11 }
  0x8f   :  { %284 = vmatmul.f32.gmra.mxu0 %v6516_v13 }
  0x91   :  { %5422 = vmatmul.msk.f32.gmra.mxu3 %vm186_vm0, %v6469_v3 }
  0x94   :  { %408 = vmatmul.f32.gmra.mxu2 %v6516_v13 }
  0x95   :  { %v311_v0 = vpop.f32.mrf.mxu1 }
  0x97   :  { %287 = vmatmul.f32.gmra.mxu0 %v6543_v16 }
  0x99   :  { %5423 = vmatmul.msk.f32.gmra.mxu3 %vm186_vm0, %v6446_v59 }
  0x9c   :  { %411 = vmatmul.f32.gmra.mxu2 %v6543_v16 }
  0x9d   :  { %v314_v2 = vpop.f32.mrf.mxu1 }
  0x9f   :  { %290 = vmatmul.f32.gmra.mxu0 %v6564_v1 }
  0xa2   :  { %v353_v42 = vpop.f32.mrf.mxu3 }
  0xa4   :  { %414 = vmatmul.f32.gmra.mxu2 %v6564_v1 }
  0xa5   :  { %v317_v5 = vpop.f32.mrf.mxu1 }
  0xaa   :  { %v435_v48 = vpop.f32.mrf.mxu3 }
  0xac   :  { %v249_v6 = vpop.f32.mrf.mxu0 }
  0xad   :  { %v6580_v7 = vadd.f32 %v311_v0, %v249_v6  ;;  %v320_v17 = vpop.f32.mrf.mxu1 }
  0xaf   :  { %1047 = vrot.lane.b32.xlu0 %v6580_v7, %s6041_s25  ;;  %5424 = vmatmul.msk.f32.vlgmr.msrb.gmra.mxu1 %vm186_vm0, %v6580_v7 }
  0xb4   :  { %v252_v10 = vpop.f32.mrf.mxu0  ;;  %v438_v53 = vpop.f32.mrf.mxu3 }
  0xb5   :  { %v6589_v14 = vadd.f32 %v314_v2, %v252_v10  ;;  %v323_v18 = vpop.f32.mrf.mxu1 }
  0xb7   :  { %1334 = vrot.lane.b32.xlu0 %v6580_v7, %s6042_s28  ;;  %1049 = vrot.lane.b32.xlu1 %v6589_v14, %s6041_s25  ;;  %v373_v46 = vpop.f32.mrf.mxu2 }
  0xb8   :  { %5425 = vmatmul.msk.f32.gmra.mxu1 %vm186_vm0, %v6589_v14  ;;  %v6712_v3 = vadd.f32 %v435_v48, %v373_v46 }
  0xbc   :  { %v255_v19 = vpop.f32.mrf.mxu0  ;;  %v441_v58 = vpop.f32.mrf.mxu3 }
  0xbd   :  { %v6600_v20 = vadd.f32 %v317_v5, %v255_v19  ;;  %v326_v21 = vpop.f32.mrf.mxu1 }
  0xbf   :  { %1336 = vrot.lane.b32.xlu1 %v6589_v14, %s6042_s28  ;;  %1051 = vrot.lane.b32.xlu2 %v6600_v20, %s6041_s25  ;;  %v376_v51 = vpop.f32.mrf.mxu2 }
  0xc0   :  { %5426 = vmatmul.msk.f32.gmra.mxu1 %vm186_vm0, %v6600_v20  ;;  %v439_v0 = vadd.f32 %v438_v53, %v376_v51 }
  0xc4   :  { %v258_v22 = vpop.f32.mrf.mxu0  ;;  %v444_v62 = vpop.f32.mrf.mxu3 }
  0xc5   :  { %v6611_v23 = vadd.f32 %v320_v17, %v258_v22  ;;  %v329_v25 = vpop.f32.mrf.mxu1 }
  0xc7   :  { %1338 = vrot.lane.b32.xlu2 %v6600_v20, %s6042_s28  ;;  %1053 = vrot.lane.b32.xlu0 %v6611_v23, %s6041_s25  ;;  %v379_v56 = vpop.f32.mrf.mxu2 }
  0xc8   :  { %5427 = vmatmul.msk.f32.gmra.mxu1 %vm186_vm0, %v6611_v23  ;;  %1340 = vrot.lane.b32.xlu1 %v6611_v23, %s6042_s28  ;;  %v442_v17 = vadd.f32 %v441_v58, %v379_v56 }
  0xcc   :  { %v261_v24 = vpop.f32.mrf.mxu0  ;;  %v447_v11 = vpop.f32.mrf.mxu3 }
  0xcd   :  { %v6624_v26 = vadd.f32 %v323_v18, %v261_v24  ;;  %v332_v29 = vpop.f32.mrf.mxu1 }
  0xcf   :  { %1342 = vrot.lane.b32.xlu0 %v6624_v26, %s6042_s28  ;;  %1055 = vrot.lane.b32.xlu2 %v6624_v26, %s6041_s25  ;;  %v382_v60 = vpop.f32.mrf.mxu2 }
  0xd0   :  { %5428 = vmatmul.msk.f32.gmra.mxu1 %vm186_vm0, %v6624_v26 }
  0xd4   :  { %v264_v27 = vpop.f32.mrf.mxu0  ;;  %v450_v5 = vpop.f32.mrf.mxu3 }
  0xd5   :  { %v6635_v28 = vadd.f32 %v326_v21, %v264_v27  ;;  %v335_v32 = vpop.f32.mrf.mxu1  ;;  %v445_v21 = vadd.f32 %v444_v62, %v382_v60 }
  0xd7   :  { %1057 = vrot.lane.b32.xlu1 %v6635_v28, %s6041_s25  ;;  %1344 = vrot.lane.b32.xlu2 %v6635_v28, %s6042_s28  ;;  %v385_v4 = vpop.f32.mrf.mxu2 }
  0xd8   :  { %5429 = vmatmul.msk.f32.gmra.mxu1 %vm186_vm0, %v6635_v28  ;;  %v448_v27 = vadd.f32 %v447_v11, %v385_v4 }
  0xdc   :  { %v267_v30 = vpop.f32.mrf.mxu0  ;;  %v453_v18 = vpop.f32.mrf.mxu3 }
  0xdd   :  { %v6646_v31 = vadd.f32 %v329_v25, %v267_v30  ;;  %v338_v35 = vpop.f32.mrf.mxu1 }
  0xdf   :  { %1059 = vrot.lane.b32.xlu0 %v6646_v31, %s6041_s25  ;;  %1346 = vrot.lane.b32.xlu1 %v6646_v31, %s6042_s28  ;;  %v388_v2 = vpop.f32.mrf.mxu2 }
  0xe0   :  { %5430 = vmatmul.msk.f32.gmra.mxu1 %vm186_vm0, %v6646_v31 }
  0xe4   :  { %v270_v33 = vpop.f32.mrf.mxu0  ;;  %v456_v24 = vpop.f32.mrf.mxu3 }
  0xe5   :  { %v6657_v34 = vadd.f32 %v332_v29, %v270_v33  ;;  %v341_v39 = vpop.f32.mrf.mxu1  ;;  %v451_v33 = vadd.f32 %v450_v5, %v388_v2 }
  0xe7   :  { %1348 = vrot.lane.b32.xlu0 %v6657_v34, %s6042_s28  ;;  %1061 = vrot.lane.b32.xlu2 %v6657_v34, %s6041_s25  ;;  %v391_v10 = vpop.f32.mrf.mxu2 }
  0xe8   :  { %5431 = vmatmul.msk.f32.gmra.mxu1 %vm186_vm0, %v6657_v34 }
  0xec   :  { %v273_v36 = vpop.f32.mrf.mxu0  ;;  %v459_v30 = vpop.f32.mrf.mxu3 }
  0xed   :  { %v6668_v37 = vadd.f32 %v335_v32, %v273_v36  ;;  %v344_v44 = vpop.f32.mrf.mxu1 }
  0xef   :  { %1063 = vrot.lane.b32.xlu1 %v6668_v37, %s6041_s25  ;;  %1350 = vrot.lane.b32.xlu2 %v6668_v37, %s6042_s28  ;;  %v394_v22 = vpop.f32.mrf.mxu2 }
  0xf0   :  { %5432 = vmatmul.msk.f32.gmra.mxu1 %vm186_vm0, %v6668_v37 }
  0xf4   :  { %v276_v38 = vpop.f32.mrf.mxu0  ;;  %v462_v36 = vpop.f32.mrf.mxu3 }
  0xf5   :  { %v339_v40 = vadd.f32 %v338_v35, %v276_v38  ;;  %v347_v49 = vpop.f32.mrf.mxu1 }
  0xf7   :  { %1065 = vrot.lane.b32.xlu0 %v339_v40, %s6041_s25  ;;  %1352 = vrot.lane.b32.xlu1 %v339_v40, %s6042_s28 }
  0xf8   :  { %5433 = vmatmul.msk.f32.gmra.mxu1 %vm186_vm0, %v339_v40 }
  0xfc   :  { %v279_v41 = vpop.f32.mrf.mxu0 }
  0xfd   :  { %v6682_v43 = vadd.f32 %v341_v39, %v279_v41  ;;  %v350_v54 = vpop.f32.mrf.mxu1  ;;  %v454_v39 = vadd.f32 %v453_v18, %v391_v10 }
  0xff   :  { %1354 = vrot.lane.b32.xlu0 %v6682_v43, %s6042_s28  ;;  %1067 = vrot.lane.b32.xlu2 %v6682_v43, %s6041_s25 }
 0x100   :  { %5434 = vmatmul.msk.f32.gmra.mxu1 %vm186_vm0, %v6682_v43 }
 0x104   :  { %v282_v45 = vpop.f32.mrf.mxu0 }
 0x105   :  { %v6690_v47 = vadd.f32 %v344_v44, %v282_v45 }
 0x107   :  { %1069 = vrot.lane.b32.xlu1 %v6690_v47, %s6041_s25  ;;  %1356 = vrot.lane.b32.xlu2 %v6690_v47, %s6042_s28 }
 0x108   :  { %5435 = vmatmul.msk.f32.gmra.mxu1 %vm186_vm0, %v6690_v47 }
 0x10c   :  { %v285_v50 = vpop.f32.mrf.mxu0 }
 0x10d   :  { %v348_v52 = vadd.f32 %v347_v49, %v285_v50 }
 0x10f   :  { %1358 = vrot.lane.b32.xlu1 %v348_v52, %s6042_s28  ;;  %1071 = vrot.lane.b32.xlu0 %v348_v52, %s6041_s25 }
 0x110   :  { %5436 = vmatmul.msk.f32.gmra.mxu1 %vm186_vm0, %v348_v52 }
 0x114   :  { %v288_v55 = vpop.f32.mrf.mxu0 }
 0x115   :  { %v351_v57 = vadd.f32 %v350_v54, %v288_v55 }
 0x117   :  { %760 = vrot.lane.b32.xlu1 %v6580_v7, %s6043_s4  ;;  %1073 = vrot.lane.b32.xlu2 %v351_v57, %s6041_s25 }
 0x118   :  { %5437 = vmatmul.msk.f32.gmra.mxu1 %vm186_vm0, %v351_v57 }
 0x119   :  { %v1052_v6 = vpop.permute.xlu2 %1051 }
 0x11c   :  { %v291_v59 = vpop.f32.mrf.mxu0 }
 0x11d   :  { %v354_v61 = vadd.f32 %v353_v42, %v291_v59  ;;  %v457_v42 = vadd.f32 %v456_v24, %v394_v22  ;;  %v2186_v24 = vld [vmem:[%s11514_s11] sm:$0xff] }
 0x11f   :  { %766 = vrot.lane.b32.xlu1 %v6611_v23, %s6043_s4  ;;  %762 = vrot.lane.b32.xlu2 %v6589_v14, %s6043_s4 }
 0x120   :  { %1075 = vrot.lane.b32.xlu0 %v354_v61, %s6041_s25  ;;  %5438 = vmatmul.msk.f32.gmra.mxu1 %vm186_vm0, %v354_v61 }
 0x121   :  { %v1048_v63 = vpop.permute.xlu0 %1047  ;;  %v1339_v19 = vpop.permute.xlu2 %1338 }
 0x122   :  { %5454 = vmatmul.msk.f32.vlgmr.msrb.gmra.mxu0 %vm186_vm0, %v1048_v63 }
 0x127   :  { %772 = vrot.lane.b32.xlu1 %v6646_v31, %s6043_s4  ;;  %768 = vrot.lane.b32.xlu2 %v6624_v26, %s6043_s4 }
 0x128   :  { %764 = vrot.lane.b32.xlu0 %v6600_v20, %s6043_s4  ;;  %5484 = vmatmul.msk.f32.vlgmr.msra.gmra.mxu1 %vm186_vm0, %v6712_v3 }
 0x129   :  { %v1335_v13 = vpop.permute.xlu0 %1334  ;;  %v1050_v16 = vpop.permute.xlu1 %1049 }
 0x12a   :  { %5455 = vmatmul.msk.f32.gmra.mxu0 %vm186_vm0, %v1050_v16  ;;  %5469 = vmatmul.msk.f32.vlgmr.msrb.gmra.mxu2 %vm186_vm0, %v1335_v13  ;;  %v1056_v25 = vpop.permute.xlu2 %1055 }
 0x12c   :  { %v6724_v1 = vpop.f32.mrf.mxu1 }
 0x12f   :  { %778 = vrot.lane.b32.xlu1 %v339_v40, %s6043_s4  ;;  %774 = vrot.lane.b32.xlu2 %v6657_v34, %s6043_s4 }
 0x130   :  { %770 = vrot.lane.b32.xlu0 %v6635_v28, %s6043_s4  ;;  %5485 = vmatmul.msk.f32.gmra.mxu1 %vm186_vm0, %v439_v0  ;;  %v397_v28 = vpop.f32.mrf.mxu2 }
 0x131   :  { %v1337_v7 = vpop.permute.xlu1 %1336  ;;  %v460_v48 = vadd.f32 %v459_v30, %v397_v28  ;;  %v2188_v28 = vld [vmem:[%s11514_s11 + $0x10] sm:$0xff] }
 0x132   :  { %5456 = vmatmul.msk.f32.gmra.mxu0 %vm186_vm0, %v1052_v6  ;;  %5470 = vmatmul.msk.f32.gmra.mxu2 %vm186_vm0, %v1337_v7 }
 0x135   :  { %v6734_v14 = vpop.f32.mrf.mxu1 }
 0x137   :  { %784 = vrot.lane.b32.xlu1 %v348_v52, %s6043_s4  ;;  %780 = vrot.lane.b32.xlu2 %v6682_v43, %s6043_s4  ;;  %v465_v43 = vpop.f32.mrf.mxu3 }
 0x138   :  { %776 = vrot.lane.b32.xlu0 %v6668_v37, %s6043_s4  ;;  %5486 = vmatmul.msk.f32.gmra.mxu1 %vm186_vm0, %v442_v17  ;;  %v400_v34 = vpop.f32.mrf.mxu2  ;;  %v1345_v37 = vpop.permute.xlu2 %1344 }
 0x139   :  { %v1054_v20 = vpop.permute.xlu0 %1053 }
 0x13a   :  { %5457 = vmatmul.msk.f32.gmra.mxu0 %vm186_vm0, %v1054_v20  ;;  %5471 = vmatmul.msk.f32.gmra.mxu2 %vm186_vm0, %v1339_v19  ;;  %v1341_v26 = vpop.permute.xlu1 %1340 }
 0x13d   :  { %v6744_v23 = vpop.f32.mrf.mxu1 }
 0x13f   :  { %1360 = vrot.lane.b32.xlu1 %v351_v57, %s6042_s28  ;;  %786 = vrot.lane.b32.xlu2 %v351_v57, %s6043_s4  ;;  %v468_v50 = vpop.f32.mrf.mxu3  ;;  %v463_v57 = vadd.f32 %v462_v36, %v400_v34 }
 0x140   :  { %782 = vrot.lane.b32.xlu0 %v6690_v47, %s6043_s4  ;;  %5487 = vmatmul.msk.f32.gmra.mxu1 %vm186_vm0, %v445_v21  ;;  %v403_v40 = vpop.f32.mrf.mxu2 }
 0x141   :  { %v1343_v31 = vpop.permute.xlu0 %1342  ;;  %v1062_v44 = vpop.permute.xlu2 %1061  ;;  %v466_v49 = vadd.f32 %v465_v43, %v403_v40 }
 0x142   :  { %5458 = vmatmul.msk.f32.gmra.mxu0 %vm186_vm0, %v1056_v25  ;;  %5472 = vmatmul.msk.f32.gmra.mxu2 %vm186_vm0, %v1341_v26 }
 0x145   :  { %v6753_v29 = vpop.f32.mrf.mxu1 }
 0x147   :  { %1895 = vrot.lane.b32.xlu1 %v439_v0, %s6043_s4  ;;  %1362 = vrot.lane.b32.xlu2 %v354_v61, %s6042_s28  ;;  %v471_v56 = vpop.f32.mrf.mxu3  ;;  %s6044_s28 = smov 80  }
 0x148   :  { %788 = vrot.lane.b32.xlu0 %v354_v61, %s6043_s4  ;;  %5488 = vmatmul.msk.f32.gmra.mxu1 %vm186_vm0, %v448_v27  ;;  %v406_v46 = vpop.f32.mrf.mxu2 }
 0x149   :  { %v1058_v32 = vpop.permute.xlu1 %1057  ;;  %v469_v55 = vadd.f32 %v468_v50, %v406_v46  ;;  %v1351_v58 = vpop.permute.xlu2 %1350 }
 0x14a   :  { %5459 = vmatmul.msk.f32.gmra.mxu0 %vm186_vm0, %v1058_v32  ;;  %5473 = vmatmul.msk.f32.gmra.mxu2 %vm186_vm0, %v1343_v31 }
 0x14d   :  { %v6761_v35 = vpop.f32.mrf.mxu1 }
 0x14f   :  { %1897 = vrot.lane.b32.xlu2 %v442_v17, %s6043_s4  ;;  %1901 = vrot.lane.b32.xlu1 %v448_v27, %s6043_s4  ;;  %v474_v62 = vpop.f32.mrf.mxu3 }
 0x150   :  { %1893 = vrot.lane.b32.xlu0 %v6712_v3, %s6043_s4  ;;  %5489 = vmatmul.msk.f32.gmra.mxu1 %vm186_vm0, %v451_v33  ;;  %v409_v53 = vpop.f32.mrf.mxu2 }
 0x151   :  { %v1060_v38 = vpop.permute.xlu0 %1059  ;;  %v1347_v45 = vpop.permute.xlu1 %1346  ;;  %v472_v63 = vadd.f32 %v471_v56, %v409_v53 }
 0x152   :  { %5460 = vmatmul.msk.f32.gmra.mxu0 %vm186_vm0, %v1060_v38  ;;  %5474 = vmatmul.msk.f32.gmra.mxu2 %vm186_vm0, %v1345_v37 }
 0x155   :  { %v6770_v41 = vpop.f32.mrf.mxu1 }
 0x157   :  { %1903 = vrot.lane.b32.xlu2 %v451_v33, %s6043_s4  ;;  %1907 = vrot.lane.b32.xlu1 %v457_v42, %s6043_s4  ;;  %v477_v0 = vpop.f32.mrf.mxu3  ;;  %v2189_v33 = vld [vmem:[%s11514_s11 + $0x18] sm:$0xff] }
 0x158   :  { %1899 = vrot.lane.b32.xlu0 %v445_v21, %s6043_s4  ;;  %5490 = vmatmul.msk.f32.gmra.mxu1 %vm186_vm0, %v454_v39  ;;  %v412_v60 = vpop.f32.mrf.mxu2 }
 0x159   :  { %v1349_v51 = vpop.permute.xlu0 %1348  ;;  %v475_v3 = vadd.f32 %v474_v62, %v412_v60  ;;  %v1068_v4 = vpop.permute.xlu2 %1067 }
 0x15a   :  { %5461 = vmatmul.msk.f32.gmra.mxu0 %vm186_vm0, %v1062_v44  ;;  %5475 = vmatmul.msk.f32.gmra.mxu2 %vm186_vm0, %v1347_v45 }
 0x15d   :  { %v6778_v47 = vpop.f32.mrf.mxu1 }
 0x15f   :  { %1909 = vrot.lane.b32.xlu2 %v460_v48, %s6043_s4  ;;  %1913 = vrot.lane.b32.xlu1 %v466_v49, %s6043_s4 }
 0x160   :  { %5491 = vmatmul.msk.f32.gmra.mxu1 %vm186_vm0, %v457_v42  ;;  %1905 = vrot.lane.b32.xlu0 %v454_v39, %s6043_s4  ;;  %v415_v13 = vpop.f32.mrf.mxu2 }
 0x161   :  { %v1064_v52 = vpop.permute.xlu1 %1063  ;;  %v478_v2 = vadd.f32 %v477_v0, %v415_v13  ;;  %v1357_v17 = vpop.permute.xlu2 %1356 }
 0x162   :  { %5462 = vmatmul.msk.f32.gmra.mxu0 %vm186_vm0, %v1064_v52  ;;  %5476 = vmatmul.msk.f32.gmra.mxu2 %vm186_vm0, %v1349_v51 }
 0x165   :  { %v6786_v54 = vpop.f32.mrf.mxu1 }
 0x167   :  { %1915 = vrot.lane.b32.xlu2 %v469_v55, %s6043_s4  ;;  %1919 = vrot.lane.b32.xlu1 %v475_v3, %s6043_s4 }
 0x168   :  { %5492 = vmatmul.msk.f32.gmra.mxu1 %vm186_vm0, %v460_v48  ;;  %1911 = vrot.lane.b32.xlu0 %v463_v57, %s6043_s4 }
 0x169   :  { %v1066_v59 = vpop.permute.xlu0 %1065  ;;  %v1353_v11 = vpop.permute.xlu1 %1352 }
 0x16a   :  { %5463 = vmatmul.msk.f32.gmra.mxu0 %vm186_vm0, %v1066_v59  ;;  %5477 = vmatmul.msk.f32.gmra.mxu2 %vm186_vm0, %v1351_v58 }
 0x16d   :  { %v6793_v61 = vpop.f32.mrf.mxu1 }
 0x16f   :  { %1921 = vrot.lane.b32.xlu2 %v478_v2, %s6043_s4 }
 0x170   :  { %5493 = vmatmul.msk.f32.gmra.mxu1 %vm186_vm0, %v463_v57  ;;  %1917 = vrot.lane.b32.xlu0 %v472_v63, %s6043_s4 }
 0x171   :  { %v1355_v5 = vpop.permute.xlu0 %1354  ;;  %v1074_v20 = vpop.permute.xlu2 %1073 }
 0x172   :  { %5464 = vmatmul.msk.f32.gmra.mxu0 %vm186_vm0, %v1068_v4  ;;  %5478 = vmatmul.msk.f32.gmra.mxu2 %vm186_vm0, %v1353_v11 }
 0x175   :  { %v6800_v16 = vpop.f32.mrf.mxu1 }
 0x178   :  { %5494 = vmatmul.msk.f32.gmra.mxu1 %vm186_vm0, %v466_v49 }
 0x179   :  { %v1070_v6 = vpop.permute.xlu1 %1069  ;;  %v763_v25 = vpop.permute.xlu2 %762 }
 0x17a   :  { %5465 = vmatmul.msk.f32.gmra.mxu0 %vm186_vm0, %v1070_v6  ;;  %5479 = vmatmul.msk.f32.gmra.mxu2 %vm186_vm0, %v1355_v5 }
 0x17d   :  { %v6806_v7 = vpop.f32.mrf.mxu1 }
 0x180   :  { %5495 = vmatmul.msk.f32.gmra.mxu1 %vm186_vm0, %v469_v55 }
 0x181   :  { %v1359_v10 = vpop.permute.xlu1 %1358  ;;  %v1072_v18 = vpop.permute.xlu0 %1071 }
 0x182   :  { %5466 = vmatmul.msk.f32.gmra.mxu0 %vm186_vm0, %v1072_v18  ;;  %5480 = vmatmul.msk.f32.gmra.mxu2 %vm186_vm0, %v1357_v17  ;;  %v769_v34 = vpop.permute.xlu2 %768 }
 0x185   :  { %v6811_v19 = vpop.f32.mrf.mxu1 }
 0x188   :  { %5496 = vmatmul.msk.f32.gmra.mxu1 %vm186_vm0, %v472_v63 }
 0x189   :  { %v761_v21 = vpop.permute.xlu1 %760 }
 0x18a   :  { %5439 = vmatmul.msk.f32.vlgmr.msra.gmra.mxu3 %vm186_vm0, %v761_v21  ;;  %5467 = vmatmul.msk.f32.gmra.mxu0 %vm186_vm0, %v1074_v20  ;;  %v775_v52 = vpop.permute.xlu2 %774  ;;  %v2274_v20 = vld [vmem:[%s11518_s15 + $0x70] sm:$0xff]  ;;  %v2273_v21 = vld [vmem:[%s11518_s15 + $0x68] sm:$0xff] }
 0x18b   :  { %5481 = vmatmul.msk.f32.gmra.mxu2 %vm186_vm0, %v1359_v10  ;;  %1965 = vmatpush.msra.mxu3 %v6478_v8  ;;  %v2275_v10 = vld [vmem:[%s11518_s15 + $0x78] sm:$0xff] }
 0x18c   :  { %2296 = vmatpush.msrb.mxu0 %v2275_v10 }
 0x18d   :  { %v6818_v22 = vpop.f32.mrf.mxu1  ;;  %1966 = vmatpush.msra.mxu3 %v6487_v9  ;;  %v2187_v9 = vld [vmem:[%s11514_s11 + $0x8] sm:$0xff] }
 0x18e   :  { %2297 = vmatpush.msrb.mxu0 %v2274_v20  ;;  %v2266_v20 = vld [vmem:[%s11518_s15 + $0x30] sm:$0xff] }
 0x18f   :  { %1967 = vmatpush.msra.mxu3 %v6511_v12 }
 0x190   :  { %5497 = vmatmul.msk.f32.gmra.mxu1 %vm186_vm0, %v475_v3  ;;  %2298 = vmatpush.msrb.mxu0 %v2273_v21  ;;  %v2279_v21 = vld [vmem:[%s11518_s15 + $0x98] sm:$0xff] }
 0x191   :  { %1968 = vmatpush.msra.mxu3 %v6523_v15  ;;  %v767_v30 = vpop.permute.xlu1 %766 }
 0x192   :  { %v1076_v26 = vpop.permute.xlu0 %1075  ;;  %5440 = vmatmul.msk.f32.gmra.mxu3 %vm186_vm0, %v763_v25  ;;  %v781_v6 = vpop.permute.xlu2 %780  ;;  %v2272_v25 = vld [vmem:[%s11518_s15 + $0x60] sm:$0xff] }
 0x193   :  { %5468 = vmatmul.msk.f32.gmra.mxu0 %vm186_vm0, %v1076_v26  ;;  %5518 = vmatmul.msk.f32.vlgmr.msra.gmra.mxu2 %vm82_vm1, %v2186_v24 }
 0x194   :  { %2299 = vmatpush.msrb.mxu0 %v2272_v25  ;;  %v2278_v25 = vld [vmem:[%s11518_s15 + $0x90] sm:$0xff] }
 0x195   :  { %v6830_v8 = vpop.f32.mrf.mxu1 }
 0x198   :  { %5498 = vmatmul.msk.f32.gmra.mxu1 %vm186_vm0, %v478_v2 }
 0x199   :  { %v773_v44 = vpop.permute.xlu1 %772 }
 0x19a   :  { %v765_v12 = vpop.permute.xlu0 %764 }
 0x19b   :  { %5441 = vmatmul.msk.f32.gmra.mxu3 %vm186_vm0, %v765_v12  ;;  %5519 = vmatmul.msk.f32.gmra.mxu2 %vm82_vm1, %v2187_v9 }
 0x19c   :  { %5514 = vmatmul.msk.f32.vlgmr.msra.gmra.mxu0 %vm82_vm1, %v2186_v24 }
 0x19d   :  { %v6839_v15 = vpop.f32.mrf.mxu1 }
 0x19f   :  { %v6841_v27 = vpop.f32.mrf.mxu0 }
 0x1a1   :  { %v779_v0 = vpop.permute.xlu1 %778 }
 0x1a2   :  { %v771_v39 = vpop.permute.xlu0 %770 }
 0x1a3   :  { %5442 = vmatmul.msk.f32.gmra.mxu3 %vm186_vm0, %v767_v30  ;;  %5520 = vmatmul.msk.f32.gmra.mxu2 %vm82_vm1, %v2188_v28  ;;  %v2283_v30 = vld [vmem:[%s11518_s15 + $0xb8] sm:$0xff] }
 0x1a4   :  { %5515 = vmatmul.msk.f32.gmra.mxu0 %vm82_vm1, %v2187_v9  ;;  %v2271_v9 = vld [vmem:[%s11518_s15 + $0x58] sm:$0xff]  ;;  %2333 = vmatpush.msrb.mxu2 %v2283_v30  ;;  %v2277_v30 = vld [vmem:[%s11518_s15 + $0x88] sm:$0xff] }
 0x1a5   :  { %v6849_v31 = vpop.f32.mrf.mxu1  ;;  %2300 = vmatpush.msrb.mxu0 %v2271_v9  ;;  %v787_v9 = vpop.permute.xlu2 %786 }
 0x1a6   :  { %v6880_v48 = vmul.f32 %v6849_v31, %v6849_v31 }
 0x1a7   :  { %v6851_v32 = vpop.f32.mrf.mxu0 }
 0x1aa   :  { %v777_v60 = vpop.permute.xlu0 %776 }
 0x1ab   :  { %5443 = vmatmul.msk.f32.gmra.mxu3 %vm186_vm0, %v769_v34  ;;  %5521 = vmatmul.msk.f32.gmra.mxu2 %vm82_vm1, %v2189_v33  ;;  %v2282_v34 = vld [vmem:[%s11518_s15 + $0xb0] sm:$0xff] }
 0x1ac   :  { %5516 = vmatmul.msk.f32.gmra.mxu0 %vm82_vm1, %v2188_v28  ;;  %v2270_v28 = vld [vmem:[%s11518_s15 + $0x50] sm:$0xff]  ;;  %2334 = vmatpush.msrb.mxu2 %v2282_v34  ;;  %v2263_v34 = vld [vmem:[%s11518_s15 + $0x18] sm:$0xff] }
 0x1ad   :  { %v6859_v36 = vpop.f32.mrf.mxu1  ;;  %v6861_v37 = vpop.f32.mrf.mxu2  ;;  %2301 = vmatpush.msrb.mxu0 %v2270_v28  ;;  %v2264_v28 = vld [vmem:[%s11518_s15 + $0x20] sm:$0xff] }
 0x1ae   :  { %v6899_v56 = vmul.f32 %v6859_v36, %v6859_v36 }
 0x1af   :  { %v6863_v38 = vpop.f32.mrf.mxu0 }
 0x1b0   :  { %11807 = vst [vmem:[#allocation10_spill] sm:$0xff] %v6899_v56 }
 0x1b2   :  { %v783_v24 = vpop.permute.xlu0 %782 }
 0x1b3   :  { %5444 = vmatmul.msk.f32.gmra.mxu3 %vm186_vm0, %v771_v39  ;;  %v785_v39 = vpop.permute.xlu1 %784 }
 0x1b4   :  { %5517 = vmatmul.msk.f32.gmra.mxu0 %vm82_vm1, %v2189_v33  ;;  %v2269_v33 = vld [vmem:[%s11518_s15 + $0x48] sm:$0xff] }
 0x1b5   :  { %v6867_v40 = vpop.f32.mrf.mxu1  ;;  %v6869_v42 = vpop.f32.mrf.mxu2  ;;  %2302 = vmatpush.msrb.mxu0 %v2269_v33 }
 0x1b6   :  { %v6918_v3 = vmul.f32 %v6867_v40, %v6867_v40 }
 0x1b7   :  { %v6871_v43 = vpop.f32.mrf.mxu0 }
 0x1b8   :  { %11810 = vst [vmem:[#allocation13_spill] sm:$0xff] %v6918_v3 }
 0x1bb   :  { %5445 = vmatmul.msk.f32.gmra.mxu3 %vm186_vm0, %v773_v44  ;;  %v2268_v44 = vld [vmem:[%s11518_s15 + $0x40] sm:$0xff] }
 0x1bc   :  { %2303 = vmatpush.msrb.mxu0 %v2268_v44 }
 0x1bd   :  { %v6874_v45 = vpop.f32.mrf.mxu1  ;;  %v6876_v46 = vpop.f32.mrf.mxu2 }
 0x1be   :  { %v6884_v49 = vmul.f32 %v6874_v45, %v6874_v45 }
 0x1bf   :  { %v6886_v50 = vpop.f32.mrf.mxu0 }
 0x1c0   :  { %11805 = vst [vmem:[#allocation8_spill] sm:$0xff] %v6884_v49  ;;  %v6890_v51 = vadd.f32 %v6884_v49, %v6880_v48 }
 0x1c2   :  { %11806 = vst [vmem:[#allocation9_spill] sm:$0xff] %v6890_v51 }
 0x1c3   :  { %5446 = vmatmul.msk.f32.gmra.mxu3 %vm186_vm0, %v775_v52  ;;  %v2281_v52 = vld [vmem:[%s11518_s15 + $0xa8] sm:$0xff] }
 0x1c4   :  { %2335 = vmatpush.msrb.mxu2 %v2281_v52  ;;  %v2262_v52 = vld [vmem:[%s11518_s15 + $0x10] sm:$0xff] }
 0x1c5   :  { %v6893_v53 = vpop.f32.mrf.mxu1  ;;  %v6895_v55 = vpop.f32.mrf.mxu2 }
 0x1c6   :  { %v6903_v57 = vmul.f32 %v6893_v53, %v6893_v53 }
 0x1c7   :  { %v6905_v58 = vpop.f32.mrf.mxu0 }
 0x1c8   :  { %11808 = vst [vmem:[#allocation11_spill] sm:$0xff] %v6903_v57  ;;  %v6909_v59 = vadd.f32 %v6903_v57, %v6899_v56 }
 0x1ca   :  { %11809 = vst [vmem:[#allocation12_spill] sm:$0xff] %v6909_v59 }
 0x1cb   :  { %5447 = vmatmul.msk.f32.gmra.mxu3 %vm186_vm0, %v777_v60 }
 0x1cd   :  { %v6912_v62 = vpop.f32.mrf.mxu1  ;;  %v6914_v63 = vpop.f32.mrf.mxu2 }
 0x1ce   :  { %v6922_v4 = vmul.f32 %v6912_v62, %v6912_v62 }
 0x1cf   :  { %v6924_v11 = vpop.f32.mrf.mxu0 }
 0x1d0   :  { %11811 = vst [vmem:[#allocation14_spill] sm:$0xff] %v6922_v4  ;;  %v6928_v13 = vadd.f32 %v6922_v4, %v6918_v3 }
 0x1d2   :  { %11812 = vst [vmem:[#allocation15_spill] sm:$0xff] %v6928_v13 }
 0x1d3   :  { %5448 = vmatmul.msk.f32.gmra.mxu3 %vm186_vm0, %v779_v0  ;;  %v2267_v0 = vld [vmem:[%s11518_s15 + $0x38] sm:$0xff] }
 0x1d4   :  { %2304 = vmatpush.msrb.mxu0 %v2267_v0  ;;  %v2261_v0 = vld [vmem:[%s11518_s15 + $0x8] sm:$0xff] }
 0x1d5   :  { %v6931_v2 = vpop.f32.mrf.mxu2 }
 0x1d6   :  { %2305 = vmatpush.msrb.mxu0 %v2266_v20  ;;  %v2260_v20 = vld [vmem:[%s11518_s15] sm:$0xff] }
 0x1d7   :  { %v6933_v5 = vpop.f32.mrf.mxu0 }
 0x1db   :  { %5449 = vmatmul.msk.f32.gmra.mxu3 %vm186_vm0, %v781_v6  ;;  %v2280_v6 = vld [vmem:[%s11518_s15 + $0xa0] sm:$0xff] }
 0x1dc   :  { %2336 = vmatpush.msrb.mxu2 %v2280_v6  ;;  %v789_v6 = vpop.permute.xlu0 %788 }
 0x1dd   :  { %v6936_v17 = vpop.f32.mrf.mxu2 }
 0x1de   :  { %11813 = vst [vmem:[#allocation16_spill] sm:$0xff] %v6936_v17  ;;  %2337 = vmatpush.msrb.mxu2 %v2279_v21 }
 0x1df   :  { %v6941_v18 = vpop.f32.mrf.mxu0 }
 0x1e0   :  { %11814 = vst [vmem:[#allocation17_spill] sm:$0xff] %v6941_v18  ;;  %2338 = vmatpush.msrb.mxu2 %v2278_v25  ;;  %v1361_v25 = vpop.permute.xlu1 %1360 }
 0x1e2   :  { %2339 = vmatpush.msrb.mxu2 %v2277_v30  ;;  %v1363_v30 = vpop.permute.xlu2 %1362 }
 0x1e3   :  { %5450 = vmatmul.msk.f32.gmra.mxu3 %vm186_vm0, %v783_v24  ;;  %v2265_v24 = vld [vmem:[%s11518_s15 + $0x28] sm:$0xff] }
 0x1e4   :  { %2306 = vmatpush.msrb.mxu0 %v2265_v24 }
 0x1e5   :  { %v6953_v26 = vpop.f32.mrf.mxu2 }
 0x1e6   :  { %11815 = vst [vmem:[#allocation18_spill] sm:$0xff] %v6953_v26  ;;  %2307 = vmatpush.msrb.mxu0 %v2264_v28 }
 0x1e7   :  { %v6958_v12 = vpop.f32.mrf.mxu0 }
 0x1e8   :  { %2308 = vmatpush.msrb.mxu0 %v2263_v34  ;;  %v1896_v13 = vpop.permute.xlu1 %1895 }
 0x1ea   :  { %2309 = vmatpush.msrb.mxu0 %v2262_v52 }
 0x1eb   :  { %5451 = vmatmul.msk.f32.gmra.mxu3 %vm186_vm0, %v785_v39  ;;  %v2276_v39 = vld [vmem:[%s11518_s15 + $0x80] sm:$0xff]  ;;  %s6045_s15 = smov 112  }
 0x1ec   :  { %2340 = vmatpush.msrb.mxu2 %v2276_v39  ;;  %2310 = vmatpush.msrb.mxu0 %v2261_v0  ;;  %v1894_v0 = vpop.permute.xlu0 %1893 }
 0x1ed   :  { %v6979_v60 = vpop.f32.mrf.mxu2 }
 0x1ee   :  { %11816 = vst [vmem:[#allocation19_spill] sm:$0xff] %v6979_v60  ;;  %2311 = vmatpush.msrb.mxu0 %v2260_v20 }
 0x1ef   :  { %v6987_v10 = vpop.f32.mrf.mxu0 }
 0x1f0   :  { %11817 = vst [vmem:[#allocation20_spill] sm:$0xff] %v6987_v10 }
 0x1f3   :  { %5452 = vmatmul.msk.f32.gmra.mxu3 %vm186_vm0, %v787_v9 }
 0x1f5   :  { %v7008_v33 = vpop.f32.mrf.mxu2 }
 0x1f6   :  { %11818 = vst [vmem:[#allocation21_spill] sm:$0xff] %v7008_v33 }
 0x1f7   :  { %v7016_v44 = vpop.f32.mrf.mxu0 }
 0x1f8   :  { %11819 = vst [vmem:[#allocation22_spill] sm:$0xff] %v7016_v44 }
 0x1fb   :  { %5453 = vmatmul.msk.f32.gmra.mxu3 %vm186_vm0, %v789_v6 }
 0x1fd   :  { %v7028_v21 = vpop.f32.mrf.mxu2 }
 0x1fe   :  { %11820 = vst [vmem:[#allocation23_spill] sm:$0xff] %v7028_v21 }
 0x1ff   :  { %v7030_v24 = vpop.f32.mrf.mxu0 }
 0x200   :  { %11821 = vst [vmem:[#allocation24_spill] sm:$0xff] %v7030_v24 }
 0x203   :  { %5482 = vmatmul.msk.f32.vlgmr.msrb.gmra.mxu3 %vm186_vm0, %v1361_v25 }
 0x205   :  { %v7033_v9 = vpop.f32.mrf.mxu2 }
 0x206   :  { %11822 = vst [vmem:[#allocation25_spill] sm:$0xff] %v7033_v9 }
 0x207   :  { %v7035_v28 = vpop.f32.mrf.mxu0 }
 0x208   :  { %11823 = vst [vmem:[#allocation26_spill] sm:$0xff] %v7035_v28 }
 0x20b   :  { %5483 = vmatmul.msk.f32.gmra.mxu3 %vm186_vm0, %v1363_v30 }
 0x20d   :  { %v837_v34 = vpop.f32.mrf.mxu3 }
 0x20e   :  { %v7038_v39 = vpop.f32.mrf.mxu2  ;;  %v882_v28 = vmul.f32 %v837_v34, %v837_v34 }
 0x20f   :  { %11824 = vst [vmem:[#allocation27_spill] sm:$0xff] %v7038_v39  ;;  %v1898_v39 = vpop.permute.xlu2 %1897 }
 0x210   :  { %v7040_v52 = vpop.f32.mrf.mxu0 }
 0x211   :  { %11825 = vst [vmem:[#allocation28_spill] sm:$0xff] %v7040_v52 }
 0x213   :  { %5499 = vmatmul.msk.f32.vlgmr.msra.gmra.mxu3 %vm186_vm0, %v1894_v0 }
 0x215   :  { %v840_v6 = vpop.f32.mrf.mxu3 }
 0x216   :  { %v2248_v20 = vpop.f32.mrf.mxu2 }
 0x217   :  { %5522 = vmatmul.msk.f32.vlgmr.msrb.gmra.mxu2 %vm82_vm1, %v2248_v20  ;;  %v1904_v44 = vpop.permute.xlu2 %1903 }
 0x219   :  { %v2219_v25 = vpop.f32.mrf.mxu0 }
 0x21a   :  { %2312 = vmatmul.f32.vlgmr.msrb.gmra.mxu0 %v2219_v25  ;;  %v1900_v25 = vpop.permute.xlu0 %1899 }
 0x21b   :  { %5500 = vmatmul.msk.f32.gmra.mxu3 %vm186_vm0, %v1896_v13 }
 0x21e   :  { %v843_v59 = vpop.f32.mrf.mxu3  ;;  %v2251_v51 = vpop.f32.mrf.mxu2 }
 0x21f   :  { %5523 = vmatmul.msk.f32.gmra.mxu2 %vm82_vm1, %v2251_v51  ;;  %v1910_v26 = vpop.permute.xlu2 %1909 }
 0x221   :  { %v2222_v30 = vpop.f32.mrf.mxu0 }
 0x222   :  { %2315 = vmatmul.f32.gmra.mxu0 %v2222_v30  ;;  %v883_v30 = vmul.f32 %v840_v6, %v840_v6 }
 0x223   :  { %5501 = vmatmul.msk.f32.gmra.mxu3 %vm186_vm0, %v1898_v39 }
 0x226   :  { %v846_v52 = vpop.f32.mrf.mxu3  ;;  %v2254_v0 = vpop.f32.mrf.mxu2 }
 0x227   :  { %v885_v9 = vmul.f32 %v846_v52, %v846_v52  ;;  %v7047_v24 = vmul.f32 %v846_v52, %v837_v34  ;;  %5524 = vmatmul.msk.f32.gmra.mxu2 %vm82_vm1, %v2254_v0  ;;  %v1902_v52 = vpop.permute.xlu1 %1901 }
 0x229   :  { %11826 = vst [vmem:[#allocation29_spill] sm:$0xff] %v7047_v24  ;;  %v7050_v20 = vadd.f32 %v885_v9, %v882_v28  ;;  %v2225_v13 = vpop.f32.mrf.mxu0 }
 0x22a   :  { %2318 = vmatmul.f32.gmra.mxu0 %v2225_v13 }
 0x22b   :  { %11827 = vst [vmem:[#allocation30_spill] sm:$0xff] %v7050_v20  ;;  %5502 = vmatmul.msk.f32.gmra.mxu3 %vm186_vm0, %v1900_v25  ;;  %v884_v20 = vmul.f32 %v843_v59, %v843_v59 }
 0x22e   :  { %v849_v51 = vpop.f32.mrf.mxu3  ;;  %v2257_v21 = vpop.f32.mrf.mxu2 }
 0x22f   :  { %v886_v4 = vmul.f32 %v849_v51, %v849_v51  ;;  %v7053_v39 = vmul.f32 %v849_v51, %v840_v6  ;;  %5525 = vmatmul.msk.f32.gmra.mxu2 %vm82_vm1, %v2257_v21  ;;  %v1906_v21 = vpop.permute.xlu0 %1905 }
 0x231   :  { %11828 = vst [vmem:[#allocation31_spill] sm:$0xff] %v7053_v39  ;;  %v7056_v60 = vadd.f32 %v886_v4, %v883_v30  ;;  %v2228_v34 = vpop.f32.mrf.mxu0 }
 0x232   :  { %2321 = vmatmul.f32.gmra.mxu0 %v2228_v34  ;;  %v1908_v34 = vpop.permute.xlu1 %1907 }
 0x233   :  { %11829 = vst [vmem:[#allocation32_spill] sm:$0xff] %v7056_v60  ;;  %5503 = vmatmul.msk.f32.gmra.mxu3 %vm186_vm0, %v1902_v52 }
 0x236   :  { %v852_v0 = vpop.f32.mrf.mxu3 }
 0x237   :  { %v887_v13 = vmul.f32 %v852_v0, %v852_v0  ;;  %v7059_v24 = vmul.f32 %v852_v0, %v843_v59 }
 0x239   :  { %11830 = vst [vmem:[#allocation33_spill] sm:$0xff] %v7059_v24  ;;  %v7061_v25 = vadd.f32 %v887_v13, %v884_v20  ;;  %v1912_v24 = vpop.permute.xlu0 %1911 }
 0x23b   :  { %11831 = vst [vmem:[#allocation34_spill] sm:$0xff] %v7061_v25  ;;  %5504 = vmatmul.msk.f32.gmra.mxu3 %vm186_vm0, %v1904_v44 }
 0x23e   :  { %v855_v6 = vpop.f32.mrf.mxu3 }
 0x23f   :  { %v891_v51 = vsub.f32 %v855_v6, %v882_v28 }
 0x243   :  { %5505 = vmatmul.msk.f32.gmra.mxu3 %vm186_vm0, %v1906_v21  ;;  %v1914_v21 = vpop.permute.xlu1 %1913 }
 0x246   :  { %v858_v60 = vpop.f32.mrf.mxu3 }
 0x247   :  { %v892_v39 = vsub.f32 %v858_v60, %v883_v30 }
 0x24b   :  { %5506 = vmatmul.msk.f32.gmra.mxu3 %vm186_vm0, %v1908_v34 }
 0x24e   :  { %v861_v52 = vpop.f32.mrf.mxu3 }
 0x24f   :  { %v893_v30 = vsub.f32 %v861_v52, %v884_v20  ;;  %v2414_v52 = vld [vmem:[%s11510_s7 + $0x8] sm:$0xff] }
 0x250   :  { %2684 = vmatpush.msrb.mxu3 %v2414_v52  ;;  %2445 = vmatpush.msra.mxu2 %v2414_v52 }
 0x251   :  { %2565 = vmatpush.msrb.mxu1 %v2414_v52 }
 0x253   :  { %5507 = vmatmul.msk.f32.gmra.mxu3 %vm186_vm0, %v1910_v26  ;;  %v1916_v26 = vpop.permute.xlu2 %1915 }
 0x256   :  { %v864_v59 = vpop.f32.mrf.mxu3 }
 0x257   :  { %v894_v0 = vsub.f32 %v864_v59, %v885_v9 }
 0x259   :  { %v7067_v25 = vadd.f32 %v894_v0, %v891_v51  ;;  %v1918_v51 = vpop.permute.xlu0 %1917  ;;  %v2413_v0 = vld [vmem:[%s11510_s7] sm:$0xff] }
 0x25a   :  { %2685 = vmatpush.msrb.mxu3 %v2413_v0  ;;  %2446 = vmatpush.msra.mxu2 %v2413_v0 }
 0x25b   :  { %11832 = vst [vmem:[#allocation35_spill] sm:$0xff] %v7067_v25  ;;  %5508 = vmatmul.msk.f32.gmra.mxu3 %vm186_vm0, %v1912_v24  ;;  %v1922_v59 = vpop.permute.xlu2 %1921  ;;  %2566 = vmatpush.msrb.mxu1 %v2413_v0 }
 0x25c   :  { %2922 = vmatpush.msrb.mxu2 %v2414_v52 }
 0x25d   :  { %3041 = vmatpush.msra.mxu1 %v2414_v52 }
 0x25e   :  { %v867_v44 = vpop.f32.mrf.mxu3  ;;  %2923 = vmatpush.msrb.mxu2 %v2413_v0 }
 0x25f   :  { %v895_v28 = vsub.f32 %v867_v44, %v886_v4  ;;  %v1920_v4 = vpop.permute.xlu1 %1919  ;;  %3042 = vmatpush.msra.mxu1 %v2413_v0 }
 0x261   :  { %v7070_v6 = vadd.f32 %v895_v28, %v892_v39 }
 0x263   :  { %11833 = vst [vmem:[#allocation36_spill] sm:$0xff] %v7070_v6  ;;  %5509 = vmatmul.msk.f32.gmra.mxu3 %vm186_vm0, %v1914_v21 }
 0x266   :  { %v870_v60 = vpop.f32.mrf.mxu3 }
 0x267   :  { %v896_v34 = vsub.f32 %v870_v60, %v887_v13 }
 0x269   :  { %v7073_v3 = vadd.f32 %v896_v34, %v893_v30 }
 0x26b   :  { %11834 = vst [vmem:[#allocation37_spill] sm:$0xff] %v7073_v3  ;;  %5510 = vmatmul.msk.f32.gmra.mxu3 %vm186_vm0, %v1916_v26 }
 0x26e   :  { %v7076_v9 = vpop.f32.mrf.mxu3 }
 0x26f   :  { %11835 = vst [vmem:[#allocation38_spill] sm:$0xff] %v7076_v9 }
 0x273   :  { %5511 = vmatmul.msk.f32.gmra.mxu3 %vm186_vm0, %v1918_v51 }
 0x276   :  { %v7079_v24 = vpop.f32.mrf.mxu3 }
 0x277   :  { %11836 = vst [vmem:[#allocation39_spill] sm:$0xff] %v7079_v24 }
 0x27b   :  { %5512 = vmatmul.msk.f32.gmra.mxu3 %vm186_vm0, %v1920_v4 }
 0x27e   :  { %v7082_v39 = vpop.f32.mrf.mxu3 }
 0x27f   :  { %11837 = vst [vmem:[#allocation40_spill] sm:$0xff] %v7082_v39 }
 0x283   :  { %5513 = vmatmul.msk.f32.gmra.mxu3 %vm186_vm0, %v1922_v59 }
 0x286   :  { %v7085_v20 = vpop.f32.mrf.mxu3 }
 0x287   :  { %11838 = vst [vmem:[#allocation41_spill] sm:$0xff] %v7085_v20 }
 0x28e   :  { %v7087_v13 = vpop.f32.mrf.mxu3 }
 0x28f   :  { %11839 = vst [vmem:[#allocation42_spill] sm:$0xff] %v7087_v13 }
 0x296   :  { %v7095_v44 = vpop.f32.mrf.mxu3 }
 0x297   :  { %11840 = vst [vmem:[#allocation43_spill] sm:$0xff] %v7095_v44  ;;  %v2313_v28 = vpop.f32.mrf.mxu0  ;;  %v7105_v3 = vmul.f32 %v7095_v44, %v7095_v44 }
 0x299   :  { %11844 = vst [vmem:[#allocation47_spill] sm:$0xff] %v7105_v3 }
 0x29a   :  { %v2342_v21 = vpop.f32.mrf.mxu2 }
 0x29b   :  { %v2343_v33 = vadd.f32 %v2342_v21, %v2313_v28 }
 0x29e   :  { %v7097_v60 = vpop.f32.mrf.mxu3 }
 0x29f   :  { %11841 = vst [vmem:[#allocation44_spill] sm:$0xff] %v7097_v60  ;;  %v2316_v30 = vpop.f32.mrf.mxu0  ;;  %v7119_v44 = vmul.f32 %v7097_v60, %v7097_v60 }
 0x2a1   :  { %11848 = vst [vmem:[#allocation51_spill] sm:$0xff] %v7119_v44 }
 0x2a2   :  { %v2345_v34 = vpop.f32.mrf.mxu2 }
 0x2a3   :  { %v2346_v39 = vadd.f32 %v2345_v34, %v2316_v30 }
 0x2a5   :  { %v2355_v28 = vmul.f32 %v2346_v39, %v2346_v39 }
 0x2a6   :  { %v7099_v26 = vpop.f32.mrf.mxu3 }
 0x2a7   :  { %11842 = vst [vmem:[#allocation45_spill] sm:$0xff] %v7099_v26  ;;  %v2319_v51 = vpop.f32.mrf.mxu0  ;;  %v7133_v34 = vmul.f32 %v7099_v26, %v7099_v26 }
 0x2a9   :  { %11852 = vst [vmem:[#allocation55_spill] sm:$0xff] %v7133_v34 }
 0x2aa   :  { %v2348_v4 = vpop.f32.mrf.mxu2 }
 0x2ab   :  { %v2349_v24 = vadd.f32 %v2348_v4, %v2319_v51  ;;  %v2354_v51 = vmul.f32 %v2343_v33, %v2343_v33  ;;  %v2360_v4 = vld [vmem:[%s11855_s1] sm:$0xff] }
 0x2ae   :  { %v7101_v59 = vpop.f32.mrf.mxu3 }
 0x2af   :  { %11843 = vst [vmem:[#allocation46_spill] sm:$0xff] %v7101_v59  ;;  %v7109_v6 = vmul.f32 %v7101_v59, %v7101_v59  ;;  %v2322_v25 = vpop.f32.mrf.mxu0 }
 0x2b1   :  { %11845 = vst [vmem:[#allocation48_spill] sm:$0xff] %v7109_v6  ;;  %v7113_v13 = vadd.f32 %v7109_v6, %v7105_v3 }
 0x2b2   :  { %v2351_v20 = vpop.f32.mrf.mxu2 }
 0x2b3   :  { %11846 = vst [vmem:[#allocation49_spill] sm:$0xff] %v7113_v13  ;;  %v2352_v9 = vadd.f32 %v2351_v20, %v2322_v25  ;;  %v2358_v13 = vmul.f32 %v2349_v24, %v2343_v33  ;;  %v2356_v20 = vmul.f32 %v2349_v24, %v2349_v24 }
 0x2b5   :  { %3152 = vmatpush.msra.mxu3 %v2352_v9  ;;  %v2359_v57 = vmul.f32 %v2352_v9, %v2346_v39  ;;  %v2357_v25 = vmul.f32 %v2352_v9, %v2352_v9 }
 0x2b6   :  { %v7115_v10 = vpop.f32.mrf.mxu3 }
 0x2b7   :  { %11847 = vst [vmem:[#allocation50_spill] sm:$0xff] %v7115_v10  ;;  %v7123_v59 = vmul.f32 %v7115_v10, %v7115_v10  ;;  %2387 = vmatpush.msra.mxu0 %v2359_v57  ;;  %3153 = vmatpush.msra.mxu3 %v2349_v24 }
 0x2b9   :  { %11849 = vst [vmem:[#allocation52_spill] sm:$0xff] %v7123_v59  ;;  %v7127_v30 = vadd.f32 %v7123_v59, %v7119_v44  ;;  %2388 = vmatpush.msra.mxu0 %v2358_v13  ;;  %3154 = vmatpush.msra.mxu3 %v2346_v39 }
 0x2bb   :  { %11850 = vst [vmem:[#allocation53_spill] sm:$0xff] %v7127_v30  ;;  %2389 = vmatpush.msra.mxu0 %v2357_v25  ;;  %3155 = vmatpush.msra.mxu3 %v2343_v33  ;;  %v2361_v25 = vld [vmem:[%s11855_s1 + $0x8] sm:$0xff] }
 0x2bd   :  { %2390 = vmatpush.msra.mxu0 %v2356_v20 }
 0x2be   :  { %v7129_v21 = vpop.f32.mrf.mxu3 }
 0x2bf   :  { %11851 = vst [vmem:[#allocation54_spill] sm:$0xff] %v7129_v21  ;;  %v7137_v57 = vmul.f32 %v7129_v21, %v7129_v21  ;;  %2391 = vmatpush.msra.mxu0 %v2355_v28 }
 0x2c1   :  { %11853 = vst [vmem:[#allocation56_spill] sm:$0xff] %v7137_v57  ;;  %v7141_v13 = vadd.f32 %v7137_v57, %v7133_v34  ;;  %2392 = vmatpush.msra.mxu0 %v2354_v51 }
 0x2c3   :  { %11854 = vst [vmem:[#allocation57_spill] sm:$0xff] %v7141_v13  ;;  %2393 = vmatpush.msra.mxu0 %v2352_v9  ;;  %v2362_v9 = vld [vmem:[%s11855_s1 + $0x10] sm:$0xff] }
 0x2c5   :  { %2394 = vmatpush.msra.mxu0 %v2349_v24  ;;  %v2363_v24 = vld [vmem:[%s11855_s1 + $0x18] sm:$0xff] }
 0x2c7   :  { %2395 = vmatpush.msra.mxu0 %v2346_v39 }
 0x2c9   :  { %2396 = vmatpush.msra.mxu0 %v2343_v33  ;;  %v2364_v33 = vld [vmem:[%s11855_s1 + $0x20] sm:$0xff]  ;;  %s6048_s1 = smov 120  }
 0x2ca   :  { %5526 = vmatmul.msk.f32.vlgmr.msra.gmra.mxu0 %vm2365_vm2, %v2360_v4 }
 0x2cb   :  { %2803 = vmatpush.msrb.mxu0 %v2414_v52 }
 0x2cd   :  { %2804 = vmatpush.msrb.mxu0 %v2413_v0 }
 0x2d2   :  { %5527 = vmatmul.msk.f32.gmra.mxu0 %vm2365_vm2, %v2361_v25 }
 0x2da   :  { %5528 = vmatmul.msk.f32.gmra.mxu0 %vm2365_vm2, %v2362_v9 }
 0x2e2   :  { %5529 = vmatmul.msk.f32.gmra.mxu0 %vm2365_vm2, %v2363_v24 }
 0x2ea   :  { %5530 = vmatmul.msk.f32.gmra.mxu0 %vm2365_vm2, %v2364_v33 }
 0x347   :  { %v2398_v39 = vpop.f32.mrf.mxu0 }
 0x348   :  { %2650 = vrot.lane.b32.xlu0 %v2398_v39, %s6043_s4  ;;  %5531 = vmatmul.msk.f32.vlgmr.msra.gmra.mxu2 %vm2415_vm3, %v2398_v39 }
 0x34f   :  { %v2401_v52 = vpop.f32.mrf.mxu0 }
 0x350   :  { %2652 = vrot.lane.b32.xlu1 %v2401_v52, %s6043_s4  ;;  %5532 = vmatmul.msk.f32.gmra.mxu2 %vm2415_vm3, %v2401_v52 }
 0x357   :  { %v2404_v0 = vpop.f32.mrf.mxu0 }
 0x358   :  { %2654 = vrot.lane.b32.xlu2 %v2404_v0, %s6043_s4  ;;  %5533 = vmatmul.msk.f32.gmra.mxu2 %vm2415_vm3, %v2404_v0 }
 0x35f   :  { %v2407_v20 = vpop.f32.mrf.mxu0 }
 0x360   :  { %2769 = vrot.lane.b32.xlu2 %v2398_v39, %s6044_s28  ;;  %2656 = vrot.lane.b32.xlu0 %v2407_v20, %s6043_s4 }
 0x361   :  { %5534 = vmatmul.msk.f32.gmra.mxu2 %vm2415_vm3, %v2407_v20 }
 0x367   :  { %v2410_v28 = vpop.f32.mrf.mxu0 }
 0x368   :  { %2775 = vrot.lane.b32.xlu2 %v2407_v20, %s6044_s28  ;;  %2771 = vrot.lane.b32.xlu0 %v2401_v52, %s6044_s28 }
 0x369   :  { %2658 = vrot.lane.b32.xlu1 %v2410_v28, %s6043_s4  ;;  %5535 = vmatmul.msk.f32.gmra.mxu2 %vm2415_vm3, %v2410_v28 }
 0x370   :  { %2890 = vrot.lane.b32.xlu2 %v2401_v52, %s6041_s25  ;;  %2777 = vrot.lane.b32.xlu0 %v2410_v28, %s6044_s28 }
 0x371   :  { %2773 = vrot.lane.b32.xlu1 %v2404_v0, %s6044_s28 }
 0x378   :  { %2896 = vrot.lane.b32.xlu2 %v2410_v28, %s6041_s25  ;;  %2892 = vrot.lane.b32.xlu0 %v2404_v0, %s6041_s25 }
 0x379   :  { %2888 = vrot.lane.b32.xlu1 %v2398_v39, %s6041_s25 }
 0x380   :  { %2535 = vrot.lane.b32.xlu2 %v2404_v0, %s6045_s15  ;;  %2531 = vrot.lane.b32.xlu0 %v2398_v39, %s6045_s15 }
 0x381   :  { %2894 = vrot.lane.b32.xlu1 %v2407_v20, %s6041_s25 }
 0x388   :  { %3007 = vrot.lane.b32.xlu2 %v2398_v39, %s6046_s29  ;;  %2537 = vrot.lane.b32.xlu0 %v2407_v20, %s6045_s15 }
 0x389   :  { %2533 = vrot.lane.b32.xlu1 %v2401_v52, %s6045_s15 }
 0x390   :  { %3013 = vrot.lane.b32.xlu2 %v2407_v20, %s6046_s29  ;;  %3009 = vrot.lane.b32.xlu0 %v2401_v52, %s6046_s29  ;;  %v3132_v52 = vld [vmem:[%s11515_s12] sm:$0xff] }
 0x391   :  { %2539 = vrot.lane.b32.xlu1 %v2410_v28, %s6045_s15 }
 0x398   :  { %3015 = vrot.lane.b32.xlu0 %v2410_v28, %s6046_s29 }
 0x399   :  { %3011 = vrot.lane.b32.xlu1 %v2404_v0, %s6046_s29 }
 0x3b2   :  { %v2655_v51 = vpop.permute.xlu2 %2654 }
 0x3ba   :  { %v2770_v4 = vpop.permute.xlu2 %2769  ;;  %v2651_v25 = vpop.permute.xlu0 %2650 }
 0x3bb   :  { %5541 = vmatmul.msk.f32.vlgmr.msrb.gmra.mxu3 %vm2415_vm3, %v2651_v25  ;;  %5546 = vmatmul.msk.f32.vlgmr.msrb.gmra.mxu0 %vm2415_vm3, %v2770_v4  ;;  %v3133_v25 = vld [vmem:[%s11515_s12 + $0x8] sm:$0xff]  ;;  %s11929_s12 = sld [smem:[#allocation240_spill]] }
 0x3c2   :  { %v2653_v9 = vpop.permute.xlu1 %2652  ;;  %v2776_v28 = vpop.permute.xlu2 %2775 }
 0x3c3   :  { %5542 = vmatmul.msk.f32.gmra.mxu3 %vm2415_vm3, %v2653_v9 }
 0x3cb   :  { %5543 = vmatmul.msk.f32.gmra.mxu3 %vm2415_vm3, %v2655_v51  ;;  %v7190_v51 = vpop.f32.mrf.mxu3 }
 0x3cc   :  { %11856 = vst [vmem:[#allocation58_spill] sm:$0xff] %v7190_v51 }
 0x3d2   :  { %v2657_v24 = vpop.permute.xlu0 %2656 }
 0x3d3   :  { %5544 = vmatmul.msk.f32.gmra.mxu3 %vm2415_vm3, %v2657_v24  ;;  %v2891_v24 = vpop.permute.xlu2 %2890 }
 0x3da   :  { %v2772_v33 = vpop.permute.xlu0 %2771 }
 0x3db   :  { %v2659_v39 = vpop.permute.xlu1 %2658  ;;  %5547 = vmatmul.msk.f32.gmra.mxu0 %vm2415_vm3, %v2772_v33  ;;  %v7198_v33 = vpop.f32.mrf.mxu3 }
 0x3dc   :  { %5545 = vmatmul.msk.f32.gmra.mxu3 %vm2415_vm3, %v2659_v39  ;;  %11857 = vst [vmem:[#allocation59_spill] sm:$0xff] %v7198_v33 }
 0x3e2   :  { %v2778_v0 = vpop.permute.xlu0 %2777 }
 0x3e3   :  { %v2774_v20 = vpop.permute.xlu1 %2773  ;;  %v7203_v13 = vpop.f32.mrf.mxu3 }
 0x3e4   :  { %5548 = vmatmul.msk.f32.gmra.mxu0 %vm2415_vm3, %v2774_v20  ;;  %5561 = vmatmul.msk.f32.vlgmr.msra.gmra.mxu3 %vm186_vm0, %v3132_v52  ;;  %v2897_v20 = vpop.permute.xlu2 %2896  ;;  %11858 = vst [vmem:[#allocation60_spill] sm:$0xff] %v7203_v13 }
 0x3ea   :  { %v2893_v4 = vpop.permute.xlu0 %2892 }
 0x3eb   :  { %v2889_v9 = vpop.permute.xlu1 %2888 }
 0x3ec   :  { %5549 = vmatmul.msk.f32.gmra.mxu0 %vm2415_vm3, %v2776_v28  ;;  %5551 = vmatmul.msk.f32.vlgmr.msrb.gmra.mxu2 %vm2415_vm3, %v2889_v9  ;;  %v2536_v28 = vpop.permute.xlu2 %2535 }
 0x3ed   :  { %5562 = vmatmul.msk.f32.gmra.mxu3 %vm186_vm0, %v3133_v25  ;;  %v7207_v25 = vpop.f32.mrf.mxu3 }
 0x3ee   :  { %11859 = vst [vmem:[#allocation61_spill] sm:$0xff] %v7207_v25 }
 0x3f2   :  { %v2532_v39 = vpop.permute.xlu0 %2531 }
 0x3f3   :  { %v2895_v52 = vpop.permute.xlu1 %2894  ;;  %5536 = vmatmul.msk.f32.vlgmr.msrb.gmra.mxu1 %vm2415_vm3, %v2532_v39 }
 0x3f4   :  { %5550 = vmatmul.msk.f32.gmra.mxu0 %vm2415_vm3, %v2778_v0  ;;  %5552 = vmatmul.msk.f32.gmra.mxu2 %vm2415_vm3, %v2891_v24 }
 0x3f5   :  { %v7213_v0 = vpop.f32.mrf.mxu3 }
 0x3f6   :  { %11860 = vst [vmem:[#allocation62_spill] sm:$0xff] %v7213_v0 }
 0x3fa   :  { %v2538_v9 = vpop.permute.xlu0 %2537 }
 0x3fb   :  { %v2534_v30 = vpop.permute.xlu1 %2533 }
 0x3fc   :  { %5537 = vmatmul.msk.f32.gmra.mxu1 %vm2415_vm3, %v2534_v30  ;;  %5553 = vmatmul.msk.f32.gmra.mxu2 %vm2415_vm3, %v2893_v4  ;;  %v3008_v4 = vpop.permute.xlu2 %3007 }
 0x3fd   :  { %v7216_v30 = vpop.f32.mrf.mxu3 }
 0x3fe   :  { %11861 = vst [vmem:[#allocation63_spill] sm:$0xff] %v7216_v30 }
 0x403   :  { %v2540_v24 = vpop.permute.xlu1 %2539 }
 0x404   :  { %5538 = vmatmul.msk.f32.gmra.mxu1 %vm2415_vm3, %v2536_v28  ;;  %5554 = vmatmul.msk.f32.gmra.mxu2 %vm2415_vm3, %v2895_v52  ;;  %v3010_v28 = vpop.permute.xlu0 %3009 }
 0x405   :  { %v7219_v39 = vpop.f32.mrf.mxu3 }
 0x406   :  { %11862 = vst [vmem:[#allocation64_spill] sm:$0xff] %v7219_v39 }
 0x40b   :  { %v3012_v52 = vpop.permute.xlu1 %3011 }
 0x40c   :  { %5539 = vmatmul.msk.f32.gmra.mxu1 %vm2415_vm3, %v2538_v9  ;;  %5555 = vmatmul.msk.f32.gmra.mxu2 %vm2415_vm3, %v2897_v20  ;;  %v3174_v20 = vld [vmem:[%s11519_s16 + $0x58] sm:$0xff]  ;;  %v3173_v9 = vld [vmem:[%s11519_s16 + $0x50] sm:$0xff]  ;;  %v3016_v34 = vpop.permute.xlu0 %3015 }
 0x40d   :  { %v7222_v13 = vpop.f32.mrf.mxu3  ;;  %3186 = vmatpush.msra.mxu0 %v3174_v20  ;;  %v3170_v20 = vld [vmem:[%s11519_s16 + $0x38] sm:$0xff] }
 0x40e   :  { %11863 = vst [vmem:[#allocation65_spill] sm:$0xff] %v7222_v13 }
 0x40f   :  { %3187 = vmatpush.msra.mxu0 %v3173_v9  ;;  %v3169_v9 = vld [vmem:[%s11519_s16 + $0x30] sm:$0xff] }
 0x414   :  { %5540 = vmatmul.msk.f32.gmra.mxu1 %vm2415_vm3, %v2540_v24  ;;  %v3172_v24 = vld [vmem:[%s11519_s16 + $0x48] sm:$0xff] }
 0x415   :  { %3188 = vmatpush.msra.mxu0 %v3172_v24  ;;  %v3168_v24 = vld [vmem:[%s11519_s16 + $0x28] sm:$0xff] }
 0x41c   :  { %5556 = vmatmul.msk.f32.vlgmr.msra.gmra.mxu1 %vm2415_vm3, %v3008_v4  ;;  %v3014_v4 = vpop.permute.xlu2 %3013 }
 0x424   :  { %5557 = vmatmul.msk.f32.gmra.mxu1 %vm2415_vm3, %v3010_v28  ;;  %v7235_v28 = vpop.f32.mrf.mxu3 }
 0x425   :  { %11864 = vst [vmem:[#allocation66_spill] sm:$0xff] %v7235_v28  ;;  %v3165_v28 = vld [vmem:[%s11519_s16 + $0x10] sm:$0xff] }
 0x42c   :  { %5558 = vmatmul.msk.f32.gmra.mxu1 %vm2415_vm3, %v3012_v52  ;;  %v3171_v52 = vld [vmem:[%s11519_s16 + $0x40] sm:$0xff] }
 0x42d   :  { %3189 = vmatpush.msra.mxu0 %v3171_v52  ;;  %v3167_v52 = vld [vmem:[%s11519_s16 + $0x20] sm:$0xff] }
 0x42f   :  { %3190 = vmatpush.msra.mxu0 %v3170_v20  ;;  %v3166_v20 = vld [vmem:[%s11519_s16 + $0x18] sm:$0xff] }
 0x431   :  { %3191 = vmatpush.msra.mxu0 %v3169_v9 }
 0x433   :  { %3192 = vmatpush.msra.mxu0 %v3168_v24  ;;  %v3163_v24 = vld [vmem:[%s11519_s16] sm:$0xff] }
 0x434   :  { %5559 = vmatmul.msk.f32.gmra.mxu1 %vm2415_vm3, %v3014_v4 }
 0x435   :  { %3193 = vmatpush.msra.mxu0 %v3167_v52 }
 0x437   :  { %3194 = vmatpush.msra.mxu0 %v3166_v20 }
 0x439   :  { %3195 = vmatpush.msra.mxu0 %v3165_v28  ;;  %v7275_v28 = vpop.f32.mrf.mxu0 }
 0x43a   :  { %11870 = vst [vmem:[#allocation72_spill] sm:$0xff] %v7275_v28 }
 0x43c   :  { %5560 = vmatmul.msk.f32.gmra.mxu1 %vm2415_vm3, %v3016_v34  ;;  %v3164_v34 = vld [vmem:[%s11519_s16 + $0x8] sm:$0xff] }
 0x43d   :  { %3196 = vmatpush.msra.mxu0 %v3164_v34 }
 0x43e   :  { %v7250_v4 = vpop.f32.mrf.mxu3 }
 0x43f   :  { %11865 = vst [vmem:[#allocation67_spill] sm:$0xff] %v7250_v4  ;;  %3197 = vmatpush.msra.mxu0 %v3163_v24  ;;  %v3261_v24 = vld [vmem:[%s11511_s8] sm:$0xff]  ;;  %s6050_s8 = smov 124  }
 0x440   :  { %3499 = vmatpush.msrb.mxu1 %v3261_v24  ;;  %3293 = vmatpush.msrb.mxu3 %v3261_v24 }
 0x441   :  { %3396 = vmatpush.msrb.mxu0 %v3261_v24 }
 0x442   :  { %3705 = vmatpush.msra.mxu3 %v3261_v24 }
 0x446   :  { %v7264_v9 = vpop.f32.mrf.mxu3 }
 0x447   :  { %11866 = vst [vmem:[#allocation68_spill] sm:$0xff] %v7264_v9 }
 0x44e   :  { %v7269_v52 = vpop.f32.mrf.mxu3 }
 0x44f   :  { %11867 = vst [vmem:[#allocation69_spill] sm:$0xff] %v7269_v52 }
 0x456   :  { %v7271_v20 = vpop.f32.mrf.mxu3 }
 0x457   :  { %11868 = vst [vmem:[#allocation70_spill] sm:$0xff] %v7271_v20  ;;  %v3208_v20 = vld [vmem:[%s11875_s26] sm:$0xff] }
 0x458   :  { %v7277_v9 = vpop.f32.mrf.mxu0 }
 0x459   :  { %11871 = vst [vmem:[#allocation73_spill] sm:$0xff] %v7277_v9 }
 0x45f   :  { %v7273_v4 = vpop.f32.mrf.mxu3 }
 0x460   :  { %11869 = vst [vmem:[#allocation71_spill] sm:$0xff] %v7273_v4 }
 0x461   :  { %v7279_v34 = vpop.f32.mrf.mxu0 }
 0x462   :  { %11872 = vst [vmem:[#allocation74_spill] sm:$0xff] %v7279_v34 }
 0x467   :  { %v3157_v33 = vpop.f32.mrf.mxu3 }
 0x468   :  { %5563 = vmatmul.msk.f32.vlgmr.msra.gmra.mxu0 %vm3175_vm4, %v3157_v33 }
 0x469   :  { %3808 = vmatpush.msra.mxu0 %v3261_v24  ;;  %v7284_v4 = vpop.f32.mrf.mxu0 }
 0x46a   :  { %11873 = vst [vmem:[#allocation75_spill] sm:$0xff] %v7284_v4 }
 0x470   :  { %v3160_v44 = vpop.f32.mrf.mxu3 }
 0x471   :  { %5564 = vmatmul.msk.f32.gmra.mxu0 %vm3175_vm4, %v3160_v44  ;;  %v7286_v33 = vpop.f32.mrf.mxu0 }
 0x472   :  { %11874 = vst [vmem:[#allocation76_spill] sm:$0xff] %v7286_v33  ;;  %v3209_v33 = vld [vmem:[%s11875_s26 + $0x8] sm:$0xff] }
 0x4e5   :  { %v3199_v44 = vpop.f32.mrf.mxu0 }
 0x4e6   :  { %v3205_v9 = vmul.f32 %v3199_v44, %v3199_v44 }
 0x4ee   :  { %v3202_v52 = vpop.f32.mrf.mxu0 }
 0x4ef   :  { %3900 = vmatpush.msra.mxu1 %v3202_v52  ;;  %v3207_v28 = vmul.f32 %v3202_v52, %v3199_v44  ;;  %v3206_v34 = vmul.f32 %v3202_v52, %v3202_v52 }
 0x4f1   :  { %3240 = vmatpush.msra.mxu2 %v3207_v28  ;;  %3901 = vmatpush.msra.mxu1 %v3199_v44  ;;  %v3210_v28 = vld [vmem:[%s11875_s26 + $0x10] sm:$0xff] }
 0x4f3   :  { %3241 = vmatpush.msra.mxu2 %v3206_v34 }
 0x4f5   :  { %3242 = vmatpush.msra.mxu2 %v3205_v9  ;;  %v3211_v9 = vld [vmem:[%s11875_s26 + $0x18] sm:$0xff] }
 0x4f7   :  { %3243 = vmatpush.msra.mxu2 %v3202_v52  ;;  %v3212_v52 = vld [vmem:[%s11875_s26 + $0x20] sm:$0xff]  ;;  %s6052_s26 = smov 108  }
 0x4f9   :  { %3244 = vmatpush.msra.mxu2 %v3199_v44 }
 0x4fa   :  { %5565 = vmatmul.msk.f32.vlgmr.msra.gmra.mxu2 %vm3213_vm5, %v3208_v20  ;;  %v7303_v20 = vpop.f32.mrf.mxu2 }
 0x4fb   :  { %3602 = vmatpush.msrb.mxu2 %v3261_v24  ;;  %11876 = vst [vmem:[#allocation77_spill] sm:$0xff] %v7303_v20 }
 0x502   :  { %5566 = vmatmul.msk.f32.gmra.mxu2 %vm3213_vm5, %v3209_v33  ;;  %v7305_v34 = vpop.f32.mrf.mxu2 }
 0x503   :  { %11877 = vst [vmem:[#allocation78_spill] sm:$0xff] %v7305_v34 }
 0x50a   :  { %5567 = vmatmul.msk.f32.gmra.mxu2 %vm3213_vm5, %v3210_v28  ;;  %v7307_v24 = vpop.f32.mrf.mxu2 }
 0x50b   :  { %11878 = vst [vmem:[#allocation79_spill] sm:$0xff] %v7307_v24 }
 0x512   :  { %5568 = vmatmul.msk.f32.gmra.mxu2 %vm3213_vm5, %v3211_v9  ;;  %v7309_v33 = vpop.f32.mrf.mxu2 }
 0x513   :  { %11879 = vst [vmem:[#allocation80_spill] sm:$0xff] %v7309_v33 }
 0x51a   :  { %5569 = vmatmul.msk.f32.gmra.mxu2 %vm3213_vm5, %v3212_v52  ;;  %v7311_v44 = vpop.f32.mrf.mxu2 }
 0x51b   :  { %11880 = vst [vmem:[#allocation81_spill] sm:$0xff] %v7311_v44 }
 0x522   :  { %v7313_v28 = vpop.f32.mrf.mxu2 }
 0x523   :  { %11881 = vst [vmem:[#allocation82_spill] sm:$0xff] %v7313_v28  ;;  %v7366_v28 = vpop.f32.mrf.mxu1 }
 0x52a   :  { %v7315_v4 = vpop.f32.mrf.mxu2 }
 0x52b   :  { %11882 = vst [vmem:[#allocation83_spill] sm:$0xff] %v7315_v4  ;;  %v7372_v4 = vpop.f32.mrf.mxu1 }
 0x52c   :  { %11886 = vst [vmem:[#allocation87_spill] sm:$0xff] %v7372_v4 }
 0x532   :  { %v7317_v9 = vpop.f32.mrf.mxu2 }
 0x533   :  { %11883 = vst [vmem:[#allocation84_spill] sm:$0xff] %v7317_v9  ;;  %v7377_v24 = vpop.f32.mrf.mxu1 }
 0x534   :  { %11887 = vst [vmem:[#allocation88_spill] sm:$0xff] %v7377_v24 }
 0x53a   :  { %v7319_v13 = vpop.f32.mrf.mxu2 }
 0x53b   :  { %11884 = vst [vmem:[#allocation85_spill] sm:$0xff] %v7319_v13  ;;  %v7379_v33 = vpop.f32.mrf.mxu1 }
 0x53c   :  { %11888 = vst [vmem:[#allocation89_spill] sm:$0xff] %v7379_v33 }
 0x542   :  { %v7321_v39 = vpop.f32.mrf.mxu2 }
 0x543   :  { %11885 = vst [vmem:[#allocation86_spill] sm:$0xff] %v7321_v39  ;;  %v7381_v20 = vpop.f32.mrf.mxu1 }
 0x544   :  { %11889 = vst [vmem:[#allocation90_spill] sm:$0xff] %v7381_v20 }
 0x54b   :  { %v7383_v34 = vpop.f32.mrf.mxu1 }
 0x54c   :  { %11890 = vst [vmem:[#allocation91_spill] sm:$0xff] %v7383_v34 }
 0x553   :  { %v7385_v30 = vpop.f32.mrf.mxu1 }
 0x554   :  { %11891 = vst [vmem:[#allocation92_spill] sm:$0xff] %v7385_v30 }
 0x55b   :  { %v7389_v0 = vpop.f32.mrf.mxu1 }
 0x55c   :  { %11892 = vst [vmem:[#allocation93_spill] sm:$0xff] %v7389_v0 }
 0x563   :  { %v7394_v21 = vpop.f32.mrf.mxu1 }
 0x564   :  { %11894 = vst [vmem:[#allocation95_spill] sm:$0xff] %v7394_v21  ;;  %v3882_v21 = vld [vmem:[%s11516_s13] sm:$0xff] }
 0x57d   :  { %v7323_v52 = vpop.f32.mrf.mxu2 }
 0x57e   :  { %3464 = vrot.lane.b32.xlu1 %v7323_v52, %s6045_s15  ;;  %5570 = vmatmul.msk.f32.vlgmr.msrb.gmra.mxu3 %vm3262_vm6, %v7323_v52 }
 0x585   :  { %v7329_v44 = vpop.f32.mrf.mxu2 }
 0x586   :  { %5571 = vmatmul.msk.f32.gmra.mxu3 %vm3262_vm6, %v7329_v44  ;;  %3466 = vrot.lane.b32.xlu2 %v7329_v44, %s6045_s15 }
 0x58d   :  { %v7335_v9 = vpop.f32.mrf.mxu2 }
 0x58e   :  { %3468 = vrot.lane.b32.xlu0 %v7335_v9, %s6045_s15  ;;  %5572 = vmatmul.msk.f32.gmra.mxu3 %vm3262_vm6, %v7335_v9 }
 0x595   :  { %v7341_v39 = vpop.f32.mrf.mxu2 }
 0x596   :  { %3567 = vrot.lane.b32.xlu0 %v7323_v52, %s6047_s21  ;;  %3470 = vrot.lane.b32.xlu1 %v7341_v39, %s6045_s15 }
 0x597   :  { %5573 = vmatmul.msk.f32.gmra.mxu3 %vm3262_vm6, %v7341_v39 }
 0x59d   :  { %v7348_v13 = vpop.f32.mrf.mxu2 }
 0x59e   :  { %3573 = vrot.lane.b32.xlu0 %v7341_v39, %s6047_s21  ;;  %3569 = vrot.lane.b32.xlu1 %v7329_v44, %s6047_s21 }
 0x59f   :  { %3472 = vrot.lane.b32.xlu2 %v7348_v13, %s6045_s15  ;;  %5574 = vmatmul.msk.f32.gmra.mxu3 %vm3262_vm6, %v7348_v13 }
 0x5a6   :  { %3363 = vrot.lane.b32.xlu0 %v7329_v44, %s6048_s1  ;;  %3575 = vrot.lane.b32.xlu1 %v7348_v13, %s6047_s21 }
 0x5a7   :  { %3571 = vrot.lane.b32.xlu2 %v7335_v9, %s6047_s21 }
 0x5ae   :  { %3369 = vrot.lane.b32.xlu0 %v7348_v13, %s6048_s1  ;;  %3365 = vrot.lane.b32.xlu1 %v7335_v9, %s6048_s1 }
 0x5af   :  { %3361 = vrot.lane.b32.xlu2 %v7323_v52, %s6048_s1 }
 0x5b6   :  { %3777 = vrot.lane.b32.xlu0 %v7335_v9, %s6049_s22  ;;  %3773 = vrot.lane.b32.xlu1 %v7323_v52, %s6049_s22 }
 0x5b7   :  { %3367 = vrot.lane.b32.xlu2 %v7341_v39, %s6048_s1 }
 0x5be   :  { %3779 = vrot.lane.b32.xlu1 %v7341_v39, %s6049_s22 }
 0x5bf   :  { %3775 = vrot.lane.b32.xlu2 %v7329_v44, %s6049_s22 }
 0x5c7   :  { %3781 = vrot.lane.b32.xlu2 %v7348_v13, %s6049_s22 }
 0x5e0   :  { %v3467_v51 = vpop.permute.xlu2 %3466 }
 0x5f0   :  { %v3465_v57 = vpop.permute.xlu1 %3464 }
 0x5f1   :  { %5580 = vmatmul.msk.f32.vlgmr.msrb.gmra.mxu1 %vm3262_vm6, %v3465_v57  ;;  %v7401_v57 = vpop.f32.mrf.mxu1 }
 0x5f2   :  { %11896 = vst [vmem:[#allocation97_spill] sm:$0xff] %v7401_v57 }
 0x5f9   :  { %v3473_v3 = vpop.permute.xlu2 %3472  ;;  %5581 = vmatmul.msk.f32.gmra.mxu1 %vm3262_vm6, %v3467_v51 }
 0x600   :  { %v3469_v59 = vpop.permute.xlu0 %3468 }
 0x601   :  { %v3572_v25 = vpop.permute.xlu2 %3571  ;;  %v7391_v6 = vpop.f32.mrf.mxu3  ;;  %5582 = vmatmul.msk.f32.gmra.mxu1 %vm3262_vm6, %v3469_v59 }
 0x602   :  { %11893 = vst [vmem:[#allocation94_spill] sm:$0xff] %v7391_v6  ;;  %v7405_v59 = vpop.f32.mrf.mxu1 }
 0x603   :  { %11897 = vst [vmem:[#allocation98_spill] sm:$0xff] %v7405_v59 }
 0x608   :  { %v3471_v26 = vpop.permute.xlu1 %3470  ;;  %v3568_v10 = vpop.permute.xlu0 %3567 }
 0x609   :  { %v3362_v60 = vpop.permute.xlu2 %3361  ;;  %v7396_v30 = vpop.f32.mrf.mxu3  ;;  %5583 = vmatmul.msk.f32.gmra.mxu1 %vm3262_vm6, %v3471_v26  ;;  %5585 = vmatmul.msk.f32.vlgmr.msrb.gmra.mxu2 %vm3262_vm6, %v3568_v10 }
 0x60a   :  { %11895 = vst [vmem:[#allocation96_spill] sm:$0xff] %v7396_v30  ;;  %5575 = vmatmul.msk.f32.vlgmr.msrb.gmra.mxu0 %vm3262_vm6, %v3362_v60  ;;  %v7412_v10 = vmul.f32 %v7396_v30, %v7396_v30  ;;  %v7416_v60 = vmul.f32 %v7391_v6, %v7391_v6  ;;  %v7425_v20 = vpop.f32.mrf.mxu1 }
 0x60b   :  { %11901 = vst [vmem:[#allocation102_spill] sm:$0xff] %v7425_v20 }
 0x60c   :  { %11898 = vst [vmem:[#allocation99_spill] sm:$0xff] %v7412_v10 }
 0x60d   :  { %11899 = vst [vmem:[#allocation100_spill] sm:$0xff] %v7416_v60 }
 0x610   :  { %v3570_v51 = vpop.permute.xlu1 %3569  ;;  %v3574_v0 = vpop.permute.xlu0 %3573 }
 0x611   :  { %v3301_v34 = vpop.f32.mrf.mxu3  ;;  %5584 = vmatmul.msk.f32.gmra.mxu1 %vm3262_vm6, %v3473_v3  ;;  %5586 = vmatmul.msk.f32.gmra.mxu2 %vm3262_vm6, %v3570_v51  ;;  %v3368_v6 = vpop.permute.xlu2 %3367 }
 0x612   :  { %v3313_v51 = vsub.f32 %v3301_v34, %v7416_v60 }
 0x618   :  { %v3576_v26 = vpop.permute.xlu1 %3575  ;;  %v3364_v24 = vpop.permute.xlu0 %3363 }
 0x619   :  { %5576 = vmatmul.msk.f32.gmra.mxu0 %vm3262_vm6, %v3364_v24  ;;  %5587 = vmatmul.msk.f32.gmra.mxu2 %vm3262_vm6, %v3572_v25  ;;  %v7431_v25 = vpop.f32.mrf.mxu1 }
 0x61a   :  { %v3304_v3 = vpop.f32.mrf.mxu3  ;;  %5600 = vmatmul.msk.f32.vlgmr.msra.gmra.mxu1 %vm2415_vm3, %v3882_v21  ;;  %11902 = vst [vmem:[#allocation103_spill] sm:$0xff] %v7431_v25 }
 0x61b   :  { %v3314_v57 = vsub.f32 %v3304_v3, %v7412_v10 }
 0x61d   :  { %v7423_v59 = vadd.f32 %v3314_v57, %v3313_v51 }
 0x61f   :  { %11900 = vst [vmem:[#allocation101_spill] sm:$0xff] %v7423_v59 }
 0x620   :  { %v3366_v30 = vpop.permute.xlu1 %3365  ;;  %v3370_v21 = vpop.permute.xlu0 %3369 }
 0x621   :  { %5577 = vmatmul.msk.f32.gmra.mxu0 %vm3262_vm6, %v3366_v30  ;;  %5588 = vmatmul.msk.f32.gmra.mxu2 %vm3262_vm6, %v3574_v0  ;;  %v7434_v34 = vpop.f32.mrf.mxu1  ;;  %v3776_v30 = vpop.permute.xlu2 %3775 }
 0x622   :  { %11903 = vst [vmem:[#allocation104_spill] sm:$0xff] %v7434_v34 }
 0x628   :  { %v3774_v24 = vpop.permute.xlu1 %3773 }
 0x629   :  { %5578 = vmatmul.msk.f32.gmra.mxu0 %vm3262_vm6, %v3368_v6  ;;  %5589 = vmatmul.msk.f32.gmra.mxu2 %vm3262_vm6, %v3576_v26  ;;  %v7437_v57 = vpop.f32.mrf.mxu1  ;;  %v3778_v6 = vpop.permute.xlu0 %3777 }
 0x62a   :  { %11904 = vst [vmem:[#allocation105_spill] sm:$0xff] %v7437_v57  ;;  %v3782_v51 = vpop.permute.xlu2 %3781 }
 0x630   :  { %v3780_v26 = vpop.permute.xlu1 %3779 }
 0x631   :  { %5579 = vmatmul.msk.f32.gmra.mxu0 %vm3262_vm6, %v3370_v21  ;;  %v7440_v0 = vpop.f32.mrf.mxu1 }
 0x632   :  { %11905 = vst [vmem:[#allocation106_spill] sm:$0xff] %v7440_v0 }
 0x639   :  { %5595 = vmatmul.msk.f32.vlgmr.msra.gmra.mxu0 %vm3262_vm6, %v3774_v24  ;;  %v7444_v3 = vpop.f32.mrf.mxu1 }
 0x63a   :  { %11906 = vst [vmem:[#allocation107_spill] sm:$0xff] %v7444_v3 }
 0x641   :  { %5596 = vmatmul.msk.f32.gmra.mxu0 %vm3262_vm6, %v3776_v30  ;;  %v7447_v21 = vpop.f32.mrf.mxu1  ;;  %v3911_v30 = vld [vmem:[%s11520_s17 + $0x28] sm:$0xff] }
 0x642   :  { %11907 = vst [vmem:[#allocation108_spill] sm:$0xff] %v7447_v21  ;;  %3926 = vmatpush.msra.mxu2 %v3911_v30  ;;  %v3907_v30 = vld [vmem:[%s11520_s17 + $0x8] sm:$0xff] }
 0x649   :  { %5597 = vmatmul.msk.f32.gmra.mxu0 %vm3262_vm6, %v3778_v6  ;;  %v7449_v24 = vpop.f32.mrf.mxu1  ;;  %v3910_v6 = vld [vmem:[%s11520_s17 + $0x20] sm:$0xff] }
 0x64a   :  { %11908 = vst [vmem:[#allocation109_spill] sm:$0xff] %v7449_v24  ;;  %3927 = vmatpush.msra.mxu2 %v3910_v6  ;;  %v3906_v6 = vld [vmem:[%s11520_s17] sm:$0xff] }
 0x651   :  { %5598 = vmatmul.msk.f32.gmra.mxu0 %vm3262_vm6, %v3780_v26  ;;  %v3909_v26 = vld [vmem:[%s11520_s17 + $0x18] sm:$0xff] }
 0x652   :  { %3928 = vmatpush.msra.mxu2 %v3909_v26 }
 0x659   :  { %5599 = vmatmul.msk.f32.gmra.mxu0 %vm3262_vm6, %v3782_v51  ;;  %v3908_v51 = vld [vmem:[%s11520_s17 + $0x10] sm:$0xff] }
 0x65a   :  { %3929 = vmatpush.msra.mxu2 %v3908_v51 }
 0x65c   :  { %3930 = vmatpush.msra.mxu2 %v3907_v30 }
 0x65e   :  { %3931 = vmatpush.msra.mxu2 %v3906_v6 }
 0x66e   :  { %v7454_v59 = vpop.f32.mrf.mxu1 }
 0x66f   :  { %11909 = vst [vmem:[#allocation110_spill] sm:$0xff] %v7454_v59  ;;  %v7475_v26 = vmul.f32 %v7454_v59, %v7454_v59 }
 0x671   :  { %11911 = vst [vmem:[#allocation112_spill] sm:$0xff] %v7475_v26 }
 0x676   :  { %v7468_v10 = vpop.f32.mrf.mxu1 }
 0x677   :  { %11910 = vst [vmem:[#allocation111_spill] sm:$0xff] %v7468_v10  ;;  %v7479_v51 = vmul.f32 %v7468_v10, %v7468_v10 }
 0x679   :  { %11912 = vst [vmem:[#allocation113_spill] sm:$0xff] %v7479_v51 }
 0x67e   :  { %v3507_v60 = vpop.f32.mrf.mxu1 }
 0x67f   :  { %v3519_v24 = vsub.f32 %v3507_v60, %v7475_v26 }
 0x686   :  { %v3510_v3 = vpop.f32.mrf.mxu1 }
 0x687   :  { %v3520_v30 = vsub.f32 %v3510_v3, %v7479_v51  ;;  %v7487_v57 = vpop.f32.mrf.mxu0 }
 0x688   :  { %11915 = vst [vmem:[#allocation116_spill] sm:$0xff] %v7487_v57 }
 0x689   :  { %v7483_v21 = vadd.f32 %v3520_v30, %v3519_v24 }
 0x68b   :  { %11913 = vst [vmem:[#allocation114_spill] sm:$0xff] %v7483_v21 }
 0x68c   :  { %v7485_v20 = vpop.f32.mrf.mxu2 }
 0x68d   :  { %11914 = vst [vmem:[#allocation115_spill] sm:$0xff] %v7485_v20  ;;  %v7499_v60 = vmul.f32 %v7485_v20, %v7485_v20 }
 0x68e   :  { %v7489_v6 = vpop.f32.mrf.mxu1 }
 0x68f   :  { %11916 = vst [vmem:[#allocation117_spill] sm:$0xff] %v7489_v6 }
 0x690   :  { %11920 = vst [vmem:[#allocation121_spill] sm:$0xff] %v7499_v60 }
 0x694   :  { %v7491_v0 = vpop.f32.mrf.mxu2 }
 0x695   :  { %11917 = vst [vmem:[#allocation118_spill] sm:$0xff] %v7491_v0  ;;  %v7503_v3 = vmul.f32 %v7491_v0, %v7491_v0 }
 0x696   :  { %v7493_v59 = vpop.f32.mrf.mxu0 }
 0x697   :  { %11918 = vst [vmem:[#allocation119_spill] sm:$0xff] %v7493_v59  ;;  %v3903_v10 = vpop.f32.mrf.mxu1 }
 0x698   :  { %5601 = vmatmul.msk.f32.vlgmr.msra.gmra.mxu2 %vm3912_vm7, %v3903_v10  ;;  %11921 = vst [vmem:[#allocation122_spill] sm:$0xff] %v7503_v3 }
 0x69c   :  { %v3610_v34 = vpop.f32.mrf.mxu2 }
 0x69d   :  { %v3622_v30 = vsub.f32 %v3610_v34, %v7499_v60 }
 0x69e   :  { %v7495_v25 = vpop.f32.mrf.mxu0 }
 0x69f   :  { %11919 = vst [vmem:[#allocation120_spill] sm:$0xff] %v7495_v25 }
 0x6a4   :  { %v3613_v24 = vpop.f32.mrf.mxu2 }
 0x6a5   :  { %v3623_v21 = vsub.f32 %v3613_v24, %v7503_v3  ;;  %v3944_v24 = vld [vmem:[%s11929_s12 + $0x10] sm:$0xff] }
 0x6a6   :  { %v7507_v51 = vpop.f32.mrf.mxu0 }
 0x6a7   :  { %11922 = vst [vmem:[#allocation123_spill] sm:$0xff] %v7507_v51  ;;  %v7509_v26 = vadd.f32 %v3623_v21, %v3622_v30  ;;  %v7522_v21 = vld [vmem:[%s11512_s9] sm:$0xf]  ;;  %v3945_v30 = vld [vmem:[%s11929_s12 + $0x18] sm:$0xff] }
 0x6a8   :  { %5620 = vmatpush.msk.msrb.mxu0 %vm3941_vm8, %v7522_v21  ;;  %5608 = vmatpush.msk.msrb.mxu2 %vm3941_vm8, %v7522_v21 }
 0x6a9   :  { %11923 = vst [vmem:[#allocation124_spill] sm:$0xff] %v7509_v26  ;;  %5614 = vmatpush.msk.msrb.mxu3 %vm3941_vm8, %v7522_v21 }
 0x6aa   :  { %5632 = vmatpush.msk.msra.mxu2 %vm3941_vm8, %v7522_v21 }
 0x6ae   :  { %v7511_v10 = vpop.f32.mrf.mxu0 }
 0x6af   :  { %11924 = vst [vmem:[#allocation125_spill] sm:$0xff] %v7511_v10 }
 0x6b6   :  { %v3810_v25 = vpop.f32.mrf.mxu0 }
 0x6b7   :  { %v3825_v59 = vmul.f32 %v3810_v25, %v3810_v25 }
 0x6be   :  { %v3813_v57 = vpop.f32.mrf.mxu0 }
 0x6bf   :  { %v3826_v20 = vmul.f32 %v3813_v57, %v3813_v57  ;;  %v7513_v6 = vmul.f32 %v3813_v57, %v3810_v25  ;;  %v3942_v57 = vld [vmem:[%s11929_s12] sm:$0xff] }
 0x6c1   :  { %11925 = vst [vmem:[#allocation126_spill] sm:$0xff] %v7513_v6  ;;  %v7515_v18 = vadd.f32 %v3826_v20, %v3825_v59 }
 0x6c3   :  { %11926 = vst [vmem:[#allocation127_spill] sm:$0xff] %v7515_v18 }
 0x6c6   :  { %v3816_v0 = vpop.f32.mrf.mxu0 }
 0x6c7   :  { %v3828_v33 = vsub.f32 %v3816_v0, %v3825_v59  ;;  %v3943_v0 = vld [vmem:[%s11929_s12 + $0x8] sm:$0xff] }
 0x6ce   :  { %v3819_v49 = vpop.f32.mrf.mxu0 }
 0x6cf   :  { %v3829_v34 = vsub.f32 %v3819_v49, %v3826_v20  ;;  %v7532_v49 = vpop.f32.mrf.mxu2 }
 0x6d0   :  { %11928 = vst [vmem:[#allocation129_spill] sm:$0xff] %v7532_v49 }
 0x6d1   :  { %v7517_v60 = vadd.f32 %v3829_v34, %v3828_v33  ;;  %v3946_v34 = vld [vmem:[%s11929_s12 + $0x20] sm:$0xff] }
 0x6d3   :  { %11927 = vst [vmem:[#allocation128_spill] sm:$0xff] %v7517_v60 }
 0x71b   :  { %v3933_v20 = vpop.f32.mrf.mxu2 }
 0x71c   :  { %v3938_v33 = vrot.slane %v3933_v20, 4  ;;  %4641 = vmatpush.msra.mxu0 %v3933_v20  ;;  %v3936_v25 = vmul.f32 %v3933_v20, %v3933_v20 }
 0x71e   :  { %v3940_v59 = vmul.f32 %v3938_v33, %v3933_v20 }
 0x720   :  { %5602 = vmatpush.msk.msrb.mxu1 %vm3941_vm8, %v3940_v59 }
 0x722   :  { %3980 = vmatpush.msrb.mxu1 %v3936_v25 }
 0x724   :  { %3981 = vmatpush.msrb.mxu1 %v3933_v20 }
 0x725   :  { %5603 = vmatmul.msk.f32.vlgmr.msrb.gmra.mxu1 %vm3947_vm9, %v3942_v57 }
 0x726   :  { %5626 = vmatpush.msk.msra.mxu1 %vm3941_vm8, %v7522_v21 }
 0x72d   :  { %5604 = vmatmul.msk.f32.gmra.mxu1 %vm3947_vm9, %v3943_v0 }
 0x735   :  { %5605 = vmatmul.msk.f32.gmra.mxu1 %vm3947_vm9, %v3944_v24 }
 0x73d   :  { %5606 = vmatmul.msk.f32.gmra.mxu1 %vm3947_vm9, %v3945_v30 }
 0x745   :  { %5607 = vmatmul.msk.f32.gmra.mxu1 %vm3947_vm9, %v3946_v34 }
 0x7a2   :  { %v3983_v20 = vpop.f32.mrf.mxu1 }
 0x7a3   :  { %4204 = vrot.lane.b32.xlu0 %v3983_v20, %s6048_s1  ;;  %5609 = vmatmul.msk.f32.vlgmr.msrb.gmra.mxu2 %vm3999_vm10, %v3983_v20 }
 0x7aa   :  { %v3986_v33 = vpop.f32.mrf.mxu1 }
 0x7ab   :  { %4206 = vrot.lane.b32.xlu1 %v3986_v33, %s6048_s1  ;;  %5610 = vmatmul.msk.f32.gmra.mxu2 %vm3999_vm10, %v3986_v33 }
 0x7b2   :  { %v3989_v59 = vpop.f32.mrf.mxu1 }
 0x7b3   :  { %4208 = vrot.lane.b32.xlu2 %v3989_v59, %s6048_s1  ;;  %5611 = vmatmul.msk.f32.gmra.mxu2 %vm3999_vm10, %v3989_v59 }
 0x7ba   :  { %v3992_v25 = vpop.f32.mrf.mxu1 }
 0x7bb   :  { %3670 = vrot.lane.b32.xlu2 %v7323_v52, %s6043_s4  ;;  %4210 = vrot.lane.b32.xlu0 %v3992_v25, %s6048_s1 }
 0x7bc   :  { %5612 = vmatmul.msk.f32.gmra.mxu2 %vm3999_vm10, %v3992_v25 }
 0x7c2   :  { %v3995_v57 = vpop.f32.mrf.mxu1 }
 0x7c3   :  { %3676 = vrot.lane.b32.xlu2 %v7341_v39, %s6043_s4  ;;  %3672 = vrot.lane.b32.xlu0 %v7329_v44, %s6043_s4 }
 0x7c4   :  { %4212 = vrot.lane.b32.xlu1 %v3995_v57, %s6048_s1  ;;  %5613 = vmatmul.msk.f32.gmra.mxu2 %vm3999_vm10, %v3995_v57 }
 0x7cb   :  { %4410 = vrot.lane.b32.xlu2 %v3983_v20, %s6045_s15  ;;  %3678 = vrot.lane.b32.xlu0 %v7348_v13, %s6043_s4 }
 0x7cc   :  { %3674 = vrot.lane.b32.xlu1 %v7335_v9, %s6043_s4 }
 0x7d3   :  { %4412 = vrot.lane.b32.xlu2 %v3986_v33, %s6045_s15  ;;  %4103 = vrot.lane.b32.xlu0 %v3986_v33, %s6050_s8 }
 0x7d4   :  { %4101 = vrot.lane.b32.xlu1 %v3983_v20, %s6050_s8 }
 0x7db   :  { %4414 = vrot.lane.b32.xlu2 %v3989_v59, %s6045_s15  ;;  %4105 = vrot.lane.b32.xlu0 %v3989_v59, %s6050_s8 }
 0x7dc   :  { %4307 = vrot.lane.b32.xlu1 %v3983_v20, %s6051_s3 }
 0x7e3   :  { %4416 = vrot.lane.b32.xlu2 %v3992_v25, %s6045_s15  ;;  %4107 = vrot.lane.b32.xlu0 %v3992_v25, %s6050_s8 }
 0x7e4   :  { %4309 = vrot.lane.b32.xlu1 %v3986_v33, %s6051_s3 }
 0x7eb   :  { %4517 = vrot.lane.b32.xlu2 %v3989_v59, %s6052_s26  ;;  %4513 = vrot.lane.b32.xlu0 %v3983_v20, %s6052_s26 }
 0x7ec   :  { %4311 = vrot.lane.b32.xlu1 %v3989_v59, %s6051_s3 }
 0x7f3   :  { %4515 = vrot.lane.b32.xlu0 %v3986_v33, %s6052_s26  ;;  %4418 = vrot.lane.b32.xlu2 %v3995_v57, %s6045_s15 }
 0x7f4   :  { %4313 = vrot.lane.b32.xlu1 %v3992_v25, %s6051_s3 }
 0x7fb   :  { %4109 = vrot.lane.b32.xlu0 %v3995_v57, %s6050_s8 }
 0x7fc   :  { %4519 = vrot.lane.b32.xlu1 %v3992_v25, %s6052_s26 }
 0x803   :  { %4521 = vrot.lane.b32.xlu0 %v3995_v57, %s6052_s26 }
 0x804   :  { %4315 = vrot.lane.b32.xlu1 %v3995_v57, %s6051_s3 }
 0x80d   :  { %v4209_v13 = vpop.permute.xlu2 %4208 }
 0x815   :  { %v4205_v39 = vpop.permute.xlu0 %4204  ;;  %v3671_v44 = vpop.permute.xlu2 %3670 }
 0x816   :  { %5590 = vmatmul.msk.f32.vlgmr.msra.gmra.mxu3 %vm3262_vm6, %v3671_v44  ;;  %5621 = vmatmul.msk.f32.vlgmr.msrb.gmra.mxu0 %vm3999_vm10, %v4205_v39 }
 0x817   :  { %5638 = vmatpush.msk.msra.mxu3 %vm3941_vm8, %v7522_v21 }
 0x81d   :  { %v4207_v9 = vpop.permute.xlu1 %4206  ;;  %v3677_v52 = vpop.permute.xlu2 %3676 }
 0x81e   :  { %5622 = vmatmul.msk.f32.gmra.mxu0 %vm3999_vm10, %v4207_v9 }
 0x825   :  { %v4411_v0 = vpop.permute.xlu2 %4410 }
 0x826   :  { %v4035_v24 = vpop.f32.mrf.mxu2  ;;  %5623 = vmatmul.msk.f32.gmra.mxu0 %vm3999_vm10, %v4209_v13  ;;  %5633 = vmatmul.msk.f32.vlgmr.msra.gmra.mxu2 %vm3999_vm10, %v4411_v0  ;;  %v4622_v0 = vld [vmem:[%s11517_s14] sm:$0xf] }
 0x827   :  { %v4050_v33 = vmul.f32 %v4035_v24, %v4035_v24 }
 0x82d   :  { %v4413_v30 = vpop.permute.xlu2 %4412  ;;  %v4211_v34 = vpop.permute.xlu0 %4210 }
 0x82e   :  { %v4038_v20 = vpop.f32.mrf.mxu2  ;;  %5624 = vmatmul.msk.f32.gmra.mxu0 %vm3999_vm10, %v4211_v34  ;;  %5634 = vmatmul.msk.f32.gmra.mxu2 %vm3999_vm10, %v4413_v30 }
 0x82f   :  { %v4051_v59 = vmul.f32 %v4038_v20, %v4038_v20  ;;  %v7591_v21 = vmul.f32 %v4038_v20, %v4035_v24 }
 0x831   :  { %11930 = vst [vmem:[#allocation130_spill] sm:$0xff] %v7591_v21  ;;  %v7593_v25 = vadd.f32 %v4051_v59, %v4050_v33 }
 0x833   :  { %11931 = vst [vmem:[#allocation131_spill] sm:$0xff] %v7593_v25 }
 0x835   :  { %v4415_v57 = vpop.permute.xlu2 %4414  ;;  %v3673_v39 = vpop.permute.xlu0 %3672 }
 0x836   :  { %v4213_v44 = vpop.permute.xlu1 %4212  ;;  %5591 = vmatmul.msk.f32.gmra.mxu3 %vm3262_vm6, %v3673_v39  ;;  %v4041_v13 = vpop.f32.mrf.mxu2  ;;  %5635 = vmatmul.msk.f32.gmra.mxu2 %vm3999_vm10, %v4415_v57 }
 0x837   :  { %v4053_v9 = vsub.f32 %v4041_v13, %v4050_v33  ;;  %5625 = vmatmul.msk.f32.gmra.mxu0 %vm3999_vm10, %v4213_v44 }
 0x83d   :  { %v4417_v30 = vpop.permute.xlu2 %4416  ;;  %v3679_v24 = vpop.permute.xlu0 %3678 }
 0x83e   :  { %v3675_v34 = vpop.permute.xlu1 %3674  ;;  %5636 = vmatmul.msk.f32.gmra.mxu2 %vm3999_vm10, %v4417_v30 }
 0x83f   :  { %5592 = vmatmul.msk.f32.gmra.mxu3 %vm3262_vm6, %v3675_v34  ;;  %v4044_v20 = vpop.f32.mrf.mxu2  ;;  %5644 = vmatmul.msk.f32.vlgmr.msra.gmra.mxu0 %vm3262_vm6, %v4622_v0 }
 0x840   :  { %v4054_v39 = vsub.f32 %v4044_v20, %v4051_v59 }
 0x842   :  { %v7604_v25 = vadd.f32 %v4054_v39, %v4053_v9  ;;  %v7621_v39 = vpop.f32.mrf.mxu0 }
 0x843   :  { %11933 = vst [vmem:[#allocation133_spill] sm:$0xff] %v7621_v39 }
 0x844   :  { %11932 = vst [vmem:[#allocation132_spill] sm:$0xff] %v7604_v25 }
 0x845   :  { %v4518_v33 = vpop.permute.xlu2 %4517  ;;  %v4104_v57 = vpop.permute.xlu0 %4103 }
 0x846   :  { %v4102_v44 = vpop.permute.xlu1 %4101 }
 0x847   :  { %5593 = vmatmul.msk.f32.gmra.mxu3 %vm3262_vm6, %v3677_v52 }
 0x84d   :  { %v4419_v13 = vpop.permute.xlu2 %4418  ;;  %v4106_v18 = vpop.permute.xlu0 %4105 }
 0x84e   :  { %v4308_v60 = vpop.permute.xlu1 %4307  ;;  %5637 = vmatmul.msk.f32.gmra.mxu2 %vm3999_vm10, %v4419_v13 }
 0x84f   :  { %5594 = vmatmul.msk.f32.gmra.mxu3 %vm3262_vm6, %v3679_v24  ;;  %5627 = vmatmul.msk.f32.vlgmr.msra.gmra.mxu1 %vm3999_vm10, %v4308_v60 }
 0x855   :  { %v4108_v59 = vpop.permute.xlu0 %4107 }
 0x856   :  { %v4310_v30 = vpop.permute.xlu1 %4309 }
 0x857   :  { %5615 = vmatmul.msk.f32.vlgmr.msrb.gmra.mxu3 %vm3999_vm10, %v4102_v44  ;;  %5628 = vmatmul.msk.f32.gmra.mxu1 %vm3999_vm10, %v4310_v30  ;;  %v4647_v44 = vld [vmem:[%s11521_s18 + $0x8] sm:$0xff]  ;;  %v4646_v30 = vld [vmem:[%s11521_s18] sm:$0xff] }
 0x85d   :  { %v4514_v52 = vpop.permute.xlu0 %4513 }
 0x85e   :  { %v4312_v9 = vpop.permute.xlu1 %4311 }
 0x85f   :  { %5616 = vmatmul.msk.f32.gmra.mxu3 %vm3999_vm10, %v4104_v57  ;;  %5629 = vmatmul.msk.f32.gmra.mxu1 %vm3999_vm10, %v4312_v9  ;;  %v4648_v57 = vld [vmem:[%s11521_s18 + $0x10] sm:$0xff] }
 0x860   :  { %4666 = vmatpush.msrb.mxu0 %v4648_v57 }
 0x862   :  { %4667 = vmatpush.msrb.mxu0 %v4647_v44 }
 0x864   :  { %4668 = vmatpush.msrb.mxu0 %v4646_v30 }
 0x865   :  { %v4516_v24 = vpop.permute.xlu0 %4515 }
 0x866   :  { %v4314_v0 = vpop.permute.xlu1 %4313 }
 0x867   :  { %5617 = vmatmul.msk.f32.gmra.mxu3 %vm3999_vm10, %v4106_v18  ;;  %5630 = vmatmul.msk.f32.gmra.mxu1 %vm3999_vm10, %v4314_v0 }
 0x86d   :  { %v4110_v60 = vpop.permute.xlu0 %4109 }
 0x86e   :  { %v4520_v34 = vpop.permute.xlu1 %4519 }
 0x86f   :  { %5618 = vmatmul.msk.f32.gmra.mxu3 %vm3999_vm10, %v4108_v59 }
 0x876   :  { %v4316_v20 = vpop.permute.xlu1 %4315 }
 0x877   :  { %5619 = vmatmul.msk.f32.gmra.mxu3 %vm3999_vm10, %v4110_v60  ;;  %5631 = vmatmul.msk.f32.gmra.mxu1 %vm3999_vm10, %v4316_v20  ;;  %v7641_v20 = vpop.f32.mrf.mxu3 }
 0x878   :  { %11937 = vst [vmem:[#allocation137_spill] sm:$0xff] %v7641_v20 }
 0x87f   :  { %5639 = vmatmul.msk.f32.vlgmr.msra.gmra.mxu3 %vm3999_vm10, %v4514_v52  ;;  %v4522_v52 = vpop.permute.xlu0 %4521 }
 0x887   :  { %5640 = vmatmul.msk.f32.gmra.mxu3 %vm3999_vm10, %v4516_v24  ;;  %v7639_v24 = vpop.f32.mrf.mxu2 }
 0x888   :  { %11936 = vst [vmem:[#allocation136_spill] sm:$0xff] %v7639_v24 }
 0x88f   :  { %5641 = vmatmul.msk.f32.gmra.mxu3 %vm3999_vm10, %v4518_v33 }
 0x893   :  { %v4241_v18 = vpop.f32.mrf.mxu0 }
 0x894   :  { %v4256_v59 = vmul.f32 %v4241_v18, %v4241_v18 }
 0x897   :  { %5642 = vmatmul.msk.f32.gmra.mxu3 %vm3999_vm10, %v4520_v34 }
 0x899   :  { %v3707_v3 = vpop.f32.mrf.mxu3 }
 0x89b   :  { %v4244_v13 = vpop.f32.mrf.mxu0 }
 0x89c   :  { %v4257_v33 = vmul.f32 %v4244_v13, %v4244_v13  ;;  %v7634_v9 = vmul.f32 %v4244_v13, %v4241_v18 }
 0x89e   :  { %11934 = vst [vmem:[#allocation134_spill] sm:$0xff] %v7634_v9  ;;  %v7636_v0 = vadd.f32 %v4257_v33, %v4256_v59 }
 0x89f   :  { %5643 = vmatmul.msk.f32.gmra.mxu3 %vm3999_vm10, %v4522_v52 }
 0x8a0   :  { %11935 = vst [vmem:[#allocation135_spill] sm:$0xff] %v7636_v0 }
 0x8a3   :  { %v4247_v34 = vpop.f32.mrf.mxu0 }
 0x8a4   :  { %v4259_v60 = vsub.f32 %v4247_v34, %v4256_v59  ;;  %v3722_v34 = vmul.f32 %v3707_v3, %v3707_v3 }
 0x8a9   :  { %v4447_v57 = vpop.f32.mrf.mxu2 }
 0x8aa   :  { %v4462_v13 = vmul.f32 %v4447_v57, %v4447_v57 }
 0x8ab   :  { %v4250_v44 = vpop.f32.mrf.mxu0 }
 0x8ac   :  { %v4260_v25 = vsub.f32 %v4250_v44, %v4257_v33 }
 0x8ae   :  { %v7643_v26 = vadd.f32 %v4260_v25, %v4259_v60 }
 0x8b0   :  { %11938 = vst [vmem:[#allocation138_spill] sm:$0xff] %v7643_v26 }
 0x8b1   :  { %v4450_v18 = vpop.f32.mrf.mxu2 }
 0x8b2   :  { %v4463_v30 = vmul.f32 %v4450_v18, %v4450_v18  ;;  %v7645_v21 = vmul.f32 %v4450_v18, %v4447_v57 }
 0x8b4   :  { %11939 = vst [vmem:[#allocation139_spill] sm:$0xff] %v7645_v21  ;;  %v7647_v0 = vadd.f32 %v4463_v30, %v4462_v13  ;;  %v7649_v52 = vpop.f32.mrf.mxu0 }
 0x8b5   :  { %11941 = vst [vmem:[#allocation141_spill] sm:$0xff] %v7649_v52 }
 0x8b6   :  { %11940 = vst [vmem:[#allocation140_spill] sm:$0xff] %v7647_v0 }
 0x8b9   :  { %v3710_v24 = vpop.f32.mrf.mxu3  ;;  %v4453_v39 = vpop.f32.mrf.mxu2 }
 0x8ba   :  { %v3723_v6 = vmul.f32 %v3710_v24, %v3710_v24  ;;  %v7653_v33 = vmul.f32 %v3710_v24, %v3707_v3  ;;  %v4465_v25 = vsub.f32 %v4453_v39, %v4462_v13 }
 0x8bc   :  { %11942 = vst [vmem:[#allocation142_spill] sm:$0xff] %v7653_v33  ;;  %v7655_v60 = vadd.f32 %v3723_v6, %v3722_v34  ;;  %v4643_v44 = vpop.f32.mrf.mxu0 }
 0x8bd   :  { %5645 = vmatmul.msk.f32.vlgmr.msrb.gmra.mxu0 %vm4649_vm11, %v4643_v44 }
 0x8be   :  { %11943 = vst [vmem:[#allocation143_spill] sm:$0xff] %v7655_v60 }
 0x8c1   :  { %v4456_v57 = vpop.f32.mrf.mxu2 }
 0x8c2   :  { %v3713_v18 = vpop.f32.mrf.mxu3  ;;  %v4466_v0 = vsub.f32 %v4456_v57, %v4463_v30 }
 0x8c3   :  { %v3725_v26 = vsub.f32 %v3713_v18, %v3722_v34 }
 0x8c4   :  { %v7657_v21 = vadd.f32 %v4466_v0, %v4465_v25 }
 0x8c6   :  { %11944 = vst [vmem:[#allocation144_spill] sm:$0xff] %v7657_v21 }
 0x8ca   :  { %v3716_v10 = vpop.f32.mrf.mxu3 }
 0x8cb   :  { %v3726_v59 = vsub.f32 %v3716_v10, %v3723_v6 }
 0x8cc   :  { %v4344_v52 = vpop.f32.mrf.mxu1 }
 0x8cd   :  { %v7659_v9 = vadd.f32 %v3726_v59, %v3725_v26  ;;  %v4359_v24 = vmul.f32 %v4344_v52, %v4344_v52 }
 0x8cf   :  { %11945 = vst [vmem:[#allocation145_spill] sm:$0xff] %v7659_v9 }
 0x8d2   :  { %v7661_v49 = vpop.f32.mrf.mxu3 }
 0x8d3   :  { %11946 = vst [vmem:[#allocation146_spill] sm:$0xff] %v7661_v49 }
 0x8d4   :  { %v4347_v39 = vpop.f32.mrf.mxu1 }
 0x8d5   :  { %v4360_v13 = vmul.f32 %v4347_v39, %v4347_v39  ;;  %v7665_v44 = vmul.f32 %v4347_v39, %v4344_v52 }
 0x8d7   :  { %11947 = vst [vmem:[#allocation147_spill] sm:$0xff] %v7665_v44  ;;  %v7667_v60 = vadd.f32 %v4360_v13, %v4359_v24 }
 0x8d9   :  { %11948 = vst [vmem:[#allocation148_spill] sm:$0xff] %v7667_v60 }
 0x8da   :  { %v4138_v30 = vpop.f32.mrf.mxu3 }
 0x8db   :  { %v4153_v6 = vmul.f32 %v4138_v30, %v4138_v30 }
 0x8dc   :  { %v4350_v0 = vpop.f32.mrf.mxu1 }
 0x8dd   :  { %v4362_v34 = vsub.f32 %v4350_v0, %v4359_v24  ;;  %v6009_v24 = vld [vmem:[%s11803_s23 + $0x20] sm:$0xff] }
 0x8e2   :  { %v4141_v25 = vpop.f32.mrf.mxu3 }
 0x8e3   :  { %v4154_v10 = vmul.f32 %v4141_v25, %v4141_v25  ;;  %v7669_v26 = vmul.f32 %v4141_v25, %v4138_v30 }
 0x8e4   :  { %v4353_v59 = vpop.f32.mrf.mxu1 }
 0x8e5   :  { %11949 = vst [vmem:[#allocation149_spill] sm:$0xff] %v7669_v26  ;;  %v7671_v57 = vadd.f32 %v4154_v10, %v4153_v6  ;;  %v4363_v18 = vsub.f32 %v4353_v59, %v4360_v13  ;;  %v4684_v59 = vld [vmem:[%s11508_s5] sm:$0xff]  ;;  %v6012_v26 = vld [vmem:[%s11803_s23 + $0x10] sm:$0xff] }
 0x8e7   :  { %11950 = vst [vmem:[#allocation150_spill] sm:$0xff] %v7671_v57  ;;  %v7673_v3 = vadd.f32 %v4363_v18, %v4362_v34 }
 0x8e9   :  { %11951 = vst [vmem:[#allocation151_spill] sm:$0xff] %v7673_v3  ;;  %v6010_v3 = vld [vmem:[%s11803_s23] sm:$0xff] }
 0x8ea   :  { %v4144_v21 = vpop.f32.mrf.mxu3  ;;  %v85_v57 = vmax.f32 %v6010_v3, %v6009_v24  ;;  %v107_v17 = vmin.f32 %v6010_v3, %v6009_v24 }
 0x8eb   :  { %v4156_v9 = vsub.f32 %v4144_v21, %v4153_v6 }
 0x8f2   :  { %v4147_v52 = vpop.f32.mrf.mxu3 }
 0x8f3   :  { %v4157_v39 = vsub.f32 %v4147_v52, %v4154_v10  ;;  %v4685_v52 = vld [vmem:[%s11508_s5 + $0x8] sm:$0xff] }
 0x8f5   :  { %v7675_v49 = vadd.f32 %v4157_v39, %v4156_v9  ;;  %v4686_v39 = vld [vmem:[%s11508_s5 + $0x10] sm:$0xff] }
 0x8f7   :  { %11952 = vst [vmem:[#allocation152_spill] sm:$0xff] %v7675_v49 }
 0x8fa   :  { %v7677_v60 = vpop.f32.mrf.mxu3 }
 0x8fb   :  { %11953 = vst [vmem:[#allocation153_spill] sm:$0xff] %v7677_v60  ;;  %v6011_v60 = vld [vmem:[%s11803_s23 + $0x30] sm:$0xff] }
 0x8fc   :  { %v88_v33 = vmax.f32 %v6012_v26, %v6011_v60  ;;  %v110_v56 = vmin.f32 %v6012_v26, %v6011_v60 }
 0x902   :  { %v7681_v0 = vpop.f32.mrf.mxu3 }
 0x903   :  { %11954 = vst [vmem:[#allocation154_spill] sm:$0xff] %v7681_v0 }
 0x90a   :  { %v7683_v30 = vpop.f32.mrf.mxu3 }
 0x90b   :  { %11955 = vst [vmem:[#allocation155_spill] sm:$0xff] %v7683_v30  ;;  %v7687_v13 = vmul.f32 %v7683_v30, %v7681_v0 }
 0x90d   :  { %11956 = vst [vmem:[#allocation156_spill] sm:$0xff] %v7687_v13 }
 0x93a   :  { %v4670_v34 = vpop.f32.mrf.mxu0 }
 0x93b   :  { %v4673_v25 = vmul.f32 %v4670_v34, %v4670_v34  ;;  %v4675_v21 = vrot.slane %v4670_v34, 2 }
 0x93d   :  { %v4677_v6 = vmul.f32 %v4675_v21, %v4670_v34  ;;  %v4679_v9 = vrot.slane %v4673_v25, 4  ;;  %v4688_v25 = vld [vmem:[%s11508_s5 + $0x20] sm:$0xff] }
 0x93e   :  { %v4741_v21 = vld [vmem:[%s11513_s10] sm:$0x3]  ;;  %s6055_s10 = smov 122  }
 0x93f   :  { %5646 = vmatpush.msk.msra.mxu0 %vm4705_vm12, %v4677_v6  ;;  %v4681_v10 = vsel %vm3941_vm8, %v4670_v34, %v4679_v9  ;;  %v4687_v34 = vld [vmem:[%s11508_s5 + $0x18] sm:$0xff]  ;;  %5652 = vmatpush.msk.msrb.mxu1 %vm4705_vm12, %v4741_v21  ;;  %s6053_s5 = smov 118  }
 0x940   :  { %v4683_v18 = vsel %vm4682_vm13, %v4681_v10, %v4679_v9  ;;  %5658 = vmatpush.msk.msrb.mxu2 %vm4705_vm12, %v4741_v21  ;;  %5664 = vmatpush.msk.msrb.mxu3 %vm4705_vm12, %v4741_v21 }
 0x941   :  { %4724 = vmatpush.msra.mxu0 %v4683_v18  ;;  %5676 = vmatpush.msk.msra.mxu1 %vm4705_vm12, %v4741_v21 }
 0x942   :  { %5647 = vmatmul.msk.f32.vlgmr.msra.gmra.mxu0 %vm4689_vm14, %v4684_v59  ;;  %5682 = vmatpush.msk.msra.mxu2 %vm4705_vm12, %v4741_v21 }
 0x943   :  { %5670 = vmatpush.msk.msrb.mxu0 %vm4705_vm12, %v4741_v21  ;;  %v6007_v21 = vld [vmem:[%s11803_s23 + $0x28] sm:$0xff] }
 0x944   :  { %v108_v51 = vsel %vm82_vm1, %v6007_v21, inf }
 0x94a   :  { %5648 = vmatmul.msk.f32.gmra.mxu0 %vm4689_vm14, %v4685_v52  ;;  %v6005_v52 = vld [vmem:[%s11803_s23 + $0x8] sm:$0xff] }
 0x952   :  { %5649 = vmatmul.msk.f32.gmra.mxu0 %vm4689_vm14, %v4686_v39  ;;  %v83_v39 = vsel %vm82_vm1, %v6005_v52, -inf }
 0x95a   :  { %5650 = vmatmul.msk.f32.gmra.mxu0 %vm4689_vm14, %v4687_v34  ;;  %v6006_v34 = vld [vmem:[%s11803_s23 + $0x18] sm:$0xff] }
 0x962   :  { %5651 = vmatmul.msk.f32.gmra.mxu0 %vm4689_vm14, %v4688_v25  ;;  %v84_v25 = vsel %vm82_vm1, %v6006_v34, -inf }
 0x9bf   :  { %v4726_v6 = vpop.f32.mrf.mxu0 }
 0x9c0   :  { %5256 = vrot.lane.b32.xlu0 %v4726_v6, %s6053_s5  ;;  %4844 = vrot.lane.b32.xlu2 %v4726_v6, %s6054_s6 }
 0x9c1   :  { %5653 = vmatmul.msk.f32.vlgmr.msrb.gmra.mxu1 %vm4742_vm15, %v4726_v6 }
 0x9c7   :  { %v4729_v9 = vpop.f32.mrf.mxu0 }
 0x9c8   :  { %5153 = vrot.lane.b32.xlu0 %v4726_v6, %s6048_s1  ;;  %4947 = vrot.lane.b32.xlu2 %v4726_v6, %s6050_s8 }
 0x9c9   :  { %4846 = vrot.lane.b32.xlu1 %v4729_v9, %s6054_s6  ;;  %5654 = vmatmul.msk.f32.gmra.mxu1 %vm4742_vm15, %v4729_v9 }
 0x9cf   :  { %v4732_v10 = vpop.f32.mrf.mxu0 }
 0x9d0   :  { %5050 = vrot.lane.b32.xlu2 %v4726_v6, %s6055_s10  ;;  %5052 = vrot.lane.b32.xlu0 %v4729_v9, %s6055_s10  ;;  %v86_v6 = vsel %vm82_vm1, %v6007_v21, -inf }
 0x9d1   :  { %4949 = vrot.lane.b32.xlu1 %v4729_v9, %s6050_s8  ;;  %5655 = vmatmul.msk.f32.gmra.mxu1 %vm4742_vm15, %v4732_v10  ;;  %v87_v49 = vmax.f32 %v83_v39, %v86_v6  ;;  %v105_v39 = vsel %vm82_vm1, %v6005_v52, inf  ;;  %v106_v6 = vsel %vm82_vm1, %v6006_v34, inf }
 0x9d2   :  { %v109_v4 = vmin.f32 %v105_v39, %v108_v51 }
 0x9d3   :  { %v91_v0 = vmax.f32 %v85_v57, %v87_v49 }
 0x9d4   :  { %v113_v49 = vmin.f32 %v107_v17, %v109_v4 }
 0x9d7   :  { %v4735_v59 = vpop.f32.mrf.mxu0 }
 0x9d8   :  { %4951 = vrot.lane.b32.xlu2 %v4732_v10, %s6050_s8  ;;  %4848 = vrot.lane.b32.xlu0 %v4732_v10, %s6054_s6 }
 0x9d9   :  { %5258 = vrot.lane.b32.xlu1 %v4729_v9, %s6053_s5  ;;  %5656 = vmatmul.msk.f32.gmra.mxu1 %vm4742_vm15, %v4735_v59 }
 0x9df   :  { %v4738_v18 = vpop.f32.mrf.mxu0 }
 0x9e0   :  { %4953 = vrot.lane.b32.xlu0 %v4735_v59, %s6050_s8  ;;  %4850 = vrot.lane.b32.xlu2 %v4735_v59, %s6054_s6 }
 0x9e1   :  { %5155 = vrot.lane.b32.xlu1 %v4729_v9, %s6048_s1  ;;  %5657 = vmatmul.msk.f32.gmra.mxu1 %vm4742_vm15, %v4738_v18  ;;  %v6008_v9 = vld [vmem:[%s11803_s23 + $0x38] sm:$0xff] }
 0x9e2   :  { %v111_v20 = vsel %vm82_vm1, %v6008_v9, inf }
 0x9e8   :  { %5260 = vrot.lane.b32.xlu2 %v4732_v10, %s6053_s5 }
 0x9e9   :  { %4852 = vrot.lane.b32.xlu1 %v4738_v18, %s6054_s6 }
 0x9f0   :  { %5157 = vrot.lane.b32.xlu2 %v4732_v10, %s6048_s1 }
 0x9f1   :  { %5054 = vrot.lane.b32.xlu1 %v4732_v10, %s6055_s10  ;;  %v89_v10 = vsel %vm82_vm1, %v6008_v9, -inf }
 0x9f2   :  { %v90_v13 = vmax.f32 %v84_v25, %v89_v10  ;;  %v112_v25 = vmin.f32 %v106_v6, %v111_v20 }
 0x9f4   :  { %v92_v44 = vmax.f32 %v88_v33, %v90_v13  ;;  %v114_v33 = vmin.f32 %v110_v56, %v112_v25 }
 0x9f6   :  { %v93_v30 = vmax.f32 %v91_v0, %v92_v44  ;;  %v115_v44 = vmin.f32 %v113_v49, %v114_v33 }
 0x9f8   :  { %5262 = vrot.lane.b32.xlu2 %v4735_v59, %s6053_s5 }
 0xa00   :  { %5056 = vrot.lane.b32.xlu2 %v4735_v59, %s6055_s10 }
 0xa08   :  { %5159 = vrot.lane.b32.xlu2 %v4735_v59, %s6048_s1 }
 0xa0a   :  { %94 = vmax.xlane.f32.xlu0 %v93_v30 }
 0xa10   :  { %4955 = vrot.lane.b32.xlu2 %v4738_v18, %s6050_s8 }
 0xa18   :  { %5264 = vrot.lane.b32.xlu2 %v4738_v18, %s6053_s5 }
 0xa1a   :  { %v4845_v57 = vpop.permute.xlu2 %4844 }
 0xa1b   :  { %116 = vmin.xlane.f32.xlu1 %v115_v44  ;;  %5659 = vmatmul.msk.f32.vlgmr.msrb.gmra.mxu2 %vm4742_vm15, %v4845_v57 }
 0xa1e   :  { %5161 = vrot.lane.b32.xlu0 %v4738_v18, %s6048_s1 }
 0xa20   :  { %5058 = vrot.lane.b32.xlu2 %v4738_v18, %s6055_s10 }
 0xa22   :  { %v4948_v0 = vpop.permute.xlu2 %4947 }
 0xa23   :  { %5665 = vmatmul.msk.f32.vlgmr.msrb.gmra.mxu3 %vm4742_vm15, %v4948_v0 }
 0xa2a   :  { %v5051_v51 = vpop.permute.xlu2 %5050 }
 0xa2b   :  { %5671 = vmatmul.msk.f32.vlgmr.msrb.gmra.mxu0 %vm4742_vm15, %v5051_v51 }
 0xa32   :  { %v5257_v20 = vpop.permute.xlu0 %5256  ;;  %v4952_v17 = vpop.permute.xlu2 %4951 }
 0xa3a   :  { %v5154_v56 = vpop.permute.xlu0 %5153  ;;  %v4851_v4 = vpop.permute.xlu2 %4850 }
 0xa3b   :  { %v4847_v60 = vpop.permute.xlu1 %4846  ;;  %5677 = vmatmul.msk.f32.vlgmr.msra.gmra.mxu1 %vm4742_vm15, %v5154_v56 }
 0xa3c   :  { %5660 = vmatmul.msk.f32.gmra.mxu2 %vm4742_vm15, %v4847_v60 }
 0xa42   :  { %v5053_v3 = vpop.permute.xlu0 %5052  ;;  %v5261_v26 = vpop.permute.xlu2 %5260 }
 0xa43   :  { %v4950_v24 = vpop.permute.xlu1 %4949  ;;  %5672 = vmatmul.msk.f32.gmra.mxu0 %vm4742_vm15, %v5053_v3 }
 0xa44   :  { %5666 = vmatmul.msk.f32.gmra.mxu3 %vm4742_vm15, %v4950_v24 }
 0xa4a   :  { %v4849_v30 = vpop.permute.xlu0 %4848  ;;  %v5158_v13 = vpop.permute.xlu2 %5157 }
 0xa4b   :  { %v5259_v59 = vpop.permute.xlu1 %5258  ;;  %5661 = vmatmul.msk.f32.gmra.mxu2 %vm4742_vm15, %v4849_v30 }
 0xa4c   :  { %5667 = vmatmul.msk.f32.gmra.mxu3 %vm4742_vm15, %v4952_v17 }
 0xa52   :  { %v4954_v18 = vpop.permute.xlu0 %4953  ;;  %v5263_v52 = vpop.permute.xlu2 %5262 }
 0xa53   :  { %v5156_v34 = vpop.permute.xlu1 %5155  ;;  %5662 = vmatmul.msk.f32.gmra.mxu2 %vm4742_vm15, %v4851_v4 }
 0xa54   :  { %5668 = vmatmul.msk.f32.gmra.mxu3 %vm4742_vm15, %v4954_v18  ;;  %5678 = vmatmul.msk.f32.gmra.mxu1 %vm4742_vm15, %v5156_v34  ;;  %v594_v18 = vmul.f32 %v6753_v29, %v6753_v29  ;;  %v595_v34 = vmul.f32 %v6761_v35, %v6761_v35 }
 0xa5a   :  { %v5057_v21 = vpop.permute.xlu2 %5056 }
 0xa5b   :  { %v4853_v9 = vpop.permute.xlu1 %4852 }
 0xa5c   :  { %5663 = vmatmul.msk.f32.gmra.mxu2 %vm4742_vm15, %v4853_v9  ;;  %5679 = vmatmul.msk.f32.gmra.mxu1 %vm4742_vm15, %v5158_v13  ;;  %v596_v9 = vmul.f32 %v6770_v41, %v6770_v41 }
 0xa62   :  { %v5160_v10 = vpop.permute.xlu2 %5159 }
 0xa63   :  { %v5055_v39 = vpop.permute.xlu1 %5054 }
 0xa64   :  { %5673 = vmatmul.msk.f32.gmra.mxu0 %vm4742_vm15, %v5055_v39  ;;  %5680 = vmatmul.msk.f32.gmra.mxu1 %vm4742_vm15, %v5160_v10  ;;  %v592_v10 = vmul.f32 %v6734_v14, %v6734_v14  ;;  %v593_v39 = vmul.f32 %v6744_v23, %v6744_v23 }
 0xa65   :  { %5683 = vmatmul.msk.f32.vlgmr.msra.gmra.mxu2 %vm4742_vm15, %v5257_v20 }
 0xa6a   :  { %v4956_v6 = vpop.permute.xlu2 %4955 }
 0xa6b   :  { %5669 = vmatmul.msk.f32.gmra.mxu3 %vm4742_vm15, %v4956_v6  ;;  %v599_v6 = vmul.f32 %v6770_v41, %v6744_v23  ;;  %v601_v23 = vsub.f32 %v6786_v54, %v592_v10  ;;  %v602_v41 = vsub.f32 %v6793_v61, %v593_v39  ;;  %v1169_v54 = vmul.f32 %v6841_v27, %v6841_v27 }
 0xa6c   :  { %5674 = vmatmul.msk.f32.gmra.mxu0 %vm4742_vm15, %v5057_v21  ;;  %v598_v21 = vmul.f32 %v6761_v35, %v6734_v14  ;;  %v1170_v61 = vmul.f32 %v6851_v32, %v6851_v32 }
 0xa6d   :  { %5684 = vmatmul.msk.f32.gmra.mxu2 %vm4742_vm15, %v5259_v59  ;;  %v591_v59 = vmul.f32 %v6724_v1, %v6724_v1 }
 0xa6f   :  { %v600_v14 = vsub.f32 %v6778_v47, %v591_v59 }
 0xa72   :  { %v5265_v25 = vpop.permute.xlu2 %5264 }
 0xa75   :  { %5685 = vmatmul.msk.f32.gmra.mxu2 %vm4742_vm15, %v5261_v26 }
 0xa7a   :  { %v5059_v49 = vpop.permute.xlu2 %5058 }
 0xa7b   :  { %5675 = vmatmul.msk.f32.gmra.mxu0 %vm4742_vm15, %v5059_v49  ;;  %v607_v49 = vsub.f32 %v6830_v8, %v598_v21 }
 0xa7d   :  { %5686 = vmatmul.msk.f32.gmra.mxu2 %vm4742_vm15, %v5263_v52  ;;  %v95_v33 = vpop.xlane.xlu0 %94  ;;  %v597_v52 = vmul.f32 %v6753_v29, %v6724_v1  ;;  %v603_v1 = vsub.f32 %v6800_v16, %v594_v18  ;;  %v604_v29 = vsub.f32 %v6806_v7, %v595_v34  ;;  %v7830_v16 = vmul.f32 2.0, %v598_v21 }
 0xa7e   :  { %v96_v44 = vrot.slane %v95_v33, 4  ;;  %v7832_v7 = vadd.f32 %v596_v9, %v593_v39  ;;  %v1178_v39 = vsub.f32 %v6924_v11, %v1169_v54  ;;  %v11973_v11 = vld [vmem:[#allocation17_spill] sm:$0xff] }
 0xa7f   :  { %v606_v35 = vsub.f32 %v6818_v22, %v597_v52  ;;  %v7836_v22 = vadd.f32 %v603_v1, %v600_v14  ;;  %v7838_v8 = vadd.f32 %v604_v29, %v601_v23 }
 0xa80   :  { %v97_v57 = vmax.f32 %v95_v33, %v96_v44  ;;  %v7820_v33 = vadd.f32 %v594_v18, %v591_v59  ;;  %v608_v44 = vsub.f32 %v6839_v15, %v599_v6  ;;  %v7880_v59 = vpop.f32.mrf.mxu1 }
 0xa81   :  { %v7842_v15 = vmul.f32 2.0, %v606_v35  ;;  %v11968_v35 = vld [vmem:[#allocation10_spill] sm:$0xff] }
 0xa82   :  { %v98_v0 = vrot.slane %v97_v57, 2 }
 0xa84   :  { %v99_v51 = vmax.f32 %v97_v57, %v98_v0  ;;  %v7824_v57 = vmul.f32 2.0, %v597_v52  ;;  %v7826_v0 = vadd.f32 %v595_v34, %v592_v10 }
 0xa85   :  { %5687 = vmatmul.msk.f32.gmra.mxu2 %vm4742_vm15, %v5265_v25  ;;  %v605_v25 = vsub.f32 %v6811_v19, %v596_v9  ;;  %v7834_v19 = vmul.f32 2.0, %v599_v6  ;;  %v1737_v6 = vsub.f32 %v7366_v28, %v6880_v48  ;;  %v11974_v48 = vld [vmem:[#allocation20_spill] sm:$0xff] }
 0xa86   :  { %v100_v20 = vrot.slane %v99_v51, 1 }
 0xa87   :  { %v7840_v47 = vadd.f32 %v605_v25, %v602_v41  ;;  %v1179_v25 = vsub.f32 %v6933_v5, %v1170_v61  ;;  %v11971_v41 = vld [vmem:[#allocation8_spill] sm:$0xff]  ;;  %v11978_v5 = vld [vmem:[#allocation13_spill] sm:$0xff] }
 0xa88   :  { %v101_v17 = vmax.f32 %v99_v51, %v100_v20  ;;  %v7844_v51 = vmul.f32 2.0, %v607_v49  ;;  %v7846_v20 = vmul.f32 2.0, %v608_v44  ;;  %v11969_v49 = vld [vmem:[#allocation87_spill] sm:$0xff]  ;;  %v11970_v44 = vld [vmem:[#allocation16_spill] sm:$0xff] }
 0xa89   :  { %v1738_v14 = vsub.f32 %v11969_v49, %v11968_v35  ;;  %v11980_v35 = vld [vmem:[#allocation18_spill] sm:$0xff] }
 0xa8a   :  { %5696 = vpush %v101_v17  ;;  %v1172_v17 = vmul.f32 %v6871_v43, %v6871_v43 }
 0xa8c   :  { %v1181_v10 = vsub.f32 %v6958_v12, %v1172_v17 }
 0xa8e   :  { %v117_v56 = vpop.xlane.xlu1 %116  ;;  %v7973_v49 = vadd.f32 %v1181_v10, %v1178_v39  ;;  %v11990_v39 = vld [vmem:[#allocation26_spill] sm:$0xff] }
 0xa8f   :  { %v118_v4 = vrot.slane %v117_v56, 4 }
 0xa90   :  { %v5162_v60 = vpop.permute.xlu0 %5161 }
 0xa91   :  { %v119_v3 = vmin.f32 %v117_v56, %v118_v4  ;;  %5681 = vmatmul.msk.f32.gmra.mxu1 %vm4742_vm15, %v5162_v60  ;;  %v1456_v56 = vmul.f32 %v6861_v37, %v6861_v37  ;;  %v1171_v4 = vmul.f32 %v6863_v38, %v6863_v38  ;;  %v7860_v60 = vmul.f32 %v6869_v42, %v6869_v42 }
 0xa93   :  { %v120_v26 = vrot.slane %v119_v3, 2  ;;  %v1465_v23 = vsub.f32 %v11970_v44, %v1456_v56 }
 0xa95   :  { %v121_v24 = vmin.f32 %v119_v3, %v120_v26  ;;  %v7864_v3 = vmul.f32 %v6871_v43, %v6841_v27  ;;  %v7868_v26 = vmul.f32 %v6874_v45, %v6849_v31  ;;  %v1459_v27 = vmul.f32 %v6895_v55, %v6895_v55 }
 0xa96   :  { %v7886_v31 = vmul.f32 %v6895_v55, %v6861_v37  ;;  %v1174_v43 = vmul.f32 %v6905_v58, %v6905_v58  ;;  %v7894_v45 = vadd.f32 %v1172_v17, %v1169_v54  ;;  %v7904_v37 = vmul.f32 %v6914_v63, %v6869_v42  ;;  %v7962_v17 = vpop.f32.mrf.mxu1 }
 0xa97   :  { %v122_v30 = vrot.slane %v121_v24, 1  ;;  %v1461_v55 = vmul.f32 %v6931_v2, %v6931_v2  ;;  %v7928_v18 = vadd.f32 %v1459_v27, %v1456_v56  ;;  %v1180_v54 = vsub.f32 %v11973_v11, %v1171_v4  ;;  %v11984_v11 = vld [vmem:[#allocation91_spill] sm:$0xff] }
 0xa98   :  { %v7931_v52 = vmul.f32 2.0, %v7886_v31  ;;  %v7933_v34 = vadd.f32 %v1174_v43, %v1171_v4  ;;  %v7945_v9 = vmul.f32 2.0, %v7904_v37  ;;  %v1466_v56 = vsub.f32 %v11980_v35, %v7860_v60  ;;  %v11983_v4 = vld [vmem:[#allocation14_spill] sm:$0xff] }
 0xa99   :  { %v123_v13 = vmin.f32 %v121_v24, %v122_v30  ;;  %v1173_v24 = vmul.f32 %v6886_v50, %v6886_v50  ;;  %v7874_v30 = vmul.f32 %v6886_v50, %v6851_v32  ;;  %v7892_v32 = vmul.f32 %v6905_v58, %v6863_v38  ;;  %11960 = vst [vmem:[#allocation160_spill] sm:$0xff] %v7928_v18 }
 0xa9a   :  { %v1460_v50 = vmul.f32 %v6914_v63, %v6914_v63  ;;  %v1458_v38 = vmul.f32 %v6876_v46, %v6876_v46  ;;  %v7918_v58 = vmul.f32 2.0, %v7868_v26  ;;  %11961 = vst [vmem:[#allocation161_spill] sm:$0xff] %v7931_v52 }
 0xa9b   :  { %5698 = vpush %v123_v13  ;;  %v7878_v13 = vmul.f32 %v6893_v53, %v6859_v36  ;;  %v7898_v36 = vmul.f32 %v6912_v62, %v6867_v40  ;;  %v7907_v53 = vmul.f32 2.0, %v7864_v3  ;;  %v7915_v40 = vmul.f32 %v6931_v2, %v6876_v46 }
 0xa9c   :  { %11957 = vst [vmem:[#allocation157_spill] sm:$0xff] %v7918_v58  ;;  %v7920_v62 = vadd.f32 %v1173_v24, %v1170_v61  ;;  %v7923_v42 = vmul.f32 2.0, %v7874_v30  ;;  %v7936_v46 = vmul.f32 2.0, %v7892_v32  ;;  %v7942_v21 = vadd.f32 %v1460_v50, %v7860_v60  ;;  %v11976_v58 = vld [vmem:[#allocation90_spill] sm:$0xff]  ;;  %v11979_v61 = vld [vmem:[#allocation88_spill] sm:$0xff]  ;;  %v11989_v60 = vld [vmem:[#allocation25_spill] sm:$0xff] }
 0xa9d   :  { %v7926_v63 = vmul.f32 2.0, %v7878_v13  ;;  %v7939_v2 = vmul.f32 2.0, %v7898_v36  ;;  %11965 = vst [vmem:[#allocation165_spill] sm:$0xff] %v7945_v9  ;;  %v7951_v1 = vadd.f32 %v1461_v55, %v1458_v38  ;;  %v7954_v29 = vmul.f32 2.0, %v7915_v40 }
 0xa9e   :  { %11958 = vst [vmem:[#allocation158_spill] sm:$0xff] %v7923_v42  ;;  %v1182_v28 = vsub.f32 %v11974_v48, %v1173_v24  ;;  %v1742_v24 = vsub.f32 %v11984_v11, %v11983_v4  ;;  %v11985_v48 = vld [vmem:[#allocation23_spill] sm:$0xff]  ;;  %v1470_v10 = vsub.f32 %v11989_v60, %v1461_v55  ;;  %v8038_v60 = vpop.f32.mrf.mxu3  ;;  %v12125_v42 = vld [vmem:[#allocation136_spill] sm:$0xff] }
 0xa9f   :  { %11959 = vst [vmem:[#allocation159_spill] sm:$0xff] %v7926_v63  ;;  %v11975_v63 = vld [vmem:[#allocation11_spill] sm:$0xff]  ;;  %v1469_v18 = vsub.f32 %v11985_v48, %v1460_v50  ;;  %v11993_v50 = vld [vmem:[#allocation93_spill] sm:$0xff]  ;;  %v12009_v48 = vld [vmem:[#allocation42_spill] sm:$0xff] }
 0xaa0   :  { %11962 = vst [vmem:[#allocation162_spill] sm:$0xff] %v7936_v46  ;;  %v1741_v9 = vsub.f32 %v11976_v58, %v11975_v63  ;;  %v11986_v58 = vld [vmem:[#allocation24_spill] sm:$0xff]  ;;  %v12124_v46 = vld [vmem:[#allocation130_spill] sm:$0xff] }
 0xaa1   :  { %11963 = vst [vmem:[#allocation163_spill] sm:$0xff] %v7939_v2  ;;  %v11972_v2 = vld [vmem:[#allocation89_spill] sm:$0xff] }
 0xaa2   :  { %11964 = vst [vmem:[#allocation164_spill] sm:$0xff] %v7942_v21  ;;  %v1740_v12 = vsub.f32 %v11972_v2, %v11971_v41  ;;  %v11981_v2 = vld [vmem:[#allocation22_spill] sm:$0xff]  ;;  %v11982_v41 = vld [vmem:[#allocation19_spill] sm:$0xff] }
 0xaa3   :  { %11966 = vst [vmem:[#allocation166_spill] sm:$0xff] %v7951_v1  ;;  %v1739_v1 = vsub.f32 %v11979_v61, %v11978_v5  ;;  %v1183_v44 = vsub.f32 %v11981_v2, %v1174_v43  ;;  %v1467_v21 = vsub.f32 %v11982_v41, %v1458_v38  ;;  %v1185_v43 = vsub.f32 %v11990_v39, %v7874_v30  ;;  %v11996_v41 = vld [vmem:[#allocation95_spill] sm:$0xff] }
 0xaa4   :  { %11967 = vst [vmem:[#allocation167_spill] sm:$0xff] %v7954_v29  ;;  %v11977_v29 = vld [vmem:[#allocation21_spill] sm:$0xff]  ;;  %v7982_v63 = vadd.f32 %v1740_v12, %v1737_v6  ;;  %v7989_v61 = vadd.f32 %v1182_v28, %v1179_v25  ;;  %v7991_v38 = vadd.f32 %v1741_v9, %v1738_v14  ;;  %v1744_v2 = vsub.f32 %v11993_v50, %v7878_v13  ;;  %v11994_v6 = vld [vmem:[#allocation27_spill] sm:$0xff]  ;;  %v12013_v50 = vld [vmem:[#allocation46_spill] sm:$0xff] }
 0xaa5   :  { %v1468_v52 = vsub.f32 %v11977_v29, %v1459_v27  ;;  %v1184_v27 = vsub.f32 %v11986_v58, %v7864_v3  ;;  %v11988_v29 = vld [vmem:[#allocation92_spill] sm:$0xff]  ;;  %v7997_v3 = vadd.f32 %v1183_v44, %v1180_v54  ;;  %v1471_v12 = vsub.f32 %v11994_v6, %v7886_v31  ;;  %v11999_v14 = vld [vmem:[#allocation29_spill] sm:$0xff]  ;;  %v12003_v44 = vld [vmem:[#allocation31_spill] sm:$0xff] }
 0xaa6   :  { %11987 = vst [vmem:[#allocation10_spill] sm:$0xff] %v7982_v63  ;;  %v1743_v5 = vsub.f32 %v11988_v29, %v7868_v26  ;;  %v11995_v26 = vld [vmem:[#allocation28_spill] sm:$0xff]  ;;  %v1745_v30 = vsub.f32 %v11996_v41, %v7898_v36  ;;  %v8005_v25 = vadd.f32 %v1742_v24, %v1739_v1  ;;  %v8007_v9 = vadd.f32 %v1469_v18, %v1466_v56  ;;  %v12006_v36 = vld [vmem:[#allocation33_spill] sm:$0xff] }
 0xaa7   :  { %11991 = vst [vmem:[#allocation87_spill] sm:$0xff] %v7991_v38  ;;  %v7993_v35 = vadd.f32 %v1468_v52, %v1465_v23  ;;  %v1186_v55 = vsub.f32 %v11995_v26, %v7892_v32  ;;  %v8009_v52 = vmul.f32 2.0, %v1184_v27  ;;  %v12000_v23 = vld [vmem:[#allocation38_spill] sm:$0xff]  ;;  %v8015_v28 = vadd.f32 %v1470_v10, %v1467_v21  ;;  %v12004_v32 = vld [vmem:[#allocation39_spill] sm:$0xff]  ;;  %v12007_v1 = vld [vmem:[#allocation40_spill] sm:$0xff]  ;;  %v8040_v10 = vpop.f32.mrf.mxu1 }
 0xaa8   :  { %11997 = vst [vmem:[#allocation8_spill] sm:$0xff] %v8005_v25  ;;  %v897_v13 = vsub.f32 %v12000_v23, %v11999_v14  ;;  %v8013_v54 = vmul.f32 2.0, %v1743_v5  ;;  %v8017_v31 = vmul.f32 2.0, %v1185_v43  ;;  %v898_v4 = vsub.f32 %v12004_v32, %v12003_v44  ;;  %v12008_v56 = vld [vmem:[#allocation41_spill] sm:$0xff]  ;;  %v12012_v43 = vld [vmem:[#allocation43_spill] sm:$0xff]  ;;  %v12015_v26 = vld [vmem:[#allocation50_spill] sm:$0xff] }
 0xaa9   :  { %11992 = vst [vmem:[#allocation16_spill] sm:$0xff] %v7993_v35  ;;  %v8021_v11 = vmul.f32 2.0, %v1744_v2  ;;  %v899_v18 = vsub.f32 %v12007_v1, %v12006_v36  ;;  %v1472_v24 = vsub.f32 %v12008_v56, %v7904_v37  ;;  %v1473_v58 = vsub.f32 %v12009_v48, %v7915_v40  ;;  %v12016_v41 = vld [vmem:[#allocation45_spill] sm:$0xff]  ;;  %v12018_v23 = vld [vmem:[#allocation48_spill] sm:$0xff]  ;;  %v12023_v48 = vld [vmem:[#allocation62_spill] sm:$0xff] }
 0xaaa   :  { %11998 = vst [vmem:[#allocation89_spill] sm:$0xff] %v8007_v9  ;;  %v8029_v27 = vmul.f32 2.0, %v1471_v12  ;;  %v8031_v21 = vmul.f32 2.0, %v1186_v55  ;;  %v8033_v29 = vmul.f32 2.0, %v1745_v30  ;;  %v8036_v5 = vmul.f32 2.0, %v11999_v14  ;;  %v12014_v12 = vld [vmem:[#allocation44_spill] sm:$0xff] }
 0xaab   :  { %12001 = vst [vmem:[#allocation17_spill] sm:$0xff] %v8013_v54  ;;  %v8043_v39 = vmul.f32 2.0, %v12003_v44  ;;  %v8046_v37 = vmul.f32 2.0, %v12006_v36  ;;  %v8048_v40 = vmul.f32 2.0, %v897_v13  ;;  %v2021_v2 = vmul.f32 %v12013_v50, %v12012_v43  ;;  %v12017_v30 = vld [vmem:[#allocation54_spill] sm:$0xff]  ;;  %v12019_v32 = vld [vmem:[#allocation61_spill] sm:$0xff] }
 0xaac   :  { %12002 = vst [vmem:[#allocation20_spill] sm:$0xff] %v8015_v28  ;;  %v8052_v6 = vmul.f32 2.0, %v898_v4  ;;  %v2022_v55 = vmul.f32 %v12015_v26, %v12014_v12  ;;  %v2023_v14 = vmul.f32 %v12017_v30, %v12016_v41  ;;  %v2027_v44 = vsub.f32 %v12019_v32, %v12018_v23  ;;  %v12022_v56 = vld [vmem:[#allocation52_spill] sm:$0xff]  ;;  %v12024_v4 = vld [vmem:[#allocation47_spill] sm:$0xff]  ;;  %v12025_v50 = vld [vmem:[#allocation58_spill] sm:$0xff] }
 0xaad   :  { %12005 = vst [vmem:[#allocation11_spill] sm:$0xff] %v8021_v11  ;;  %v8060_v1 = vmul.f32 2.0, %v899_v18  ;;  %v8062_v36 = vmul.f32 2.0, %v1472_v24  ;;  %v8064_v13 = vmul.f32 2.0, %v1473_v58  ;;  %v2028_v43 = vsub.f32 %v12023_v48, %v12022_v56  ;;  %v12026_v38 = vld [vmem:[#allocation56_spill] sm:$0xff]  ;;  %v12027_v12 = vld [vmem:[#allocation63_spill] sm:$0xff] }
 0xaae   :  { %12010 = vst [vmem:[#allocation90_spill] sm:$0xff] %v8029_v27  ;;  %v2024_v25 = vsub.f32 %v12025_v50, %v12024_v4  ;;  %v2029_v26 = vsub.f32 %v12027_v12, %v12026_v38  ;;  %v12028_v63 = vld [vmem:[#allocation64_spill] sm:$0xff]  ;;  %v12029_v30 = vld [vmem:[#allocation65_spill] sm:$0xff]  ;;  %v8074_v23 = vmul.f32 2.0, %v2021_v2  ;;  %v12031_v18 = vld [vmem:[#allocation51_spill] sm:$0xff]  ;;  %v8081_v48 = vmul.f32 2.0, %v2022_v55 }
 0xaaf   :  { %12011 = vst [vmem:[#allocation21_spill] sm:$0xff] %v8033_v29  ;;  %v2030_v41 = vsub.f32 %v12028_v63, %v2021_v2  ;;  %v2031_v29 = vsub.f32 %v12029_v30, %v2022_v55  ;;  %v12032_v24 = vld [vmem:[#allocation59_spill] sm:$0xff]  ;;  %v12033_v58 = vld [vmem:[#allocation66_spill] sm:$0xff]  ;;  %v8083_v4 = vmul.f32 2.0, %v2023_v14  ;;  %v12038_v38 = vld [vmem:[#allocation60_spill] sm:$0xff] }
 0xab0   :  { %12020 = vst [vmem:[#allocation13_spill] sm:$0xff] %v8062_v36  ;;  %v2025_v32 = vsub.f32 %v12032_v24, %v12031_v18  ;;  %v2032_v11 = vsub.f32 %v12033_v58, %v2023_v14  ;;  %v12034_v54 = vld [vmem:[#allocation78_spill] sm:$0xff]  ;;  %v12037_v50 = vld [vmem:[#allocation55_spill] sm:$0xff]  ;;  %v8087_v63 = vadd.f32 %v2027_v44, %v2024_v25  ;;  %v12041_v2 = vld [vmem:[#allocation77_spill] sm:$0xff] }
 0xab1   :  { %12021 = vst [vmem:[#allocation88_spill] sm:$0xff] %v8064_v13  ;;  %v2464_v56 = vmul.f32 %v12034_v54, %v12034_v54  ;;  %v2026_v12 = vsub.f32 %v12038_v38, %v12037_v50  ;;  %v2465_v18 = vmul.f32 %v12034_v54, %v12041_v2  ;;  %v12042_v24 = vld [vmem:[#allocation80_spill] sm:$0xff]  ;;  %v8098_v55 = vmul.f32 2.0, %v2030_v41  ;;  %v12049_v50 = vld [vmem:[#allocation81_spill] sm:$0xff] }
 0xab2   :  { %12030 = vst [vmem:[#allocation18_spill] sm:$0xff] %v8074_v23  ;;  %v8089_v30 = vadd.f32 %v2028_v43, %v2025_v32  ;;  %v2463_v23 = vmul.f32 %v12041_v2, %v12041_v2  ;;  %v8100_v14 = vmul.f32 2.0, %v2031_v29  ;;  %v8104_v44 = vmul.f32 2.0, %v2032_v11  ;;  %v12048_v43 = vld [vmem:[#allocation79_spill] sm:$0xff]  ;;  %v12052_v2 = vld [vmem:[#allocation73_spill] sm:$0xff]  ;;  %v8117_v11 = vpop.f32.mrf.mxu3 }
 0xab3   :  { %12035 = vst [vmem:[#allocation22_spill] sm:$0xff] %v8081_v48  ;;  %v2467_v58 = vsub.f32 %v12042_v24, %v2464_v56  ;;  %v8096_v28 = vadd.f32 %v2029_v26, %v2026_v12  ;;  %v2468_v38 = vsub.f32 %v12049_v50, %v2465_v18  ;;  %v12050_v48 = vld [vmem:[#allocation67_spill] sm:$0xff]  ;;  %v12051_v12 = vld [vmem:[#allocation70_spill] sm:$0xff]  ;;  %v2822_v29 = vmul.f32 %v12052_v2, %v12052_v2  ;;  %v12053_v24 = vld [vmem:[#allocation72_spill] sm:$0xff] }
 0xab4   :  { %12036 = vst [vmem:[#allocation19_spill] sm:$0xff] %v8083_v4  ;;  %v12046_v4 = vld [vmem:[#allocation68_spill] sm:$0xff]  ;;  %v2466_v32 = vsub.f32 %v12048_v43, %v2463_v23  ;;  %v2702_v26 = vmul.f32 %v12050_v48, %v12050_v48  ;;  %v8121_v43 = vadd.f32 %v2464_v56, %v2463_v23  ;;  %v8123_v50 = vmul.f32 2.0, %v2465_v18  ;;  %v12064_v56 = vld [vmem:[#allocation83_spill] sm:$0xff]  ;;  %v12100_v27 = vld [vmem:[#allocation117_spill] sm:$0xff] }
 0xab5   :  { %12039 = vst [vmem:[#allocation14_spill] sm:$0xff] %v8087_v63  ;;  %v2703_v25 = vmul.f32 %v12046_v4, %v12046_v4  ;;  %v2704_v54 = vmul.f32 %v12046_v4, %v12050_v48  ;;  %v2821_v48 = vmul.f32 %v12053_v24, %v12053_v24  ;;  %v8133_v13 = vmul.f32 2.0, %v2468_v38 }
 0xab6   :  { %12040 = vst [vmem:[#allocation91_spill] sm:$0xff] %v8089_v30  ;;  %v8119_v30 = vpop.f32.mrf.mxu1  ;;  %v8125_v4 = vadd.f32 %v2467_v58, %v2466_v32  ;;  %v2941_v18 = vmul.f32 %v12064_v56, %v12064_v56 }
 0xab7   :  { %12043 = vst [vmem:[#allocation23_spill] sm:$0xff] %v8096_v28  ;;  %v2706_v41 = vsub.f32 %v12051_v12, %v2703_v25  ;;  %v2823_v28 = vmul.f32 %v12052_v2, %v12053_v24  ;;  %v12057_v12 = vld [vmem:[#allocation69_spill] sm:$0xff]  ;;  %v12060_v2 = vld [vmem:[#allocation76_spill] sm:$0xff]  ;;  %v8135_v36 = vadd.f32 %v2703_v25, %v2702_v26  ;;  %v8137_v23 = vmul.f32 2.0, %v2704_v54 }
 0xab8   :  { %12044 = vst [vmem:[#allocation24_spill] sm:$0xff] %v8098_v55  ;;  %v2705_v63 = vsub.f32 %v12057_v12, %v2702_v26  ;;  %v12059_v55 = vld [vmem:[#allocation75_spill] sm:$0xff]  ;;  %v8145_v32 = vadd.f32 %v2822_v29, %v2821_v48 }
 0xab9   :  { %12045 = vst [vmem:[#allocation92_spill] sm:$0xff] %v8100_v14  ;;  %v2825_v9 = vsub.f32 %v12059_v55, %v2822_v29  ;;  %v2826_v35 = vsub.f32 %v12060_v2, %v2823_v28  ;;  %v12068_v55 = vld [vmem:[#allocation82_spill] sm:$0xff]  ;;  %v8152_v25 = vmul.f32 2.0, %v2823_v28 }
 0xaba   :  { %12047 = vst [vmem:[#allocation25_spill] sm:$0xff] %v8104_v44  ;;  %v12058_v44 = vld [vmem:[#allocation71_spill] sm:$0xff]  ;;  %v8143_v58 = vadd.f32 %v2706_v41, %v2705_v63  ;;  %v2942_v12 = vmul.f32 %v12064_v56, %v12068_v55  ;;  %v2940_v38 = vmul.f32 %v12068_v55, %v12068_v55  ;;  %v12071_v63 = vld [vmem:[#allocation97_spill] sm:$0xff] }
 0xabb   :  { %12054 = vst [vmem:[#allocation26_spill] sm:$0xff] %v8121_v43  ;;  %v2707_v14 = vsub.f32 %v12058_v44, %v2704_v54  ;;  %s8141_s23 = spop %5696  ;;  %v12067_v44 = vld [vmem:[#allocation74_spill] sm:$0xff]  ;;  %v2583_v2 = vmul.f32 %v12071_v63, %v12071_v63  ;;  %v8166_v56 = vmul.f32 2.0, %v2826_v35  ;;  %v12082_v35 = vld [vmem:[#allocation105_spill] sm:$0xff] }
 0xabc   :  { %12055 = vst [vmem:[#allocation93_spill] sm:$0xff] %v8123_v50  ;;  %v2824_v24 = vsub.f32 %v12067_v44, %v2821_v48  ;;  %v12070_v54 = vld [vmem:[#allocation98_spill] sm:$0xff]  ;;  %v8168_v28 = vadd.f32 %v2941_v18, %v2940_v38  ;;  %v12076_v44 = vld [vmem:[#allocation85_spill] sm:$0xff]  ;;  %p103_p1 = scmp.gt.f32.partialorder %s8141_s23, 128.0 }
 0xabd   :  { %12056 = vst [vmem:[#allocation27_spill] sm:$0xff] %v8125_v4  ;;  %v2584_v26 = vmul.f32 %v12070_v54, %v12070_v54  ;;  %v2585_v41 = vmul.f32 %v12070_v54, %v12071_v63  ;;  %v8160_v29 = vmul.f32 2.0, %v2707_v14  ;;  %v2944_v55 = vsub.f32 %v12076_v44, %v2941_v18  ;;  %v12081_v54 = vld [vmem:[#allocation106_spill] sm:$0xff]  ;;  %v12090_v4 = vld [vmem:[#allocation96_spill] sm:$0xff] }
 0xabe   :  { %12061 = vst [vmem:[#allocation28_spill] sm:$0xff] %v8133_v13  ;;  %v8162_v48 = vadd.f32 %v2825_v9, %v2824_v24  ;;  %v8176_v14 = vmul.f32 2.0, %v2942_v12  ;;  %v12080_v9 = vld [vmem:[#allocation104_spill] sm:$0xff]  ;;  %v3060_v63 = vmul.f32 %v12081_v54, %v12081_v54  ;;  %v12086_v44 = vld [vmem:[#allocation102_spill] sm:$0xff]  ;;  %s104_s12 = scalar_select %p103_p1, 255.0, 1.0 }
 0xabf   :  { %12062 = vst [vmem:[#allocation95_spill] sm:$0xff] %v8135_v36  ;;  %v2588_v24 = vsub.f32 %v12080_v9, %v2585_v41  ;;  %v8185_v18 = vmul.f32 2.0, %v2585_v41  ;;  %v12087_v9 = vld [vmem:[#allocation108_spill] sm:$0xff]  ;;  %v12089_v43 = vld [vmem:[#allocation94_spill] sm:$0xff]  ;;  %v8198_v41 = vpop.f32.mrf.mxu1 }
 0xac0   :  { %12063 = vst [vmem:[#allocation29_spill] sm:$0xff] %v8137_v23  ;;  %v12078_v23 = vld [vmem:[#allocation86_spill] sm:$0xff] }
 0xac1   :  { %12065 = vst [vmem:[#allocation38_spill] sm:$0xff] %v8143_v58  ;;  %v2945_v36 = vsub.f32 %v12078_v23, %v2942_v12  ;;  %v8173_v58 = vpop.f32.mrf.mxu2  ;;  %v3059_v12 = vmul.f32 %v12082_v35, %v12082_v35 }
 0xac2   :  { %12066 = vst [vmem:[#allocation31_spill] sm:$0xff] %v8145_v32 }
 0xac3   :  { %12069 = vst [vmem:[#allocation39_spill] sm:$0xff] %v8152_v25  ;;  %v12077_v25 = vld [vmem:[#allocation103_spill] sm:$0xff] }
 0xac4   :  { %12072 = vst [vmem:[#allocation33_spill] sm:$0xff] %v8160_v29  ;;  %v2587_v32 = vsub.f32 %v12077_v25, %v2584_v26  ;;  %v12085_v25 = vld [vmem:[#allocation84_spill] sm:$0xff]  ;;  %v12088_v29 = vld [vmem:[#allocation109_spill] sm:$0xff] }
 0xac5   :  { %12073 = vst [vmem:[#allocation40_spill] sm:$0xff] %v8162_v48  ;;  %v3061_v48 = vmul.f32 %v12081_v54, %v12082_v35  ;;  %v2943_v23 = vsub.f32 %v12085_v25, %v2940_v38  ;;  %v3312_v54 = vmul.f32 %v12090_v4, %v12089_v43  ;;  %v12094_v25 = vld [vmem:[#allocation110_spill] sm:$0xff]  ;;  %v12095_v35 = vld [vmem:[#allocation111_spill] sm:$0xff] }
 0xac6   :  { %12074 = vst [vmem:[#allocation41_spill] sm:$0xff] %v8166_v56  ;;  %v2586_v56 = vsub.f32 %v12086_v44, %v2583_v2  ;;  %v3518_v44 = vmul.f32 %v12095_v35, %v12094_v25  ;;  %v12098_v43 = vld [vmem:[#allocation107_spill] sm:$0xff] }
 0xac7   :  { %12075 = vst [vmem:[#allocation42_spill] sm:$0xff] %v8168_v28  ;;  %v8183_v28 = vadd.f32 %v2584_v26, %v2583_v2  ;;  %v3064_v50 = vsub.f32 %v12088_v29, %v3061_v48  ;;  %v8196_v26 = vpop.f32.mrf.mxu3  ;;  %v8204_v2 = vmul.f32 2.0, %v2945_v36  ;;  %v8210_v29 = vmul.f32 2.0, %v2588_v24  ;;  %v12102_v36 = vld [vmem:[#allocation115_spill] sm:$0xff] }
 0xac8   :  { %12079 = vst [vmem:[#allocation43_spill] sm:$0xff] %v8176_v14  ;;  %v3063_v14 = vsub.f32 %v12087_v9, %v3060_v63  ;;  %v8202_v38 = vadd.f32 %v2587_v32, %v2586_v56  ;;  %v8212_v9 = vadd.f32 %v3060_v63, %v3059_v12  ;;  %v3062_v4 = vsub.f32 %v12098_v43, %v3059_v12  ;;  %v12103_v56 = vld [vmem:[#allocation118_spill] sm:$0xff]  ;;  %v12109_v35 = vld [vmem:[#allocation123_spill] sm:$0xff] }
 0xac9   :  { %12083 = vst [vmem:[#allocation46_spill] sm:$0xff] %v8183_v28  ;;  %v12099_v28 = vld [vmem:[#allocation137_spill] sm:$0xff]  ;;  %v8225_v24 = vmul.f32 2.0, %v3061_v48  ;;  %v8229_v12 = vmul.f32 2.0, %v3064_v50  ;;  %v12112_v48 = vld [vmem:[#allocation100_spill] sm:$0xff] }
 0xaca   :  { %12084 = vst [vmem:[#allocation44_spill] sm:$0xff] %v8185_v18  ;;  %v8200_v18 = vadd.f32 %v2944_v55, %v2943_v23  ;;  %v3315_v13 = vsub.f32 %v12099_v28, %v3312_v54  ;;  %v3521_v55 = vsub.f32 %v12100_v27, %v3518_v44  ;;  %v12101_v23 = vld [vmem:[#allocation119_spill] sm:$0xff]  ;;  %v8227_v63 = vadd.f32 %v3063_v14, %v3062_v4 }
 0xacb   :  { %12092 = vst [vmem:[#allocation45_spill] sm:$0xff] %v8202_v38  ;;  %v3414_v32 = vmul.f32 %v12101_v23, %v12101_v23  ;;  %v8231_v28 = vmul.f32 2.0, %v3312_v54  ;;  %v12113_v14 = vld [vmem:[#allocation99_spill] sm:$0xff]  ;;  %v12116_v54 = vld [vmem:[#allocation112_spill] sm:$0xff] }
 0xacc   :  { %s8150_s1 = spop %5698  ;;  %12091 = vst [vmem:[#allocation50_spill] sm:$0xff] %v8200_v18  ;;  %v3621_v18 = vmul.f32 %v12103_v56, %v12102_v36  ;;  %v12111_v56 = vld [vmem:[#allocation125_spill] sm:$0xff]  ;;  %v8244_v4 = vadd.f32 %v12113_v14, %v12112_v48  ;;  %v8246_v50 = vmul.f32 2.0, %v3315_v13  ;;  %v4055_v48 = vsub.f32 %v12125_v42, %v12124_v46  ;;  %v5087_v14 = vpop.f32.mrf.mxu0 }
 0xacd   :  { %p125_p0 = scmp.lt.f32.partialorder %s8150_s1, -0.5  ;;  %12093 = vst [vmem:[#allocation54_spill] sm:$0xff] %v8204_v2  ;;  %v12104_v2 = vld [vmem:[#allocation116_spill] sm:$0xff]  ;;  %v3417_v43 = vsub.f32 %v12109_v35, %v3414_v32  ;;  %v12120_v35 = vld [vmem:[#allocation133_spill] sm:$0xff] }
 0xace   :  { %12096 = vst [vmem:[#allocation48_spill] sm:$0xff] %v8210_v29  ;;  %v3415_v25 = vmul.f32 %v12101_v23, %v12104_v2  ;;  %v3413_v27 = vmul.f32 %v12104_v2, %v12104_v2  ;;  %v8238_v23 = vpop.f32.mrf.mxu2  ;;  %v12119_v2 = vld [vmem:[#allocation126_spill] sm:$0xff]  ;;  %v12126_v13 = vld [vmem:[#allocation121_spill] sm:$0xff] }
 0xacf   :  { %s126_s8 = scalar_select %p125_p0, -1.0, 0.0  ;;  %12097 = vst [vmem:[#allocation61_spill] sm:$0xff] %v8212_v9  ;;  %v12110_v9 = vld [vmem:[#allocation129_spill] sm:$0xff] }
 0xad0   :  { %12105 = vst [vmem:[#allocation52_spill] sm:$0xff] %v8225_v24  ;;  %v3624_v36 = vsub.f32 %v12110_v9, %v3621_v18  ;;  %v3418_v38 = vsub.f32 %v12111_v56, %v3415_v25  ;;  %v3830_v9 = vsub.f32 %v12120_v35, %v12119_v2  ;;  %v8256_v56 = vmul.f32 2.0, %v3518_v44 }
 0xad1   :  { %12106 = vst [vmem:[#allocation62_spill] sm:$0xff] %v8227_v63  ;;  %s8240_s21 = ssub.f32 %s104_s12, %s126_s8  ;;  %v8254_v63 = vmul.f32 2.0, %v3521_v55  ;;  %v4984_v55 = vpop.f32.mrf.mxu3 }
 0xad2   :  { %12107 = vst [vmem:[#allocation47_spill] sm:$0xff] %v8229_v12  ;;  %v12123_v12 = vld [vmem:[#allocation120_spill] sm:$0xff]  ;;  %v8273_v44 = vmul.f32 2.0, %v3624_v36 }
 0xad3   :  { %12108 = vst [vmem:[#allocation58_spill] sm:$0xff] %v8231_v28  ;;  %v12117_v28 = vld [vmem:[#allocation113_spill] sm:$0xff]  ;;  %v3416_v29 = vsub.f32 %v12123_v12, %v3413_v27  ;;  %v8275_v12 = vmul.f32 2.0, %v3418_v38  ;;  %s129_s22 = smul.f32 0.03, %s8240_s21  ;;  %v12141_v38 = vld [vmem:[#allocation134_spill] sm:$0xff] }
 0xad4   :  { %12114 = vst [vmem:[#allocation56_spill] sm:$0xff] %v8244_v4  ;;  %v8250_v24 = vadd.f32 %v12117_v28, %v12116_v54  ;;  %v8265_v28 = vadd.f32 %v3414_v32, %v3413_v27  ;;  %v8267_v54 = vmul.f32 2.0, %v3621_v18  ;;  %v8283_v32 = vmul.f32 2.0, %v3830_v9  ;;  %v4790_v27 = vpop.f32.mrf.mxu1  ;;  %v12145_v9 = vld [vmem:[#allocation141_spill] sm:$0xff]  ;;  %s128_s24 = smul.f32 0.01, %s8240_s21 }
 0xad5   :  { %12115 = vst [vmem:[#allocation63_spill] sm:$0xff] %v8246_v50  ;;  %v12127_v50 = vld [vmem:[#allocation122_spill] sm:$0xff]  ;;  %v8271_v35 = vadd.f32 %v3417_v43, %v3416_v29  ;;  %v8286_v18 = vmul.f32 2.0, %v12124_v46  ;;  %v8290_v43 = vmul.f32 2.0, %v4055_v48  ;;  %v8293_v36 = vmul.f32 2.0, %v12141_v38  ;;  %s131_s2 = smul.f32 %s129_s22, %s129_s22 }
 0xad6   :  { %12118 = vst [vmem:[#allocation64_spill] sm:$0xff] %v8250_v24  ;;  %v8263_v4 = vadd.f32 %v12127_v50, %v12126_v13  ;;  %v8269_v24 = vmul.f32 2.0, %v3415_v25  ;;  %v8281_v50 = vmul.f32 2.0, %v12119_v2  ;;  %v12139_v25 = vld [vmem:[#allocation155_spill] sm:$0xff]  ;;  %s130_s13 = smul.f32 %s128_s24, %s128_s24 }
 0xad7   :  { %12121 = vst [vmem:[#allocation65_spill] sm:$0xff] %v8254_v63  ;;  %v4566_v29 = vmul.f32 %v12139_v25, %v12139_v25  ;;  %v12144_v13 = vld [vmem:[#allocation147_spill] sm:$0xff] }
 0xad8   :  { %12122 = vst [vmem:[#allocation51_spill] sm:$0xff] %v8256_v56  ;;  %v12135_v56 = vld [vmem:[#allocation139_spill] sm:$0xff]  ;;  %v4364_v2 = vsub.f32 %v7880_v59, %v12144_v13 }
 0xad9   :  { %12128 = vst [vmem:[#allocation59_spill] sm:$0xff] %v8263_v4  ;;  %v4467_v42 = vsub.f32 %v8173_v58, %v12135_v56  ;;  %v8296_v58 = vmul.f32 2.0, %v12135_v56  ;;  %v4569_v48 = vsub.f32 %v8117_v11, %v4566_v29  ;;  %v8324_v11 = vmul.f32 2.0, %v12144_v13  ;;  %v12250_v4 = vld [vmem:[#allocation166_spill] sm:$0xff] }
 0xada   :  { %12129 = vst [vmem:[#allocation66_spill] sm:$0xff] %v8265_v28  ;;  %v12254_v28 = vld [vmem:[#allocation165_spill] sm:$0xff] }
 0xadb   :  { %12130 = vst [vmem:[#allocation78_spill] sm:$0xff] %v8267_v54  ;;  %v12146_v54 = vsub.f32 %v12145_v9, %v12141_v38  ;;  %v8319_v38 = vmul.f32 2.0, %v4467_v42  ;;  %v12160_v42 = vld [vmem:[#allocation153_spill] sm:$0xff] }
 0xadc   :  { %12131 = vst [vmem:[#allocation55_spill] sm:$0xff] %v8269_v24  ;;  %v12148_v24 = vld [vmem:[#allocation154_spill] sm:$0xff] }
 0xadd   :  { %12132 = vst [vmem:[#allocation60_spill] sm:$0xff] %v8271_v35  ;;  %v8303_v46 = vmul.f32 2.0, %v12146_v54  ;;  %v4565_v25 = vmul.f32 %v12148_v24, %v12148_v24  ;;  %v4794_v54 = vmul.f32 %v8040_v10, %v8040_v10  ;;  %v4884_v24 = vpop.f32.mrf.mxu2  ;;  %v12256_v35 = vld [vmem:[#allocation167_spill] sm:$0xff] }
 0xade   :  { %12133 = vst [vmem:[#allocation77_spill] sm:$0xff] %v8273_v44  ;;  %v12252_v44 = vld [vmem:[#allocation161_spill] sm:$0xff] }
 0xadf   :  { %12134 = vst [vmem:[#allocation80_spill] sm:$0xff] %v8275_v12  ;;  %v4797_v13 = vsub.f32 %v8198_v41, %v4794_v54  ;;  %v12259_v12 = vld [vmem:[#allocation17_spill] sm:$0xff] }
 0xae0   :  { %12136 = vst [vmem:[#allocation68_spill] sm:$0xff] %v8281_v50 }
 0xae1   :  { %12137 = vst [vmem:[#allocation79_spill] sm:$0xff] %v8283_v32  ;;  %v8342_v32 = vadd.f32 %v4566_v29, %v4565_v25  ;;  %v8358_v29 = vmul.f32 %v4884_v24, %v4884_v24 }
 0xae2   :  { %12138 = vst [vmem:[#allocation81_spill] sm:$0xff] %v8286_v18  ;;  %v12149_v18 = vld [vmem:[#allocation156_spill] sm:$0xff] }
 0xae3   :  { %12140 = vst [vmem:[#allocation67_spill] sm:$0xff] %v8290_v43  ;;  %v4570_v50 = vsub.f32 %v8196_v26, %v12149_v18  ;;  %v12157_v26 = vld [vmem:[#allocation149_spill] sm:$0xff] }
 0xae4   :  { %12142 = vst [vmem:[#allocation70_spill] sm:$0xff] %v8293_v36  ;;  %v12150_v36 = vld [vmem:[#allocation142_spill] sm:$0xff]  ;;  %v8327_v9 = vmul.f32 2.0, %v12157_v26 }
 0xae5   :  { %12143 = vst [vmem:[#allocation73_spill] sm:$0xff] %v8296_v58  ;;  %v8312_v56 = vmul.f32 2.0, %v12150_v36  ;;  %v12152_v58 = vld [vmem:[#allocation146_spill] sm:$0xff] }
 0xae6   :  { %12147 = vst [vmem:[#allocation72_spill] sm:$0xff] %v8303_v46  ;;  %v12153_v59 = vsub.f32 %v12152_v58, %v12150_v36  ;;  %v4795_v36 = vmul.f32 %v8040_v10, %v7962_v17  ;;  %v8332_v58 = vmul.f32 2.0, %v4364_v2  ;;  %v4793_v46 = vmul.f32 %v7962_v17, %v7962_v17  ;;  %v4987_v2 = vpop.f32.mrf.mxu3 }
 0xae7   :  { %12151 = vst [vmem:[#allocation69_spill] sm:$0xff] %v8312_v56  ;;  %v4568_v56 = vsub.f32 %v8038_v60, %v4565_v25  ;;  %v8345_v60 = vmul.f32 2.0, %v12149_v18  ;;  %v8349_v10 = vmul.f32 2.0, %v4570_v50  ;;  %v8354_v17 = vstv %s131_s2  ;;  %v8365_v50 = vpop.f32.mrf.mxu1 }
 0xae8   :  { %v8317_v43 = vmul.f32 2.0, %v12153_v59  ;;  %12155 = vst [vmem:[#allocation75_spill] sm:$0xff] %v8319_v38  ;;  %v12161_v59 = vsub.f32 %v12160_v42, %v12157_v26  ;;  %v8351_v26 = vadd.f32 %v4794_v54, %v4793_v46  ;;  %v4796_v42 = vsub.f32 %v8119_v30, %v4793_v46 }
 0xae9   :  { %12156 = vst [vmem:[#allocation76_spill] sm:$0xff] %v8324_v11  ;;  %v5090_v11 = vpop.f32.mrf.mxu0  ;;  %v8356_v41 = vmul.f32 2.0, %v4795_v36  ;;  %v8361_v18 = vmul.f32 %v4884_v24, %v8238_v23  ;;  %v8371_v54 = vmul.f32 %v4987_v2, %v4987_v2  ;;  %v8373_v30 = vmul.f32 %v4987_v2, %v4984_v55 }
 0xaea   :  { %12154 = vst [vmem:[#allocation71_spill] sm:$0xff] %v8317_v43  ;;  %v8337_v38 = vmul.f32 2.0, %v12161_v59  ;;  %v4798_v59 = vsub.f32 %v4790_v27, %v4795_v36  ;;  %v8363_v25 = vmul.f32 %v5090_v11, %v5090_v11  ;;  %v8377_v27 = vmul.f32 %v8238_v23, %v8238_v23  ;;  %v12248_v43 = vld [vmem:[#allocation164_spill] sm:$0xff] }
 0xaeb   :  { %12158 = vst [vmem:[#allocation83_spill] sm:$0xff] %v8327_v9  ;;  %v8347_v9 = vadd.f32 %v4569_v48, %v4568_v56  ;;  %v8367_v48 = vadd.f32 %v4797_v13, %v4796_v42  ;;  %v8369_v56 = vmul.f32 %v5090_v11, %v5087_v14  ;;  %v8379_v46 = vmul.f32 %v5087_v14, %v5087_v14  ;;  %v8399_v14 = vpop.f32.mrf.mxu2 }
 0xaec   :  { %12159 = vst [vmem:[#allocation74_spill] sm:$0xff] %v8332_v58  ;;  %v8381_v24 = vstv %s130_s13  ;;  %v8385_v36 = vadd.f32 %v7836_v22, %v8354_v17  ;;  %v8387_v13 = vmul.f32 2.0, %v4798_v59  ;;  %v8389_v11 = vmul.f32 %v4984_v55, %v4984_v55  ;;  %v12246_v58 = vld [vmem:[#allocation160_spill] sm:$0xff] }
 0xaed   :  { %12162 = vst [vmem:[#allocation82_spill] sm:$0xff] %v8337_v38  ;;  %v8393_v2 = vmul.f32 %v8365_v50, %v8365_v50  ;;  %v8397_v23 = vadd.f32 %v7838_v8, %v8354_v17  ;;  %v8403_v42 = vadd.f32 %v8358_v29, %v8377_v27  ;;  %v8406_v22 = vmul.f32 2.0, %v8361_v18 }
 0xaee   :  { %12163 = vst [vmem:[#allocation98_spill] sm:$0xff] %v8342_v32  ;;  %v8410_v55 = vadd.f32 %v8363_v25, %v8379_v46  ;;  %v8414_v59 = vadd.f32 %v7840_v47, %v8354_v17  ;;  %v8417_v8 = vmul.f32 2.0, %v8369_v56  ;;  %v8436_v47 = vadd.f32 %v8381_v24, %v7832_v7 }
 0xaef   :  { %12164 = vst [vmem:[#allocation97_spill] sm:$0xff] %v8345_v60  ;;  %v8424_v60 = vmul.f32 2.0, %v8373_v30  ;;  %5837 = vrcp.f32 %v8385_v36  ;;  %v8456_v7 = vadd.f32 %v7824_v57, %v8381_v24  ;;  %v12204_v57 = vld [vmem:[#allocation36_spill] sm:$0xff]  ;;  %v8615_v38 = vadd.f32 %v12246_v58, %v8381_v24 }
 0xaf0   :  { %12165 = vst [vmem:[#allocation85_spill] sm:$0xff] %v8347_v9  ;;  %5839 = vrcp.f32 %v8397_v23  ;;  %v12242_v9 = vld [vmem:[#allocation89_spill] sm:$0xff]  ;;  %v8630_v63 = vadd.f32 %v12252_v44, %v8381_v24  ;;  %v8634_v58 = vadd.f32 %v12254_v28, %v8381_v24  ;;  %vm627_vm10 = vweird.f32 %v8385_v36 }
 0xaf1   :  { %12166 = vst [vmem:[#allocation103_spill] sm:$0xff] %v8349_v10  ;;  %5841 = vrcp.f32 %v8414_v59  ;;  %v12244_v10 = vld [vmem:[#allocation20_spill] sm:$0xff] }
 0xaf2   :  { %12167 = vst [vmem:[#allocation86_spill] sm:$0xff] %v8351_v26  ;;  %v12236_v26 = vld [vmem:[#allocation13_spill] sm:$0xff] }
 0xaf3   :  { %12168 = vst [vmem:[#allocation104_spill] sm:$0xff] %v8354_v17 }
 0xaf4   :  { %12169 = vst [vmem:[#allocation106_spill] sm:$0xff] %v8356_v41  ;;  %v8421_v41 = vadd.f32 %v8371_v54, %v8389_v11 }
 0xaf5   :  { %12170 = vst [vmem:[#allocation105_spill] sm:$0xff] %v8358_v29  ;;  %v8540_v29 = vadd.f32 %v7973_v49, %v8354_v17  ;;  %v8559_v49 = vadd.f32 %v7920_v62, %v8381_v24 }
 0xaf6   :  { %12171 = vst [vmem:[#allocation84_spill] sm:$0xff] %v8361_v18  ;;  %v12210_v18 = vld [vmem:[#allocation32_spill] sm:$0xff] }
 0xaf7   :  { %12172 = vst [vmem:[#allocation102_spill] sm:$0xff] %v8363_v25  ;;  %v8432_v25 = vadd.f32 %v8381_v24, %v7826_v0  ;;  %v8451_v0 = vadd.f32 %v8354_v17, %v7846_v20  ;;  %v8473_v20 = vadd.f32 %v8048_v40, %v8354_v17  ;;  %v12208_v40 = vld [vmem:[#allocation30_spill] sm:$0xff] }
 0xaf8   :  { %12173 = vst [vmem:[#allocation108_spill] sm:$0xff] %v8365_v50  ;;  %v8570_v50 = vadd.f32 %v7907_v53, %v8381_v24  ;;  %v8589_v53 = vadd.f32 %v12236_v26, %v8354_v17  ;;  %v8608_v26 = vadd.f32 %v12244_v10, %v8354_v17 }
 0xaf9   :  { %12174 = vst [vmem:[#allocation109_spill] sm:$0xff] %v8367_v48  ;;  %v12238_v48 = vld [vmem:[#allocation88_spill] sm:$0xff] }
 0xafa   :  { %12175 = vst [vmem:[#allocation94_spill] sm:$0xff] %v8369_v56 }
 0xafb   :  { %12176 = vst [vmem:[#allocation96_spill] sm:$0xff] %v8371_v54  ;;  %v8499_v54 = vadd.f32 %v12210_v18, %v8381_v24  ;;  %v8518_v18 = vadd.f32 %v8046_v37, %v8381_v24 }
 0xafc   :  { %12177 = vst [vmem:[#allocation110_spill] sm:$0xff] %v8373_v30  ;;  %v8477_v30 = vadd.f32 %v12204_v57, %v8354_v17  ;;  %v8495_v57 = vadd.f32 %v12208_v40, %v8381_v24  ;;  %v8514_v40 = vadd.f32 %v8043_v39, %v8381_v24  ;;  %v8533_v39 = vadd.f32 %v8031_v21, %v8354_v17 }
 0xafd   :  { %12178 = vst [vmem:[#allocation111_spill] sm:$0xff] %v8377_v27 }
 0xafe   :  { %12179 = vst [vmem:[#allocation107_spill] sm:$0xff] %v8379_v46  ;;  %vm931_vm5 = vweird.f32 %v8477_v30 }
 0xaff   :  { %12180 = vst [vmem:[#allocation137_spill] sm:$0xff] %v8381_v24 }
 0xb00   :  { %12181 = vst [vmem:[#allocation117_spill] sm:$0xff] %v8387_v13  ;;  %v12240_v13 = vld [vmem:[#allocation16_spill] sm:$0xff] }
 0xb01   :  { %12182 = vst [vmem:[#allocation119_spill] sm:$0xff] %v8389_v11  ;;  %v12229_v11 = vld [vmem:[#allocation158_spill] sm:$0xff]  ;;  %v8600_v32 = vadd.f32 %v12240_v13, %v8354_v17  ;;  %v8619_v13 = vadd.f32 %v12248_v43, %v8381_v24  ;;  %v8638_v43 = vadd.f32 %v12256_v35, %v8381_v24 }
 0xb02   :  { %12183 = vst [vmem:[#allocation115_spill] sm:$0xff] %v8393_v2  ;;  %v8555_v2 = vadd.f32 %v7894_v45, %v8381_v24  ;;  %v8574_v45 = vadd.f32 %v12229_v11, %v8381_v24  ;;  %v8593_v11 = vadd.f32 %v12238_v48, %v8354_v17 }
 0xb03   :  { %12184 = vst [vmem:[#allocation118_spill] sm:$0xff] %v8397_v23 }
 0xb04   :  { %12185 = vst [vmem:[#allocation116_spill] sm:$0xff] %v8399_v14  ;;  %v8525_v14 = vadd.f32 %v8009_v52, %v8354_v17  ;;  %v8544_v52 = vadd.f32 %v7989_v61, %v8354_v17  ;;  %v8563_v61 = vadd.f32 %v7933_v34, %v8381_v24 }
 0xb05   :  { %12186 = vst [vmem:[#allocation123_spill] sm:$0xff] %v8403_v42 }
 0xb06   :  { %12187 = vst [vmem:[#allocation129_spill] sm:$0xff] %v8406_v22  ;;  %v8428_v22 = vadd.f32 %v8381_v24, %v7820_v33  ;;  %v8447_v33 = vadd.f32 %v8354_v17, %v7844_v51  ;;  %v8469_v51 = vadd.f32 %v7834_v19, %v8381_v24  ;;  %v12207_v19 = vld [vmem:[#allocation37_spill] sm:$0xff] }
 0xb07   :  { %12188 = vst [vmem:[#allocation125_spill] sm:$0xff] %v8410_v55  ;;  %v8490_v46 = vadd.f32 %v12207_v19, %v8354_v17  ;;  %v8510_v19 = vadd.f32 %v8036_v5, %v8381_v24  ;;  %v8529_v5 = vadd.f32 %v8017_v31, %v8354_v17  ;;  %v8548_v31 = vadd.f32 %v7997_v3, %v8354_v17  ;;  %v12231_v55 = vld [vmem:[#allocation162_spill] sm:$0xff] }
 0xb08   :  { %12189 = vst [vmem:[#allocation100_spill] sm:$0xff] %v8414_v59  ;;  %5843 = vrcp.f32 %v8428_v22  ;;  %v8578_v62 = vadd.f32 %v12231_v55, %v8381_v24 }
 0xb09   :  { %12190 = vst [vmem:[#allocation99_spill] sm:$0xff] %v8417_v8  ;;  %v8460_v8 = vadd.f32 %v7830_v16, %v8381_v24  ;;  %v8482_v16 = vadd.f32 %v8052_v6, %v8354_v17  ;;  %5845 = vrcp.f32 %v8432_v25  ;;  %v12212_v6 = vld [vmem:[#allocation34_spill] sm:$0xff]  ;;  %vm945_vm11 = vweird.f32 %v8490_v46 }
 0xb0a   :  { %12191 = vst [vmem:[#allocation112_spill] sm:$0xff] %v8421_v41  ;;  %v8503_v27 = vadd.f32 %v12212_v6, %v8381_v24  ;;  %5847 = vrcp.f32 %v8436_v47  ;;  %v12234_v41 = vld [vmem:[#allocation90_spill] sm:$0xff] }
 0xb0b   :  { %12192 = vst [vmem:[#allocation113_spill] sm:$0xff] %v8424_v60  ;;  %v8443_v60 = vadd.f32 %v8354_v17, %v7842_v15  ;;  %v12201_v15 = vld [vmem:[#allocation35_spill] sm:$0xff]  ;;  %v8585_v42 = vadd.f32 %v12234_v41, %v8354_v17  ;;  %v8604_v41 = vadd.f32 %v12242_v9, %v8354_v17  ;;  %v8623_v9 = vadd.f32 %v12250_v4, %v8381_v24 }
 0xb0c   :  { %12193 = vst [vmem:[#allocation126_spill] sm:$0xff] %v8428_v22  ;;  %v8464_v56 = vadd.f32 %v12201_v15, %v8354_v17  ;;  %v8486_v15 = vadd.f32 %v8060_v1, %v8354_v17  ;;  %v8506_v1 = vpop.eup %5837 }
 0xb0d   :  { %12194 = vst [vmem:[#allocation133_spill] sm:$0xff] %v8432_v25  ;;  %v8521_v6 = vpop.eup %5839  ;;  %vm628_vm3 = vweird.f32 %v8506_v1 }
 0xb0e   :  { %12195 = vst [vmem:[#allocation120_spill] sm:$0xff] %v8436_v47  ;;  %5849 = vrcp.f32 %v8464_v56  ;;  %v8536_v37 = vpop.eup %5841  ;;  %v12277_v47 = vld [vmem:[#allocation15_spill] sm:$0xff]  ;;  %vm917_vm2 = vweird.f32 %v8464_v56  ;;  %vm642_vm6 = vweird.f32 %v8521_v6 }
 0xb0f   :  { %12196 = vst [vmem:[#allocation130_spill] sm:$0xff] %v8443_v60  ;;  %5851 = vrcp.f32 %v8477_v30  ;;  %v8551_v21 = vpop.eup %5843  ;;  %v12309_v60 = vld [vmem:[#allocation19_spill] sm:$0xff] }
 0xb10   :  { %12197 = vst [vmem:[#allocation136_spill] sm:$0xff] %v8447_v33  ;;  %5853 = vrcp.f32 %v8490_v46  ;;  %v8566_v3 = vpop.eup %5845 }
 0xb11   :  { %12198 = vst [vmem:[#allocation121_spill] sm:$0xff] %v8451_v0  ;;  %5855 = vrcp.f32 %v8495_v57  ;;  %v8581_v34 = vpop.eup %5847  ;;  %v12305_v0 = vld [vmem:[#allocation18_spill] sm:$0xff] }
 0xb12   :  { %12199 = vst [vmem:[#allocation122_spill] sm:$0xff] %v8456_v7  ;;  %5857 = vrcp.f32 %v8499_v54  ;;  %v12279_v7 = vld [vmem:[#allocation157_spill] sm:$0xff]  ;;  %v8750_v33 = vadd.f32 %v12305_v0, %v8381_v24 }
 0xb13   :  { %12200 = vst [vmem:[#allocation139_spill] sm:$0xff] %v8460_v8  ;;  %5859 = vrcp.f32 %v8503_v27 }
 0xb14   :  { %12202 = vst [vmem:[#allocation155_spill] sm:$0xff] %v8469_v51  ;;  %v8596_v55 = vpop.eup %5849  ;;  %5861 = vrcp.f32 %v8540_v29  ;;  %v12273_v51 = vld [vmem:[#allocation9_spill] sm:$0xff] }
 0xb15   :  { %12203 = vst [vmem:[#allocation134_spill] sm:$0xff] %v8473_v20  ;;  %v8611_v48 = vpop.eup %5851  ;;  %5863 = vrcp.f32 %v8544_v52  ;;  %v8675_v8 = vadd.f32 %v12273_v51, %v8381_v24  ;;  %v12335_v20 = vld [vmem:[#allocation95_spill] sm:$0xff]  ;;  %vm918_vm0 = vweird.f32 %v8596_v55 }
 0xb16   :  { %12205 = vst [vmem:[#allocation147_spill] sm:$0xff] %v8482_v16  ;;  %v8626_v10 = vpop.eup %5853  ;;  %5865 = vrcp.f32 %v8548_v31  ;;  %vm932_vm1 = vweird.f32 %v8611_v48  ;;  %vm9285_vm14 = vmor %vm917_vm2, %vm918_vm0 }
 0xb17   :  { %12206 = vst [vmem:[#allocation141_spill] sm:$0xff] %v8486_v15  ;;  %v8641_v4 = vpop.eup %5855  ;;  %5867 = vrcp.f32 %v8555_v2  ;;  %v12328_v15 = vld [vmem:[#allocation44_spill] sm:$0xff]  ;;  %vm946_vm4 = vweird.f32 %v8626_v10  ;;  %vm9303_vm0 = vmor %vm931_vm5, %vm932_vm1 }
 0xb18   :  { %12209 = vst [vmem:[#allocation154_spill] sm:$0xff] %v8495_v57  ;;  %v8656_v35 = vpop.eup %5857  ;;  %5869 = vrcp.f32 %v8559_v49  ;;  %vm9317_vm1 = vmor %vm627_vm10, %vm628_vm3 }
 0xb19   :  { %12211 = vst [vmem:[#allocation156_spill] sm:$0xff] %v8499_v54  ;;  %5871 = vrcp.f32 %v8563_v61  ;;  %vm9325_vm5 = vmor %vm945_vm11, %vm946_vm4  ;;  %vm12495_vm11 = vweird.f32 %v8536_v37 }
 0xb1a   :  { %12213 = vst [vmem:[#allocation142_spill] sm:$0xff] %v8503_v27  ;;  %v8645_v27 = vadd.f32 %v12259_v12, %v8354_v17  ;;  %5873 = vrcp.f32 %v8600_v32 }
 0xb1b   :  { %12214 = vst [vmem:[#allocation146_spill] sm:$0xff] %v8510_v19  ;;  %5875 = vrcp.f32 %v8604_v41 }
 0xb1c   :  { %12215 = vst [vmem:[#allocation149_spill] sm:$0xff] %v8514_v40  ;;  %5877 = vrcp.f32 %v8608_v26  ;;  %v12314_v40 = vld [vmem:[#allocation27_spill] sm:$0xff] }
 0xb1d   :  { %12216 = vst [vmem:[#allocation153_spill] sm:$0xff] %v8518_v18  ;;  %5879 = vrcp.f32 %v8615_v38  ;;  %v8769_v0 = vadd.f32 %v12314_v40, %v8354_v17 }
 0xb1e   :  { %12217 = vst [vmem:[#allocation35_spill] sm:$0xff] %v8525_v14  ;;  %5881 = vrcp.f32 %v8619_v13  ;;  %v12312_v14 = vld [vmem:[#allocation28_spill] sm:$0xff] }
 0xb1f   :  { %12218 = vst [vmem:[#allocation36_spill] sm:$0xff] %v8529_v5  ;;  %v12307_v5 = vld [vmem:[#allocation22_spill] sm:$0xff]  ;;  %v8765_v18 = vadd.f32 %v12312_v14, %v8354_v17  ;;  %5883 = vrcp.f32 %v8623_v9 }
 0xb20   :  { %12219 = vst [vmem:[#allocation37_spill] sm:$0xff] %v8533_v39  ;;  %v12302_v39 = vld [vmem:[#allocation57_spill] sm:$0xff] }
 0xb21   :  { %12220 = vst [vmem:[#allocation30_spill] sm:$0xff] %v8540_v29 }
 0xb22   :  { %12221 = vst [vmem:[#allocation32_spill] sm:$0xff] %v8544_v52 }
 0xb23   :  { %12222 = vst [vmem:[#allocation34_spill] sm:$0xff] %v8548_v31 }
 0xb24   :  { %12223 = vst [vmem:[#allocation168_spill] sm:$0xff] %v8551_v21 }
 0xb25   :  { %12224 = vst [vmem:[#allocation169_spill] sm:$0xff] %v8555_v2 }
 0xb26   :  { %12225 = vst [vmem:[#allocation170_spill] sm:$0xff] %v8559_v49 }
 0xb27   :  { %12226 = vst [vmem:[#allocation171_spill] sm:$0xff] %v8563_v61  ;;  %v12285_v61 = vld [vmem:[#allocation24_spill] sm:$0xff] }
 0xb28   :  { %12227 = vst [vmem:[#allocation172_spill] sm:$0xff] %v8566_v3 }
 0xb29   :  { %12228 = vst [vmem:[#allocation173_spill] sm:$0xff] %v8570_v50  ;;  %v12270_v50 = vld [vmem:[#allocation8_spill] sm:$0xff] }
 0xb2a   :  { %12230 = vst [vmem:[#allocation158_spill] sm:$0xff] %v8574_v45  ;;  %v12268_v45 = vld [vmem:[#allocation87_spill] sm:$0xff] }
 0xb2b   :  { %12232 = vst [vmem:[#allocation162_spill] sm:$0xff] %v8578_v62  ;;  %v12261_v62 = vld [vmem:[#allocation11_spill] sm:$0xff]  ;;  %v8664_v12 = vadd.f32 %v12268_v45, %v8354_v17  ;;  %v8683_v45 = vadd.f32 %v12277_v47, %v8381_v24 }
 0xb2c   :  { %12233 = vst [vmem:[#allocation174_spill] sm:$0xff] %v8581_v34  ;;  %v8649_v44 = vadd.f32 %v12261_v62, %v8354_v17  ;;  %v8668_v62 = vadd.f32 %v12270_v50, %v8354_v17  ;;  %v12275_v34 = vld [vmem:[#allocation12_spill] sm:$0xff] }
 0xb2d   :  { %12235 = vst [vmem:[#allocation90_spill] sm:$0xff] %v8585_v42  ;;  %v12300_v42 = vld [vmem:[#allocation53_spill] sm:$0xff] }
 0xb2e   :  { %12237 = vst [vmem:[#allocation13_spill] sm:$0xff] %v8589_v53  ;;  %v12293_v53 = vld [vmem:[#allocation91_spill] sm:$0xff] }
 0xb2f   :  { %12239 = vst [vmem:[#allocation88_spill] sm:$0xff] %v8593_v11  ;;  %v12287_v11 = vld [vmem:[#allocation92_spill] sm:$0xff] }
 0xb30   :  { %12241 = vst [vmem:[#allocation16_spill] sm:$0xff] %v8600_v32 }
 0xb31   :  { %12243 = vst [vmem:[#allocation89_spill] sm:$0xff] %v8604_v41 }
 0xb32   :  { %12245 = vst [vmem:[#allocation20_spill] sm:$0xff] %v8608_v26 }
 0xb33   :  { %12247 = vst [vmem:[#allocation160_spill] sm:$0xff] %v8615_v38  ;;  %v12342_v38 = vld [vmem:[#allocation40_spill] sm:$0xff] }
 0xb34   :  { %12249 = vst [vmem:[#allocation164_spill] sm:$0xff] %v8619_v13  ;;  %v12337_v13 = vld [vmem:[#allocation29_spill] sm:$0xff] }
 0xb35   :  { %12251 = vst [vmem:[#allocation166_spill] sm:$0xff] %v8623_v9  ;;  %v12326_v9 = vld [vmem:[#allocation46_spill] sm:$0xff] }
 0xb36   :  { %12253 = vst [vmem:[#allocation161_spill] sm:$0xff] %v8630_v63  ;;  %v12263_v63 = vld [vmem:[#allocation21_spill] sm:$0xff]  ;;  %v8795_v19 = vadd.f32 %v12326_v9, %v8381_v24  ;;  %v8814_v9 = vadd.f32 %v12335_v20, %v8381_v24 }
 0xb37   :  { %12255 = vst [vmem:[#allocation165_spill] sm:$0xff] %v8634_v58  ;;  %v8653_v28 = vadd.f32 %v12263_v63, %v8354_v17  ;;  %v8671_v63 = vpop.eup %5859 }
 0xb38   :  { %12257 = vst [vmem:[#allocation167_spill] sm:$0xff] %v8638_v43  ;;  %v12266_v43 = vld [vmem:[#allocation10_spill] sm:$0xff]  ;;  %v8686_v50 = vpop.eup %5861 }
 0xb39   :  { %12258 = vst [vmem:[#allocation175_spill] sm:$0xff] %v8641_v4  ;;  %v8660_v58 = vadd.f32 %v12266_v43, %v8354_v17  ;;  %v8679_v43 = vadd.f32 %v12275_v34, %v8381_v24  ;;  %v8701_v47 = vpop.eup %5863  ;;  %vm12501_vm3 = vweird.f32 %v8686_v50 }
 0xb3a   :  { %12260 = vst [vmem:[#allocation17_spill] sm:$0xff] %v8645_v27  ;;  %v8705_v27 = vadd.f32 %v12285_v61, %v8354_v17  ;;  %v8724_v61 = vadd.f32 %v12293_v53, %v8354_v17  ;;  %v8743_v53 = vadd.f32 %v12302_v39, %v8381_v24 }
 0xb3b   :  { %12262 = vst [vmem:[#allocation11_spill] sm:$0xff] %v8649_v44  ;;  %v12283_v44 = vld [vmem:[#allocation163_spill] sm:$0xff]  ;;  %5885 = vrcp.f32 %v8660_v58 }
 0xb3c   :  { %12264 = vst [vmem:[#allocation21_spill] sm:$0xff] %v8653_v28  ;;  %v8690_v28 = vadd.f32 %v12279_v7, %v8381_v24  ;;  %v8698_v34 = vadd.f32 %v12283_v44, %v8381_v24  ;;  %v8709_v7 = vadd.f32 %v12287_v11, %v8354_v17  ;;  %v8716_v44 = vpop.eup %5865  ;;  %5887 = vrcp.f32 %v8664_v12 }
 0xb3d   :  { %12265 = vst [vmem:[#allocation176_spill] sm:$0xff] %v8656_v35  ;;  %5889 = vrcp.f32 %v8668_v62 }
 0xb3e   :  { %12267 = vst [vmem:[#allocation10_spill] sm:$0xff] %v8660_v58  ;;  %5891 = vrcp.f32 %v8675_v8 }
 0xb3f   :  { %12269 = vst [vmem:[#allocation87_spill] sm:$0xff] %v8664_v12  ;;  %5893 = vrcp.f32 %v8679_v43 }
 0xb40   :  { %12271 = vst [vmem:[#allocation8_spill] sm:$0xff] %v8668_v62  ;;  %5895 = vrcp.f32 %v8683_v45 }
 0xb41   :  { %12272 = vst [vmem:[#allocation177_spill] sm:$0xff] %v8671_v63  ;;  %v12281_v63 = vld [vmem:[#allocation159_spill] sm:$0xff] }
 0xb42   :  { %12274 = vst [vmem:[#allocation9_spill] sm:$0xff] %v8675_v8  ;;  %v8694_v51 = vadd.f32 %v12281_v63, %v8381_v24  ;;  %v12354_v8 = vld [vmem:[#allocation42_spill] sm:$0xff] }
 0xb43   :  { %12276 = vst [vmem:[#allocation12_spill] sm:$0xff] %v8679_v43 }
 0xb44   :  { %12278 = vst [vmem:[#allocation15_spill] sm:$0xff] %v8683_v45 }
 0xb45   :  { %12280 = vst [vmem:[#allocation157_spill] sm:$0xff] %v8690_v28  ;;  %v12289_v28 = vld [vmem:[#allocation25_spill] sm:$0xff] }
 0xb46   :  { %12282 = vst [vmem:[#allocation159_spill] sm:$0xff] %v8694_v51  ;;  %v8713_v63 = vadd.f32 %v12289_v28, %v8354_v17  ;;  %v8731_v28 = vpop.eup %5867 }
 0xb47   :  { %12284 = vst [vmem:[#allocation163_spill] sm:$0xff] %v8698_v34  ;;  %v12291_v34 = vld [vmem:[#allocation14_spill] sm:$0xff] }
 0xb48   :  { %12286 = vst [vmem:[#allocation24_spill] sm:$0xff] %v8705_v27  ;;  %v8720_v51 = vadd.f32 %v12291_v34, %v8354_v17  ;;  %v12295_v27 = vld [vmem:[#allocation23_spill] sm:$0xff]  ;;  %v8739_v34 = vadd.f32 %v12300_v42, %v8381_v24  ;;  %v8758_v42 = vadd.f32 %v12309_v60, %v8381_v24 }
 0xb49   :  { %12288 = vst [vmem:[#allocation92_spill] sm:$0xff] %v8709_v7  ;;  %v8728_v11 = vadd.f32 %v12295_v27, %v8354_v17  ;;  %v8746_v27 = vpop.eup %5869 }
 0xb4a   :  { %12290 = vst [vmem:[#allocation25_spill] sm:$0xff] %v8713_v63  ;;  %v12298_v63 = vld [vmem:[#allocation49_spill] sm:$0xff]  ;;  %v8761_v39 = vpop.eup %5871  ;;  %5897 = vrcp.f32 %v8720_v51 }
 0xb4b   :  { %12292 = vst [vmem:[#allocation14_spill] sm:$0xff] %v8720_v51  ;;  %v8735_v7 = vadd.f32 %v12298_v63, %v8381_v24  ;;  %v8754_v63 = vadd.f32 %v12307_v5, %v8381_v24  ;;  %v8776_v60 = vpop.eup %5873  ;;  %5899 = vrcp.f32 %v8724_v61 }
 0xb4c   :  { %12294 = vst [vmem:[#allocation91_spill] sm:$0xff] %v8724_v61  ;;  %5901 = vrcp.f32 %v8728_v11 }
 0xb4d   :  { %12296 = vst [vmem:[#allocation23_spill] sm:$0xff] %v8728_v11  ;;  %5903 = vrcp.f32 %v8735_v7 }
 0xb4e   :  { %12297 = vst [vmem:[#allocation178_spill] sm:$0xff] %v8731_v28  ;;  %5905 = vrcp.f32 %v8739_v34 }
 0xb4f   :  { %12299 = vst [vmem:[#allocation49_spill] sm:$0xff] %v8735_v7 }
 0xb50   :  { %12301 = vst [vmem:[#allocation53_spill] sm:$0xff] %v8739_v34 }
 0xb51   :  { %12303 = vst [vmem:[#allocation57_spill] sm:$0xff] %v8743_v53 }
 0xb52   :  { %12304 = vst [vmem:[#allocation179_spill] sm:$0xff] %v8746_v27  ;;  %v12365_v27 = vld [vmem:[#allocation52_spill] sm:$0xff] }
 0xb53   :  { %12306 = vst [vmem:[#allocation18_spill] sm:$0xff] %v8750_v33  ;;  %v12316_v33 = vld [vmem:[#allocation26_spill] sm:$0xff] }
 0xb54   :  { %12308 = vst [vmem:[#allocation22_spill] sm:$0xff] %v8754_v63  ;;  %v8773_v5 = vadd.f32 %v12316_v33, %v8381_v24  ;;  %v8791_v33 = vpop.eup %5875  ;;  %5907 = vrcp.f32 %v8743_v53 }
 0xb55   :  { %12310 = vst [vmem:[#allocation19_spill] sm:$0xff] %v8758_v42  ;;  %v12319_v42 = vld [vmem:[#allocation93_spill] sm:$0xff] }
 0xb56   :  { %12311 = vst [vmem:[#allocation180_spill] sm:$0xff] %v8761_v39  ;;  %v8780_v63 = vadd.f32 %v12319_v42, %v8381_v24  ;;  %v12321_v39 = vld [vmem:[#allocation48_spill] sm:$0xff]  ;;  %v8799_v42 = vadd.f32 %v12328_v15, %v8381_v24  ;;  %v8818_v15 = vadd.f32 %v12337_v13, %v8381_v24 }
 0xb57   :  { %12313 = vst [vmem:[#allocation28_spill] sm:$0xff] %v8765_v18  ;;  %v8784_v14 = vadd.f32 %v12321_v39, %v8354_v17  ;;  %v12323_v18 = vld [vmem:[#allocation45_spill] sm:$0xff] }
 0xb58   :  { %12315 = vst [vmem:[#allocation27_spill] sm:$0xff] %v8769_v0  ;;  %v8788_v40 = vadd.f32 %v12323_v18, %v8354_v17  ;;  %v8806_v18 = vpop.eup %5877  ;;  %5909 = vrcp.f32 %v8769_v0 }
 0xb59   :  { %12317 = vst [vmem:[#allocation26_spill] sm:$0xff] %v8773_v5 }
 0xb5a   :  { %12318 = vst [vmem:[#allocation181_spill] sm:$0xff] %v8776_v60  ;;  %v8855_v60 = vadd.f32 %v12354_v8, %v8381_v24 }
 0xb5b   :  { %12320 = vst [vmem:[#allocation93_spill] sm:$0xff] %v8780_v63  ;;  %v12330_v63 = vld [vmem:[#allocation33_spill] sm:$0xff] }
 0xb5c   :  { %12322 = vst [vmem:[#allocation48_spill] sm:$0xff] %v8784_v14  ;;  %v8803_v39 = vadd.f32 %v12330_v63, %v8354_v17  ;;  %v12333_v14 = vld [vmem:[#allocation38_spill] sm:$0xff]  ;;  %v8821_v63 = vpop.eup %5879  ;;  %5911 = vrcp.f32 %v8773_v5 }
 0xb5d   :  { %12324 = vst [vmem:[#allocation45_spill] sm:$0xff] %v8788_v40  ;;  %v8810_v16 = vadd.f32 %v12333_v14, %v8354_v17  ;;  %v8829_v14 = vadd.f32 %v12342_v38, %v8354_v17  ;;  %v8836_v13 = vpop.eup %5881  ;;  %5913 = vrcp.f32 %v8788_v40 }
 0xb5e   :  { %12325 = vst [vmem:[#allocation182_spill] sm:$0xff] %v8791_v33 }
 0xb5f   :  { %12327 = vst [vmem:[#allocation46_spill] sm:$0xff] %v8795_v19 }
 0xb60   :  { %12329 = vst [vmem:[#allocation44_spill] sm:$0xff] %v8799_v42 }
 0xb61   :  { %12331 = vst [vmem:[#allocation33_spill] sm:$0xff] %v8803_v39  ;;  %v12340_v39 = vld [vmem:[#allocation41_spill] sm:$0xff] }
 0xb62   :  { %12332 = vst [vmem:[#allocation183_spill] sm:$0xff] %v8806_v18  ;;  %v8825_v42 = vadd.f32 %v12340_v39, %v8354_v17  ;;  %v12344_v18 = vld [vmem:[#allocation31_spill] sm:$0xff] }
 0xb63   :  { %12334 = vst [vmem:[#allocation38_spill] sm:$0xff] %v8810_v16  ;;  %v8833_v20 = vadd.f32 %v12344_v18, %v8381_v24  ;;  %v8851_v18 = vpop.eup %5883  ;;  %5915 = vrcp.f32 %v8795_v19 }
 0xb64   :  { %12336 = vst [vmem:[#allocation95_spill] sm:$0xff] %v8814_v9 }
 0xb65   :  { %12338 = vst [vmem:[#allocation29_spill] sm:$0xff] %v8818_v15  ;;  %v12347_v15 = vld [vmem:[#allocation39_spill] sm:$0xff] }
 0xb66   :  { %12339 = vst [vmem:[#allocation184_spill] sm:$0xff] %v8821_v63  ;;  %v8840_v33 = vadd.f32 %v12347_v15, %v8381_v24  ;;  %v12349_v63 = vld [vmem:[#allocation54_spill] sm:$0xff] }
 0xb67   :  { %12341 = vst [vmem:[#allocation41_spill] sm:$0xff] %v8825_v42  ;;  %v8844_v39 = vadd.f32 %v12349_v63, %v8354_v17  ;;  %v12351_v42 = vld [vmem:[#allocation50_spill] sm:$0xff] }
 0xb68   :  { %12343 = vst [vmem:[#allocation40_spill] sm:$0xff] %v8829_v14  ;;  %v8848_v38 = vadd.f32 %v12351_v42, %v8354_v17  ;;  %v8866_v42 = vpop.eup %5885  ;;  %5917 = vrcp.f32 %v8810_v16 }
 0xb69   :  { %12345 = vst [vmem:[#allocation31_spill] sm:$0xff] %v8833_v20 }
 0xb6a   :  { %12346 = vst [vmem:[#allocation185_spill] sm:$0xff] %v8836_v13  ;;  %v12356_v13 = vld [vmem:[#allocation43_spill] sm:$0xff] }
 0xb6b   :  { %12348 = vst [vmem:[#allocation39_spill] sm:$0xff] %v8840_v33  ;;  %v8859_v15 = vadd.f32 %v12356_v13, %v8381_v24  ;;  %v12358_v33 = vld [vmem:[#allocation47_spill] sm:$0xff]  ;;  %v8878_v13 = vadd.f32 %v12365_v27, %v8381_v24  ;;  %v8984_v27 = vmul.f32 %v8521_v6, %v8397_v23 }
 0xb6c   :  { %12350 = vst [vmem:[#allocation54_spill] sm:$0xff] %v8844_v39  ;;  %v8863_v63 = vadd.f32 %v12358_v33, %v8354_v17  ;;  %v12361_v39 = vld [vmem:[#allocation62_spill] sm:$0xff]  ;;  %v8881_v33 = vpop.eup %5887  ;;  %5919 = vrcp.f32 %v8814_v9 }
 0xb6d   :  { %12352 = vst [vmem:[#allocation50_spill] sm:$0xff] %v8848_v38  ;;  %v8870_v43 = vadd.f32 %v12361_v39, %v8354_v17 }
 0xb6e   :  { %12353 = vst [vmem:[#allocation186_spill] sm:$0xff] %v8851_v18  ;;  %v12363_v18 = vld [vmem:[#allocation61_spill] sm:$0xff] }
 0xb6f   :  { %12355 = vst [vmem:[#allocation42_spill] sm:$0xff] %v8855_v60  ;;  %v8874_v8 = vadd.f32 %v12363_v18, %v8381_v24  ;;  %v8893_v18 = vpop.eup %5889  ;;  %5921 = vrcp.f32 %v8829_v14 }
 0xb70   :  { %12357 = vst [vmem:[#allocation43_spill] sm:$0xff] %v8859_v15  ;;  %v12369_v15 = vld [vmem:[#allocation56_spill] sm:$0xff] }
 0xb71   :  { %12359 = vst [vmem:[#allocation47_spill] sm:$0xff] %v8863_v63  ;;  %v12367_v63 = vld [vmem:[#allocation101_spill] sm:$0xff]  ;;  %v8889_v39 = vadd.f32 %v12369_v15, %v8381_v24 }
 0xb72   :  { %12360 = vst [vmem:[#allocation187_spill] sm:$0xff] %v8866_v42  ;;  %v8885_v45 = vadd.f32 %v12367_v63, %v8354_v17  ;;  %v8899_v63 = vpop.eup %5891  ;;  %5923 = vrcp.f32 %v8833_v20  ;;  %v8976_v17 = vmul.f32 %v8506_v1, %v8385_v36  ;;  %v12380_v42 = vand.u32 2147483648, %v8385_v36 }
 0xb73   :  { %12362 = vst [vmem:[#allocation62_spill] sm:$0xff] %v8870_v43 }
 0xb74   :  { %12364 = vst [vmem:[#allocation61_spill] sm:$0xff] %v8874_v8  ;;  %v8980_v15 = vor.u32 1.1754944e-38, %v12380_v42 }
 0xb75   :  { %12366 = vst [vmem:[#allocation52_spill] sm:$0xff] %v8878_v13  ;;  %v12383_v13 = vand.u32 2147483648, %v8397_v23  ;;  %v12464_v23 = vld [vmem:[#allocation89_spill] sm:$0xff] }
 0xb76   :  { %12368 = vst [vmem:[#allocation101_spill] sm:$0xff] %v8885_v45 }
 0xb77   :  { %12370 = vst [vmem:[#allocation56_spill] sm:$0xff] %v8889_v39  ;;  %v8905_v39 = vpop.eup %5893  ;;  %5925 = vrcp.f32 %v8848_v38  ;;  %v8991_v8 = vor.u32 1.1754944e-38, %v12383_v13  ;;  %v9013_v13 = vmul.f32 %v8596_v55, %v8464_v56 }
 0xb78   :  { %12371 = vst [vmem:[#allocation188_spill] sm:$0xff] %v8899_v63  ;;  %v8911_v24 = vpop.eup %5895  ;;  %5927 = vrcp.f32 %v8855_v60  ;;  %v8995_v60 = vmul.f32 %v8536_v37, %v8414_v59 }
 0xb79   :  { %12372 = vst [vmem:[#allocation189_spill] sm:$0xff] %v8905_v39  ;;  %v8917_v45 = vpop.eup %5897  ;;  %5929 = vrcp.f32 %v8870_v43  ;;  %v9009_v43 = vmul.f32 %v8566_v3, %v8432_v25  ;;  %v9031_v25 = vmul.f32 %v8626_v10, %v8490_v46  ;;  %v12395_v3 = vand.u32 2147483648, %v8490_v46 }
 0xb7a   :  { %12373 = vst [vmem:[#allocation190_spill] sm:$0xff] %v8911_v24  ;;  %v8923_v34 = vpop.eup %5899 }
 0xb7b   :  { %v8929_v53 = vpop.eup %5901  ;;  %12381 = vst [vmem:[#allocation197_spill] sm:$0xff] %v8980_v15  ;;  %v12401_v15 = vand.u32 2147483648, %v8540_v29 }
 0xb7c   :  { %v8935_v24 = vpop.eup %5903  ;;  %12384 = vst [vmem:[#allocation199_spill] sm:$0xff] %v8991_v8  ;;  %v9045_v8 = vmul.f32 %v8656_v35, %v8499_v54  ;;  %v9067_v54 = vmul.f32 %v8716_v44, %v8548_v31  ;;  %v12407_v35 = vand.u32 2147483648, %v8548_v31  ;;  %v12429_v31 = vld [vmem:[#allocation185_spill] sm:$0xff] }
 0xb7d   :  { %12374 = vst [vmem:[#allocation191_spill] sm:$0xff] %v8935_v24  ;;  %v8941_v5 = vpop.eup %5905 }
 0xb7e   :  { %12375 = vst [vmem:[#allocation192_spill] sm:$0xff] %v8941_v5  ;;  %v8947_v0 = vpop.eup %5907 }
 0xb7f   :  { %12376 = vst [vmem:[#allocation193_spill] sm:$0xff] %v8947_v0  ;;  %v8953_v19 = vpop.eup %5909 }
 0xb80   :  { %12377 = vst [vmem:[#allocation194_spill] sm:$0xff] %v8953_v19  ;;  %v8959_v16 = vpop.eup %5911 }
 0xb81   :  { %12378 = vst [vmem:[#allocation195_spill] sm:$0xff] %v8959_v16  ;;  %v8965_v9 = vpop.eup %5913  ;;  %v12385_v16 = vand.u32 2147483648, %v8414_v59 }
 0xb82   :  { %v8971_v0 = vpop.eup %5915  ;;  %12389 = vst [vmem:[#allocation203_spill] sm:$0xff] %v9009_v43 }
 0xb83   :  { %12379 = vst [vmem:[#allocation196_spill] sm:$0xff] %v8971_v0  ;;  %v8986_v20 = vpop.eup %5917  ;;  %v8999_v42 = vor.u32 1.1754944e-38, %v12385_v16  ;;  %v9005_v0 = vmul.f32 %v8551_v21, %v8428_v22  ;;  %v12393_v22 = vand.u32 2147483648, %v8477_v30 }
 0xb84   :  { %12382 = vst [vmem:[#allocation198_spill] sm:$0xff] %v8986_v20  ;;  %v9001_v14 = vpop.eup %5919  ;;  %v12390_v20 = vand.u32 2147483648, %v8464_v56 }
 0xb85   :  { %12386 = vst [vmem:[#allocation200_spill] sm:$0xff] %v8999_v42  ;;  %v9019_v16 = vpop.eup %5921  ;;  %v9027_v21 = vor.u32 1.1754944e-38, %v12393_v22  ;;  %v9035_v42 = vor.u32 1.1754944e-38, %v12395_v3  ;;  %v9049_v22 = vmul.f32 %v8686_v50, %v8540_v29 }
 0xb86   :  { %12387 = vst [vmem:[#allocation201_spill] sm:$0xff] %v9001_v14  ;;  %v9017_v19 = vor.u32 1.1754944e-38, %v12390_v20  ;;  %v9023_v14 = vmul.f32 %v8611_v48, %v8477_v30  ;;  %v9037_v20 = vpop.eup %5923 }
 0xb87   :  { %12388 = vst [vmem:[#allocation202_spill] sm:$0xff] %v9005_v0  ;;  %v9055_v3 = vpop.eup %5925 }
 0xb88   :  { %12391 = vst [vmem:[#allocation204_spill] sm:$0xff] %v9017_v19  ;;  %v12411_v19 = vld [vmem:[#allocation179_spill] sm:$0xff] }
 0xb89   :  { %12392 = vst [vmem:[#allocation205_spill] sm:$0xff] %v9019_v16  ;;  %v9041_v16 = vmul.f32 %v8641_v4, %v8495_v57  ;;  %v12404_v57 = vand.u32 2147483648, %v8544_v52 }
 0xb8a   :  { %12394 = vst [vmem:[#allocation206_spill] sm:$0xff] %v9027_v21  ;;  %v9053_v21 = vor.u32 1.1754944e-38, %v12401_v15  ;;  %v9073_v15 = vpop.eup %5927 }
 0xb8b   :  { %12396 = vst [vmem:[#allocation207_spill] sm:$0xff] %v9035_v42  ;;  %v9063_v4 = vor.u32 1.1754944e-38, %v12404_v57  ;;  %v9071_v42 = vor.u32 1.1754944e-38, %v12407_v35  ;;  %v12413_v57 = vld [vmem:[#allocation181_spill] sm:$0xff]  ;;  %v9091_v35 = vpop.eup %5929 }
 0xb8c   :  { %12397 = vst [vmem:[#allocation208_spill] sm:$0xff] %v9037_v20  ;;  %v9059_v20 = vmul.f32 %v8701_v47, %v8544_v52 }
 0xb8d   :  { %12398 = vst [vmem:[#allocation209_spill] sm:$0xff] %v9041_v16  ;;  %v12459_v16 = vld [vmem:[#allocation34_spill] sm:$0xff] }
 0xb8e   :  { %12399 = vst [vmem:[#allocation210_spill] sm:$0xff] %v9045_v8  ;;  %v12466_v8 = vld [vmem:[#allocation10_spill] sm:$0xff] }
 0xb8f   :  { %12400 = vst [vmem:[#allocation211_spill] sm:$0xff] %v9049_v22 }
 0xb90   :  { %12402 = vst [vmem:[#allocation212_spill] sm:$0xff] %v9053_v21  ;;  %v9077_v21 = vmul.f32 %v8731_v28, %v8555_v2  ;;  %v12420_v2 = vand.u32 2147483648, %v8604_v41 }
 0xb91   :  { %12403 = vst [vmem:[#allocation213_spill] sm:$0xff] %v9059_v20  ;;  %v9081_v20 = vmul.f32 %v12411_v19, %v8559_v49  ;;  %v12422_v49 = vld [vmem:[#allocation183_spill] sm:$0xff] }
 0xb92   :  { %12405 = vst [vmem:[#allocation214_spill] sm:$0xff] %v9063_v4  ;;  %v9085_v4 = vmul.f32 %v12413_v57, %v8600_v32  ;;  %v9099_v28 = vor.u32 1.1754944e-38, %v12420_v2  ;;  %v9103_v19 = vmul.f32 %v12422_v49, %v8608_v26 }
 0xb93   :  { %12406 = vst [vmem:[#allocation215_spill] sm:$0xff] %v9067_v54  ;;  %v12415_v54 = vand.u32 2147483648, %v8600_v32 }
 0xb94   :  { %12408 = vst [vmem:[#allocation216_spill] sm:$0xff] %v9071_v42 }
 0xb95   :  { %12409 = vst [vmem:[#allocation217_spill] sm:$0xff] %v9073_v15  ;;  %v9089_v22 = vor.u32 1.1754944e-38, %v12415_v54  ;;  %v12418_v15 = vld [vmem:[#allocation182_spill] sm:$0xff]  ;;  %v12425_v54 = vld [vmem:[#allocation160_spill] sm:$0xff] }
 0xb96   :  { %12410 = vst [vmem:[#allocation218_spill] sm:$0xff] %v9077_v21  ;;  %v9095_v42 = vmul.f32 %v12418_v15, %v8604_v41  ;;  %v12431_v41 = vld [vmem:[#allocation187_spill] sm:$0xff] }
 0xb97   :  { %12412 = vst [vmem:[#allocation219_spill] sm:$0xff] %v9081_v20  ;;  %v9119_v2 = vmul.f32 %v12431_v41, %v8660_v58 }
 0xb98   :  { %12414 = vst [vmem:[#allocation181_spill] sm:$0xff] %v9085_v4  ;;  %v12423_v4 = vand.u32 2147483648, %v8608_v26  ;;  %v12438_v26 = vld [vmem:[#allocation9_spill] sm:$0xff] }
 0xb99   :  { %12416 = vst [vmem:[#allocation220_spill] sm:$0xff] %v9089_v22  ;;  %v12426_v22 = vld [vmem:[#allocation184_spill] sm:$0xff]  ;;  %v12456_v43 = vld [vmem:[#allocation213_spill] sm:$0xff] }
 0xb9a   :  { %12417 = vst [vmem:[#allocation221_spill] sm:$0xff] %v9091_v35  ;;  %v9107_v20 = vor.u32 1.1754944e-38, %v12423_v4  ;;  %v9111_v32 = vmul.f32 %v12426_v22, %v12425_v54  ;;  %v12428_v35 = vld [vmem:[#allocation164_spill] sm:$0xff]  ;;  %v9127_v4 = vmul.f32 %v8881_v33, %v8664_v12  ;;  %v12457_v0 = vld [vmem:[#allocation215_spill] sm:$0xff] }
 0xb9b   :  { %12419 = vst [vmem:[#allocation182_spill] sm:$0xff] %v9095_v42  ;;  %v9115_v21 = vmul.f32 %v12429_v31, %v12428_v35  ;;  %v9135_v35 = vmul.f32 %v8893_v18, %v8668_v62  ;;  %v12436_v31 = vand.u32 2147483648, %v8668_v62  ;;  %v12525_v62 = vld [vmem:[#allocation50_spill] sm:$0xff] }
 0xb9c   :  { %12421 = vst [vmem:[#allocation222_spill] sm:$0xff] %v9099_v28  ;;  %v12432_v28 = vand.u32 2147483648, %v8660_v58 }
 0xb9d   :  { %12424 = vst [vmem:[#allocation183_spill] sm:$0xff] %v9107_v20  ;;  %v12434_v20 = vand.u32 2147483648, %v8664_v12  ;;  %v9139_v22 = vor.u32 1.1754944e-38, %v12436_v31  ;;  %v9160_v31 = vmul.f32 %v8923_v34, %v8724_v61 }
 0xb9e   :  { %12427 = vst [vmem:[#allocation223_spill] sm:$0xff] %v9111_v32  ;;  %v9123_v42 = vor.u32 1.1754944e-38, %v12432_v28  ;;  %v9143_v28 = vmul.f32 %v8899_v63, %v12438_v26  ;;  %v12444_v26 = vand.u32 2147483648, %v8724_v61  ;;  %v12508_v32 = vld [vmem:[#allocation32_spill] sm:$0xff] }
 0xb9f   :  { %12430 = vst [vmem:[#allocation224_spill] sm:$0xff] %v9115_v21  ;;  %v9131_v54 = vor.u32 1.1754944e-38, %v12434_v20  ;;  %v9151_v20 = vmul.f32 %v8917_v45, %v8720_v51  ;;  %v12467_v21 = vld [vmem:[#allocation87_spill] sm:$0xff] }
 0xba0   :  { %12433 = vst [vmem:[#allocation187_spill] sm:$0xff] %v9123_v42  ;;  %v12440_v42 = vld [vmem:[#allocation12_spill] sm:$0xff]  ;;  %v9164_v63 = vor.u32 1.1754944e-38, %v12444_v26  ;;  %v9185_v26 = vmul.f32 %v8965_v9, %v8788_v40 }
 0xba1   :  { %12435 = vst [vmem:[#allocation225_spill] sm:$0xff] %v9131_v54  ;;  %v9147_v58 = vmul.f32 %v8905_v39, %v12440_v42  ;;  %v12442_v54 = vand.u32 2147483648, %v8720_v51  ;;  %v9168_v42 = vmul.f32 %v8929_v53, %v8728_v11  ;;  %v12446_v39 = vand.u32 2147483648, %v8728_v11 }
 0xba2   :  { %12437 = vst [vmem:[#allocation226_spill] sm:$0xff] %v9139_v22  ;;  %v12463_v29 = vld [vmem:[#allocation182_spill] sm:$0xff] }
 0xba3   :  { %12439 = vst [vmem:[#allocation227_spill] sm:$0xff] %v9143_v28  ;;  %v9155_v12 = vor.u32 1.1754944e-38, %v12442_v54  ;;  %v9172_v22 = vor.u32 1.1754944e-38, %v12446_v39  ;;  %v9177_v54 = vmul.f32 %v8935_v24, %v8735_v7  ;;  %v9196_v39 = vmul.f32 %v9055_v3, %v8848_v38  ;;  %v12490_v28 = vld [vmem:[#allocation118_spill] sm:$0xff] }
 0xba4   :  { %12441 = vst [vmem:[#allocation228_spill] sm:$0xff] %v9147_v58  ;;  %v914_v7 = vsub.f32 1.0, %v9013_v13  ;;  %v928_v24 = vsub.f32 1.0, %v9023_v14  ;;  %v12455_v13 = vld [vmem:[#allocation211_spill] sm:$0xff]  ;;  %v1215_v14 = vsub.f32 1.0, %v12456_v43  ;;  %v1502_v59 = vsub.f32 1.0, %v12463_v29 }
 0xba5   :  { %12443 = vst [vmem:[#allocation229_spill] sm:$0xff] %v9155_v12  ;;  %v12449_v12 = vld [vmem:[#allocation53_spill] sm:$0xff]  ;;  %v1788_v29 = vsub.f32 1.0, %v9135_v35  ;;  %v2061_v43 = vsub.f32 1.0, %v9160_v31  ;;  %v2075_v31 = vsub.f32 1.0, %v9168_v42  ;;  %v2595_v58 = vsub.f32 1.0, %v9185_v26 }
 0xba6   :  { %12445 = vst [vmem:[#allocation230_spill] sm:$0xff] %v9164_v63  ;;  %v9181_v51 = vmul.f32 %v8941_v5, %v12449_v12  ;;  %v12451_v63 = vand.u32 2147483648, %v8788_v40  ;;  %v12453_v12 = vand.u32 2147483648, %v8848_v38  ;;  %v12462_v40 = vld [vmem:[#allocation181_spill] sm:$0xff]  ;;  %v2952_v42 = vsub.f32 1.0, %v9196_v39 }
 0xba7   :  { %12447 = vst [vmem:[#allocation231_spill] sm:$0xff] %v9172_v22  ;;  %v1488_v52 = vsub.f32 1.0, %v12462_v40  ;;  %v1774_v22 = vsub.f32 1.0, %v9127_v4  ;;  %v929_v40 = vmul.f32 %v8611_v48, %v928_v24  ;;  %v12474_v4 = vand.u32 2147483647, %v8490_v46 }
 0xba8   :  { %12448 = vst [vmem:[#allocation232_spill] sm:$0xff] %v9177_v54  ;;  %v9189_v61 = vor.u32 1.1754944e-38, %v12451_v63  ;;  %v9200_v5 = vor.u32 1.1754944e-38, %v12453_v12  ;;  %v652_v63 = vsub.f32 1.0, %v8995_v60  ;;  %v1201_v12 = vsub.f32 1.0, %v12455_v13 }
 0xba9   :  { %12450 = vst [vmem:[#allocation233_spill] sm:$0xff] %v9181_v51  ;;  %v1516_v13 = vsub.f32 1.0, %v9103_v19  ;;  %v1760_v60 = vsub.f32 1.0, %v9119_v2  ;;  %v915_v19 = vmul.f32 %v8596_v55, %v914_v7  ;;  %v12468_v7 = vand.u32 2147483647, %v8464_v56 }
 0xbaa   :  { %12452 = vst [vmem:[#allocation234_spill] sm:$0xff] %v9189_v61  ;;  %v12465_v61 = vld [vmem:[#allocation20_spill] sm:$0xff]  ;;  %vm9270_vm12 = vcmp.eq.f32.partialorder %v12474_v4, 8.507059e+37  ;;  %v12480_v26 = vsub.f32 1.0, %v8984_v27  ;;  %v653_v51 = vmul.f32 %v8536_v37, %v652_v63  ;;  %v930_v39 = vadd.f32 %v8611_v48, %v929_v40 }
 0xbab   :  { %12454 = vst [vmem:[#allocation235_spill] sm:$0xff] %v9200_v5  ;;  %v942_v5 = vsub.f32 1.0, %v9031_v25  ;;  %v1229_v25 = vsub.f32 1.0, %v12457_v0  ;;  %v2047_v0 = vsub.f32 1.0, %v9151_v20  ;;  %vm9258_vm15 = vcmp.eq.f32.partialorder %v12468_v7, 8.507059e+37 }
 0xbac   :  { %v639_v7 = vmul.f32 %v8521_v6, %v12480_v26  ;;  %v916_v27 = vadd.f32 %v8596_v55, %v915_v19  ;;  %v1489_v40 = vmul.f32 %v12413_v57, %v1488_v52  ;;  %v1503_v26 = vmul.f32 %v12418_v15, %v1502_v59  ;;  %v12502_v59 = vld [vmem:[#allocation30_spill] sm:$0xff] }
 0xbad   :  { %v943_v38 = vmul.f32 %v8626_v10, %v942_v5  ;;  %v12471_v5 = vand.u32 2147483647, %v8477_v30  ;;  %v12485_v30 = vmov 0  ;;  %v1230_v19 = vmul.f32 %v8716_v44, %v1229_v25 }
 0xbae   :  { %v12486_v30 = vsel %vm9317_vm1, 4294967295, %v12485_v30  ;;  %vm12491_vm7 = vweird.f32 %v12490_v28  ;;  %v12492_v46 = vmov 0  ;;  %v12498_v52 = vmov 0 }
 0xbaf   :  { %vm9264_vm8 = vcmp.eq.f32.partialorder %v12471_v5, 8.507059e+37  ;;  %v12479_v5 = vsub.f32 1.0, %v8976_v17  ;;  %v1202_v17 = vmul.f32 %v8686_v50, %v1201_v12  ;;  %v944_v63 = vadd.f32 %v8626_v10, %v943_v38  ;;  %12487 = vst [vmem:[#allocation211_spill] sm:$0xff] %v12486_v30  ;;  %vm9339_vm4 = vmor %vm12491_vm7, %vm642_vm6 }
 0xbb0   :  { %v1216_v38 = vmul.f32 %v8701_v47, %v1215_v14  ;;  %v12493_v46 = vsel %vm9339_vm4, 4294967295, %v12492_v46  ;;  %v12496_v14 = vld [vmem:[#allocation100_spill] sm:$0xff]  ;;  %vm12503_vm10 = vweird.f32 %v12502_v59  ;;  %v12504_v25 = vmov 0 }
 0xbb1   :  { %v625_v2 = vmul.f32 %v8506_v1, %v12479_v5  ;;  %12494 = vst [vmem:[#allocation213_spill] sm:$0xff] %v12493_v46  ;;  %vm12497_vm2 = vweird.f32 %v12496_v14  ;;  %vm9355_vm13 = vmor %vm12503_vm10, %vm12501_vm3  ;;  %vm12507_vm6 = vweird.f32 %v8701_v47  ;;  %vm12509_vm7 = vweird.f32 %v12508_v32 }
 0xbb2   :  { %vm9347_vm9 = vmor %vm12497_vm2, %vm12495_vm11  ;;  %v12505_v25 = vsel %vm9355_vm13, 4294967295, %v12504_v25  ;;  %v12510_v46 = vmov 0  ;;  %v1517_v11 = vmul.f32 %v12422_v49, %v1516_v13  ;;  %v1775_v30 = vmul.f32 %v8881_v33, %v1774_v22 }
 0xbb3   :  { %v12499_v52 = vsel %vm9347_vm9, 4294967295, %v12498_v52  ;;  %12506 = vst [vmem:[#allocation34_spill] sm:$0xff] %v12505_v25  ;;  %vm9363_vm4 = vmor %vm12509_vm7, %vm12507_vm6  ;;  %v1789_v5 = vmul.f32 %v8893_v18, %v1788_v29  ;;  %vm12514_vm3 = vweird.f32 %v8716_v44  ;;  %vm12515_vm10 = vweird.f32 %v12459_v16 }
 0xbb4   :  { %12500 = vst [vmem:[#allocation215_spill] sm:$0xff] %v12499_v52  ;;  %v12511_v46 = vsel %vm9363_vm4, 4294967295, %v12510_v46  ;;  %v1761_v52 = vmul.f32 %v12431_v41, %v1760_v60  ;;  %vm9376_vm11 = vmor %vm12515_vm10, %vm12514_vm3  ;;  %v12516_v25 = vmov 0  ;;  %vm12519_vm6 = vweird.f32 %v12413_v57 }
 0xbb5   :  { %12512 = vst [vmem:[#allocation181_spill] sm:$0xff] %v12511_v46  ;;  %v12517_v25 = vsel %vm9376_vm11, 4294967295, %v12516_v25  ;;  %v12520_v46 = vld [vmem:[#allocation16_spill] sm:$0xff]  ;;  %v12522_v60 = vmov 0  ;;  %v2048_v22 = vmul.f32 %v8917_v45, %v2047_v0  ;;  %v2062_v13 = vmul.f32 %v8923_v34, %v2061_v43 }
 0xbb6   :  { %12518 = vst [vmem:[#allocation182_spill] sm:$0xff] %v12517_v25  ;;  %vm12521_vm7 = vweird.f32 %v12520_v46  ;;  %v2076_v29 = vmul.f32 %v8929_v53, %v2075_v31  ;;  %v2596_v54 = vmul.f32 %v8965_v9, %v2595_v58  ;;  %vm12526_vm10 = vweird.f32 %v12418_v15  ;;  %v12646_v31 = vld [vmem:[#allocation197_spill] sm:$0xff] }
 0xbb7   :  { %vm9384_vm4 = vmor %vm12521_vm7, %vm12519_vm6  ;;  %vm12527_vm2 = vweird.f32 %v12464_v23  ;;  %v920_v43 = vsel %vm9285_vm14, %v8596_v55, %v916_v27  ;;  %v934_v58 = vsel %vm9303_vm0, %v8611_v48, %v930_v39  ;;  %v948_v0 = vsel %vm9325_vm5, %v8626_v10, %v944_v63 }
 0xbb8   :  { %v12523_v60 = vsel %vm9384_vm4, 4294967295, %v12522_v60  ;;  %vm9397_vm11 = vmor %vm12527_vm2, %vm12526_vm10  ;;  %vm12530_vm6 = vweird.f32 %v12422_v49  ;;  %vm12531_vm2 = vweird.f32 %v12465_v61  ;;  %v9423_v55 = vadd.f32 %v8521_v6, %v639_v7 }
 0xbb9   :  { %12524 = vst [vmem:[#allocation89_spill] sm:$0xff] %v12523_v60  ;;  %v2953_v60 = vmul.f32 %v9055_v3, %v2952_v42  ;;  %vm9415_vm7 = vmor %vm12531_vm2, %vm12530_vm6  ;;  %v9420_v42 = vadd.f32 %v8506_v1, %v625_v2  ;;  %v9426_v48 = vadd.f32 %v8536_v37, %v653_v51  ;;  %v9429_v4 = vadd.f32 %v8686_v50, %v1202_v17  ;;  %v12648_v51 = vld [vmem:[#allocation212_spill] sm:$0xff] }
 0xbba   :  { %v12534_v10 = vand.u32 2147483647, %v8385_v36  ;;  %v12535_v56 = vmov 0  ;;  %v12537_v27 = vand.u32 2147483647, %v12502_v59  ;;  %v12538_v2 = vmov 0 }
 0xbbb   :  { %vm12540_vm5 = vweird.f32 %v12431_v41  ;;  %vm12541_vm10 = vweird.f32 %v12466_v8  ;;  %v9452_v36 = vadd.f32 %v8701_v47, %v1216_v38  ;;  %v9455_v7 = vadd.f32 %v8716_v44, %v1230_v19 }
 0xbbc   :  { %vm9433_vm14 = vcmp.eq.f32.partialorder %v12534_v10, 8.507059e+37  ;;  %vm9439_vm0 = vcmp.eq.f32.partialorder %v12537_v27, 8.507059e+37  ;;  %vm9447_vm6 = vmor %vm12541_vm10, %vm12540_vm5  ;;  %v9458_v17 = vadd.f32 %v12413_v57, %v1489_v40  ;;  %v9461_v39 = vadd.f32 %v12418_v15, %v1503_v26 }
 0xbbd   :  { %v12536_v56 = vsel %vm9433_vm14, 4294967295, %v12535_v56  ;;  %v12539_v2 = vsel %vm9439_vm0, 4294967295, %v12538_v2  ;;  %v12544_v63 = vand.u32 2147483647, %v12490_v28  ;;  %v12545_v12 = vmov 0 }
 0xbbe   :  { %v12547_v59 = vand.u32 2147483647, %v12496_v14  ;;  %v12548_v38 = vmov 0  ;;  %v12551_v19 = vand.u32 2147483647, %v12508_v32  ;;  %v12552_v40 = vmov 0 }
 0xbbf   :  { %vm9465_vm2 = vcmp.eq.f32.partialorder %v12544_v63, 8.507059e+37  ;;  %vm12555_vm3 = vweird.f32 %v8881_v33  ;;  %vm12556_vm0 = vweird.f32 %v12467_v21  ;;  %v9490_v26 = vadd.f32 %v12422_v49, %v1517_v11  ;;  %v12559_v14 = vld [vmem:[#allocation204_spill] sm:$0xff]  ;;  %v12560_v32 = vld [vmem:[#allocation206_spill] sm:$0xff]  ;;  %v12561_v63 = vld [vmem:[#allocation207_spill] sm:$0xff] }
 0xbc0   :  { %v12546_v12 = vsel %vm9465_vm2, 4294967295, %v12545_v12  ;;  %vm9471_vm5 = vcmp.eq.f32.partialorder %v12547_v59, 8.507059e+37  ;;  %vm9477_vm10 = vcmp.eq.f32.partialorder %v12551_v19, 8.507059e+37  ;;  %vm9485_vm14 = vmor %vm12556_vm0, %vm12555_vm3  ;;  %v925_v10 = vsel %vm9258_vm15, %v12559_v14, %v920_v43  ;;  %v12576_v43 = vld [vmem:[#allocation8_spill] sm:$0xff] }
 0xbc1   :  { %v12549_v38 = vsel %vm9471_vm5, 4294967295, %v12548_v38  ;;  %v12553_v40 = vsel %vm9477_vm10, 4294967295, %v12552_v40  ;;  %v939_v27 = vsel %vm9264_vm8, %v12560_v32, %v934_v58  ;;  %v953_v59 = vsel %vm9270_vm12, %v12561_v63, %v948_v0 }
 0xbc2   :  { %12550 = vst [vmem:[#allocation20_spill] sm:$0xff] %v12549_v38  ;;  %v12562_v19 = vand.u32 2147483647, %v12459_v16  ;;  %v12565_v11 = vand.u32 2147483647, %v12520_v46  ;;  %v12566_v38 = vmov 0  ;;  %vm12575_vm12 = vweird.f32 %v8893_v18 }
 0xbc3   :  { %12554 = vst [vmem:[#allocation10_spill] sm:$0xff] %v12553_v40  ;;  %v12563_v40 = vmov 0  ;;  %v12568_v24 = vand.u32 2147483647, %v12464_v23  ;;  %v12569_v35 = vmov 0  ;;  %v12572_v16 = vmov 0 }
 0xbc4   :  { %vm9503_vm3 = vcmp.eq.f32.partialorder %v12562_v19, 8.507059e+37  ;;  %vm9509_vm0 = vcmp.eq.f32.partialorder %v12565_v11, 8.507059e+37  ;;  %v12571_v20 = vand.u32 2147483647, %v12465_v61  ;;  %v1762_v23 = vadd.f32 %v12431_v41, %v1761_v52 }
 0xbc5   :  { %v12564_v40 = vsel %vm9503_vm3, 4294967295, %v12563_v40  ;;  %v12567_v38 = vsel %vm9509_vm0, 4294967295, %v12566_v38  ;;  %vm9515_vm15 = vcmp.eq.f32.partialorder %v12568_v24, 8.507059e+37  ;;  %vm12577_vm3 = vweird.f32 %v12576_v43 }
 0xbc6   :  { %v12570_v35 = vsel %vm9515_vm15, 4294967295, %v12569_v35  ;;  %vm9521_vm8 = vcmp.eq.f32.partialorder %v12571_v20, 8.507059e+37  ;;  %vm9529_vm10 = vmor %vm12577_vm3, %vm12575_vm12  ;;  %v1776_v58 = vadd.f32 %v8881_v33, %v1775_v30  ;;  %v1790_v0 = vadd.f32 %v8893_v18, %v1789_v5  ;;  %v12593_v5 = vld [vmem:[#allocation14_spill] sm:$0xff] }
 0xbc7   :  { %v12573_v16 = vsel %vm9521_vm8, 4294967295, %v12572_v16  ;;  %v2049_v61 = vadd.f32 %v8917_v45, %v2048_v22  ;;  %v12580_v14 = vand.u32 2147483647, %v12466_v8  ;;  %v12581_v32 = vmov 0  ;;  %v12665_v8 = vld [vmem:[#allocation222_spill] sm:$0xff] }
 0xbc8   :  { %12574 = vst [vmem:[#allocation87_spill] sm:$0xff] %v12573_v16  ;;  %v12584_v63 = vand.u32 2147483647, %v12467_v21  ;;  %v12585_v19 = vmov 0  ;;  %v12588_v52 = vand.u32 2147483647, %v12576_v43  ;;  %vm12592_vm8 = vweird.f32 %v8917_v45 }
 0xbc9   :  { %vm9539_vm15 = vcmp.eq.f32.partialorder %v12580_v14, 8.507059e+37  ;;  %v12589_v30 = vmov 0  ;;  %vm12594_vm0 = vweird.f32 %v12593_v5  ;;  %v2063_v21 = vadd.f32 %v8923_v34, %v2062_v13  ;;  %v12601_v14 = vld [vmem:[#allocation91_spill] sm:$0xff]  ;;  %v12655_v28 = vld [vmem:[#allocation20_spill] sm:$0xff] }
 0xbca   :  { %v12582_v32 = vsel %vm9539_vm15, 4294967295, %v12581_v32  ;;  %vm9545_vm3 = vcmp.eq.f32.partialorder %v12584_v63, 8.507059e+37  ;;  %vm9551_vm12 = vcmp.eq.f32.partialorder %v12588_v52, 8.507059e+37  ;;  %vm9559_vm5 = vmor %vm12594_vm0, %vm12592_vm8  ;;  %v2077_v22 = vadd.f32 %v8929_v53, %v2076_v29  ;;  %v12611_v29 = vld [vmem:[#allocation134_spill] sm:$0xff] }
 0xbcb   :  { %12583 = vst [vmem:[#allocation118_spill] sm:$0xff] %v12582_v32  ;;  %v12586_v19 = vsel %vm9545_vm3, 4294967295, %v12585_v19  ;;  %v12590_v30 = vsel %vm9551_vm12, 4294967295, %v12589_v30  ;;  %v2597_v11 = vadd.f32 %v8965_v9, %v2596_v54  ;;  %v2954_v24 = vadd.f32 %v9055_v3, %v2953_v60  ;;  %v12618_v32 = vld [vmem:[#allocation45_spill] sm:$0xff]  ;;  %v12658_v46 = vld [vmem:[#allocation10_spill] sm:$0xff]  ;;  %v12670_v54 = vld [vmem:[#allocation187_spill] sm:$0xff] }
 0xbcc   :  { %12587 = vst [vmem:[#allocation100_spill] sm:$0xff] %v12586_v19  ;;  %v12597_v20 = vand.u32 2147483647, %v12593_v5  ;;  %v12598_v43 = vmov 0  ;;  %v12602_v63 = vand.u32 2147483647, %v12601_v14  ;;  %vm12606_vm8 = vweird.f32 %v8923_v34 }
 0xbcd   :  { %12591 = vst [vmem:[#allocation30_spill] sm:$0xff] %v12590_v30  ;;  %v12603_v52 = vmov 0  ;;  %vm12607_vm12 = vweird.f32 %v12601_v14  ;;  %v630_v13 = vsel %vm9317_vm1, %v8506_v1, %v9420_v42  ;;  %v9592_v5 = vmul.f32 %v925_v10, %v12611_v29  ;;  %v12614_v30 = vld [vmem:[#allocation23_spill] sm:$0xff]  ;;  %v12673_v10 = vld [vmem:[#allocation225_spill] sm:$0xff] }
 0xbce   :  { %vm9569_vm3 = vcmp.eq.f32.partialorder %v12597_v20, 8.507059e+37  ;;  %vm9575_vm0 = vcmp.eq.f32.partialorder %v12602_v63, 8.507059e+37  ;;  %vm9583_vm15 = vmor %vm12607_vm12, %vm12606_vm8  ;;  %v12612_v20 = vld [vmem:[#allocation147_spill] sm:$0xff]  ;;  %v12615_v14 = vand.u32 2147483647, %v12614_v30  ;;  %v12616_v19 = vmov 0 }
 0xbcf   :  { %v12599_v43 = vsel %vm9569_vm3, 4294967295, %v12598_v43  ;;  %v12604_v52 = vsel %vm9575_vm0, 4294967295, %v12603_v52  ;;  %v9595_v63 = vmul.f32 %v939_v27, %v12612_v20  ;;  %v12619_v16 = vand.u32 2147483647, %v12618_v32  ;;  %v12629_v27 = vld [vmem:[#allocation213_spill] sm:$0xff] }
 0xbd0   :  { %12600 = vst [vmem:[#allocation32_spill] sm:$0xff] %v12599_v43  ;;  %vm9602_vm12 = vcmp.eq.f32.partialorder %v12615_v14, 8.507059e+37  ;;  %v12622_v1 = vand.u32 2147483647, %v12525_v62  ;;  %v12623_v42 = vmov 0  ;;  %vm12625_vm0 = vweird.f32 %v8929_v53  ;;  %v12700_v60 = vld [vmem:[#allocation13_spill] sm:$0xff] }
 0xbd1   :  { %12605 = vst [vmem:[#allocation16_spill] sm:$0xff] %v12604_v52  ;;  %v12613_v52 = vld [vmem:[#allocation141_spill] sm:$0xff]  ;;  %v12617_v19 = vsel %vm9602_vm12, 4294967295, %v12616_v19  ;;  %vm9608_vm8 = vcmp.eq.f32.partialorder %v12619_v16, 8.507059e+37  ;;  %vm12626_vm3 = vweird.f32 %v12614_v30  ;;  %vm12630_vm12 = vnez %v12629_v27 }
 0xbd2   :  { %v9598_v43 = vmul.f32 %v953_v59, %v12613_v52  ;;  %vm9614_vm1 = vcmp.eq.f32.partialorder %v12622_v1, 8.507059e+37  ;;  %vm9622_vm2 = vmor %vm12626_vm3, %vm12625_vm0  ;;  %v644_v59 = vsel %vm12630_vm12, %v8521_v6, %v9423_v55  ;;  %v658_v52 = vsel %vm9347_vm9, %v8536_v37, %v9426_v48  ;;  %v12633_v30 = vld [vmem:[#allocation181_spill] sm:$0xff]  ;;  %v12639_v37 = vld [vmem:[#allocation182_spill] sm:$0xff] }
 0xbd3   :  { %v12624_v42 = vsel %vm9614_vm1, 4294967295, %v12623_v42  ;;  %v1207_v20 = vsel %vm9355_vm13, %v8686_v50, %v9429_v4  ;;  %vm12634_vm3 = vnez %v12633_v30  ;;  %vm12635_vm0 = vweird.f32 %v8965_v9  ;;  %v12674_v27 = vld [vmem:[#allocation100_spill] sm:$0xff] }
 0xbd4   :  { %v1221_v14 = vsel %vm12634_vm3, %v8701_v47, %v9452_v36  ;;  %vm12636_vm1 = vweird.f32 %v12618_v32  ;;  %vm12640_vm9 = vnez %v12639_v37  ;;  %v1494_v48 = vsel %vm9384_vm4, %v12413_v57, %v9458_v17  ;;  %v12650_v36 = vld [vmem:[#allocation146_spill] sm:$0xff]  ;;  %v12663_v32 = vld [vmem:[#allocation220_spill] sm:$0xff] }
 0xbd5   :  { %vm9646_vm12 = vmor %vm12636_vm1, %vm12635_vm0  ;;  %v1235_v55 = vsel %vm12640_vm9, %v8716_v44, %v9455_v7  ;;  %v1508_v47 = vsel %vm9397_vm11, %v12418_v15, %v9461_v39  ;;  %v1522_v4 = vsel %vm9415_vm7, %v12422_v49, %v9490_v26  ;;  %vm12642_vm13 = vweird.f32 %v9055_v3  ;;  %v12654_v39 = vld [vmem:[#allocation200_spill] sm:$0xff]  ;;  %v12657_v26 = vld [vmem:[#allocation214_spill] sm:$0xff] }
 0xbd6   :  { %vm12643_vm1 = vweird.f32 %v12525_v62  ;;  %v1766_v57 = vsel %vm9447_vm6, %v12431_v41, %v1762_v23  ;;  %v1780_v15 = vsel %vm9485_vm14, %v8881_v33, %v1776_v58  ;;  %v1794_v49 = vsel %vm9529_vm10, %v8893_v18, %v1790_v0  ;;  %v12660_v23 = vld [vmem:[#allocation153_spill] sm:$0xff]  ;;  %v12661_v0 = vld [vmem:[#allocation216_spill] sm:$0xff]  ;;  %v12677_v16 = vld [vmem:[#allocation30_spill] sm:$0xff] }
 0xbd7   :  { %vm9670_vm3 = vmor %vm12643_vm1, %vm12642_vm13  ;;  %v2053_v62 = vsel %vm9559_vm5, %v8917_v45, %v2049_v61  ;;  %v2067_v25 = vsel %vm9583_vm15, %v8923_v34, %v2063_v21  ;;  %v2081_v41 = vsel %vm9622_vm2, %v8929_v53, %v2077_v22  ;;  %v2601_v33 = vsel %vm9646_vm12, %v8965_v9, %v2597_v11  ;;  %v12651_v53 = vld [vmem:[#allocation149_spill] sm:$0xff]  ;;  %v12652_v9 = vld [vmem:[#allocation199_spill] sm:$0xff] }
 0xbd8   :  { %v2958_v18 = vsel %vm9670_vm3, %v9055_v3, %v2954_v24  ;;  %vm12647_vm4 = vnez %v12536_v56  ;;  %vm12649_vm11 = vnez %v12539_v2  ;;  %v9706_v7 = vmul.f32 %v12650_v36, %v9592_v5  ;;  %v12667_v22 = vld [vmem:[#allocation183_spill] sm:$0xff]  ;;  %v12684_v6 = vld [vmem:[#allocation16_spill] sm:$0xff] }
 0xbd9   :  { %v635_v45 = vsel %vm12647_vm4, %v12646_v31, %v630_v13  ;;  %v1212_v34 = vsel %vm12649_vm11, %v12648_v51, %v1207_v20  ;;  %v9710_v17 = vmul.f32 %v12651_v53, %v9595_v63  ;;  %vm12653_vm7 = vnez %v12546_v12  ;;  %v12668_v11 = vld [vmem:[#allocation87_spill] sm:$0xff]  ;;  %v12671_v13 = vld [vmem:[#allocation118_spill] sm:$0xff]  ;;  %v12681_v20 = vld [vmem:[#allocation32_spill] sm:$0xff] }
 0xbda   :  { %v649_v3 = vsel %vm12653_vm7, %v12652_v9, %v644_v59  ;;  %vm12656_vm14 = vnez %v12655_v28  ;;  %vm12659_vm6 = vnez %v12658_v46  ;;  %v9723_v58 = vmul.f32 %v12660_v23, %v9598_v43  ;;  %v12676_v59 = vld [vmem:[#allocation226_spill] sm:$0xff]  ;;  %v12693_v31 = vld [vmem:[#allocation136_spill] sm:$0xff]  ;;  %v12703_v23 = vld [vmem:[#allocation11_spill] sm:$0xff] }
 0xbdb   :  { %v663_v56 = vsel %vm12656_vm14, %v12654_v39, %v658_v52  ;;  %v1226_v2 = vsel %vm12659_vm6, %v12657_v26, %v1221_v14  ;;  %vm12662_vm2 = vnez %v12564_v40  ;;  %vm12664_vm5 = vnez %v12567_v38  ;;  %v12679_v52 = vld [vmem:[#allocation35_spill] sm:$0xff]  ;;  %v12683_v14 = vld [vmem:[#allocation230_spill] sm:$0xff] }
 0xbdc   :  { %v1240_v61 = vsel %vm12662_vm2, %v12661_v0, %v1235_v55  ;;  %v1499_v12 = vsel %vm12664_vm5, %v12663_v32, %v1494_v48  ;;  %vm12666_vm10 = vnez %v12570_v35  ;;  %vm12669_vm15 = vnez %v12668_v11  ;;  %v12680_v35 = vld [vmem:[#allocation229_spill] sm:$0xff]  ;;  %v12686_v55 = vld [vmem:[#allocation130_spill] sm:$0xff]  ;;  %v12687_v48 = vld [vmem:[#allocation36_spill] sm:$0xff] }
 0xbdd   :  { %v1513_v21 = vsel %vm12666_vm10, %v12665_v8, %v1508_v47  ;;  %v1527_v24 = vsel %vm12669_vm15, %v12667_v22, %v1522_v4  ;;  %vm12672_vm0 = vnez %v12671_v13  ;;  %vm12675_vm12 = vnez %v12674_v27  ;;  %v12688_v4 = vld [vmem:[#allocation231_spill] sm:$0xff]  ;;  %v12696_v53 = vld [vmem:[#allocation202_spill] sm:$0xff]  ;;  %v12706_v22 = vld [vmem:[#allocation92_spill] sm:$0xff] }
 0xbde   :  { %v1771_v1 = vsel %vm12672_vm0, %v12670_v54, %v1766_v57  ;;  %v1785_v40 = vsel %vm12675_vm12, %v12673_v10, %v1780_v15  ;;  %vm12678_vm9 = vnez %v12677_v16  ;;  %v9747_v29 = vmul.f32 %v1212_v34, %v12679_v52  ;;  %v12690_v57 = vld [vmem:[#allocation234_spill] sm:$0xff]  ;;  %v12710_v52 = vld [vmem:[#allocation203_spill] sm:$0xff] }
 0xbdf   :  { %v1799_v38 = vsel %vm12678_vm9, %v12676_v59, %v1794_v49  ;;  %vm12682_vm13 = vnez %v12681_v20  ;;  %vm12685_vm1 = vnez %v12684_v6  ;;  %v713_v50 = vmul.f32 %v635_v45, %v12686_v55  ;;  %v12691_v49 = vld [vmem:[#allocation235_spill] sm:$0xff]  ;;  %v12695_v45 = vld [vmem:[#allocation37_spill] sm:$0xff]  ;;  %v12699_v39 = vld [vmem:[#allocation90_spill] sm:$0xff] }
 0xbe0   :  { %v2058_v30 = vsel %vm12682_vm13, %v12680_v35, %v2053_v62  ;;  %v2072_v37 = vsel %vm12685_vm1, %v12683_v14, %v2067_v25  ;;  %v9757_v47 = vmul.f32 %v1226_v2, %v12687_v48  ;;  %vm12689_vm3 = vnez %v12617_v19  ;;  %v12694_v25 = vld [vmem:[#allocation121_spill] sm:$0xff]  ;;  %v12698_v19 = vld [vmem:[#allocation168_spill] sm:$0xff]  ;;  %v12707_v27 = vld [vmem:[#allocation126_spill] sm:$0xff] }
 0xbe1   :  { %v2086_v44 = vsel %vm12689_vm3, %v12688_v4, %v2081_v41  ;;  %v2606_v15 = vsel %vm9608_vm8, %v12690_v57, %v2601_v33  ;;  %vm12692_vm4 = vnez %v12624_v42  ;;  %v714_v51 = vmul.f32 %v649_v3, %v12693_v31  ;;  %v12712_v20 = vld [vmem:[#allocation172_spill] sm:$0xff]  ;;  %v12713_v14 = vld [vmem:[#allocation122_spill] sm:$0xff]  ;;  %v12714_v57 = vld [vmem:[#allocation133_spill] sm:$0xff] }
 0xbe2   :  { %v2963_v62 = vsel %vm12692_vm4, %v12691_v49, %v2958_v18  ;;  %v715_v34 = vmul.f32 %v663_v56, %v12694_v25  ;;  %v9771_v36 = vmul.f32 %v1240_v61, %v12695_v45  ;;  %vm728_vm11 = vcmask 179200   ;;  %v12701_v18 = vld [vmem:[#allocation88_spill] sm:$0xff]  ;;  %v12702_v56 = vld [vmem:[#allocation17_spill] sm:$0xff] }
 0xbe3   :  { %v12697_v9 = vsub.f32 1.0, %v12696_v53  ;;  %v9777_v28 = vmul.f32 %v1499_v12, %v12699_v39  ;;  %v9780_v33 = vmul.f32 %v1513_v21, %v12700_v60  ;;  %vm732_vm8 = vcmask 177152   ;;  %v12704_v61 = vld [vmem:[#allocation21_spill] sm:$0xff]  ;;  %v12705_v12 = vld [vmem:[#allocation24_spill] sm:$0xff] }
 0xbe4   :  { %v1304_v42 = vsel %vm728_vm11, %v9747_v29, 0.0  ;;  %v9785_v3 = vmul.f32 %v1527_v24, %v12701_v18  ;;  %v9788_v26 = vmul.f32 %v1771_v1, %v12702_v56  ;;  %v1305_v46 = vsel %vm728_vm11, %v9757_v47, 0.0  ;;  %v12715_v31 = vld [vmem:[#allocation25_spill] sm:$0xff]  ;;  %v12718_v53 = vld [vmem:[#allocation120_spill] sm:$0xff] }
 0xbe5   :  { %v674_v41 = vmul.f32 %v12698_v19, %v12697_v9  ;;  %v729_v2 = vsel %vm728_vm11, %v713_v50, 0.0  ;;  %v9794_v0 = vmul.f32 %v1785_v40, %v12703_v23  ;;  %v9797_v32 = vmul.f32 %v1799_v38, %v12704_v61  ;;  %v12719_v9 = vld [vmem:[#allocation174_spill] sm:$0xff]  ;;  %v12721_v23 = vld [vmem:[#allocation48_spill] sm:$0xff] }
 0xbe6   :  { %v9800_v8 = vmul.f32 %v2058_v30, %v12705_v12  ;;  %v1306_v21 = vadd.f32 %v1305_v46, %v1304_v42  ;;  %v9803_v11 = vmul.f32 %v2072_v37, %v12706_v22  ;;  %v1307_v24 = vsel %vm732_vm8, %v9771_v36, 0.0  ;;  %v12722_v12 = vld [vmem:[#allocation54_spill] sm:$0xff] }
 0xbe7   :  { %v730_v54 = vsel %vm728_vm11, %v714_v51, 0.0  ;;  %v675_v13 = vadd.f32 %v12698_v19, %v674_v41  ;;  %vm676_vm7 = vweird.f32 %v12707_v27  ;;  %vm677_vm14 = vweird.f32 %v12698_v19  ;;  %v12720_v41 = vld [vmem:[#allocation139_spill] sm:$0xff]  ;;  %v12724_v22 = vld [vmem:[#allocation194_spill] sm:$0xff] }
 0xbe8   :  { %v1308_v1 = vadd.f32 %v1307_v24, %v1306_v21  ;;  %v731_v10 = vadd.f32 %v730_v54, %v729_v2  ;;  %v733_v40 = vsel %vm732_vm8, %v715_v34, 0.0  ;;  %vm9812_vm6 = vmor %vm676_vm7, %vm677_vm14  ;;  %v680_v16 = vand.u32 2147483647, %v12707_v27  ;;  %v12725_v54 = vld [vmem:[#allocation155_spill] sm:$0xff] }
 0xbe9   :  { %v682_v38 = vand.u32 2147483648, %v12707_v27  ;;  %v12711_v35 = vsub.f32 1.0, %v12710_v52  ;;  %v722_v6 = vmul.f32 %v12713_v14, %v713_v50  ;;  %v679_v55 = vsel %vm9812_vm6, %v12698_v19, %v675_v13 }
 0xbea   :  { %1309 = vadd.xlane.f32.xlu0 %v1308_v1  ;;  %v734_v37 = vadd.f32 %v733_v40, %v731_v10  ;;  %vm691_vm2 = vweird.f32 %v12712_v20  ;;  %vm690_vm5 = vweird.f32 %v12714_v57  ;;  %v694_v49 = vand.u32 2147483647, %v12714_v57 }
 0xbeb   :  { %v688_v30 = vmul.f32 %v12712_v20, %v12711_v35  ;;  %v683_v48 = vor.u32 1.1754944e-38, %v682_v38  ;;  %v9830_v25 = vmul.f32 %v2086_v44, %v12715_v31  ;;  %vm681_vm10 = vcmp.eq.f32.partialorder %v680_v16, 8.507059e+37  ;;  %vm9832_vm15 = vmor %vm690_vm5, %vm691_vm2 }
 0xbec   :  { %735 = vadd.xlane.f32.xlu1 %v734_v37  ;;  %v696_v45 = vand.u32 2147483648, %v12714_v57  ;;  %v700_v19 = vmul.f32 %v12719_v9, %v12718_v53  ;;  %v723_v39 = vmul.f32 %v12720_v41, %v714_v51  ;;  %v708_v44 = vand.u32 2147483647, %v12718_v53  ;;  %v12723_v51 = vld [vmem:[#allocation27_spill] sm:$0xff] }
 0xbed   :  { %v689_v4 = vadd.f32 %v12712_v20, %v688_v30  ;;  %v684_v60 = vsel %vm681_vm10, %v683_v48, %v679_v55  ;;  %v710_v46 = vand.u32 2147483648, %v12718_v53  ;;  %v9846_v61 = vmul.f32 %v2606_v15, %v12721_v23 }
 0xbee   :  { %v697_v18 = vor.u32 1.1754944e-38, %v696_v45  ;;  %v701_v56 = vsub.f32 1.0, %v700_v19  ;;  %v725_v2 = vmul.f32 %v722_v6, %v684_v60  ;;  %v9849_v21 = vmul.f32 %v2963_v62, %v12722_v12 }
 0xbef   :  { %v693_v42 = vsel %vm9832_vm15, %v12712_v20, %v689_v4  ;;  %vm695_vm0 = vcmp.eq.f32.partialorder %v694_v49, 8.507059e+37  ;;  %v2474_v24 = vmul.f32 %v12724_v22, %v12723_v51  ;;  %v724_v13 = vmul.f32 %v12725_v54, %v715_v34 }
 0xbf0   :  { %v698_v1 = vsel %vm695_vm0, %v697_v18, %v693_v42  ;;  %v702_v10 = vmul.f32 %v12719_v9, %v701_v56  ;;  %vm705_vm12 = vweird.f32 %v12719_v9  ;;  %vm704_vm9 = vweird.f32 %v12718_v53  ;;  %v12728_v42 = vld [vmem:[#allocation46_spill] sm:$0xff] }
 0xbf1   :  { %v726_v27 = vmul.f32 %v723_v39, %v698_v1  ;;  %v745_v15 = vsel %vm728_vm11, %v725_v2, 0.0  ;;  %v2475_v40 = vsub.f32 1.0, %v2474_v24  ;;  %vm709_vm13 = vcmp.eq.f32.partialorder %v708_v44, 8.507059e+37  ;;  %vm706_vm1 = vmor %vm704_vm9, %vm705_vm12  ;;  %v12727_v39 = vld [vmem:[#allocation28_spill] sm:$0xff] }
 0xbf2   :  { %v703_v62 = vadd.f32 %v12719_v9, %v702_v10  ;;  %v711_v59 = vor.u32 1.1754944e-38, %v710_v46  ;;  %v2484_v16 = vand.u32 2147483648, %v12723_v51  ;;  %vm2479_vm3 = vweird.f32 %v12724_v22  ;;  %v12729_v44 = vld [vmem:[#allocation196_spill] sm:$0xff]  ;;  %v12731_v46 = vld [vmem:[#allocation162_spill] sm:$0xff] }
 0xbf3   :  { %v746_v34 = vsel %vm728_vm11, %v726_v27, 0.0  ;;  %v2476_v38 = vmul.f32 %v12724_v22, %v2475_v40  ;;  %v2482_v52 = vand.u32 2147483647, %v12723_v51  ;;  %vm2478_vm4 = vweird.f32 %v12723_v51  ;;  %v12737_v27 = vld [vmem:[#allocation44_spill] sm:$0xff]  ;;  %v12738_v40 = vld [vmem:[#allocation154_spill] sm:$0xff] }
 0xbf4   :  { %v707_v35 = vsel %vm706_vm1, %v12719_v9, %v703_v62  ;;  %v747_v20 = vadd.f32 %v746_v34, %v745_v15  ;;  %vm2508_vm7 = vcmask 46080   ;;  %v1017_v6 = vsel %vm728_vm11, %v9592_v5, 0.0  ;;  %vm2480_vm14 = vmor %vm2478_vm4, %vm2479_vm3  ;;  %v12726_v9 = vld [vmem:[#allocation173_spill] sm:$0xff]  ;;  %v12739_v34 = vld [vmem:[#allocation210_spill] sm:$0xff] }
 0xbf5   :  { %v712_v30 = vsel %vm709_vm13, %v711_v59, %v707_v35  ;;  %v2477_v14 = vadd.f32 %v12724_v22, %v2476_v38  ;;  %v1018_v37 = vsel %vm728_vm11, %v9595_v63, 0.0  ;;  %v2485_v48 = vor.u32 1.1754944e-38, %v2484_v16 }
 0xbf6   :  { %v727_v55 = vmul.f32 %v724_v13, %v712_v30  ;;  %v1019_v4 = vadd.f32 %v1018_v37, %v1017_v6  ;;  %v1863_v57 = vsel %vm728_vm11, %v9788_v26, 0.0  ;;  %vm2483_vm6 = vcmp.eq.f32.partialorder %v2482_v52, 8.507059e+37  ;;  %v12736_v13 = vld [vmem:[#allocation175_spill] sm:$0xff]  ;;  %v12741_v52 = vld [vmem:[#allocation176_spill] sm:$0xff] }
 0xbf7   :  { %v2481_v49 = vsel %vm2480_vm14, %v12724_v22, %v2477_v14  ;;  %v1020_v31 = vsel %vm732_vm8, %v9598_v43, 0.0  ;;  %v1864_v50 = vsel %vm728_vm11, %v9794_v0, 0.0  ;;  %v9881_v19 = vmul.f32 %v12726_v9, %v9747_v29  ;;  %v12730_v43 = vld [vmem:[#allocation158_spill] sm:$0xff]  ;;  %v12742_v14 = vld [vmem:[#allocation156_spill] sm:$0xff] }
 0xbf8   :  { %v748_v5 = vsel %vm732_vm8, %v727_v55, 0.0  ;;  %v2486_v45 = vsel %vm2483_vm6, %v2485_v48, %v2481_v49  ;;  %v1021_v63 = vadd.f32 %v1020_v31, %v1019_v4  ;;  %v1865_v53 = vadd.f32 %v1864_v50, %v1863_v57  ;;  %v12745_v31 = vld [vmem:[#allocation142_spill] sm:$0xff]  ;;  %v12746_v50 = vld [vmem:[#allocation177_spill] sm:$0xff] }
 0xbf9   :  { %v749_v41 = vadd.f32 %v748_v5, %v747_v20  ;;  %v9884_v60 = vmul.f32 %v2486_v45, %v12727_v39  ;;  %v2610_v18 = vmul.f32 %v12729_v44, %v12728_v42  ;;  %v9890_v56 = vmul.f32 %v12730_v43, %v9757_v47 }
 0xbfa   :  { %v9894_v2 = vmul.f32 %v12731_v46, %v9771_v36  ;;  %1022 = vadd.xlane.f32.xlu1 %v1021_v63  ;;  %v1866_v29 = vsel %vm732_vm8, %v9797_v32, 0.0  ;;  %v2618_v23 = vand.u32 2147483647, %v12728_v42  ;;  %v2620_v24 = vand.u32 2147483648, %v12728_v42  ;;  %v12734_v36 = vld [vmem:[#allocation209_spill] sm:$0xff] }
 0xbfb   :  { %750 = vadd.xlane.f32.xlu2 %v749_v41  ;;  %v2509_v12 = vsel %vm2508_vm7, %v9884_v60, 0.0  ;;  %v1867_v51 = vadd.f32 %v1866_v29, %v1865_v53  ;;  %v2611_v22 = vsub.f32 1.0, %v2610_v18  ;;  %vm2614_vm2 = vweird.f32 %v12728_v42 }
 0xbfc   :  { %2510 = vadd.xlane.f32.xlu0 %v2509_v12  ;;  %vm2615_vm5 = vweird.f32 %v12729_v44  ;;  %vm9904_vm10 = vcmp.eq.f32.partialorder %v2618_v23, 8.507059e+37  ;;  %v12735_v54 = vsub.f32 1.0, %v12734_v36  ;;  %v2626_v15 = vmul.f32 %v12737_v27, %v9846_v61 }
 0xbfd   :  { %v2612_v10 = vmul.f32 %v12729_v44, %v2611_v22  ;;  %vm965_vm15 = vweird.f32 %v12738_v40  ;;  %vm966_vm0 = vweird.f32 %v12736_v13  ;;  %v969_v59 = vand.u32 2147483647, %v12738_v40  ;;  %vm2616_vm13 = vmor %vm2614_vm2, %vm2615_vm5 }
 0xbfe   :  { %v963_v1 = vmul.f32 %v12736_v13, %v12735_v54  ;;  %v971_v16 = vand.u32 2147483648, %v12738_v40  ;;  %v12740_v38 = vsub.f32 1.0, %v12739_v34  ;;  %v2621_v30 = vor.u32 1.1754944e-38, %v2620_v24  ;;  %vm967_vm12 = vmor %vm965_vm15, %vm966_vm0  ;;  %v12748_v24 = vld [vmem:[#allocation165_spill] sm:$0xff]  ;;  %v12749_v54 = vld [vmem:[#allocation167_spill] sm:$0xff] }
 0xbff   :  { %v2613_v20 = vadd.f32 %v12729_v44, %v2612_v10  ;;  %vm980_vm9 = vweird.f32 %v12741_v52  ;;  %v983_v6 = vand.u32 2147483647, %v12742_v14  ;;  %vm979_vm1 = vweird.f32 %v12742_v14  ;;  %v12750_v40 = vld [vmem:[#allocation40_spill] sm:$0xff] }
 0xc00   :  { %v964_v62 = vadd.f32 %v12736_v13, %v963_v1  ;;  %v977_v35 = vmul.f32 %v12741_v52, %v12740_v38  ;;  %v972_v55 = vor.u32 1.1754944e-38, %v971_v16  ;;  %vm970_vm3 = vcmp.eq.f32.partialorder %v969_v59, 8.507059e+37  ;;  %vm9933_vm4 = vmor %vm979_vm1, %vm980_vm9 }
 0xc01   :  { %v2617_v4 = vsel %vm2616_vm13, %v12729_v44, %v2613_v20  ;;  %v985_v49 = vand.u32 2147483648, %v12742_v14  ;;  %v989_v5 = vmul.f32 %v12746_v50, %v12745_v31  ;;  %vm984_vm14 = vcmp.eq.f32.partialorder %v983_v6, 8.507059e+37  ;;  %v12752_v6 = vld [vmem:[#allocation218_spill] sm:$0xff] }
 0xc02   :  { %v968_v37 = vsel %vm967_vm12, %v12736_v13, %v964_v62  ;;  %v978_v48 = vadd.f32 %v12741_v52, %v977_v35  ;;  %v2622_v45 = vsel %vm9904_vm10, %v2621_v30, %v2617_v4  ;;  %vm994_vm6 = vweird.f32 %v12746_v50  ;;  %v12751_v62 = vld [vmem:[#allocation205_spill] sm:$0xff] }
 0xc03   :  { %v973_v63 = vsel %vm970_vm3, %v972_v55, %v968_v37  ;;  %1868 = vadd.xlane.f32.xlu2 %v1867_v51  ;;  %v2627_v9 = vmul.f32 %v2626_v15, %v2622_v45  ;;  %v986_v41 = vor.u32 1.1754944e-38, %v985_v49  ;;  %v990_v39 = vsub.f32 1.0, %v989_v5  ;;  %v12747_v51 = vld [vmem:[#allocation161_spill] sm:$0xff]  ;;  %v12754_v55 = vld [vmem:[#allocation178_spill] sm:$0xff] }
 0xc04   :  { %v982_v53 = vsel %vm9933_vm4, %v12741_v52, %v978_v48  ;;  %v997_v42 = vand.u32 2147483647, %v12745_v31  ;;  %v999_v44 = vand.u32 2147483648, %v12745_v31  ;;  %v1014_v18 = vmul.f32 %v9706_v7, %v973_v63  ;;  %v12757_v49 = vld [vmem:[#allocation169_spill] sm:$0xff] }
 0xc05   :  { %v2150_v43 = vsel %vm728_vm11, %v9800_v8, 0.0  ;;  %v2639_v46 = vsel %vm2508_vm7, %v2627_v9, 0.0  ;;  %v987_v29 = vsel %vm984_vm14, %v986_v41, %v982_v53  ;;  %v991_v23 = vmul.f32 %v12746_v50, %v990_v39  ;;  %v12760_v41 = vld [vmem:[#allocation219_spill] sm:$0xff]  ;;  %v12775_v9 = vld [vmem:[#allocation217_spill] sm:$0xff] }
 0xc06   :  { %v2151_v12 = vsel %vm728_vm11, %v9803_v11, 0.0  ;;  %v9957_v22 = vmul.f32 %v12747_v51, %v9777_v28  ;;  %v9961_v47 = vmul.f32 %v12748_v24, %v9780_v33  ;;  %2640 = vadd.xlane.f32.xlu0 %v2639_v46  ;;  %v1015_v7 = vmul.f32 %v9710_v17, %v987_v29  ;;  %v12763_v46 = vld [vmem:[#allocation170_spill] sm:$0xff]  ;;  %v12764_v24 = vld [vmem:[#allocation157_spill] sm:$0xff] }
 0xc07   :  { %v1032_v36 = vsel %vm728_vm11, %v1014_v18, 0.0  ;;  %v9967_v13 = vmul.f32 %v12749_v54, %v9785_v3  ;;  %v992_v1 = vadd.f32 %v12746_v50, %v991_v23  ;;  %vm993_vm2 = vweird.f32 %v12745_v31  ;;  %v12765_v54 = vld [vmem:[#allocation171_spill] sm:$0xff] }
 0xc08   :  { %v2152_v10 = vadd.f32 %v2151_v12, %v2150_v43  ;;  %vm995_vm5 = vmor %vm993_vm2, %vm994_vm6  ;;  %v1000_v27 = vor.u32 1.1754944e-38, %v999_v44  ;;  %v1033_v15 = vsel %vm728_vm11, %v1015_v7, 0.0  ;;  %v2153_v17 = vsel %vm732_vm8, %v9830_v25, 0.0 }
 0xc09   :  { %v2832_v59 = vmul.f32 %v12751_v62, %v12750_v40  ;;  %v996_v16 = vsel %vm995_vm5, %v12746_v50, %v992_v1  ;;  %vm998_vm10 = vcmp.eq.f32.partialorder %v997_v42, 8.507059e+37  ;;  %v1034_v34 = vadd.f32 %v1033_v15, %v1032_v36  ;;  %v12762_v42 = vld [vmem:[#allocation179_spill] sm:$0xff]  ;;  %v12766_v1 = vld [vmem:[#allocation180_spill] sm:$0xff] }
 0xc0a   :  { %v2154_v38 = vadd.f32 %v2153_v17, %v2152_v10  ;;  %v1001_v52 = vsel %vm998_vm10, %v1000_v27, %v996_v16  ;;  %v2840_v20 = vand.u32 2147483647, %v12750_v40  ;;  %v2842_v30 = vand.u32 2147483648, %v12750_v40  ;;  %v12767_v27 = vld [vmem:[#allocation41_spill] sm:$0xff] }
 0xc0b   :  { %v2833_v35 = vsub.f32 1.0, %v2832_v59  ;;  %v1016_v14 = vmul.f32 %v9723_v58, %v1001_v52  ;;  %vm2836_vm15 = vweird.f32 %v12750_v40  ;;  %vm2837_vm0 = vweird.f32 %v12751_v62 }
 0xc0c   :  { %2155 = vadd.xlane.f32.xlu2 %v2154_v38  ;;  %v12753_v37 = vsub.f32 1.0, %v12752_v6  ;;  %vm9988_vm12 = vcmp.eq.f32.partialorder %v2840_v20, 8.507059e+37  ;;  %vm1252_vm9 = vweird.f32 %v12757_v49  ;;  %vm1253_vm13 = vweird.f32 %v12754_v55  ;;  %vm2838_vm3 = vmor %vm2836_vm15, %vm2837_vm0  ;;  %v12769_v20 = vld [vmem:[#allocation195_spill] sm:$0xff] }
 0xc0d   :  { %v2834_v4 = vmul.f32 %v12751_v62, %v2833_v35  ;;  %v1035_v58 = vsel %vm732_vm8, %v1016_v14, 0.0  ;;  %v1256_v50 = vand.u32 2147483647, %v12757_v49  ;;  %v1258_v5 = vand.u32 2147483648, %v12757_v49  ;;  %vm9999_vm1 = vmor %vm1252_vm9, %vm1253_vm13  ;;  %v12768_v35 = vld [vmem:[#allocation26_spill] sm:$0xff]  ;;  %v12770_v14 = vld [vmem:[#allocation159_spill] sm:$0xff] }
 0xc0e   :  { %v1250_v48 = vmul.f32 %v12754_v55, %v12753_v37  ;;  %v1036_v45 = vadd.f32 %v1035_v58, %v1034_v34  ;;  %v2843_v53 = vor.u32 1.1754944e-38, %v2842_v30  ;;  %v12761_v39 = vsub.f32 1.0, %v12760_v41 }
 0xc0f   :  { %v2835_v63 = vadd.f32 %v12751_v62, %v2834_v4  ;;  %v1259_v43 = vor.u32 1.1754944e-38, %v1258_v5  ;;  %vm1266_vm4 = vweird.f32 %v12763_v46  ;;  %vm1267_vm14 = vweird.f32 %v12762_v42 }
 0xc10   :  { %v1251_v31 = vadd.f32 %v12754_v55, %v1250_v48  ;;  %v1264_v44 = vmul.f32 %v12762_v42, %v12761_v39  ;;  %1037 = vadd.xlane.f32.xlu1 %v1036_v45  ;;  %v1270_v12 = vand.u32 2147483647, %v12763_v46  ;;  %v1272_v51 = vand.u32 2147483648, %v12763_v46  ;;  %vm1268_vm2 = vmor %vm1266_vm4, %vm1267_vm14  ;;  %v12773_v45 = vld [vmem:[#allocation93_spill] sm:$0xff]  ;;  %v12784_v48 = vld [vmem:[#allocation160_spill] sm:$0xff] }
 0xc11   :  { %v2839_v29 = vsel %vm2838_vm3, %v12751_v62, %v2835_v63  ;;  %v10021_v7 = vmul.f32 %v12764_v24, %v9788_v26  ;;  %vm1257_vm6 = vcmp.eq.f32.partialorder %v1256_v50, 8.507059e+37  ;;  %v1276_v10 = vmul.f32 %v12766_v1, %v12765_v54 }
 0xc12   :  { %v1255_v18 = vsel %vm9999_vm1, %v12754_v55, %v1251_v31  ;;  %v1265_v23 = vadd.f32 %v12762_v42, %v1264_v44  ;;  %v2844_v36 = vsel %vm9988_vm12, %v2843_v53, %v2839_v29  ;;  %v1273_v62 = vor.u32 1.1754944e-38, %v1272_v51  ;;  %v12774_v53 = vld [vmem:[#allocation42_spill] sm:$0xff] }
 0xc13   :  { %v10028_v15 = vmul.f32 %v2844_v36, %v12767_v27  ;;  %v1260_v17 = vsel %vm1257_vm6, %v1259_v43, %v1255_v18  ;;  %vm1271_vm5 = vcmp.eq.f32.partialorder %v1270_v12, 8.507059e+37  ;;  %v1277_v59 = vsub.f32 1.0, %v1276_v10  ;;  %v12796_v36 = vld [vmem:[#allocation33_spill] sm:$0xff] }
 0xc14   :  { %v1269_v40 = vsel %vm1268_vm2, %v12762_v42, %v1265_v23  ;;  %v1284_v26 = vand.u32 2147483647, %v12765_v54  ;;  %v1286_v16 = vand.u32 2147483648, %v12765_v54  ;;  %v1301_v52 = vmul.f32 %v9881_v19, %v1260_v17  ;;  %v12776_v23 = vld [vmem:[#allocation43_spill] sm:$0xff] }
 0xc15   :  { %v2866_v34 = vsel %vm2508_vm7, %v10028_v15, 0.0  ;;  %v1274_v38 = vsel %vm1271_vm5, %v1273_v62, %v1269_v40  ;;  %v2490_v30 = vmul.f32 %v12769_v20, %v12768_v35  ;;  %v10040_v6 = vmul.f32 %v12770_v14, %v9794_v0 }
 0xc16   :  { %2867 = vadd.xlane.f32.xlu0 %v2866_v34  ;;  %v1278_v37 = vmul.f32 %v12766_v1, %v1277_v59  ;;  %vm1281_vm10 = vweird.f32 %v12766_v1  ;;  %v1302_v55 = vmul.f32 %v9890_v56, %v1274_v38  ;;  %vm1280_vm15 = vweird.f32 %v12765_v54  ;;  %v12779_v59 = vld [vmem:[#allocation38_spill] sm:$0xff] }
 0xc17   :  { %vm10046_vm0 = vcmp.eq.f32.partialorder %v1284_v26, 8.507059e+37  ;;  %v1319_v19 = vsel %vm728_vm11, %v1301_v52, 0.0  ;;  %v2491_v4 = vsub.f32 1.0, %v2490_v30  ;;  %v2498_v49 = vand.u32 2147483647, %v12768_v35  ;;  %vm1282_vm12 = vmor %vm1280_vm15, %vm1281_vm10  ;;  %v12780_v26 = vld [vmem:[#allocation198_spill] sm:$0xff] }
 0xc18   :  { %v1279_v57 = vadd.f32 %v12766_v1, %v1278_v37  ;;  %v1320_v0 = vsel %vm728_vm11, %v1302_v55, 0.0  ;;  %v2500_v58 = vand.u32 2147483648, %v12768_v35  ;;  %v1287_v31 = vor.u32 1.1754944e-38, %v1286_v16  ;;  %v12781_v30 = vld [vmem:[#allocation223_spill] sm:$0xff]  ;;  %v12783_v37 = vld [vmem:[#allocation184_spill] sm:$0xff] }
 0xc19   :  { %v2492_v56 = vmul.f32 %v12769_v20, %v2491_v4  ;;  %vm2494_vm9 = vweird.f32 %v12768_v35  ;;  %vm2495_vm13 = vweird.f32 %v12769_v20  ;;  %v1321_v5 = vadd.f32 %v1320_v0, %v1319_v19 }
 0xc1a   :  { %v1283_v50 = vsel %vm1282_vm12, %v12766_v1, %v1279_v57  ;;  %v2506_v63 = vmul.f32 %v12773_v45, %v9884_v60  ;;  %v2967_v41 = vmul.f32 %v12775_v9, %v12774_v53  ;;  %vm2499_vm1 = vcmp.eq.f32.partialorder %v2498_v49, 8.507059e+37  ;;  %vm2496_vm3 = vmor %vm2494_vm9, %vm2495_vm13  ;;  %v12789_v45 = vld [vmem:[#allocation224_spill] sm:$0xff] }
 0xc1b   :  { %v1288_v39 = vsel %vm10046_vm0, %v1287_v31, %v1283_v50  ;;  %v2493_v42 = vadd.f32 %v12769_v20, %v2492_v56  ;;  %v2501_v44 = vor.u32 1.1754944e-38, %v2500_v58  ;;  %vm2971_vm4 = vweird.f32 %v12774_v53 }
 0xc1c   :  { %v1303_v18 = vmul.f32 %v9894_v2, %v1288_v39  ;;  %v2968_v43 = vsub.f32 1.0, %v2967_v41  ;;  %v2975_v46 = vand.u32 2147483647, %v12774_v53  ;;  %vm2972_vm14 = vweird.f32 %v12775_v9  ;;  %v12792_v41 = vld [vmem:[#allocation164_spill] sm:$0xff] }
 0xc1d   :  { %v2497_v60 = vsel %vm2496_vm3, %v12769_v20, %v2493_v42  ;;  %v2977_v29 = vand.u32 2147483648, %v12774_v53  ;;  %v2983_v12 = vmul.f32 %v12776_v23, %v9849_v21  ;;  %v1591_v27 = vsel %vm728_vm11, %v9777_v28, 0.0  ;;  %vm2973_vm2 = vmor %vm2971_vm4, %vm2972_vm14  ;;  %v12791_v53 = vld [vmem:[#allocation185_spill] sm:$0xff] }
 0xc1e   :  { %v1322_v51 = vsel %vm732_vm8, %v1303_v18, 0.0  ;;  %v2502_v24 = vsel %vm2499_vm1, %v2501_v44, %v2497_v60  ;;  %v2969_v2 = vmul.f32 %v12775_v9, %v2968_v43  ;;  %vm10076_vm6 = vcmp.eq.f32.partialorder %v2975_v46, 8.507059e+37  ;;  %v12793_v60 = vld [vmem:[#allocation163_spill] sm:$0xff] }
 0xc1f   :  { %v1323_v54 = vadd.f32 %v1322_v51, %v1321_v5  ;;  %v2507_v1 = vmul.f32 %v2506_v63, %v2502_v24  ;;  %v2978_v10 = vor.u32 1.1754944e-38, %v2977_v29  ;;  %v1592_v40 = vsel %vm728_vm11, %v9780_v33, 0.0  ;;  %v12794_v51 = vld [vmem:[#allocation166_spill] sm:$0xff] }
 0xc20   :  { %v2970_v17 = vadd.f32 %v12775_v9, %v2969_v2  ;;  %v1594_v62 = vsel %vm732_vm8, %v9785_v3, 0.0  ;;  %v2713_v16 = vmul.f32 %v12780_v26, %v12779_v59  ;;  %v1593_v28 = vadd.f32 %v1592_v40, %v1591_v27  ;;  %v12795_v24 = vld [vmem:[#allocation186_spill] sm:$0xff] }
 0xc21   :  { %1324 = vadd.xlane.f32.xlu1 %v1323_v54  ;;  %v2520_v34 = vsel %vm2508_vm7, %v2507_v1, 0.0  ;;  %vm2717_vm5 = vweird.f32 %v12779_v59  ;;  %vm2718_vm10 = vweird.f32 %v12780_v26  ;;  %v2721_v38 = vand.u32 2147483647, %v12779_v59 }
 0xc22   :  { %2521 = vadd.xlane.f32.xlu2 %v2520_v34  ;;  %v2974_v33 = vsel %vm2973_vm2, %v12775_v9, %v2970_v17  ;;  %v2714_v3 = vsub.f32 1.0, %v2713_v16  ;;  %v2723_v52 = vand.u32 2147483648, %v12779_v59  ;;  %v1595_v20 = vadd.f32 %v1594_v62, %v1593_v28  ;;  %vm2719_vm1 = vmor %vm2717_vm5, %vm2718_vm10  ;;  %v12798_v16 = vld [vmem:[#allocation208_spill] sm:$0xff] }
 0xc23   :  { %v2979_v35 = vsel %vm10076_vm6, %v2978_v10, %v2974_v33  ;;  %v12782_v14 = vsub.f32 1.0, %v12781_v30  ;;  %vm1539_vm15 = vweird.f32 %v12784_v48  ;;  %vm10106_vm0 = vcmp.eq.f32.partialorder %v2721_v38, 8.507059e+37  ;;  %v12817_v33 = vld [vmem:[#allocation62_spill] sm:$0xff] }
 0xc24   :  { %v2984_v19 = vmul.f32 %v2983_v12, %v2979_v35  ;;  %v2715_v4 = vmul.f32 %v12780_v26, %v2714_v3  ;;  %v2724_v0 = vor.u32 1.1754944e-38, %v2723_v52  ;;  %vm1540_vm12 = vweird.f32 %v12783_v37 }
 0xc25   :  { %v1537_v55 = vmul.f32 %v12783_v37, %v12782_v14  ;;  %v1543_v58 = vand.u32 2147483647, %v12784_v48  ;;  %v1545_v31 = vand.u32 2147483648, %v12784_v48  ;;  %vm10116_vm9 = vmor %vm1539_vm15, %vm1540_vm12  ;;  %v12790_v63 = vsub.f32 1.0, %v12789_v45 }
 0xc26   :  { %v2996_v56 = vsel %vm2508_vm7, %v2984_v19, 0.0  ;;  %v2716_v50 = vadd.f32 %v12780_v26, %v2715_v4  ;;  %vm1553_vm13 = vweird.f32 %v12792_v41  ;;  %vm1554_vm4 = vweird.f32 %v12791_v53  ;;  %v12803_v19 = vld [vmem:[#allocation188_spill] sm:$0xff] }
 0xc27   :  { %v1538_v49 = vadd.f32 %v12783_v37, %v1537_v55  ;;  %v1551_v9 = vmul.f32 %v12791_v53, %v12790_v63  ;;  %2997 = vadd.xlane.f32.xlu0 %v2996_v56  ;;  %vm1544_vm3 = vcmp.eq.f32.partialorder %v1543_v58, 8.507059e+37  ;;  %v1546_v42 = vor.u32 1.1754944e-38, %v1545_v31  ;;  %vm1555_vm14 = vmor %vm1553_vm13, %vm1554_vm4  ;;  %v12801_v55 = vld [vmem:[#allocation227_spill] sm:$0xff]  ;;  %v12805_v31 = vld [vmem:[#allocation9_spill] sm:$0xff] }
 0xc28   :  { %v2720_v44 = vsel %vm2719_vm1, %v12780_v26, %v2716_v50  ;;  %v1557_v43 = vand.u32 2147483647, %v12792_v41  ;;  %v1559_v46 = vand.u32 2147483648, %v12792_v41  ;;  %v10138_v29 = vmul.f32 %v12793_v60, %v9797_v32  ;;  %v12797_v26 = vld [vmem:[#allocation31_spill] sm:$0xff]  ;;  %v12811_v60 = vld [vmem:[#allocation12_spill] sm:$0xff] }
 0xc29   :  { %v1542_v39 = vsel %vm10116_vm9, %v12783_v37, %v1538_v49  ;;  %v1552_v18 = vadd.f32 %v12791_v53, %v1551_v9  ;;  %1596 = vadd.xlane.f32.xlu1 %v1595_v20  ;;  %v2725_v23 = vsel %vm10106_vm0, %v2724_v0, %v2720_v44  ;;  %v1563_v2 = vmul.f32 %v12795_v24, %v12794_v51  ;;  %v12804_v49 = vld [vmem:[#allocation39_spill] sm:$0xff]  ;;  %v12808_v9 = vld [vmem:[#allocation228_spill] sm:$0xff] }
 0xc2a   :  { %v1547_v12 = vsel %vm1544_vm3, %v1546_v42, %v1542_v39  ;;  %v10147_v54 = vmul.f32 %v2725_v23, %v12796_v36  ;;  %v1560_v10 = vor.u32 1.1754944e-38, %v1559_v46  ;;  %vm1567_vm6 = vweird.f32 %v12794_v51  ;;  %v12810_v39 = vld [vmem:[#allocation189_spill] sm:$0xff] }
 0xc2b   :  { %v1556_v1 = vsel %vm1555_vm14, %v12791_v53, %v1552_v18  ;;  %vm1558_vm2 = vcmp.eq.f32.partialorder %v1557_v43, 8.507059e+37  ;;  %v1564_v32 = vsub.f32 1.0, %v1563_v2  ;;  %v1571_v27 = vand.u32 2147483647, %v12794_v51  ;;  %v12812_v2 = vld [vmem:[#allocation18_spill] sm:$0xff] }
 0xc2c   :  { %v1573_v17 = vand.u32 2147483648, %v12794_v51  ;;  %v2747_v40 = vsel %vm2508_vm7, %v10147_v54, 0.0  ;;  %v1561_v62 = vsel %vm1558_vm2, %v1560_v10, %v1556_v1  ;;  %v1588_v59 = vmul.f32 %v9957_v22, %v1547_v12 }
 0xc2d   :  { %v2848_v34 = vmul.f32 %v12798_v16, %v12797_v26  ;;  %2748 = vadd.xlane.f32.xlu2 %v2747_v40  ;;  %v1565_v28 = vmul.f32 %v12795_v24, %v1564_v32  ;;  %vm1568_vm5 = vweird.f32 %v12795_v24  ;;  %vm10160_vm10 = vcmp.eq.f32.partialorder %v1571_v27, 8.507059e+37  ;;  %v12815_v32 = vld [vmem:[#allocation15_spill] sm:$0xff]  ;;  %v12816_v27 = vld [vmem:[#allocation190_spill] sm:$0xff] }
 0xc2e   :  { %v1589_v3 = vmul.f32 %v9961_v47, %v1561_v62  ;;  %v1574_v38 = vor.u32 1.1754944e-38, %v1573_v17  ;;  %v1606_v52 = vsel %vm728_vm11, %v1588_v59, 0.0  ;;  %vm2852_vm15 = vweird.f32 %v12797_v26  ;;  %vm1569_vm12 = vmor %vm1567_vm6, %vm1568_vm5 }
 0xc2f   :  { %v2849_v35 = vsub.f32 1.0, %v2848_v34  ;;  %v1566_v22 = vadd.f32 %v12795_v24, %v1565_v28  ;;  %vm2853_vm0 = vweird.f32 %v12798_v16  ;;  %v2858_v30 = vand.u32 2147483648, %v12797_v26 }
 0xc30   :  { %v1607_v20 = vsel %vm728_vm11, %v1589_v3, 0.0  ;;  %v2856_v37 = vand.u32 2147483647, %v12797_v26  ;;  %v12802_v48 = vsub.f32 1.0, %v12801_v55  ;;  %v2864_v58 = vmul.f32 %v12804_v49, %v10028_v15  ;;  %vm2854_vm13 = vmor %vm2852_vm15, %vm2853_vm0  ;;  %v12818_v3 = vld [vmem:[#allocation221_spill] sm:$0xff] }
 0xc31   :  { %v1608_v14 = vadd.f32 %v1607_v20, %v1606_v52  ;;  %v2850_v47 = vmul.f32 %v12798_v16, %v2849_v35  ;;  %v1570_v57 = vsel %vm1569_vm12, %v12795_v24, %v1566_v22  ;;  %v2859_v0 = vor.u32 1.1754944e-38, %v2858_v30 }
 0xc32   :  { %v1809_v4 = vmul.f32 %v12803_v19, %v12802_v48  ;;  %vm1811_vm9 = vweird.f32 %v12805_v31  ;;  %v1575_v56 = vsel %vm10160_vm10, %v1574_v38, %v1570_v57  ;;  %vm1812_vm1 = vweird.f32 %v12803_v19  ;;  %v12821_v48 = vld [vmem:[#allocation191_spill] sm:$0xff] }
 0xc33   :  { %v2851_v50 = vadd.f32 %v12798_v16, %v2850_v47  ;;  %v1590_v45 = vmul.f32 %v9967_v13, %v1575_v56  ;;  %vm10190_vm3 = vmor %vm1811_vm9, %vm1812_vm1  ;;  %v1815_v15 = vand.u32 2147483647, %v12805_v31  ;;  %v1817_v53 = vand.u32 2147483648, %v12805_v31  ;;  %v12822_v31 = vld [vmem:[#allocation49_spill] sm:$0xff] }
 0xc34   :  { %v1810_v5 = vadd.f32 %v12803_v19, %v1809_v4  ;;  %v12809_v41 = vsub.f32 1.0, %v12808_v9  ;;  %vm2857_vm4 = vcmp.eq.f32.partialorder %v2856_v37, 8.507059e+37  ;;  %vm1826_vm14 = vweird.f32 %v12810_v39  ;;  %v12819_v37 = vld [vmem:[#allocation232_spill] sm:$0xff]  ;;  %v12825_v9 = vld [vmem:[#allocation233_spill] sm:$0xff] }
 0xc35   :  { %v2855_v44 = vsel %vm2854_vm13, %v12798_v16, %v2851_v50  ;;  %v1609_v13 = vsel %vm732_vm8, %v1590_v45, 0.0  ;;  %v1818_v46 = vor.u32 1.1754944e-38, %v1817_v53  ;;  %vm1825_vm6 = vweird.f32 %v12811_v60 }
 0xc36   :  { %v1823_v42 = vmul.f32 %v12810_v39, %v12809_v41  ;;  %v1814_v18 = vsel %vm10190_vm3, %v12803_v19, %v1810_v5  ;;  %v2860_v43 = vsel %vm2857_vm4, %v2859_v0, %v2855_v44  ;;  %v1610_v23 = vadd.f32 %v1609_v13, %v1608_v14  ;;  %vm10212_vm5 = vmor %vm1825_vm6, %vm1826_vm14  ;;  %v12828_v13 = vld [vmem:[#allocation53_spill] sm:$0xff] }
 0xc37   :  { %v2865_v12 = vmul.f32 %v2864_v58, %v2860_v43  ;;  %v1829_v24 = vand.u32 2147483647, %v12811_v60  ;;  %v10210_v36 = vmul.f32 %v12812_v2, %v9800_v8  ;;  %vm1816_vm2 = vcmp.eq.f32.partialorder %v1815_v15, 8.507059e+37  ;;  %v12856_v2 = vld [vmem:[#allocation71_spill] sm:$0xff] }
 0xc38   :  { %v1824_v51 = vadd.f32 %v12810_v39, %v1823_v42  ;;  %v1831_v10 = vand.u32 2147483648, %v12811_v60  ;;  %v1835_v17 = vmul.f32 %v12816_v27, %v12815_v32  ;;  %1611 = vadd.xlane.f32.xlu1 %v1610_v23  ;;  %v1819_v62 = vsel %vm1816_vm2, %v1818_v46, %v1814_v18 }
 0xc39   :  { %v2877_v40 = vsel %vm2508_vm7, %v2865_v12, 0.0  ;;  %vm1839_vm10 = vweird.f32 %v12815_v32  ;;  %vm1830_vm15 = vcmp.eq.f32.partialorder %v1829_v24, 8.507059e+37  ;;  %v1843_v16 = vand.u32 2147483647, %v12815_v32  ;;  %v12829_v12 = vld [vmem:[#allocation47_spill] sm:$0xff] }
 0xc3a   :  { %v1828_v59 = vsel %vm10212_vm5, %v12810_v39, %v1824_v51  ;;  %2878 = vadd.xlane.f32.xlu2 %v2877_v40  ;;  %v1832_v8 = vor.u32 1.1754944e-38, %v1831_v10  ;;  %v1836_v26 = vsub.f32 1.0, %v1835_v17  ;;  %vm1840_vm0 = vweird.f32 %v12816_v27  ;;  %v12827_v39 = vld [vmem:[#allocation192_spill] sm:$0xff]  ;;  %v12832_v10 = vld [vmem:[#allocation22_spill] sm:$0xff]  ;;  %v12833_v17 = vld [vmem:[#allocation57_spill] sm:$0xff] }
 0xc3b   :  { %v1845_v34 = vand.u32 2147483648, %v12815_v32  ;;  %v1860_v28 = vmul.f32 %v10021_v7, %v1819_v62  ;;  %v3070_v38 = vmul.f32 %v12818_v3, %v12817_v33  ;;  %vm3074_vm12 = vweird.f32 %v12817_v33  ;;  %vm1841_vm1 = vmor %vm1839_vm10, %vm1840_vm0  ;;  %v12834_v40 = vld [vmem:[#allocation193_spill] sm:$0xff] }
 0xc3c   :  { %v1833_v52 = vsel %vm1830_vm15, %v1832_v8, %v1828_v59  ;;  %v1837_v35 = vmul.f32 %v12816_v27, %v1836_v26  ;;  %vm3075_vm9 = vweird.f32 %v12818_v3  ;;  %v3078_v14 = vand.u32 2147483647, %v12817_v33  ;;  %v12835_v59 = vld [vmem:[#allocation101_spill] sm:$0xff] }
 0xc3d   :  { %v1861_v22 = vmul.f32 %v10040_v6, %v1833_v52  ;;  %v1878_v20 = vsel %vm728_vm11, %v1860_v28, 0.0  ;;  %v3071_v30 = vsub.f32 1.0, %v3070_v38  ;;  %vm1844_vm13 = vcmp.eq.f32.partialorder %v1843_v16, 8.507059e+37  ;;  %vm3076_vm14 = vmor %vm3074_vm12, %vm3075_vm9  ;;  %v12837_v28 = vld [vmem:[#allocation63_spill] sm:$0xff] }
 0xc3e   :  { %v1838_v47 = vadd.f32 %v12816_v27, %v1837_v35  ;;  %v3080_v7 = vand.u32 2147483648, %v12817_v33  ;;  %v12820_v55 = vsub.f32 1.0, %v12819_v37  ;;  %v1846_v6 = vor.u32 1.1754944e-38, %v1845_v34  ;;  %v12836_v34 = vld [vmem:[#allocation104_spill] sm:$0xff]  ;;  %v12838_v35 = vld [vmem:[#allocation95_spill] sm:$0xff] }
 0xc3f   :  { %v1879_v4 = vsel %vm728_vm11, %v1861_v22, 0.0  ;;  %v3072_v57 = vmul.f32 %v12818_v3, %v3071_v30  ;;  %vm2099_vm3 = vweird.f32 %v12821_v48  ;;  %vm2098_vm4 = vweird.f32 %v12822_v31  ;;  %v12839_v22 = vld [vmem:[#allocation201_spill] sm:$0xff]  ;;  %v12840_v37 = vld [vmem:[#allocation80_spill] sm:$0xff] }
 0xc40   :  { %v2096_v19 = vmul.f32 %v12821_v48, %v12820_v55  ;;  %v1842_v0 = vsel %vm1841_vm1, %v12816_v27, %v1838_v47  ;;  %v1880_v49 = vadd.f32 %v1879_v4, %v1878_v20  ;;  %vm3079_vm6 = vcmp.eq.f32.partialorder %v3078_v14, 8.507059e+37  ;;  %vm10258_vm2 = vmor %vm2098_vm4, %vm2099_vm3 }
 0xc41   :  { %v1847_v56 = vsel %vm1844_vm13, %v1846_v6, %v1842_v0  ;;  %v3073_v50 = vadd.f32 %v12818_v3, %v3072_v57  ;;  %v2104_v5 = vand.u32 2147483648, %v12822_v31  ;;  %v3081_v63 = vor.u32 1.1754944e-38, %v3080_v7  ;;  %v12843_v6 = vld [vmem:[#allocation66_spill] sm:$0xff]  ;;  %v12844_v57 = vld [vmem:[#allocation56_spill] sm:$0xff]  ;;  %v12845_v0 = vld [vmem:[#allocation19_spill] sm:$0xff] }
 0xc42   :  { %v2097_v58 = vadd.f32 %v12821_v48, %v2096_v19  ;;  %v1862_v45 = vmul.f32 %v10138_v29, %v1847_v56  ;;  %v2102_v53 = vand.u32 2147483647, %v12822_v31  ;;  %v12826_v41 = vsub.f32 1.0, %v12825_v9  ;;  %v12842_v19 = vld [vmem:[#allocation137_spill] sm:$0xff]  ;;  %v12848_v9 = vld [vmem:[#allocation64_spill] sm:$0xff] }
 0xc43   :  { %v3077_v44 = vsel %vm3076_vm14, %v12818_v3, %v3073_v50  ;;  %vm2112_vm5 = vweird.f32 %v12828_v13  ;;  %vm2113_vm10 = vweird.f32 %v12827_v39  ;;  %v2116_v60 = vand.u32 2147483647, %v12828_v13  ;;  %v12846_v50 = vld [vmem:[#allocation65_spill] sm:$0xff] }
 0xc44   :  { %v2110_v42 = vmul.f32 %v12827_v39, %v12826_v41  ;;  %v2101_v18 = vsel %vm10258_vm2, %v12821_v48, %v2097_v58  ;;  %v1881_v29 = vsel %vm732_vm8, %v1862_v45, 0.0  ;;  %v3082_v43 = vsel %vm3079_vm6, %v3081_v63, %v3077_v44  ;;  %vm10278_vm15 = vmor %vm2112_vm5, %vm2113_vm10 }
 0xc45   :  { %v1882_v23 = vadd.f32 %v1881_v29, %v1880_v49  ;;  %v10276_v51 = vmul.f32 %v3082_v43, %v12829_v12  ;;  %v2105_v24 = vor.u32 1.1754944e-38, %v2104_v5  ;;  %v2118_v1 = vand.u32 2147483648, %v12828_v13  ;;  %v12853_v43 = vld [vmem:[#allocation59_spill] sm:$0xff] }
 0xc46   :  { %v2111_v46 = vadd.f32 %v12827_v39, %v2110_v42  ;;  %v2145_v32 = vmul.f32 %v12832_v10, %v9803_v11  ;;  %vm2103_vm0 = vcmp.eq.f32.partialorder %v2102_v53, 8.507059e+37  ;;  %v2122_v62 = vmul.f32 %v12834_v40, %v12833_v17  ;;  %v12847_v53 = vld [vmem:[#allocation114_spill] sm:$0xff]  ;;  %v12850_v42 = vld [vmem:[#allocation77_spill] sm:$0xff] }
 0xc47   :  { %5931 = vrcp.f32 %v12835_v59  ;;  %1883 = vadd.xlane.f32.xlu1 %v1882_v23  ;;  %v3104_v8 = vsel %vm2508_vm7, %v10276_v51, 0.0  ;;  %v2106_v26 = vsel %vm2103_vm0, %v2105_v24, %v2101_v18  ;;  %v2119_v16 = vor.u32 1.1754944e-38, %v2118_v1  ;;  %v12852_v18 = vld [vmem:[#allocation124_spill] sm:$0xff]  ;;  %v12857_v10 = vld [vmem:[#allocation145_spill] sm:$0xff] }
 0xc48   :  { %v2115_v27 = vsel %vm10278_vm15, %v12827_v39, %v2111_v46  ;;  %v10295_v33 = vadd.f32 %v12837_v28, %v12836_v34  ;;  %3105 = vadd.xlane.f32.xlu2 %v3104_v8  ;;  %vm2117_vm12 = vcmp.eq.f32.partialorder %v2116_v60, 8.507059e+37  ;;  %v2123_v11 = vsub.f32 1.0, %v2122_v62  ;;  %v12855_v60 = vld [vmem:[#allocation61_spill] sm:$0xff]  ;;  %v12859_v62 = vld [vmem:[#allocation79_spill] sm:$0xff] }
 0xc49   :  { %v2147_v3 = vmul.f32 %v10210_v36, %v2106_v26  ;;  %v2120_v38 = vsel %vm2117_vm12, %v2119_v16, %v2115_v27  ;;  %vm2127_vm9 = vweird.f32 %v12834_v40  ;;  %v2132_v52 = vand.u32 2147483648, %v12833_v17  ;;  %v12841_v36 = vld [vmem:[#allocation60_spill] sm:$0xff]  ;;  %v12858_v27 = vld [vmem:[#allocation143_spill] sm:$0xff] }
 0xc4a   :  { %v2729_v20 = vmul.f32 %v12839_v22, %v12838_v35  ;;  %v2124_v30 = vmul.f32 %v12834_v40, %v2123_v11  ;;  %v2130_v14 = vand.u32 2147483647, %v12833_v17  ;;  %v2148_v47 = vmul.f32 %v2145_v32, %v2120_v38 }
 0xc4b   :  { %v2165_v7 = vsel %vm728_vm11, %v2147_v3, 0.0  ;;  %v10307_v55 = vadd.f32 %v12840_v37, %v12836_v34  ;;  %v10311_v48 = vadd.f32 %v12841_v36, %v12836_v34  ;;  %v10315_v4 = vadd.f32 %v12843_v6, %v12842_v19  ;;  %v12860_v37 = vld [vmem:[#allocation29_spill] sm:$0xff] }
 0xc4c   :  { %5933 = vrcp.f32 %v12844_v57  ;;  %v2146_v49 = vmul.f32 %v12845_v0, %v9830_v25  ;;  %v2125_v58 = vadd.f32 %v12834_v40, %v2124_v30  ;;  %vm2126_vm13 = vweird.f32 %v12833_v17 }
 0xc4d   :  { %v2166_v31 = vsel %vm728_vm11, %v2148_v47, 0.0  ;;  %v5932_v56 = vpop.eup %5931  ;;  %v10325_v5 = vadd.f32 %v12846_v50, %v12836_v34  ;;  %vm2128_vm1 = vmor %vm2126_vm13, %vm2127_vm9  ;;  %v2133_v45 = vor.u32 1.1754944e-38, %v2132_v52  ;;  %v2730_v15 = vsub.f32 1.0, %v2729_v20 }
 0xc4e   :  { %v2167_v63 = vadd.f32 %v2166_v31, %v2165_v7  ;;  %v10331_v25 = vadd.f32 %v12847_v53, %v12836_v34  ;;  %v10335_v41 = vadd.f32 %v12848_v9, %v12842_v19  ;;  %v2129_v39 = vsel %vm2128_vm1, %v12834_v40, %v2125_v58 }
 0xc4f   :  { %vm2131_vm11 = vcmp.eq.f32.partialorder %v2130_v14, 8.507059e+37  ;;  %v10340_v44 = vadd.f32 %v12850_v42, %v12836_v34  ;;  %v10344_v13 = vadd.f32 %v12852_v18, %v12836_v34  ;;  %5935 = vrcp.f32 %v10311_v48 }
 0xc50   :  { %12849 = vst [vmem:[#allocation50_spill] sm:$0xff] %v10335_v41  ;;  %v2134_v29 = vsel %vm2131_vm11, %v2133_v45, %v2129_v39  ;;  %v10349_v46 = vadd.f32 %v12853_v43, %v12842_v19  ;;  %5937 = vrcp.f32 %v12855_v60  ;;  %v3321_v12 = vmul.f32 %v5932_v56, %v12835_v59 }
 0xc51   :  { %12851 = vst [vmem:[#allocation204_spill] sm:$0xff] %v10340_v44  ;;  %v2149_v23 = vmul.f32 %v2146_v49, %v2134_v29  ;;  %v10355_v1 = vadd.f32 %v12856_v2, %v12836_v34  ;;  %v10359_v32 = vadd.f32 %v12857_v10, %v12836_v34  ;;  %v10363_v17 = vadd.f32 %v12858_v27, %v12842_v19  ;;  %v12866_v10 = vld [vmem:[#allocation127_spill] sm:$0xff] }
 0xc52   :  { %12854 = vst [vmem:[#allocation206_spill] sm:$0xff] %v10349_v46  ;;  %v5934_v24 = vpop.eup %5933  ;;  %v2731_v40 = vmul.f32 %v12839_v22, %v2730_v15  ;;  %v10368_v8 = vadd.f32 %v12859_v62, %v12836_v34  ;;  %5939 = vrcp.f32 %v10331_v25  ;;  %v3322_v16 = vsub.f32 1.0, %v3321_v12 }
 0xc53   :  { %v2168_v26 = vsel %vm732_vm8, %v2149_v23, 0.0  ;;  %v2628_v11 = vsel %vm2508_vm7, %v9846_v61, 0.0  ;;  %vm2733_vm3 = vweird.f32 %v12838_v35  ;;  %v3329_v3 = vand.u32 2147483647, %v12835_v59 }
 0xc54   :  { %v2169_v28 = vadd.f32 %v2168_v26, %v2167_v63  ;;  %v3323_v38 = vmul.f32 %v5932_v56, %v3322_v16  ;;  %vm3326_vm4 = vweird.f32 %v5932_v56  ;;  %v3331_v52 = vand.u32 2147483648, %v12835_v59  ;;  %v12868_v16 = vld [vmem:[#allocation67_spill] sm:$0xff] }
 0xc55   :  { %v3337_v20 = vmul.f32 %v5934_v24, %v12844_v57  ;;  %v5936_v30 = vpop.eup %5935  ;;  %v2732_v14 = vadd.f32 %v12839_v22, %v2731_v40  ;;  %vm2734_vm8 = vweird.f32 %v12839_v22  ;;  %v2737_v47 = vand.u32 2147483647, %v12838_v35 }
 0xc56   :  { %2170 = vadd.xlane.f32.xlu1 %v2169_v28  ;;  %v2739_v61 = vand.u32 2147483648, %v12838_v35  ;;  %v10382_v7 = vpop.eup %5937  ;;  %v2745_v36 = vmul.f32 %v12860_v37, %v10147_v54  ;;  %v3324_v6 = vadd.f32 %v5932_v56, %v3323_v38  ;;  %vm3325_vm14 = vweird.f32 %v12835_v59  ;;  %vm10393_vm5 = vmor %vm2733_vm3, %vm2734_vm8 }
 0xc57   :  { %v3338_v0 = vsub.f32 1.0, %v3337_v20  ;;  %vm3327_vm6 = vmor %vm3325_vm14, %vm3326_vm4  ;;  %vm3330_vm2 = vcmp.eq.f32.partialorder %v3329_v3, 8.507059e+37  ;;  %v3332_v49 = vor.u32 1.1754944e-38, %v3331_v52  ;;  %v3345_v58 = vand.u32 2147483647, %v12844_v57 }
 0xc58   :  { %v3347_v31 = vand.u32 2147483648, %v12844_v57  ;;  %v10389_v50 = vpop.eup %5939  ;;  %v3328_v54 = vsel %vm3327_vm6, %v5932_v56, %v3324_v6  ;;  %vm3342_vm10 = vweird.f32 %v5934_v24  ;;  %v3424_v59 = vmul.f32 %v5936_v30, %v10311_v48  ;;  %v12864_v56 = vld [vmem:[#allocation58_spill] sm:$0xff] }
 0xc59   :  { %v3339_v63 = vmul.f32 %v5934_v24, %v3338_v0  ;;  %v2736_v15 = vsel %vm10393_vm5, %v12839_v22, %v2732_v14  ;;  %v3086_v53 = vmul.f32 %v10382_v7, %v12855_v60  ;;  %v3333_v9 = vsel %vm3330_vm2, %v3332_v49, %v3328_v54 }
 0xc5a   :  { %vm3341_vm15 = vweird.f32 %v12844_v57  ;;  %v10405_v35 = vmul.f32 %v3333_v9, %v10295_v33  ;;  %v3352_v42 = vadd.f32 %v12864_v56, %v12842_v19  ;;  %v3425_v18 = vsub.f32 1.0, %v3424_v59  ;;  %v12865_v33 = vld [vmem:[#allocation128_spill] sm:$0xff] }
 0xc5b   :  { %v3340_v39 = vadd.f32 %v5934_v24, %v3339_v63  ;;  %vm3343_vm0 = vmor %vm3341_vm15, %vm3342_vm10  ;;  %vm3346_vm12 = vcmp.eq.f32.partialorder %v3345_v58, 8.507059e+37  ;;  %v3348_v29 = vor.u32 1.1754944e-38, %v3347_v31  ;;  %vm3429_vm9 = vweird.f32 %v5936_v30  ;;  %v12871_v58 = vld [vmem:[#allocation82_spill] sm:$0xff] }
 0xc5c   :  { %12863 = vst [vmem:[#allocation207_spill] sm:$0xff] %v10405_v35  ;;  %v3434_v22 = vand.u32 2147483648, %v10311_v48  ;;  %v3353_v23 = vmul.f32 %v3352_v42, %v10405_v35  ;;  %v3426_v12 = vmul.f32 %v5936_v30, %v3425_v18  ;;  %v3432_v57 = vand.u32 2147483647, %v10311_v48 }
 0xc5d   :  { %v3344_v43 = vsel %vm3343_vm0, %v5934_v24, %v3340_v39  ;;  %v10414_v2 = vadd.f32 %v12865_v33, %v12836_v34  ;;  %v10418_v27 = vadd.f32 %v12866_v10, %v12842_v19  ;;  %v2740_v40 = vor.u32 1.1754944e-38, %v2739_v61  ;;  %v12878_v10 = vld [vmem:[#allocation74_spill] sm:$0xff] }
 0xc5e   :  { %2629 = vadd.xlane.f32.xlu1 %v2628_v11  ;;  %v3349_v62 = vsel %vm3346_vm12, %v3348_v29, %v3344_v43  ;;  %vm2738_vm13 = vcmp.eq.f32.partialorder %v2737_v47, 8.507059e+37  ;;  %v3427_v24 = vadd.f32 %v5936_v30, %v3426_v12  ;;  %vm3428_vm1 = vweird.f32 %v10311_v48  ;;  %v12869_v47 = vld [vmem:[#allocation132_spill] sm:$0xff]  ;;  %v12870_v48 = vld [vmem:[#allocation131_spill] sm:$0xff]  ;;  %v12876_v29 = vld [vmem:[#allocation138_spill] sm:$0xff] }
 0xc5f   :  { %v10420_v26 = vmul.f32 %v3353_v23, %v3349_v62  ;;  %v10425_v28 = vadd.f32 %v12868_v16, %v12836_v34  ;;  %v2741_v3 = vsel %vm2738_vm13, %v2740_v40, %v2736_v15  ;;  %vm3430_vm11 = vmor %vm3428_vm1, %vm3429_vm9  ;;  %v3435_v38 = vor.u32 1.1754944e-38, %v3434_v22  ;;  %v736_v6 = vpop.xlane.xlu1 %735  ;;  %v12877_v23 = vld [vmem:[#allocation135_spill] sm:$0xff] }
 0xc60   :  { %v3527_v52 = vmul.f32 %v10389_v50, %v10331_v25  ;;  %v2746_v11 = vmul.f32 %v2745_v36, %v2741_v3  ;;  %v3087_v20 = vsub.f32 1.0, %v3086_v53  ;;  %v3431_v14 = vsel %vm3430_vm11, %v5936_v30, %v3427_v24  ;;  %v12872_v36 = vld [vmem:[#allocation152_spill] sm:$0xff]  ;;  %v12874_v53 = vld [vmem:[#allocation150_spill] sm:$0xff]  ;;  %v12879_v3 = vld [vmem:[#allocation151_spill] sm:$0xff] }
 0xc61   :  { %12867 = vst [vmem:[#allocation8_spill] sm:$0xff] %v10420_v26  ;;  %vm3433_vm3 = vcmp.eq.f32.partialorder %v3432_v57, 8.507059e+37  ;;  %v10432_v61 = vadd.f32 %v12869_v47, %v12836_v34  ;;  %v10436_v37 = vadd.f32 %v12870_v48, %v12842_v19  ;;  %v10440_v31 = vadd.f32 %v12871_v58, %v12836_v34  ;;  %v12882_v48 = vld [vmem:[#allocation75_spill] sm:$0xff]  ;;  %v5193_v26 = vpop.f32.mrf.mxu1 }
 0xc62   :  { %v3436_v0 = vsel %vm3433_vm3, %v3435_v38, %v3431_v14  ;;  %v3528_v49 = vsub.f32 1.0, %v3527_v52  ;;  %v10444_v45 = vadd.f32 %v12872_v36, %v12836_v34  ;;  %v737_v30 = vrot.slane %v736_v6, 4  ;;  %v12881_v14 = vld [vmem:[#allocation148_spill] sm:$0xff] }
 0xc63   :  { %v10447_v54 = vmul.f32 %v3436_v0, %v10307_v55  ;;  %vm3532_vm4 = vweird.f32 %v10389_v50  ;;  %v3535_v59 = vand.u32 2147483647, %v10331_v25  ;;  %v3537_v15 = vand.u32 2147483648, %v10331_v25  ;;  %v12875_v55 = vld [vmem:[#allocation72_spill] sm:$0xff] }
 0xc64   :  { %v3529_v63 = vmul.f32 %v10389_v50, %v3528_v49  ;;  %v10455_v9 = vadd.f32 %v12874_v53, %v12842_v19  ;;  %v2758_v39 = vsel %vm2508_vm7, %v2746_v11, 0.0  ;;  %v3088_v56 = vmul.f32 %v10382_v7, %v3087_v20  ;;  %v12883_v0 = vld [vmem:[#allocation144_spill] sm:$0xff] }
 0xc65   :  { %12873 = vst [vmem:[#allocation14_spill] sm:$0xff] %v10447_v54  ;;  %v738_v42 = vadd.f32 %v737_v30, %v736_v6  ;;  %v10461_v18 = vadd.f32 %v12875_v55, %v12836_v34  ;;  %v10465_v22 = vadd.f32 %v12876_v29, %v12836_v34  ;;  %vm3531_vm8 = vweird.f32 %v10331_v25  ;;  %v12886_v30 = vld [vmem:[#allocation52_spill] sm:$0xff] }
 0xc66   :  { %2759 = vadd.xlane.f32.xlu1 %v2758_v39  ;;  %v3530_v43 = vadd.f32 %v10389_v50, %v3529_v63  ;;  %v10471_v12 = vadd.f32 %v12877_v23, %v12842_v19  ;;  %5941 = vrcp.f32 %v10359_v32  ;;  %vm3533_vm14 = vmor %vm3531_vm8, %vm3532_vm4  ;;  %v3538_v33 = vor.u32 1.1754944e-38, %v3537_v15  ;;  %v12887_v53 = vld [vmem:[#allocation140_spill] sm:$0xff]  ;;  %v12895_v23 = vld [vmem:[#allocation117_spill] sm:$0xff] }
 0xc67   :  { %v739_v57 = vrot.slane %v738_v42, 2  ;;  %v10478_v40 = vadd.f32 %v12878_v10, %v12836_v34  ;;  %5943 = vrcp.f32 %v10315_v4  ;;  %vm3536_vm6 = vcmp.eq.f32.partialorder %v3535_v59, 8.507059e+37 }
 0xc68   :  { %v3534_v62 = vsel %vm3533_vm14, %v10389_v50, %v3530_v43  ;;  %v3089_v25 = vadd.f32 %v10382_v7, %v3088_v56  ;;  %vm3091_vm2 = vweird.f32 %v10382_v7  ;;  %v10486_v38 = vadd.f32 %v12879_v3, %v12836_v34  ;;  %v12888_v56 = vld [vmem:[#allocation103_spill] sm:$0xff] }
 0xc69   :  { %v740_v24 = vadd.f32 %v739_v57, %v738_v42  ;;  %v3539_v16 = vsel %vm3536_vm6, %v3538_v33, %v3534_v62  ;;  %5945 = vrcp.f32 %v10335_v41  ;;  %v3096_v52 = vand.u32 2147483648, %v12855_v60 }
 0xc6a   :  { %v10491_v11 = vmul.f32 %v3539_v16, %v10325_v5  ;;  %5947 = vrcp.f32 %v10344_v13  ;;  %vm3090_vm5 = vweird.f32 %v12855_v60  ;;  %v3094_v50 = vand.u32 2147483647, %v12855_v60 }
 0xc6b   :  { %v741_v20 = vrot.slane %v740_v24, 1  ;;  %v10498_v47 = vadd.f32 %v12881_v14, %v12842_v19  ;;  %v10502_v6 = vadd.f32 %v12882_v48, %v12836_v34  ;;  %v10506_v49 = vadd.f32 %v12883_v0, %v12836_v34  ;;  %vm10511_vm10 = vmor %vm3090_vm5, %vm3091_vm2  ;;  %v12900_v14 = vld [vmem:[#allocation86_spill] sm:$0xff]  ;;  %v1310_v0 = vpop.xlane.xlu0 %1309 }
 0xc6c   :  { %12880 = vst [vmem:[#allocation91_spill] sm:$0xff] %v10491_v11  ;;  %5949 = vrcp.f32 %v10349_v46  ;;  %v10515_v60 = vpop.eup %5941  ;;  %v2985_v58 = vsel %vm2508_vm7, %v9849_v21, 0.0  ;;  %v3093_v36 = vsel %vm10511_vm10, %v10382_v7, %v3089_v25  ;;  %v3102_v63 = vmul.f32 %v12886_v30, %v10276_v51  ;;  %v12890_v7 = vld [vmem:[#allocation85_spill] sm:$0xff]  ;;  %v12892_v51 = vld [vmem:[#allocation98_spill] sm:$0xff] }
 0xc6d   :  { %v742_v59 = vadd.f32 %v741_v20, %v740_v24  ;;  %v10524_v15 = vpop.eup %5943  ;;  %v10528_v39 = vadd.f32 %v12887_v53, %v12842_v19  ;;  %v10532_v42 = vadd.f32 %v12888_v56, %v12836_v34  ;;  %5951 = vrcp.f32 %v10363_v17  ;;  %v1023_v10 = vpop.xlane.xlu1 %1022  ;;  %v12897_v24 = vld [vmem:[#allocation109_spill] sm:$0xff] }
 0xc6e   :  { %2986 = vadd.xlane.f32.xlu1 %v2985_v58  ;;  %v3097_v21 = vor.u32 1.1754944e-38, %v3096_v52  ;;  %v10537_v55 = vadd.f32 %v12890_v7, %v12836_v34  ;;  %v10541_v29 = vadd.f32 %v12892_v51, %v12842_v19  ;;  %5953 = vrcp.f32 %v10414_v2  ;;  %v751_v52 = vpop.xlane.xlu2 %750 }
 0xc6f   :  { %12889 = vst [vmem:[#allocation211_spill] sm:$0xff] %v10532_v42  ;;  %vm3095_vm15 = vcmp.eq.f32.partialorder %v3094_v50, 8.507059e+37  ;;  %v10544_v43 = vpop.eup %5945  ;;  %v10548_v57 = vadd.f32 %v12895_v23, %v12836_v34  ;;  %5955 = vrcp.f32 %v10418_v27  ;;  %v3733_v62 = vmul.f32 %v10515_v60, %v10359_v32 }
 0xc70   :  { %12891 = vst [vmem:[#allocation134_spill] sm:$0xff] %v10537_v55  ;;  %v3098_v33 = vsel %vm3095_vm15, %v3097_v21, %v3093_v36  ;;  %v10553_v25 = vpop.eup %5947  ;;  %v10557_v16 = vadd.f32 %v12897_v24, %v12836_v34  ;;  %5957 = vrcp.f32 %v10432_v61  ;;  %v1024_v50 = vrot.slane %v1023_v10, 4  ;;  %v12901_v36 = vld [vmem:[#allocation123_spill] sm:$0xff] }
 0xc71   :  { %12893 = vst [vmem:[#allocation147_spill] sm:$0xff] %v10541_v29  ;;  %v3103_v3 = vmul.f32 %v3102_v63, %v3098_v33  ;;  %v10564_v48 = vadd.f32 %v12900_v14, %v12842_v19  ;;  %5959 = vrcp.f32 %v10436_v37  ;;  %v752_v5 = vrot.slane %v751_v52, 4 }
 0xc72   :  { %5700 = vpush %v742_v59  ;;  %v10560_v20 = vpop.eup %5949  ;;  %v3734_v58 = vsub.f32 1.0, %v3733_v62  ;;  %v10569_v30 = vadd.f32 %v12901_v36, %v12842_v19  ;;  %v12902_v59 = vld [vmem:[#allocation112_spill] sm:$0xff]  ;;  %5961 = vrcp.f32 %v10444_v45  ;;  %v1025_v53 = vadd.f32 %v1024_v50, %v1023_v10  ;;  %v10587_v10 = vpop.f32.mrf.mxu3 }
 0xc73   :  { %12894 = vst [vmem:[#allocation141_spill] sm:$0xff] %v10544_v43  ;;  %v10573_v63 = vadd.f32 %v12902_v59, %v12842_v19  ;;  %v10576_v56 = vpop.eup %5951  ;;  %5963 = vrcp.f32 %v10455_v9  ;;  %v753_v21 = vadd.f32 %v752_v5, %v751_v52  ;;  %vm3738_vm0 = vweird.f32 %v10515_v60 }
 0xc74   :  { %12896 = vst [vmem:[#allocation23_spill] sm:$0xff] %v10548_v57  ;;  %v3735_v7 = vmul.f32 %v10515_v60, %v3734_v58  ;;  %v10581_v51 = vpop.eup %5953  ;;  %5965 = vrcp.f32 %v10465_v22  ;;  %v3115_v23 = vsel %vm2508_vm7, %v3103_v3, 0.0  ;;  %v1311_v33 = vrot.slane %v1310_v0, 4  ;;  %v12903_v58 = vld [vmem:[#allocation125_spill] sm:$0xff]  ;;  %v12906_v57 = vld [vmem:[#allocation119_spill] sm:$0xff] }
 0xc75   :  { %12898 = vst [vmem:[#allocation45_spill] sm:$0xff] %v10557_v16  ;;  %v1026_v62 = vrot.slane %v1025_v53, 2  ;;  %v10585_v24 = vpop.eup %5955  ;;  %v754_v50 = vrot.slane %v753_v21, 2  ;;  %vm3737_vm12 = vweird.f32 %v10359_v32  ;;  %v3741_v14 = vand.u32 2147483647, %v10359_v32 }
 0xc76   :  { %12899 = vst [vmem:[#allocation213_spill] sm:$0xff] %v10560_v20  ;;  %3116 = vadd.xlane.f32.xlu1 %v3115_v23  ;;  %v3736_v52 = vadd.f32 %v10515_v60, %v3735_v7  ;;  %v10592_v5 = vpop.eup %5957  ;;  %v10596_v36 = vadd.f32 %v12903_v58, %v12842_v19  ;;  %5967 = vrcp.f32 %v10471_v12  ;;  %vm10601_vm7 = vmor %vm3737_vm12, %vm3738_vm0  ;;  %v3743_v7 = vand.u32 2147483648, %v10359_v32  ;;  %v12908_v32 = vld [vmem:[#allocation69_spill] sm:$0xff] }
 0xc77   :  { %v1027_v3 = vadd.f32 %v1026_v62, %v1025_v53  ;;  %v10606_v23 = vpop.eup %5959  ;;  %5969 = vrcp.f32 %v10486_v38  ;;  %v755_v35 = vadd.f32 %v754_v50, %v753_v21  ;;  %v3749_v53 = vmul.f32 %v10576_v56, %v10363_v17 }
 0xc78   :  { %v3740_v58 = vsel %vm10601_vm7, %v10515_v60, %v3736_v52  ;;  %v10614_v62 = vpop.eup %5961  ;;  %5971 = vrcp.f32 %v10498_v47  ;;  %v3744_v44 = vor.u32 1.1754944e-38, %v3743_v7  ;;  %v1312_v20 = vadd.f32 %v1311_v33, %v1310_v0 }
 0xc79   :  { %v1028_v42 = vrot.slane %v1027_v3, 1  ;;  %v10619_v11 = vpop.eup %5963  ;;  %v756_v21 = vrot.slane %v755_v35, 1  ;;  %vm3742_vm9 = vcmp.eq.f32.partialorder %v3741_v14, 8.507059e+37  ;;  %v3750_v50 = vsub.f32 1.0, %v3749_v53  ;;  %v12909_v53 = vld [vmem:[#allocation108_spill] sm:$0xff] }
 0xc7a   :  { %v10621_v59 = vpop.eup %5965  ;;  %5973 = vrcp.f32 %v10506_v49  ;;  %v10624_v60 = vmul.f32 %v5193_v26, %v5193_v26  ;;  %v3745_v46 = vsel %vm3742_vm9, %v3744_v44, %v3740_v58  ;;  %v3759_v7 = vand.u32 2147483648, %v10363_v17 }
 0xc7b   :  { %v1029_v52 = vadd.f32 %v1028_v42, %v1027_v3  ;;  %v757_v54 = vadd.f32 %v756_v21, %v755_v35  ;;  %v10627_v43 = vmul.f32 %v3745_v46, %v10355_v1  ;;  %v3764_v0 = vadd.f32 %v12908_v32, %v12842_v19  ;;  %v10641_v46 = vpop.f32.mrf.mxu2 }
 0xc7c   :  { %v10632_v33 = vpop.eup %5967  ;;  %5975 = vrcp.f32 %v10528_v39  ;;  %v3751_v14 = vmul.f32 %v10576_v56, %v3750_v50  ;;  %vm3754_vm13 = vweird.f32 %v10576_v56  ;;  %v3757_v42 = vand.u32 2147483647, %v10363_v17 }
 0xc7d   :  { %12907 = vst [vmem:[#allocation215_spill] sm:$0xff] %v10627_v43  ;;  %v10638_v44 = vpop.eup %5969  ;;  %5977 = vrcp.f32 %v10537_v55  ;;  %v1313_v1 = vrot.slane %v1312_v20, 2  ;;  %v3765_v35 = vmul.f32 %v3764_v0, %v10627_v43  ;;  %v3836_v3 = vmul.f32 %v10581_v51, %v10414_v2 }
 0xc7e   :  { %5702 = vpush %v757_v54  ;;  %v10646_v58 = vpop.eup %5971  ;;  %5979 = vrcp.f32 %v10541_v29  ;;  %v10650_v32 = vmul.f32 %v5193_v26, %v12909_v53  ;;  %v3752_v21 = vadd.f32 %v10576_v56, %v3751_v14  ;;  %vm3753_vm1 = vweird.f32 %v10363_v17 }
 0xc7f   :  { %5704 = vpush %v1029_v52  ;;  %5981 = vrcp.f32 %v10557_v16  ;;  %vm3755_vm11 = vmor %vm3753_vm1, %vm3754_vm13  ;;  %v3760_v54 = vor.u32 1.1754944e-38, %v3759_v7  ;;  %v3837_v50 = vsub.f32 1.0, %v3836_v3  ;;  %v3844_v0 = vand.u32 2147483647, %v10414_v2 }
 0xc80   :  { %v10658_v43 = vpop.eup %5973  ;;  %v3756_v29 = vsel %vm3755_vm11, %v10576_v56, %v3752_v21  ;;  %vm3758_vm3 = vcmp.eq.f32.partialorder %v3757_v42, 8.507059e+37  ;;  %v3846_v26 = vand.u32 2147483648, %v10414_v2  ;;  %v3852_v52 = vmul.f32 %v10585_v24, %v10418_v27 }
 0xc81   :  { %v10664_v17 = vadd.f32 %v1313_v1, %v1312_v20  ;;  %v3761_v14 = vsel %vm3758_vm3, %v3760_v54, %v3756_v29  ;;  %v3838_v53 = vmul.f32 %v10581_v51, %v3837_v50  ;;  %vm3841_vm4 = vweird.f32 %v10581_v51 }
 0xc82   :  { %v10668_v7 = vpop.eup %5975  ;;  %v10670_v3 = vmul.f32 %v3765_v35, %v3761_v14  ;;  %vm3840_vm8 = vweird.f32 %v10414_v2  ;;  %v3853_v56 = vsub.f32 1.0, %v3852_v52  ;;  %vm3856_vm14 = vweird.f32 %v10418_v27 }
 0xc83   :  { %v10674_v42 = vpop.eup %5977  ;;  %v3839_v21 = vadd.f32 %v10581_v51, %v3838_v53  ;;  %vm10677_vm6 = vcmp.eq.f32.partialorder %v3844_v0, 8.507059e+37  ;;  %v3860_v29 = vand.u32 2147483647, %v10418_v27  ;;  %v3862_v1 = vand.u32 2147483648, %v10418_v27  ;;  %vm3842_vm2 = vmor %vm3840_vm8, %vm3841_vm4  ;;  %v1038_v0 = vpop.xlane.xlu1 %1037  ;;  %v12921_v53 = vld [vmem:[#allocation115_spill] sm:$0xff] }
 0xc84   :  { %12910 = vst [vmem:[#allocation34_spill] sm:$0xff] %v10670_v3  ;;  %v10683_v54 = vpop.eup %5979  ;;  %v3847_v35 = vor.u32 1.1754944e-38, %v3846_v26  ;;  %v3854_v2 = vmul.f32 %v10585_v24, %v3853_v56  ;;  %vm3857_vm5 = vweird.f32 %v10585_v24  ;;  %v4061_v50 = vmul.f32 %v10592_v5, %v10432_v61  ;;  %v10701_v41 = vpop.f32.mrf.mxu2 }
 0xc85   :  { %12911 = vst [vmem:[#allocation181_spill] sm:$0xff] %v10674_v42  ;;  %v10689_v52 = vpop.eup %5981  ;;  %v3843_v14 = vsel %vm3842_vm2, %v10581_v51, %v3839_v21  ;;  %vm10692_vm10 = vcmp.eq.f32.partialorder %v3860_v29, 8.507059e+37  ;;  %v3863_v3 = vor.u32 1.1754944e-38, %v3862_v1  ;;  %v1039_v16 = vrot.slane %v1038_v0, 4  ;;  %vm3858_vm15 = vmor %vm3856_vm14, %vm3857_vm5 }
 0xc86   :  { %12914 = vst [vmem:[#allocation182_spill] sm:$0xff] %v10683_v54  ;;  %v12918_v54 = vld [vmem:[#allocation68_spill] sm:$0xff]  ;;  %v3848_v56 = vsel %vm10677_vm6, %v3847_v35, %v3843_v14  ;;  %v3855_v42 = vadd.f32 %v10585_v24, %v3854_v2  ;;  %v4062_v55 = vsub.f32 1.0, %v4061_v50  ;;  %vm4066_vm0 = vweird.f32 %v10592_v5 }
 0xc87   :  { %12915 = vst [vmem:[#allocation89_spill] sm:$0xff] %v10689_v52  ;;  %v3867_v26 = vadd.f32 %v12918_v54, %v12842_v19  ;;  %v10704_v52 = vmul.f32 %v3848_v56, %v10368_v8  ;;  %v4069_v51 = vand.u32 2147483647, %v10432_v61  ;;  %v4071_v21 = vand.u32 2147483648, %v10432_v61 }
 0xc88   :  { %v1040_v29 = vadd.f32 %v1039_v16, %v1038_v0  ;;  %v3859_v20 = vsel %vm3858_vm15, %v10585_v24, %v3855_v42  ;;  %v4063_v1 = vmul.f32 %v10592_v5, %v4062_v55  ;;  %v4077_v54 = vmul.f32 %v10606_v23, %v10436_v37 }
 0xc89   :  { %12919 = vst [vmem:[#allocation197_spill] sm:$0xff] %v10704_v52  ;;  %v1315_v8 = vrot.slane %v10664_v17, 1  ;;  %v3864_v27 = vsel %vm10692_vm10, %v3863_v3, %v3859_v20  ;;  %v3868_v35 = vmul.f32 %v3867_v26, %v10704_v52  ;;  %vm4065_vm12 = vweird.f32 %v10432_v61 }
 0xc8a   :  { %v1041_v2 = vrot.slane %v1040_v29, 2  ;;  %v4064_v50 = vadd.f32 %v10592_v5, %v4063_v1  ;;  %vm4070_vm7 = vcmp.eq.f32.partialorder %v4069_v51, 8.507059e+37  ;;  %v4078_v16 = vsub.f32 1.0, %v4077_v54  ;;  %vm4067_vm9 = vmor %vm4065_vm12, %vm4066_vm0 }
 0xc8b   :  { %v10721_v24 = vmul.f32 %v3868_v35, %v3864_v27  ;;  %v4072_v55 = vor.u32 1.1754944e-38, %v4071_v21  ;;  %vm4082_vm13 = vweird.f32 %v10606_v23  ;;  %v4085_v42 = vand.u32 2147483647, %v10436_v37 }
 0xc8c   :  { %v1042_v3 = vadd.f32 %v1041_v2, %v1040_v29  ;;  %v4068_v0 = vsel %vm4067_vm9, %v10592_v5, %v4064_v50  ;;  %v4079_v61 = vmul.f32 %v10606_v23, %v4078_v16  ;;  %v4087_v14 = vand.u32 2147483648, %v10436_v37  ;;  %v12923_v5 = vld [vmem:[#allocation81_spill] sm:$0xff]  ;;  %v10748_v50 = vpop.f32.mrf.mxu2 }
 0xc8d   :  { %12920 = vst [vmem:[#allocation212_spill] sm:$0xff] %v10721_v24  ;;  %5983 = vrcp.f32 %v10564_v48  ;;  %v5229_v26 = vadd.f32 %v10624_v60, %v12921_v53  ;;  %v4073_v56 = vsel %vm4070_vm7, %v4072_v55, %v4068_v0  ;;  %vm4081_vm1 = vweird.f32 %v10436_v37 }
 0xc8e   :  { %v1043_v51 = vrot.slane %v1042_v3, 1  ;;  %v10735_v21 = vmul.f32 %v4073_v56, %v10425_v28  ;;  %v4080_v29 = vadd.f32 %v10606_v23, %v4079_v61  ;;  %v4092_v20 = vadd.f32 %v12923_v5, %v12842_v19  ;;  %vm4083_vm11 = vmor %vm4081_vm1, %vm4082_vm13 }
 0xc8f   :  { %v1316_v1 = vadd.f32 %v1315_v8, %v10664_v17  ;;  %vm4086_vm3 = vcmp.eq.f32.partialorder %v4085_v42, 8.507059e+37  ;;  %v4088_v54 = vor.u32 1.1754944e-38, %v4087_v14  ;;  %v4164_v27 = vmul.f32 %v10614_v62, %v10444_v45 }
 0xc90   :  { %12922 = vst [vmem:[#allocation146_spill] sm:$0xff] %v10735_v21  ;;  %v1044_v37 = vadd.f32 %v1043_v51, %v1042_v3  ;;  %v4084_v35 = vsel %vm4083_vm11, %v10606_v23, %v4080_v29  ;;  %v4093_v28 = vmul.f32 %v4092_v20, %v10735_v21  ;;  %v4172_v2 = vand.u32 2147483647, %v10444_v45  ;;  %v12925_v3 = vld [vmem:[#allocation105_spill] sm:$0xff] }
 0xc91   :  { %v4089_v16 = vsel %vm4086_vm3, %v4088_v54, %v4084_v35  ;;  %v4165_v55 = vsub.f32 1.0, %v4164_v27  ;;  %v4174_v17 = vand.u32 2147483648, %v10444_v45  ;;  %v4180_v8 = vmul.f32 %v10619_v11, %v10455_v9 }
 0xc92   :  { %5985 = vrcp.f32 %v10569_v30  ;;  %v10755_v42 = vadd.f32 %v5229_v26, %v12842_v19  ;;  %v4900_v23 = vsub.f32 %v10641_v46, %v12925_v3  ;;  %5706 = vpush %v1044_v37  ;;  %v10759_v0 = vmul.f32 %v4093_v28, %v4089_v16  ;;  %v12932_v26 = vld [vmem:[#allocation83_spill] sm:$0xff] }
 0xc93   :  { %v10761_v61 = vpop.eup %5983  ;;  %5987 = vrcp.f32 %v10573_v63  ;;  %5708 = vpush %v1316_v1  ;;  %v4166_v14 = vmul.f32 %v10614_v62, %v4165_v55  ;;  %vm4169_vm4 = vweird.f32 %v10614_v62  ;;  %v4181_v56 = vsub.f32 1.0, %v4180_v8 }
 0xc94   :  { %12924 = vst [vmem:[#allocation149_spill] sm:$0xff] %v10755_v42  ;;  %vm4168_vm8 = vweird.f32 %v10444_v45  ;;  %vm10767_vm14 = vcmp.eq.f32.partialorder %v4172_v2, 8.507059e+37  ;;  %vm4184_vm6 = vweird.f32 %v10455_v9  ;;  %v4267_v46 = vmul.f32 %v10621_v59, %v10465_v22  ;;  %v1325_v51 = vpop.xlane.xlu1 %1324 }
 0xc95   :  { %12926 = vst [vmem:[#allocation199_spill] sm:$0xff] %v10759_v0  ;;  %v4167_v29 = vadd.f32 %v10614_v62, %v4166_v14  ;;  %v4175_v5 = vor.u32 1.1754944e-38, %v4174_v17  ;;  %v4182_v20 = vmul.f32 %v10619_v11, %v4181_v56  ;;  %vm4185_vm2 = vweird.f32 %v10619_v11  ;;  %vm4170_vm5 = vmor %vm4168_vm8, %vm4169_vm4 }
 0xc96   :  { %v1326_v1 = vrot.slane %v1325_v51, 4  ;;  %v4188_v45 = vand.u32 2147483647, %v10455_v9  ;;  %v4190_v54 = vand.u32 2147483648, %v10455_v9  ;;  %v4268_v27 = vsub.f32 1.0, %v4267_v46  ;;  %vm10789_vm10 = vmor %vm4184_vm6, %vm4185_vm2  ;;  %v1869_v46 = vpop.xlane.xlu2 %1868 }
 0xc97   :  { %v4171_v37 = vsel %vm4170_vm5, %v10614_v62, %v4167_v29  ;;  %v4183_v35 = vadd.f32 %v10619_v11, %v4182_v20  ;;  %v4275_v28 = vand.u32 2147483647, %v10465_v22  ;;  %v4277_v2 = vand.u32 2147483648, %v10465_v22 }
 0xc98   :  { %v10783_v16 = vpop.eup %5985  ;;  %v1327_v55 = vadd.f32 %v1326_v1, %v1325_v51  ;;  %v4176_v17 = vsel %vm10767_vm14, %v4175_v5, %v4171_v37  ;;  %v4269_v62 = vmul.f32 %v10621_v59, %v4268_v27  ;;  %vm4272_vm15 = vweird.f32 %v10621_v59  ;;  %v10809_v1 = vpop.f32.mrf.mxu2 }
 0xc99   :  { %v10795_v3 = vpop.eup %5987  ;;  %v10798_v14 = vmul.f32 %v4176_v17, %v10440_v31  ;;  %v4187_v56 = vsel %vm10789_vm10, %v10619_v11, %v4183_v35  ;;  %v4195_v9 = vadd.f32 %v12932_v26, %v12842_v19  ;;  %vm4271_vm0 = vweird.f32 %v10465_v22  ;;  %v12933_v17 = vld [vmem:[#allocation116_spill] sm:$0xff]  ;;  %v4993_v26 = vpop.f32.mrf.mxu3 }
 0xc9a   :  { %v1328_v51 = vrot.slane %v1327_v55, 2  ;;  %v4191_v29 = vor.u32 1.1754944e-38, %v4190_v54  ;;  %v4270_v5 = vadd.f32 %v10621_v59, %v4269_v62  ;;  %v4283_v20 = vmul.f32 %v10632_v33, %v10471_v12  ;;  %vm4273_vm7 = vmor %vm4271_vm0, %vm4272_vm15  ;;  %v12934_v54 = vld [vmem:[#allocation111_spill] sm:$0xff] }
 0xc9b   :  { %12931 = vst [vmem:[#allocation200_spill] sm:$0xff] %v10798_v14  ;;  %vm4189_vm12 = vcmp.eq.f32.partialorder %v4188_v45, 8.507059e+37  ;;  %v4196_v31 = vmul.f32 %v4195_v9, %v10798_v14  ;;  %vm4276_vm9 = vcmp.eq.f32.partialorder %v4275_v28, 8.507059e+37  ;;  %v4278_v11 = vor.u32 1.1754944e-38, %v4277_v2 }
 0xc9c   :  { %v1329_v27 = vadd.f32 %v1328_v51, %v1327_v55  ;;  %v4192_v37 = vsel %vm4189_vm12, %v4191_v29, %v4187_v56  ;;  %v4274_v22 = vsel %vm4273_vm7, %v10621_v59, %v4270_v5  ;;  %v4284_v35 = vsub.f32 1.0, %v4283_v20  ;;  %v1597_v21 = vpop.xlane.xlu1 %1596  ;;  %v12939_v51 = vld [vmem:[#allocation96_spill] sm:$0xff] }
 0xc9d   :  { %v12935_v8 = vsub.f32 %v12933_v17, %v12934_v54  ;;  %v1870_v0 = vrot.slane %v1869_v46, 4  ;;  %v10816_v24 = vmul.f32 %v4196_v31, %v4192_v37  ;;  %v4279_v45 = vsel %vm4276_vm9, %v4278_v11, %v4274_v22 }
 0xc9e   :  { %v1598_v52 = vrot.slane %v1597_v21, 4  ;;  %v1330_v9 = vrot.slane %v1329_v27, 1  ;;  %v10819_v28 = vmul.f32 %v4279_v45, %v10461_v18  ;;  %v4293_v2 = vand.u32 2147483648, %v10471_v12  ;;  %v10831_v18 = vpop.f32.mrf.mxu1 }
 0xc9f   :  { %v4904_v62 = vadd.f32 %v4900_v23, %v12935_v8  ;;  %12936 = vst [vmem:[#allocation20_spill] sm:$0xff] %v10816_v24  ;;  %v4285_v59 = vmul.f32 %v10632_v33, %v4284_v35  ;;  %vm4288_vm13 = vweird.f32 %v10632_v33  ;;  %v4291_v55 = vand.u32 2147483647, %v10471_v12  ;;  %v12938_v23 = vld [vmem:[#allocation70_spill] sm:$0xff]  ;;  %v10850_v8 = vpop.f32.mrf.mxu0 }
 0xca0   :  { %12937 = vst [vmem:[#allocation214_spill] sm:$0xff] %v10819_v28  ;;  %v4298_v56 = vadd.f32 %v12938_v23, %v12842_v19  ;;  %v5003_v29 = vsub.f32 %v4993_v26, %v12939_v51  ;;  %v1599_v5 = vadd.f32 %v1598_v52, %v1597_v21  ;;  %v1331_v20 = vadd.f32 %v1330_v9, %v1329_v27  ;;  %v10853_v9 = vpop.f32.mrf.mxu2 }
 0xca1   :  { %v4370_v31 = vmul.f32 %v10638_v44, %v10486_v38  ;;  %5989 = vrcp.f32 %v10596_v36  ;;  %v4286_v11 = vadd.f32 %v10632_v33, %v4285_v59  ;;  %vm4287_vm1 = vweird.f32 %v10471_v12 }
 0xca2   :  { %v4299_v37 = vmul.f32 %v4298_v56, %v10819_v28  ;;  %5991 = vrcp.f32 %v10755_v42  ;;  %v10838_v22 = vadd.f32 %v4904_v62, %v12836_v34  ;;  %v1600_v52 = vrot.slane %v1599_v5, 2  ;;  %5710 = vpush %v1331_v20  ;;  %vm4289_vm11 = vmor %vm4287_vm1, %vm4288_vm13  ;;  %v12944_v56 = vld [vmem:[#allocation107_spill] sm:$0xff] }
 0xca3   :  { %v4294_v21 = vor.u32 1.1754944e-38, %v4293_v2  ;;  %v10842_v27 = vadd.f32 %v1870_v0, %v1869_v46  ;;  %v4290_v35 = vsel %vm4289_vm11, %v10632_v33, %v4286_v11  ;;  %vm4292_vm3 = vcmp.eq.f32.partialorder %v4291_v55, 8.507059e+37  ;;  %s11175_s11 = spop %5700 }
 0xca4   :  { %v4371_v17 = vsub.f32 1.0, %v4370_v31  ;;  %v12940_v12 = vsub.f32 %v10587_v10, %v12906_v57  ;;  %v1601_v62 = vadd.f32 %v1600_v52, %v1599_v5  ;;  %v4380_v45 = vand.u32 2147483648, %v10486_v38  ;;  %v12942_v10 = vld [vmem:[#allocation84_spill] sm:$0xff] }
 0xca5   :  { %v4295_v26 = vsel %vm4292_vm3, %v4294_v21, %v4290_v35  ;;  %vm4375_vm4 = vweird.f32 %v10638_v44  ;;  %v4378_v33 = vand.u32 2147483647, %v10486_v38  ;;  %v4386_v55 = vmul.f32 %v10646_v58, %v10498_v47 }
 0xca6   :  { %v10848_v54 = vadd.f32 %v5003_v29, %v12940_v12  ;;  %v10855_v2 = vmul.f32 %v4299_v37, %v4295_v26  ;;  %v4372_v0 = vmul.f32 %v10638_v44, %v4371_v17  ;;  %v1602_v59 = vrot.slane %v1601_v62, 1  ;;  %v2156_v26 = vpop.xlane.xlu2 %2155 }
 0xca7   :  { %v10866_v23 = vpop.eup %5989  ;;  %v1872_v29 = vrot.slane %v10842_v27, 2  ;;  %vm4374_vm8 = vweird.f32 %v10486_v38  ;;  %v4381_v11 = vor.u32 1.1754944e-38, %v4380_v45  ;;  %v4387_v37 = vsub.f32 1.0, %v4386_v55 }
 0xca8   :  { %12941 = vst [vmem:[#allocation10_spill] sm:$0xff] %v10855_v2  ;;  %v4373_v5 = vadd.f32 %v10638_v44, %v4372_v0  ;;  %v10873_v20 = vpop.eup %5991  ;;  %v1603_v31 = vadd.f32 %v1602_v59, %v1601_v62  ;;  %vm4376_vm14 = vmor %vm4374_vm8, %vm4375_vm4  ;;  %v4396_v52 = vand.u32 2147483648, %v10498_v47  ;;  %vm4379_vm6 = vcmp.eq.f32.partialorder %v4378_v33, 8.507059e+37  ;;  %v5199_v62 = vpop.f32.mrf.mxu1  ;;  %v12947_v0 = vld [vmem:[#allocation76_spill] sm:$0xff] }
 0xca9   :  { %12943 = vst [vmem:[#allocation153_spill] sm:$0xff] %v10866_v23  ;;  %vm4390_vm2 = vweird.f32 %v10498_v47  ;;  %v4473_v35 = vmul.f32 %v10658_v43, %v10506_v49  ;;  %v4388_v38 = vmul.f32 %v10646_v58, %v4387_v37  ;;  %vm4391_vm5 = vweird.f32 %v10646_v58 }
 0xcaa   :  { %12945 = vst [vmem:[#allocation216_spill] sm:$0xff] %v10873_v20  ;;  %v4377_v21 = vsel %vm4376_vm14, %v10638_v44, %v4373_v5  ;;  %v4394_v12 = vand.u32 2147483647, %v10498_v47  ;;  %v4397_v44 = vor.u32 1.1754944e-38, %v4396_v52  ;;  %v4401_v33 = vadd.f32 %v12947_v0, %v12842_v19  ;;  %vm4392_vm15 = vmor %vm4390_vm2, %vm4391_vm5  ;;  %v10900_v0 = vpop.f32.mrf.mxu2  ;;  %v5096_v47 = vpop.f32.mrf.mxu0 }
 0xcab   :  { %5712 = vpush %v1603_v31  ;;  %v4382_v17 = vsel %vm4379_vm6, %v4381_v11, %v4377_v21  ;;  %v4474_v59 = vsub.f32 1.0, %v4473_v35  ;;  %v1612_v55 = vpop.xlane.xlu1 %1611  ;;  %v4389_v5 = vadd.f32 %v10646_v58, %v4388_v38  ;;  %vm4478_vm10 = vweird.f32 %v10658_v43 }
 0xcac   :  { %v10884_v45 = vmul.f32 %v4382_v17, %v10478_v40  ;;  %v4483_v31 = vand.u32 2147483648, %v10506_v49  ;;  %v4489_v11 = vmul.f32 %v10668_v7, %v10528_v39  ;;  %v1613_v37 = vrot.slane %v1612_v55, 4 }
 0xcad   :  { %v4475_v52 = vmul.f32 %v10658_v43, %v4474_v59  ;;  %v4481_v21 = vand.u32 2147483647, %v10506_v49  ;;  %v5209_v35 = vsub.f32 %v5199_v62, %v10624_v60  ;;  %v2157_v17 = vrot.slane %v2156_v26, 4 }
 0xcae   :  { %12946 = vst [vmem:[#allocation220_spill] sm:$0xff] %v10884_v45  ;;  %v4402_v40 = vmul.f32 %v4401_v33, %v10884_v45  ;;  %v4393_v38 = vsel %vm4392_vm15, %v10646_v58, %v4389_v5  ;;  %vm4395_vm0 = vcmp.eq.f32.partialorder %v4394_v12, 8.507059e+37  ;;  %v1614_v46 = vadd.f32 %v1613_v37, %v1612_v55  ;;  %v10911_v55 = vpop.xlane.xlu0 %2510 }
 0xcaf   :  { %v4398_v51 = vsel %vm4395_vm0, %v4397_v44, %v4393_v38  ;;  %v4476_v57 = vadd.f32 %v10658_v43, %v4475_v52  ;;  %vm4477_vm12 = vweird.f32 %v10506_v49  ;;  %v1873_v33 = vadd.f32 %v1872_v29, %v10842_v27  ;;  %s11180_s5 = spop %5702 }
 0xcb0   :  { %v10905_v59 = vmul.f32 %v4402_v40, %v4398_v51  ;;  %vm4479_vm7 = vmor %vm4477_vm12, %vm4478_vm10  ;;  %v4484_v60 = vor.u32 1.1754944e-38, %v4483_v31  ;;  %v4490_v62 = vsub.f32 1.0, %v4489_v11  ;;  %v1615_v58 = vrot.slane %v1614_v46, 2  ;;  %v12949_v51 = vld [vmem:[#allocation102_spill] sm:$0xff]  ;;  %s11186_s6 = spop %5704 }
 0xcb1   :  { %v4480_v12 = vsel %vm4479_vm7, %v10658_v43, %v4476_v57  ;;  %vm4482_vm9 = vcmp.eq.f32.partialorder %v4481_v21, 8.507059e+37  ;;  %v4499_v44 = vand.u32 2147483648, %v10528_v39  ;;  %vm4494_vm13 = vweird.f32 %v10668_v7  ;;  %v12951_v43 = vld [vmem:[#allocation73_spill] sm:$0xff]  ;;  %s1031_s26 = sadd.f32 %s11186_s6, %s11175_s11 }
 0xcb2   :  { %12948 = vst [vmem:[#allocation222_spill] sm:$0xff] %v10905_v59  ;;  %v4485_v5 = vsel %vm4482_vm9, %v4484_v60, %v4480_v12  ;;  %v4491_v49 = vmul.f32 %v10668_v7, %v4490_v62  ;;  %v4497_v27 = vand.u32 2147483647, %v10528_v39  ;;  %v5106_v29 = vsub.f32 %v5096_v47, %v12949_v51  ;;  %v4996_v60 = vpop.f32.mrf.mxu3 }
 0xcb3   :  { %v1616_v37 = vadd.f32 %v1615_v58, %v1614_v46  ;;  %v10918_v31 = vmul.f32 %v4485_v5, %v10502_v6  ;;  %v4504_v57 = vadd.f32 %v12951_v43, %v12842_v19  ;;  %v12952_v11 = vsub.f32 %v10831_v18, %v12921_v53 }
 0xcb4   :  { %v1874_v52 = vrot.slane %v1873_v33, 1  ;;  %v4492_v21 = vadd.f32 %v10668_v7, %v4491_v49  ;;  %vm4493_vm1 = vweird.f32 %v10528_v39  ;;  %v3440_v47 = vmul.f32 %v10524_v15, %v10315_v4  ;;  %v5099_v49 = vpop.f32.mrf.mxu0 }
 0xcb5   :  { %12950 = vst [vmem:[#allocation183_spill] sm:$0xff] %v10918_v31  ;;  %v5213_v40 = vadd.f32 %v5209_v35, %v12952_v11  ;;  %v1617_v38 = vrot.slane %v1616_v37, 1  ;;  %vm4495_vm11 = vmor %vm4493_vm1, %vm4494_vm13  ;;  %v4500_v46 = vor.u32 1.1754944e-38, %v4499_v44  ;;  %v4505_v6 = vmul.f32 %v4504_v57, %v10918_v31 }
 0xcb6   :  { %v5309_v62 = vmul.f32 %v10809_v1, %v10809_v1  ;;  %v2158_v58 = vadd.f32 %v2157_v17, %v2156_v26  ;;  %v4496_v53 = vsel %vm4495_vm11, %v10668_v7, %v4492_v21  ;;  %vm4498_vm3 = vcmp.eq.f32.partialorder %v4497_v27, 8.507059e+37  ;;  %v10943_v26 = vpop.xlane.xlu2 %2521 }
 0xcb7   :  { %v10935_v18 = vadd.f32 %v10848_v54, %v12836_v34  ;;  %v12953_v39 = vsub.f32 %v10850_v8, %v12944_v56  ;;  %v1618_v12 = vadd.f32 %v1617_v38, %v1616_v37  ;;  %v4501_v44 = vsel %vm4498_vm3, %v4500_v46, %v4496_v53  ;;  %v12956_v56 = vld [vmem:[#allocation110_spill] sm:$0xff]  ;;  %v5305_v37 = vpop.f32.mrf.mxu2  ;;  %v5202_v46 = vpop.f32.mrf.mxu1 }
 0xcb8   :  { %v5308_v5 = vmul.f32 %v10748_v50, %v10748_v50  ;;  %v5312_v51 = vsub.f32 %v10900_v0, %v5309_v62  ;;  %v1875_v7 = vadd.f32 %v1874_v52, %v1873_v33  ;;  %v10945_v17 = vmul.f32 %v4505_v6, %v4501_v44 }
 0xcb9   :  { %v5110_v35 = vadd.f32 %v5106_v29, %v12953_v39  ;;  %v12955_v54 = vsub.f32 %v10701_v41, %v12942_v10  ;;  %v10951_v8 = vadd.f32 %v5213_v40, %v12836_v34  ;;  %v5004_v29 = vsub.f32 %v4996_v60, %v12956_v56  ;;  %5714 = vpush %v1618_v12  ;;  %v12957_v10 = vld [vmem:[#allocation94_spill] sm:$0xff] }
 0xcba   :  { %12954 = vst [vmem:[#allocation87_spill] sm:$0xff] %v10945_v17  ;;  %v3441_v43 = vsub.f32 1.0, %v3440_v47  ;;  %v5310_v0 = vmul.f32 %v10809_v1, %v10748_v50  ;;  %v5332_v57 = vadd.f32 %v5309_v62, %v5308_v5  ;;  %v5311_v33 = vsub.f32 %v10853_v9, %v5308_v5  ;;  %v1884_v52 = vpop.xlane.xlu1 %1883  ;;  %v10966_v47 = vpop.xlane.xlu0 %2640 }
 0xcbb   :  { %v4902_v27 = vmul.f32 2.0, %v12955_v54  ;;  %v2159_v11 = vrot.slane %v2158_v58, 2  ;;  %5716 = vpush %v1875_v7  ;;  %5993 = vrcp.f32 %v10838_v22  ;;  %v10959_v41 = vadd.f32 %v5110_v35, %v12836_v34 }
 0xcbc   :  { %v5107_v40 = vsub.f32 %v5099_v49, %v12957_v10  ;;  %v1885_v21 = vrot.slane %v1884_v52, 4  ;;  %v10963_v38 = vmul.f32 2.0, %v10650_v32  ;;  %5995 = vrcp.f32 %v10935_v18 }
 0xcbd   :  { %v5316_v50 = vadd.f32 %v5312_v51, %v5311_v33  ;;  %v5313_v1 = vsub.f32 %v5305_v37, %v5310_v0  ;;  %v10969_v9 = vadd.f32 %v4902_v27, %v12836_v34  ;;  %5997 = vrcp.f32 %v10951_v8  ;;  %v12962_v33 = vld [vmem:[#allocation141_spill] sm:$0xff] }
 0xcbe   :  { %12958 = vst [vmem:[#allocation187_spill] sm:$0xff] %v10963_v38  ;;  %v1886_v6 = vadd.f32 %v1885_v21, %v1884_v52  ;;  %v3442_v60 = vmul.f32 %v10524_v15, %v3441_v43  ;;  %v5005_v62 = vmul.f32 2.0, %v5004_v29  ;;  %v10974_v53 = vadd.f32 %v5332_v57, %v12842_v19  ;;  %v2749_v43 = vpop.xlane.xlu2 %2748  ;;  %v12963_v21 = vld [vmem:[#allocation55_spill] sm:$0xff] }
 0xcbf   :  { %v10976_v39 = vmul.f32 2.0, %v5310_v0  ;;  %v2160_v35 = vadd.f32 %v2159_v11, %v2158_v58  ;;  %5999 = vrcp.f32 %v10959_v41  ;;  %v5108_v12 = vmul.f32 2.0, %v5107_v40 }
 0xcc0   :  { %12959 = vst [vmem:[#allocation118_spill] sm:$0xff] %v10974_v53  ;;  %v1887_v44 = vrot.slane %v1886_v6, 2  ;;  %v3630_v5 = vmul.f32 %v10553_v25, %v10344_v13  ;;  %v10982_v49 = vadd.f32 %v5316_v50, %v12836_v34  ;;  %v5314_v51 = vmul.f32 2.0, %v5313_v1 }
 0xcc1   :  { %12960 = vst [vmem:[#allocation225_spill] sm:$0xff] %v10976_v39  ;;  %v5210_v7 = vsub.f32 %v5202_v46, %v10650_v32  ;;  %v2512_v54 = vrot.slane %v10911_v55, 4  ;;  %v10986_v27 = vpop.eup %5993  ;;  %v2523_v56 = vrot.slane %v10943_v26, 4  ;;  %v3443_v29 = vadd.f32 %v10524_v15, %v3442_v60  ;;  %v12961_v32 = vld [vmem:[#allocation50_spill] sm:$0xff] }
 0xcc2   :  { %v1888_v58 = vadd.f32 %v1887_v44, %v1886_v6  ;;  %vm3445_vm4 = vweird.f32 %v10524_v15  ;;  %v10991_v37 = vpop.eup %5995  ;;  %v2161_v0 = vrot.slane %v2160_v35, 1  ;;  %vm3444_vm8 = vweird.f32 %v10315_v4 }
 0xcc3   :  { %v3450_v57 = vand.u32 2147483648, %v10315_v4  ;;  %v3543_v11 = vmul.f32 %v12962_v33, %v12961_v32  ;;  %v10997_v52 = vpop.eup %5997  ;;  %v3448_v40 = vand.u32 2147483647, %v10315_v4  ;;  %v3455_v50 = vadd.f32 %v12963_v21, %v12842_v19  ;;  %vm11009_vm14 = vmor %vm3444_vm8, %vm3445_vm4  ;;  %s11197_s10 = spop %5706 }
 0xcc4   :  { %v1889_v10 = vrot.slane %v1888_v58, 1  ;;  %v3631_v1 = vsub.f32 1.0, %v3630_v5  ;;  %v11003_v46 = vadd.f32 %v5005_v62, %v12836_v34  ;;  %6001 = vrcp.f32 %v10974_v53  ;;  %v12967_v5 = vld [vmem:[#allocation14_spill] sm:$0xff]  ;;  %s5709_s16 = spop %5708  ;;  %s1046_s0 = sadd.f32 %s11197_s10, %s11180_s5 }
 0xcc5   :  { %v5211_v6 = vmul.f32 2.0, %v5210_v7  ;;  %v2513_v60 = vadd.f32 %v2512_v54, %v10911_v55  ;;  %v11013_v39 = vpop.eup %5999  ;;  %v2524_v4 = vadd.f32 %v2523_v56, %v10943_v26  ;;  %v3447_v62 = vsel %vm11009_vm14, %v10524_v15, %v3443_v29  ;;  %v11023_v55 = vpop.xlane.xlu0 %2867  ;;  %s11242_s14 = sadd.f32 %s5709_s16, %s1031_s26 }
 0xcc6   :  { %12964 = vst [vmem:[#allocation100_spill] sm:$0xff] %v11003_v46  ;;  %v1890_v21 = vadd.f32 %v1889_v10, %v1888_v58  ;;  %v3456_v38 = vmul.f32 %v3455_v50, %v12967_v5  ;;  %v11021_v7 = vadd.f32 %v5108_v12, %v12836_v34  ;;  %v2162_v54 = vadd.f32 %v2161_v0, %v2160_v35  ;;  %v12973_v50 = vld [vmem:[#allocation213_spill] sm:$0xff] }
 0xcc7   :  { %v3451_v17 = vor.u32 1.1754944e-38, %v3450_v57  ;;  %v3544_v31 = vsub.f32 1.0, %v3543_v11  ;;  %6003 = vrcp.f32 %v10982_v49  ;;  %v11027_v59 = vadd.f32 %v5314_v51, %v12836_v34 }
 0xcc8   :  { %12968 = vst [vmem:[#allocation226_spill] sm:$0xff] %v11021_v7  ;;  %vm3449_vm6 = vcmp.eq.f32.partialorder %v3448_v40, 8.507059e+37  ;;  %v3632_v26 = vmul.f32 %v10553_v25, %v3631_v1  ;;  %v11031_v15 = vadd.f32 %v5211_v6, %v12836_v34  ;;  %v2514_v56 = vrot.slane %v2513_v60, 2  ;;  %v12972_v40 = vld [vmem:[#allocation206_spill] sm:$0xff]  ;;  %v12974_v7 = vld [vmem:[#allocation51_spill] sm:$0xff] }
 0xcc9   :  { %12969 = vst [vmem:[#allocation30_spill] sm:$0xff] %v11027_v59  ;;  %v2642_v12 = vrot.slane %v10966_v47, 4  ;;  %v2171_v58 = vpop.xlane.xlu1 %2170  ;;  %v3452_v35 = vsel %vm3449_vm6, %v3451_v17, %v3447_v62  ;;  %v2525_v29 = vrot.slane %v2524_v4, 2  ;;  %v2750_v0 = vrot.slane %v2749_v43, 4 }
 0xcca   :  { %5718 = vpush %v1890_v21  ;;  %v2172_v57 = vrot.slane %v2171_v58, 4  ;;  %v11034_v11 = vmul.f32 %v3456_v38, %v3452_v35  ;;  %v11036_v51 = vpop.eup %6001  ;;  %v3545_v10 = vmul.f32 %v12962_v33, %v3544_v31  ;;  %vm3548_vm2 = vweird.f32 %v12962_v33  ;;  %v2879_v21 = vpop.xlane.xlu2 %2878 }
 0xccb   :  { %12970 = vst [vmem:[#allocation35_spill] sm:$0xff] %v11031_v15  ;;  %v3553_v34 = vand.u32 2147483648, %v12961_v32  ;;  %v3646_v1 = vmul.f32 %v12973_v50, %v12972_v40  ;;  %vm3547_vm5 = vweird.f32 %v12961_v32  ;;  %v3633_v17 = vadd.f32 %v10553_v25, %v3632_v26 }
 0xccc   :  { %5720 = vpush %v2162_v54  ;;  %v2173_v6 = vadd.f32 %v2172_v57, %v2171_v58  ;;  %vm3635_vm10 = vweird.f32 %v10553_v25  ;;  %v3638_v38 = vand.u32 2147483647, %v10344_v13  ;;  %v2643_v44 = vadd.f32 %v2642_v12, %v10966_v47  ;;  %vm11080_vm13 = vmor %vm3547_vm5, %vm3548_vm2 }
 0xccd   :  { %12971 = vst [vmem:[#allocation229_spill] sm:$0xff] %v11036_v51  ;;  %v2515_v31 = vadd.f32 %v2514_v56, %v2513_v60  ;;  %v3551_v62 = vand.u32 2147483647, %v12961_v32  ;;  %v3640_v54 = vand.u32 2147483648, %v10344_v13  ;;  %v11050_v35 = vpop.eup %6003  ;;  %v2751_v59 = vadd.f32 %v2750_v0, %v2749_v43  ;;  %v2998_v12 = vpop.xlane.xlu0 %2997 }
 0xcce   :  { %v2174_v58 = vrot.slane %v2173_v6, 2  ;;  %v2526_v57 = vadd.f32 %v2525_v29, %v2524_v4  ;;  %vm3634_vm15 = vweird.f32 %v10344_v13  ;;  %v3546_v26 = vadd.f32 %v12962_v33, %v3545_v10 }
 0xccf   :  { %v3554_v15 = vor.u32 1.1754944e-38, %v3553_v34  ;;  %v3558_v45 = vadd.f32 %v12974_v7, %v12842_v19  ;;  %vm11058_vm0 = vmor %vm3634_vm15, %vm3635_vm10  ;;  %v3647_v60 = vsub.f32 1.0, %v3646_v1  ;;  %v2869_v56 = vrot.slane %v11023_v55, 4 }
 0xcd0   :  { %v2175_v43 = vadd.f32 %v2174_v58, %v2173_v6  ;;  %v3637_v13 = vsel %vm11058_vm0, %v10553_v25, %v3633_v17  ;;  %vm3639_vm12 = vcmp.eq.f32.partialorder %v3638_v38, 8.507059e+37  ;;  %v2644_v4 = vrot.slane %v2643_v44, 2  ;;  %v12979_v6 = vld [vmem:[#allocation91_spill] sm:$0xff] }
 0xcd1   :  { %v2880_v29 = vrot.slane %v2879_v21, 4  ;;  %v2630_v0 = vpop.xlane.xlu1 %2629  ;;  %v2516_v7 = vrot.slane %v2515_v31, 1  ;;  %v3641_v10 = vor.u32 1.1754944e-38, %v3640_v54  ;;  %v2752_v34 = vrot.slane %v2751_v59, 2 }
 0xcd2   :  { %v2631_v2 = vrot.slane %v2630_v0, 4  ;;  %v2176_v28 = vrot.slane %v2175_v43, 1  ;;  %v2527_v24 = vrot.slane %v2526_v57, 1  ;;  %vm11066_vm7 = vcmp.eq.f32.partialorder %v3551_v62, 8.507059e+37  ;;  %v12982_v62 = vld [vmem:[#allocation134_spill] sm:$0xff] }
 0xcd3   :  { %v11071_v58 = vmul.f32 %v3558_v45, %v12979_v6  ;;  %v3642_v47 = vsel %vm3639_vm12, %v3641_v10, %v3637_v13  ;;  %v3648_v25 = vmul.f32 %v12973_v50, %v3647_v60  ;;  %vm3650_vm9 = vweird.f32 %v12972_v40  ;;  %v12983_v60 = vld [vmem:[#allocation181_spill] sm:$0xff]  ;;  %s11214_s3 = spop %5710 }
 0xcd4   :  { %v2870_v17 = vadd.f32 %v2869_v56, %v11023_v55  ;;  %v2999_v38 = vrot.slane %v2998_v12, 4  ;;  %v2632_v54 = vadd.f32 %v2631_v2, %v2630_v0  ;;  %v2177_v14 = vadd.f32 %v2176_v28, %v2175_v43  ;;  %v3106_v2 = vpop.xlane.xlu2 %3105  ;;  %s11339_s9 = sadd.f32 %s11214_s3, %s1046_s0 }
 0xcd5   :  { %v2881_v51 = vadd.f32 %v2880_v29, %v2879_v21  ;;  %v2517_v53 = vadd.f32 %v2516_v7, %v2515_v31  ;;  %v2645_v20 = vadd.f32 %v2644_v4, %v2643_v44  ;;  %v4576_v13 = vmul.f32 %v12983_v60, %v12982_v62  ;;  %v12984_v21 = vld [vmem:[#allocation78_spill] sm:$0xff] }
 0xcd6   :  { %v2633_v10 = vrot.slane %v2632_v54, 2  ;;  %5722 = vpush %v2177_v14  ;;  %v2528_v55 = vadd.f32 %v2527_v24, %v2526_v57  ;;  %v2753_v56 = vadd.f32 %v2752_v34, %v2751_v59  ;;  %v3550_v28 = vsel %vm11080_vm13, %v12962_v33, %v3546_v26  ;;  %v12985_v24 = vld [vmem:[#allocation204_spill] sm:$0xff] }
 0xcd7   :  { %5724 = vpush %v2517_v53  ;;  %vm3651_vm1 = vweird.f32 %v12973_v50  ;;  %v3654_v32 = vand.u32 2147483647, %v12972_v40  ;;  %v3656_v44 = vand.u32 2147483648, %v12972_v40  ;;  %v3661_v31 = vadd.f32 %v12984_v21, %v12842_v19 }
 0xcd8   :  { %v2871_v43 = vrot.slane %v2870_v17, 2  ;;  %5726 = vpush %v2528_v55  ;;  %v2634_v14 = vadd.f32 %v2633_v10, %v2632_v54  ;;  %v11095_v59 = vmul.f32 %v3642_v47, %v12985_v24  ;;  %v3649_v57 = vadd.f32 %v12973_v50, %v3648_v25  ;;  %vm11104_vm11 = vmor %vm3650_vm9, %vm3651_vm1  ;;  %v12991_v54 = vld [vmem:[#allocation89_spill] sm:$0xff] }
 0xcd9   :  { %v3000_v33 = vadd.f32 %v2999_v38, %v2998_v12  ;;  %v2882_v26 = vrot.slane %v2881_v51, 2  ;;  %v2760_v53 = vpop.xlane.xlu1 %2759  ;;  %v2646_v4 = vrot.slane %v2645_v20, 1  ;;  %v4577_v29 = vsub.f32 1.0, %v4576_v13  ;;  %v12990_v38 = vld [vmem:[#allocation45_spill] sm:$0xff] }
 0xcda   :  { %v3107_v0 = vrot.slane %v3106_v2, 4  ;;  %v2761_v7 = vrot.slane %v2760_v53, 4  ;;  %v2635_v34 = vrot.slane %v2634_v14, 1  ;;  %v2754_v45 = vrot.slane %v2753_v56, 1 }
 0xcdb   :  { %v3555_v21 = vsel %vm11066_vm7, %v3554_v15, %v3550_v28  ;;  %vm11108_vm3 = vcmp.eq.f32.partialorder %v3654_v32, 8.507059e+37  ;;  %v3657_v25 = vor.u32 1.1754944e-38, %v3656_v44  ;;  %v4804_v13 = vmul.f32 %v12991_v54, %v12990_v38 }
 0xcdc   :  { %v2762_v10 = vadd.f32 %v2761_v7, %v2760_v53  ;;  %v2636_v55 = vadd.f32 %v2635_v34, %v2634_v14  ;;  %v3653_v15 = vsel %vm11104_vm11, %v12973_v50, %v3649_v57  ;;  %v3662_v40 = vmul.f32 %v3661_v31, %v11095_v59  ;;  %v12992_v7 = vld [vmem:[#allocation147_spill] sm:$0xff]  ;;  %v12993_v50 = vld [vmem:[#allocation182_spill] sm:$0xff]  ;;  %s11221_s4 = spop %5712 }
 0xcdd   :  { %v3001_v1 = vrot.slane %v3000_v33, 2  ;;  %v2647_v28 = vadd.f32 %v2646_v4, %v2645_v20  ;;  %v2872_v24 = vadd.f32 %v2871_v43, %v2870_v17  ;;  %v4578_v32 = vmul.f32 %v12983_v60, %v4577_v29  ;;  %s1605_s28 = sadd.f32 %s11221_s4, %s11242_s14 }
 0xcde   :  { %v3108_v42 = vadd.f32 %v3107_v0, %v3106_v2  ;;  %v2763_v46 = vrot.slane %v2762_v10, 2  ;;  %5728 = vpush %v2636_v55  ;;  %v2755_v44 = vadd.f32 %v2754_v45, %v2753_v56  ;;  %v2883_v23 = vadd.f32 %v2882_v26, %v2881_v51 }
 0xcdf   :  { %5730 = vpush %v2647_v28  ;;  %v3658_v14 = vsel %vm11108_vm3, %v3657_v25, %v3653_v15  ;;  %v4584_v53 = vand.u32 2147483647, %v12982_v62  ;;  %v4592_v57 = vmul.f32 %v12993_v50, %v12992_v7  ;;  %v4805_v31 = vsub.f32 1.0, %v4804_v13 }
 0xce0   :  { %5732 = vpush %v2755_v44  ;;  %v2764_v20 = vadd.f32 %v2763_v46, %v2762_v10  ;;  %v11125_v17 = vmul.f32 %v11071_v58, %v3555_v21  ;;  %v11127_v2 = vmul.f32 %v3662_v40, %v3658_v14  ;;  %v4586_v56 = vand.u32 2147483648, %v12982_v62 }
 0xce1   :  { %v3002_v51 = vadd.f32 %v3001_v1, %v3000_v33  ;;  %v2987_v43 = vpop.xlane.xlu1 %2986  ;;  %v2873_v26 = vrot.slane %v2872_v24, 1  ;;  %v4579_v4 = vadd.f32 %v12983_v60, %v4578_v32  ;;  %vm4581_vm4 = vweird.f32 %v12983_v60 }
 0xce2   :  { %v3109_v29 = vrot.slane %v3108_v42, 2  ;;  %v2988_v0 = vrot.slane %v2987_v43, 4  ;;  %v2765_v34 = vrot.slane %v2764_v20, 1  ;;  %v2884_v45 = vrot.slane %v2883_v23, 1 }
 0xce3   :  { %vm4580_vm8 = vweird.f32 %v12982_v62  ;;  %vm11133_vm14 = vcmp.eq.f32.partialorder %v4584_v53, 8.507059e+37  ;;  %v4593_v58 = vsub.f32 1.0, %v4592_v57  ;;  %v4806_v21 = vmul.f32 %v12991_v54, %v4805_v31 }
 0xce4   :  { %v2989_v33 = vadd.f32 %v2988_v0, %v2987_v43  ;;  %v2766_v47 = vadd.f32 %v2765_v34, %v2764_v20  ;;  %vm11138_vm6 = vmor %vm4580_vm8, %vm4581_vm4  ;;  %v4587_v25 = vor.u32 1.1754944e-38, %v4586_v56  ;;  %v4907_v13 = vmul.f32 %v10986_v27, %v10838_v22 }
 0xce5   :  { %v2874_v10 = vadd.f32 %v2873_v26, %v2872_v24  ;;  %v4583_v62 = vsel %vm11138_vm6, %v12983_v60, %v4579_v4  ;;  %vm4596_vm2 = vweird.f32 %v12992_v7  ;;  %vm4597_vm5 = vweird.f32 %v12993_v50 }
 0xce6   :  { %v4600_v55 = vand.u32 2147483647, %v12992_v7  ;;  %v3110_v15 = vadd.f32 %v3109_v29, %v3108_v42  ;;  %v2990_v40 = vrot.slane %v2989_v33, 2  ;;  %5734 = vpush %v2766_v47  ;;  %v2885_v1 = vadd.f32 %v2884_v45, %v2883_v23  ;;  %v12998_v42 = vld [vmem:[#allocation97_spill] sm:$0xff]  ;;  %vm11192_vm9 = vmor %vm4596_vm2, %vm4597_vm5 }
 0xce7   :  { %v4820_v28 = vmul.f32 %v10761_v61, %v10564_v48  ;;  %5736 = vpush %v2874_v10  ;;  %v4594_v24 = vmul.f32 %v12993_v50, %v4593_v58  ;;  %v4807_v32 = vadd.f32 %v12991_v54, %v4806_v21  ;;  %vm4809_vm10 = vweird.f32 %v12991_v54 }
 0xce8   :  { %v4814_v60 = vand.u32 2147483648, %v12990_v38  ;;  %5738 = vpush %v2885_v1  ;;  %v2991_v44 = vadd.f32 %v2990_v40, %v2989_v33  ;;  %v4602_v14 = vand.u32 2147483648, %v12992_v7  ;;  %v4607_v53 = vadd.f32 %v12998_v42, %v12842_v19  ;;  %v13005_v40 = vld [vmem:[#allocation211_spill] sm:$0xff] }
 0xce9   :  { %v4908_v23 = vsub.f32 1.0, %v4907_v13  ;;  %v3117_v57 = vpop.xlane.xlu1 %3116  ;;  %v3003_v31 = vrot.slane %v3002_v51, 1  ;;  %v4588_v20 = vsel %vm11133_vm14, %v4587_v25, %v4583_v62  ;;  %vm4808_vm15 = vweird.f32 %v12990_v38 }
 0xcea   :  { %v4812_v56 = vand.u32 2147483647, %v12990_v38  ;;  %v3118_v43 = vrot.slane %v3117_v57, 4  ;;  %v2992_v26 = vrot.slane %v2991_v44, 1  ;;  %v3111_v4 = vrot.slane %v3110_v15, 1  ;;  %vm11165_vm0 = vmor %vm4808_vm15, %vm4809_vm10  ;;  %s11240_s15 = spop %5714 }
 0xceb   :  { %v4821_v0 = vsub.f32 1.0, %v4820_v28  ;;  %v4595_v34 = vadd.f32 %v12993_v50, %v4594_v24  ;;  %v4811_v45 = vsel %vm11165_vm0, %v12991_v54, %v4807_v32  ;;  %v4815_v46 = vor.u32 1.1754944e-38, %v4814_v60  ;;  %v13006_v60 = vld [vmem:[#allocation23_spill] sm:$0xff]  ;;  %s1620_s7 = sadd.f32 %s11240_s15, %s11339_s9 }
 0xcec   :  { %v4923_v38 = vmul.f32 %v10783_v16, %v10569_v30  ;;  %v3119_v58 = vadd.f32 %v3118_v43, %v3117_v57  ;;  %v2993_v21 = vadd.f32 %v2992_v26, %v2991_v44  ;;  %v4909_v33 = vmul.f32 %v10986_v27, %v4908_v23  ;;  %s5717_s27 = spop %5716  ;;  %v13024_v26 = vld [vmem:[#allocation100_spill] sm:$0xff] }
 0xced   :  { %v5010_v47 = vmul.f32 %v10991_v37, %v10935_v18  ;;  %v3004_v12 = vadd.f32 %v3003_v31, %v3002_v51  ;;  %vm11182_vm12 = vcmp.eq.f32.partialorder %v4600_v55, 8.507059e+37  ;;  %v4603_v54 = vor.u32 1.1754944e-38, %v4602_v14  ;;  %s1877_s29 = sadd.f32 %s5717_s27, %s1605_s28 }
 0xcee   :  { %vm4813_vm7 = vcmp.eq.f32.partialorder %v4812_v56, 8.507059e+37  ;;  %v3120_v13 = vrot.slane %v3119_v58, 2  ;;  %5740 = vpush %v2993_v21  ;;  %v3112_v10 = vadd.f32 %v3111_v4, %v3110_v15  ;;  %v4822_v55 = vmul.f32 %v10761_v61, %v4821_v0  ;;  %v13007_v56 = vld [vmem:[#allocation106_spill] sm:$0xff] }
 0xcef   :  { %v4816_v51 = vsel %vm4813_vm7, %v4815_v46, %v4811_v45  ;;  %5742 = vpush %v3004_v12  ;;  %v11200_v1 = vmul.f32 %v4588_v20, %v13005_v40  ;;  %v4599_v15 = vsel %vm11192_vm9, %v12993_v50, %v4595_v34  ;;  %vm4825_vm13 = vweird.f32 %v10761_v61  ;;  %v13026_v34 = vld [vmem:[#allocation212_spill] sm:$0xff]  ;;  %v13039_v40 = vld [vmem:[#allocation229_spill] sm:$0xff] }
 0xcf0   :  { %v4924_v7 = vsub.f32 1.0, %v4923_v38  ;;  %v3121_v28 = vadd.f32 %v3120_v13, %v3119_v58  ;;  %5744 = vpush %v3112_v10  ;;  %v4910_v24 = vadd.f32 %v10986_v27, %v4909_v33  ;;  %vm4912_vm1 = vweird.f32 %v10986_v27  ;;  %v13014_v33 = vld [vmem:[#allocation207_spill] sm:$0xff] }
 0xcf1   :  { %v5011_v32 = vsub.f32 1.0, %v5010_v47  ;;  %v11209_v44 = vmul.f32 %v4816_v51, %v13006_v60  ;;  %v4828_v14 = vand.u32 2147483647, %v10564_v48  ;;  %v4830_v50 = vand.u32 2147483648, %v10564_v48 }
 0xcf2   :  { %v4917_v42 = vand.u32 2147483648, %v10838_v22  ;;  %v3122_v23 = vrot.slane %v3121_v28, 1  ;;  %v4823_v57 = vadd.f32 %v10761_v61, %v4822_v55  ;;  %vm4911_vm11 = vweird.f32 %v10838_v22 }
 0xcf3   :  { %v4915_v31 = vand.u32 2147483647, %v10838_v22  ;;  %v4608_v20 = vmul.f32 %v4607_v53, %v11200_v1  ;;  %vm4824_vm3 = vweird.f32 %v10564_v48  ;;  %v4835_v43 = vadd.f32 %v13007_v56, %v12842_v19  ;;  %vm11229_vm4 = vmor %vm4911_vm11, %vm4912_vm1 }
 0xcf4   :  { %v4925_v4 = vmul.f32 %v10783_v16, %v4924_v7  ;;  %v3123_v29 = vadd.f32 %v3122_v23, %v3121_v28  ;;  %v4914_v22 = vsel %vm11229_vm4, %v10986_v27, %v4910_v24  ;;  %v5012_v53 = vmul.f32 %v10991_v37, %v5011_v32  ;;  %vm11248_vm8 = vmor %vm4824_vm3, %vm4825_vm13  ;;  %v13027_v27 = vld [vmem:[#allocation113_spill] sm:$0xff] }
 0xcf5   :  { %v5026_v48 = vmul.f32 %v10795_v3, %v10573_v63  ;;  %v4604_v0 = vsel %vm11182_vm12, %v4603_v54, %v4599_v15  ;;  %vm11252_vm14 = vcmp.eq.f32.partialorder %v4828_v14, 8.507059e+37  ;;  %v4918_v45 = vor.u32 1.1754944e-38, %v4917_v42  ;;  %v13015_v54 = vld [vmem:[#allocation8_spill] sm:$0xff] }
 0xcf6   :  { %v5113_v46 = vmul.f32 %v11013_v39, %v10959_v41  ;;  %5746 = vpush %v3123_v29  ;;  %v4827_v38 = vsel %vm11248_vm8, %v10761_v61, %v4823_v57  ;;  %v4831_v58 = vor.u32 1.1754944e-38, %v4830_v50  ;;  %v4836_v21 = vmul.f32 %v4835_v43, %v11209_v44  ;;  %v13023_v43 = vld [vmem:[#allocation34_spill] sm:$0xff] }
 0xcf7   :  { %vm4916_vm6 = vcmp.eq.f32.partialorder %v4915_v31, 8.507059e+37  ;;  %5748 = vpush %v13014_v33  ;;  %v4926_v12 = vadd.f32 %v10783_v16, %v4925_v4  ;;  %vm4928_vm2 = vweird.f32 %v10783_v16  ;;  %v4931_v25 = vand.u32 2147483647, %v10569_v30  ;;  %v13022_v31 = vld [vmem:[#allocation215_spill] sm:$0xff] }
 0xcf8   :  { %v4919_v47 = vsel %vm4916_vm6, %v4918_v45, %v4914_v22  ;;  %5750 = vpush %v13015_v54  ;;  %v4933_v13 = vand.u32 2147483648, %v10569_v30  ;;  %v5013_v61 = vadd.f32 %v10991_v37, %v5012_v53  ;;  %vm5015_vm5 = vweird.f32 %v10991_v37  ;;  %v13025_v22 = vld [vmem:[#allocation197_spill] sm:$0xff] }
 0xcf9   :  { %v5027_v10 = vsub.f32 1.0, %v5026_v48  ;;  %5752 = vpush %v12967_v5  ;;  %v4832_v62 = vsel %vm11252_vm14, %v4831_v58, %v4827_v38  ;;  %vm4927_vm10 = vweird.f32 %v10569_v30  ;;  %v5020_v51 = vand.u32 2147483648, %v10935_v18  ;;  %v13028_v38 = vld [vmem:[#allocation149_spill] sm:$0xff]  ;;  %v13029_v58 = vld [vmem:[#allocation216_spill] sm:$0xff] }
 0xcfa   :  { %v5114_v55 = vsub.f32 1.0, %v5113_v46  ;;  %5754 = vpush %v11034_v11  ;;  %vm11282_vm15 = vmor %vm4927_vm10, %vm4928_vm2  ;;  %vm5014_vm0 = vweird.f32 %v10935_v18  ;;  %v5018_v5 = vand.u32 2147483647, %v10935_v18  ;;  %v5216_v30 = vmul.f32 %v10997_v52, %v10951_v8 }
 0xcfb   :  { %s11277_s25 = spop %5718  ;;  %v5319_v15 = vmul.f32 %v11050_v35, %v10982_v49  ;;  %5756 = vpush %v12979_v6  ;;  %v11293_v11 = vmul.f32 %v4608_v20, %v4604_v0  ;;  %v11295_v7 = vmul.f32 %v4836_v21, %v4832_v62  ;;  %v11298_v28 = vmul.f32 %v4919_v47, %v10969_v9  ;;  %vm11305_vm12 = vmor %vm5014_vm0, %vm5015_vm5  ;;  %v13030_v47 = vld [vmem:[#allocation146_spill] sm:$0xff] }
 0xcfc   :  { %v4930_v18 = vsel %vm11282_vm15, %v10783_v16, %v4926_v12  ;;  %5758 = vpush %v11125_v17  ;;  %vm4932_vm7 = vcmp.eq.f32.partialorder %v4931_v25, 8.507059e+37  ;;  %v4934_v6 = vor.u32 1.1754944e-38, %v4933_v13  ;;  %v5017_v9 = vsel %vm11305_vm12, %v10991_v37, %v5013_v61  ;;  %v13020_v16 = vld [vmem:[#allocation129_spill] sm:$0xff]  ;;  %v13035_v61 = vld [vmem:[#allocation199_spill] sm:$0xff]  ;;  %s1892_s23 = sadd.f32 %s11277_s25, %s1620_s7 }
 0xcfd   :  { %s5721_s30 = spop %5720  ;;  %v5028_v32 = vmul.f32 %v10795_v3, %v5027_v10  ;;  %5760 = vpush %v11095_v59  ;;  %v4938_v60 = vadd.f32 %v13020_v16, %v12842_v19  ;;  %v5021_v14 = vor.u32 1.1754944e-38, %v5020_v51  ;;  %v5115_v50 = vmul.f32 %v11013_v39, %v5114_v55  ;;  %v13021_v17 = vld [vmem:[#allocation153_spill] sm:$0xff]  ;;  %v13038_v55 = vld [vmem:[#allocation118_spill] sm:$0xff]  ;;  %v13058_v25 = vld [vmem:[#allocation35_spill] sm:$0xff] }
 0xcfe   :  { %s2164_s18 = sadd.f32 %s5721_s30, %s1877_s29  ;;  %v5129_v42 = vmul.f32 %v13021_v17, %v10596_v36  ;;  %5762 = vpush %v11127_v2  ;;  %v4935_v23 = vsel %vm4932_vm7, %v4934_v6, %v4930_v18  ;;  %vm5019_vm9 = vcmp.eq.f32.partialorder %v5018_v5, 8.507059e+37  ;;  %v5217_v37 = vsub.f32 1.0, %v5216_v30  ;;  %v13043_v18 = vld [vmem:[#allocation20_spill] sm:$0xff] }
 0xcff   :  { %v5320_v57 = vsub.f32 1.0, %v5319_v15  ;;  %5764 = vpush %v13022_v31  ;;  %v4939_v59 = vmul.f32 %v4938_v60, %v11298_v28  ;;  %v5022_v20 = vsel %vm5019_vm9, %v5021_v14, %v5017_v9  ;;  %vm5030_vm13 = vweird.f32 %v10573_v63  ;;  %v13045_v14 = vld [vmem:[#allocation10_spill] sm:$0xff] }
 0xd00   :  { %s2183_s17 = smul.f32 0.00034435262, %s2164_s18  ;;  %v5034_v56 = vand.u32 2147483647, %v10573_v63  ;;  %5766 = vpush %v13023_v43  ;;  %v11329_v2 = vmul.f32 %v5022_v20, %v13024_v26  ;;  %v5029_v4 = vadd.f32 %v10795_v3, %v5028_v32  ;;  %vm5031_vm1 = vweird.f32 %v10795_v3  ;;  %v13044_v32 = vld [vmem:[#allocation214_spill] sm:$0xff] }
 0xd01   :  { %v5036_v29 = vand.u32 2147483648, %v10573_v63  ;;  %5768 = vpush %v13025_v22  ;;  %v5116_v53 = vadd.f32 %v11013_v39, %v5115_v50  ;;  %vm5118_vm11 = vweird.f32 %v11013_v39  ;;  %v5121_v48 = vand.u32 2147483647, %v10959_v41  ;;  %vm11355_vm3 = vmor %vm5030_vm13, %vm5031_vm1 }
 0xd02   :  { %2185 = sst [smem:[#allocation4]] %s2183_s17  ;;  %v5130_v0 = vsub.f32 1.0, %v5129_v42  ;;  %5770 = vpush %v13026_v34  ;;  %v5041_v45 = vadd.f32 %v13027_v27, %v12842_v19  ;;  %v5218_v46 = vmul.f32 %v10997_v52, %v5217_v37  ;;  %v5232_v21 = vmul.f32 %v13029_v58, %v13028_v38  ;;  %v13054_v34 = vld [vmem:[#allocation226_spill] sm:$0xff] }
 0xd03   :  { %v5321_v33 = vmul.f32 %v11050_v35, %v5320_v57  ;;  %5772 = vpush %v13030_v47  ;;  %v11349_v12 = vmul.f32 %v4939_v59, %v4935_v23  ;;  %vm11359_vm4 = vcmp.eq.f32.partialorder %v5034_v56, 8.507059e+37  ;;  %vm5117_vm8 = vweird.f32 %v10959_v41  ;;  %v13048_v57 = vld [vmem:[#allocation220_spill] sm:$0xff] }
 0xd04   :  { %v5123_v13 = vand.u32 2147483648, %v10959_v41  ;;  %5774 = vpush %v13035_v61  ;;  %v5033_v10 = vsel %vm11355_vm3, %v10795_v3, %v5029_v4  ;;  %v5037_v63 = vor.u32 1.1754944e-38, %v5036_v29  ;;  %v5042_v62 = vmul.f32 %v5041_v45, %v11329_v2  ;;  %vm11372_vm14 = vmor %vm5117_vm8, %vm5118_vm11  ;;  %v13040_v41 = vld [vmem:[#allocation200_spill] sm:$0xff]  ;;  %v13052_v4 = vld [vmem:[#allocation183_spill] sm:$0xff] }
 0xd05   :  { %v5335_v5 = vmul.f32 %v13039_v40, %v13038_v55  ;;  %5776 = vpush %v13040_v41  ;;  %v5120_v3 = vsel %vm11372_vm14, %v11013_v39, %v5116_v53  ;;  %vm11384_vm6 = vcmp.eq.f32.partialorder %v5121_v48, 8.507059e+37  ;;  %v5131_v15 = vmul.f32 %v13021_v17, %v5130_v0  ;;  %v13053_v0 = vld [vmem:[#allocation87_spill] sm:$0xff] }
 0xd06   :  { %vm5221_vm2 = vweird.f32 %v10997_v52  ;;  %5778 = vpush %v13043_v18  ;;  %v5219_v24 = vadd.f32 %v10997_v52, %v5218_v46  ;;  %v5233_v6 = vsub.f32 1.0, %v5232_v21  ;;  %v5322_v9 = vadd.f32 %v11050_v35, %v5321_v33  ;;  %v13057_v46 = vld [vmem:[#allocation99_spill] sm:$0xff] }
 0xd07   :  { %vm5324_vm5 = vweird.f32 %v11050_v35  ;;  %5780 = vpush %v13044_v32  ;;  %v5124_v39 = vor.u32 1.1754944e-38, %v5123_v13  ;;  %vm5220_vm10 = vweird.f32 %v10951_v8  ;;  %v5226_v16 = vand.u32 2147483648, %v10951_v8  ;;  %s5723_s1 = spop %5722 }
 0xd08   :  { %v5329_v60 = vand.u32 2147483648, %v10982_v49  ;;  %5782 = vpush %v13045_v14  ;;  %vm11400_vm15 = vmor %vm5220_vm10, %vm5221_vm2  ;;  %v5224_v42 = vand.u32 2147483647, %v10951_v8  ;;  %vm5323_vm0 = vweird.f32 %v10982_v49  ;;  %v5327_v23 = vand.u32 2147483647, %v10982_v49  ;;  %s2179_s8 = sadd.f32 %s5723_s1, %s1892_s23  ;;  %v13051_v49 = vld [vmem:[#allocation222_spill] sm:$0xff]  ;;  %s11470_s21 = spop %5724 }
 0xd09   :  { %v5336_v37 = vsub.f32 1.0, %v5335_v5  ;;  %5784 = vpush %v13048_v57  ;;  %v5038_v31 = vsel %vm11359_vm4, %v5037_v63, %v5033_v10  ;;  %v5125_v59 = vsel %vm11384_vm6, %v5124_v39, %v5120_v3  ;;  %vm5133_vm12 = vweird.f32 %v10596_v36  ;;  %vm11416_vm9 = vmor %vm5323_vm0, %vm5324_vm5  ;;  %v13060_v63 = vld [vmem:[#allocation30_spill] sm:$0xff]  ;;  %v13063_v3 = vld [vmem:[#allocation225_spill] sm:$0xff]  ;;  %s11486_s22 = spop %5726 }
 0xd0a   :  { %vm5134_vm7 = vweird.f32 %v13021_v17  ;;  %5786 = vpush %v13051_v49  ;;  %v5132_v20 = vadd.f32 %v13021_v17, %v5131_v15  ;;  %v5223_v56 = vsel %vm11400_vm15, %v10997_v52, %v5219_v24  ;;  %v5234_v43 = vmul.f32 %v13029_v58, %v5233_v6  ;;  %s2180_s12 = smul.f32 0.00034435262, %s2179_s8  ;;  %s5370_s8 = sshll.u32 %s11522_s19, 4  ;;  %s5371_s8 = int_to_ptr.vmem [resolvable:$true] %s5370_s8 }
 0xd0b   :  { %v5326_v26 = vsel %vm11416_vm9, %v11050_v35, %v5322_v9  ;;  %5788 = vpush %v13052_v4  ;;  %v5043_v29 = vmul.f32 %v5042_v62, %v5038_v31  ;;  %v5137_v22 = vand.u32 2147483647, %v10596_v36  ;;  %v5227_v53 = vor.u32 1.1754944e-38, %v5226_v16  ;;  %vm11439_vm11 = vmor %vm5133_vm12, %vm5134_vm7 }
 0xd0c   :  { %v5330_v48 = vor.u32 1.1754944e-38, %v5329_v60  ;;  %5790 = vpush %v13053_v0  ;;  %v5142_v27 = vmul.f32 %v5125_v59, %v13054_v34  ;;  %vm5225_vm13 = vcmp.eq.f32.partialorder %v5224_v42, 8.507059e+37  ;;  %vm5328_vm1 = vcmp.eq.f32.partialorder %v5327_v23, 8.507059e+37  ;;  %2182 = sst [smem:[#allocation2]] %s2180_s12 }
 0xd0d   :  { %v5337_v52 = vmul.f32 %v13039_v40, %v5336_v37  ;;  %5792 = vpush %v11200_v1  ;;  %v5139_v45 = vand.u32 2147483648, %v10596_v36  ;;  %v5144_v21 = vadd.f32 %v13057_v46, %v12842_v19  ;;  %v5228_v33 = vsel %vm5225_vm13, %v5227_v53, %v5223_v56 }
 0xd0e   :  { %v5331_v47 = vsel %vm5328_vm1, %v5330_v48, %v5326_v26  ;;  %5794 = vpush %v11293_v11  ;;  %v5136_v1 = vsel %vm11439_vm11, %v13021_v17, %v5132_v20  ;;  %v5245_v54 = vmul.f32 %v5228_v33, %v13058_v25  ;;  %v5235_v13 = vadd.f32 %v13029_v58, %v5234_v43  ;;  %v13059_v11 = vld [vmem:[#allocation187_spill] sm:$0xff] }
 0xd0f   :  { %vm5237_vm3 = vweird.f32 %v13029_v58  ;;  %5796 = vpush %v11209_v44  ;;  %vm5236_vm4 = vweird.f32 %v13028_v38  ;;  %v5240_v36 = vand.u32 2147483647, %v13028_v38  ;;  %v5242_v61 = vand.u32 2147483648, %v13028_v38  ;;  %s5729_s24 = spop %5728 }
 0xd10   :  { %v5247_v10 = vadd.f32 %v13059_v11, %v12842_v19  ;;  %5798 = vpush %v11295_v7  ;;  %v5145_v17 = vmul.f32 %v5144_v21, %v5142_v27  ;;  %v5348_v62 = vmul.f32 %v5331_v47, %v13060_v63  ;;  %v5338_v51 = vadd.f32 %v13039_v40, %v5337_v52  ;;  %vm11464_vm6 = vmor %vm5236_vm4, %vm5237_vm3  ;;  %s5731_s2 = spop %5730  ;;  %s2638_s13 = sadd.f32 %s5729_s24, %s11470_s21 }
 0xd11   :  { %vm5340_vm8 = vweird.f32 %v13039_v40  ;;  %5800 = vpush %v11298_v28  ;;  %vm5138_vm14 = vcmp.eq.f32.partialorder %v5137_v22, 8.507059e+37  ;;  %v5140_v44 = vor.u32 1.1754944e-38, %v5139_v45  ;;  %vm5339_vm2 = vweird.f32 %v13038_v55  ;;  %s5733_s11 = spop %5732  ;;  %s2649_s16 = sadd.f32 %s5731_s2, %s11486_s22 }
 0xd12   :  { %v5345_v38 = vand.u32 2147483648, %v13038_v55  ;;  %5802 = vpush %v11349_v12  ;;  %v5239_v7 = vsel %vm11464_vm6, %v13029_v58, %v5235_v13  ;;  %v5248_v41 = vmul.f32 %v5247_v10, %v5245_v54  ;;  %v5343_v28 = vand.u32 2147483647, %v13038_v55  ;;  %vm11482_vm5 = vmor %vm5339_vm2, %vm5340_vm8  ;;  %s2757_s10 = sadd.f32 %s5733_s11, %s2638_s13 }
 0xd13   :  { %v5350_v30 = vadd.f32 %v13063_v3, %v12842_v19  ;;  %5804 = vpush %v11329_v2  ;;  %v5141_v15 = vsel %vm5138_vm14, %v5140_v44, %v5136_v1  ;;  %v5243_v18 = vor.u32 1.1754944e-38, %v5242_v61  ;;  %vm5241_vm10 = vcmp.eq.f32.partialorder %v5240_v36, 8.507059e+37 }
 0xd14   :  { %5806 = vpush %v5043_v29  ;;  %v5146_v58 = vmul.f32 %v5145_v17, %v5141_v15  ;;  %v5342_v19 = vsel %vm11482_vm5, %v13039_v40, %v5338_v51  ;;  %v5346_v55 = vor.u32 1.1754944e-38, %v5345_v38  ;;  %vm5344_vm15 = vcmp.eq.f32.partialorder %v5343_v28, 8.507059e+37 }
 0xd15   :  { %v5351_v12 = vmul.f32 %v5350_v30, %v5348_v62  ;;  %5808 = vpush %v5142_v27  ;;  %v5244_v2 = vsel %vm5241_vm10, %v5243_v18, %v5239_v7 }
 0xd16   :  { %5810 = vpush %v5146_v58  ;;  %v5249_v6 = vmul.f32 %v5248_v41, %v5244_v2  ;;  %v5347_v9 = vsel %vm5344_vm15, %v5346_v55, %v5342_v19 }
 0xd17   :  { %5812 = vpush %v5245_v54  ;;  %v5352_v32 = vmul.f32 %v5351_v12, %v5347_v9  ;;  %s5735_s5 = spop %5734 }
 0xd18   :  { %5814 = vpush %v5249_v6  ;;  %s5737_s6 = spop %5736  ;;  %s2768_s4 = sadd.f32 %s5735_s5, %s2649_s16 }
 0xd19   :  { %5816 = vpush %v5348_v62  ;;  %s2876_s3 = sadd.f32 %s5737_s6, %s2757_s10  ;;  %s5739_s26 = spop %5738 }
 0xd1a   :  { %5818 = vpush %v5352_v32  ;;  %s2887_s25 = sadd.f32 %s5739_s26, %s2768_s4 }
 0xd1f   :  { %s5741_s15 = spop %5740 }
 0xd20   :  { %s2995_s14 = sadd.f32 %s5741_s15, %s2876_s3  ;;  %s5743_s27 = spop %5742 }
 0xd21   :  { %s5745_s28 = spop %5744  ;;  %s3006_s18 = sadd.f32 %s5743_s27, %s2887_s25 }
 0xd22   :  { %s3114_s29 = sadd.f32 %s5745_s28, %s2995_s14 }
 0xd24   :  { %s3129_s30 = smul.f32 0.0046296297, %s3114_s29 }
 0xd26   :  { %3131 = sst [smem:[#allocation4 + $0x1]] %s3129_s30 }
 0xd27   :  { %s5747_s17 = spop %5746 }
 0xd28   :  { %s3125_s0 = sadd.f32 %s5747_s17, %s3006_s18  ;;  %s5749_s9 = spop %5748 }
 0xd29   :  { %s5751_s7 = spop %5750 }
 0xd2a   :  { %s3126_s12 = smul.f32 0.0046296297, %s3125_s0  ;;  %s5753_s21 = spop %5752 }
 0xd2b   :  { %s3460_s22 = sadd.f32 %s5753_s21, %s5749_s9  ;;  %s5755_s24 = spop %5754 }
 0xd2c   :  { %3128 = sst [smem:[#allocation2 + $0x1]] %s3126_s12  ;;  %s5757_s2 = spop %5756 }
 0xd2d   :  { %s3463_s13 = sadd.f32 %s5755_s24, %s5751_s7  ;;  %s5759_s11 = spop %5758 }
 0xd2e   :  { %s3563_s5 = sadd.f32 %s5757_s2, %s3460_s22  ;;  %s5761_s6 = spop %5760 }
 0xd2f   :  { %s3566_s10 = sadd.f32 %s5759_s11, %s3463_s13  ;;  %s5763_s16 = spop %5762 }
 0xd30   :  { %s3666_s3 = sadd.f32 %s5761_s6, %s3563_s5  ;;  %s5765_s26 = spop %5764 }
 0xd31   :  { %s3669_s4 = sadd.f32 %s5763_s16, %s3566_s10  ;;  %s5767_s15 = spop %5766 }
 0xd32   :  { %s3769_s14 = sadd.f32 %s5765_s26, %s3666_s3  ;;  %s5769_s27 = spop %5768 }
 0xd33   :  { %s3772_s28 = sadd.f32 %s5767_s15, %s3669_s4  ;;  %s5771_s29 = spop %5770 }
 0xd34   :  { %s3872_s25 = sadd.f32 %s5769_s27, %s3769_s14  ;;  %s5773_s30 = spop %5772 }
 0xd35   :  { %s3875_s18 = sadd.f32 %s5771_s29, %s3772_s28  ;;  %s5775_s17 = spop %5774 }
 0xd36   :  { %s3879_s0 = smul.f32 0.16666667, %s3872_s25  ;;  %s5777_s9 = spop %5776 }
 0xd37   :  { %s3876_s7 = smul.f32 0.16666667, %s3875_s18  ;;  %s4200_s23 = sadd.f32 %s5777_s9, %s5773_s30 }
 0xd38   :  { %3881 = sst [smem:[#allocation4 + $0x2]] %s3879_s0  ;;  %s5779_s1 = spop %5778 }
 0xd39   :  { %3878 = sst [smem:[#allocation2 + $0x2]] %s3876_s7  ;;  %s5781_s12 = spop %5780 }
 0xd3a   :  { %s4203_s21 = sadd.f32 %s5779_s1, %s5775_s17  ;;  %s5783_s22 = spop %5782 }
 0xd3b   :  { %s4303_s24 = sadd.f32 %s5781_s12, %s4200_s23  ;;  %s5785_s2 = spop %5784 }
 0xd3c   :  { %s4306_s13 = sadd.f32 %s5783_s22, %s4203_s21  ;;  %s5787_s11 = spop %5786 }
 0xd3d   :  { %s4406_s5 = sadd.f32 %s5785_s2, %s4303_s24  ;;  %s5789_s6 = spop %5788 }
 0xd3e   :  { %s4409_s10 = sadd.f32 %s5787_s11, %s4306_s13  ;;  %s5791_s16 = spop %5790 }
 0xd3f   :  { %s4509_s3 = sadd.f32 %s5789_s6, %s4406_s5  ;;  %s5793_s26 = spop %5792 }
 0xd40   :  { %s4512_s4 = sadd.f32 %s5791_s16, %s4409_s10  ;;  %s5795_s15 = spop %5794 }
 0xd41   :  { %s4612_s14 = sadd.f32 %s5793_s26, %s4509_s3  ;;  %s5797_s27 = spop %5796 }
 0xd42   :  { %s4615_s28 = sadd.f32 %s5795_s15, %s4512_s4  ;;  %s5799_s29 = spop %5798 }
 0xd43   :  { %s4619_s25 = smul.f32 0.16666667, %s4612_s14  ;;  %s5801_s30 = spop %5800 }
 0xd44   :  { %s4616_s18 = smul.f32 0.16666667, %s4615_s28  ;;  %s4943_s17 = sadd.f32 %s5801_s30, %s5797_s27 }
 0xd45   :  { %4621 = sst [smem:[#allocation4 + $0x3]] %s4619_s25  ;;  %s5803_s0 = spop %5802 }
 0xd46   :  { %4618 = sst [smem:[#allocation2 + $0x3]] %s4616_s18  ;;  %s5805_s9 = spop %5804 }
 0xd47   :  { %s4946_s7 = sadd.f32 %s5803_s0, %s5799_s29  ;;  %s5807_s23 = spop %5806 }
 0xd48   :  { %s5046_s1 = sadd.f32 %s5805_s9, %s4943_s17  ;;  %s5809_s12 = spop %5808 }
 0xd49   :  { %s5049_s21 = sadd.f32 %s5807_s23, %s4946_s7  ;;  %s5811_s22 = spop %5810 }
 0xd4a   :  { %s5149_s24 = sadd.f32 %s5809_s12, %s5046_s1  ;;  %s5813_s2 = spop %5812 }
 0xd4b   :  { %s5152_s13 = sadd.f32 %s5811_s22, %s5049_s21  ;;  %s5815_s11 = spop %5814 }
 0xd4c   :  { %s5252_s5 = sadd.f32 %s5813_s2, %s5149_s24  ;;  %s5817_s6 = spop %5816 }
 0xd4d   :  { %s5255_s10 = sadd.f32 %s5815_s11, %s5152_s13  ;;  %s5379_s26 = sshll.u32 %s11523_s20, 4  ;;  %s5380_s26 = int_to_ptr.vmem [resolvable:$true] %s5379_s26 }
 0xd4e   :  { %s5355_s4 = sadd.f32 %s5817_s6, %s5252_s5  ;;  %s5819_s15 = spop %5818 }
 0xd4f   :  { %s5358_s14 = sadd.f32 %s5819_s15, %s5255_s10  ;;  %s6056_s30 = smov [#allocation2]  }
 0xd50   :  { %s5362_s27 = smul.f32 0.16666667, %s5355_s4  ;;  %s6057_s18 = smov [#allocation4]  }
 0xd51   :  { %s5359_s25 = smul.f32 0.16666667, %s5358_s14 }
 0xd52   :  { %5364 = sst [smem:[#allocation4 + $0x4]] %s5362_s27 }
 0xd53   :  { %5361 = sst [smem:[#allocation2 + $0x4]] %s5359_s25 }
 0xd54   :  { %5373 = dma.smem_to_vmem %s6056_s30, 16, %s5371_s8, [#allocation3]  }
 0xd55   :  { %5382 = dma.smem_to_vmem %s6057_s18, 16, %s5380_s26, [#allocation5]  }
 0xd56   :  { %6037 = dma.done.wait [#allocation3], 16  }
 0xd57   :  { %6038 = vsyncadd [#allocation3], 4294967280 }
 0xd58   :  { %6039 = dma.done.wait [#allocation5], 16  }
 0xd59   :  { %6040 = vsyncadd [#allocation5], 4294967280 }
 0xd5a   :  { %5391 = sfence }
 0xd5b   :  { %5392 = vsyncpa [#allocation3], 1 }
 0xd5c   :  { %5393 = vsyncpa [#allocation5], 1 }

</bundles_post_ra>
